<compile_context>
chip_gen: v7x
topology: tpu7x:2x2x1
jax: 0.10.0
libtpu: 0.0.40
codegen_flags: <defaults>
</compile_context>

<pallas_src>
import jax
import jax.numpy as jnp
from jax.experimental import pallas as pl
from jax.experimental.pallas import tpu as pltpu

EPS = 1e-5  # BatchNorm2d eps


def conv_bn_add_relu_kernel(w_ref, x_ref, res_ref, gamma_ref, beta_ref, o_ref):
    # 1x1 conv == matmul on the MXU, channels-first: (Cb, Cin) @ (Cin, M) -> (Cb, M)
    y = jnp.dot(w_ref[...], x_ref[...], preferred_element_type=jnp.float32)

    # BatchNorm2d (module is in default training mode): per-channel (row) batch
    # statistics over all M = N*H*W positions, biased variance (matches the
    # normalization PyTorch applies in the forward pass).  Single reduction
    # pass: var = E[y^2] - mean^2 with f32 accumulation (post-conv y is
    # ~unit-scale, so cancellation is benign; verified against the reference).
    # TODO(synk): running_mean/running_var momentum updates (training-time side
    # effect, not part of the returned value) are not materialized here.
    inv_m = 1.0 / y.shape[1]
    mean = jnp.sum(y, axis=1, keepdims=True) * inv_m                  # (Cb, 1)
    mean_sq = jnp.sum(y * y, axis=1, keepdims=True) * inv_m           # (Cb, 1)
    var = mean_sq - mean * mean                                       # (Cb, 1)

    # Fold BN into one scale/shift (rsqrt goes to the EUP; cheap).
    scale = gamma_ref[...] * jax.lax.rsqrt(var + EPS)                 # (Cb, 1)
    shift = beta_ref[...] - mean * scale                              # (Cb, 1)

    # normalize + residual add + ReLU in one elementwise pass.
    o_ref[...] = jnp.maximum(y * scale + shift + res_ref[...], 0.0)


def conv2d_bn_add_relu(x, w, residual, gamma, beta, *, block_cout=1024):
    """x: (N, Cin, H, W) f32; w: (Cout, Cin, 1, 1) f32; residual: (N, Cout, H, W) f32."""
    N, Cin, H, W = x.shape
    Cout = w.shape[0]
    M = N * H * W

    # Channels-first 2D views.  For N == 1 these transposes move a size-1 axis,
    # so XLA lowers them to pure reshapes (no HBM traffic).
    x2d = jnp.transpose(x, (1, 0, 2, 3)).reshape(Cin, M)              # (Cin, M)
    w2d = w.reshape(Cout, Cin)                                        # free reshape, no transpose
    r2d = jnp.transpose(residual, (1, 0, 2, 3)).reshape(Cout, M)      # (Cout, M)
    g2d = gamma.reshape(Cout, 1)
    b2d = beta.reshape(Cout, 1)

    bc = min(block_cout, Cout)
    grid = (Cout // bc,)   # (2,) by default: one block per TC on v7x, 2 pipelined steps on v5e/v6e

    cost = pl.CostEstimate(
        flops=2 * M * Cin * Cout,
        transcendentals=Cout,  # rsqrt per channel
        bytes_accessed=4 * (Cout * Cin + Cin * M + 2 * Cout * M + 2 * Cout),
    )

    out2d = pl.pallas_call(
        conv_bn_add_relu_kernel,
        out_shape=jax.ShapeDtypeStruct((Cout, M), jnp.float32),
        grid=grid,
        in_specs=[
            pl.BlockSpec((bc, Cin), lambda j: (j, 0)),   # weight slice (2 MiB, double-buffered)
            pl.BlockSpec((Cin, M), lambda j: (0, 0)),    # x, shared across blocks (not re-fetched)
            pl.BlockSpec((bc, M), lambda j: (j, 0)),     # residual slice
            pl.BlockSpec((bc, 1), lambda j: (j, 0)),     # gamma slice
            pl.BlockSpec((bc, 1), lambda j: (j, 0)),     # beta slice
        ],
        out_specs=pl.BlockSpec((bc, M), lambda j: (j, 0)),
        compiler_params=pltpu.CompilerParams(dimension_semantics=("parallel",)),
        cost_estimate=cost,
    )(w2d, x2d, r2d, g2d, b2d)

    # Back to NCHW (again a free size-1-axis transpose for N == 1).
    return jnp.transpose(out2d.reshape(Cout, N, H, W), (1, 0, 2, 3))


if __name__ == "__main__":
    key = jax.random.PRNGKey(0)
    k1, k2, k3 = jax.random.split(key, 3)

    # Shapes implied by the module: Cin=512, Cout=2048 (fixed by Conv2d), 7x7 spatial, batch 1.
    N, Cin, Cout, H, W = 1, 512, 2048, 7, 7
    x508 = jax.random.normal(k1, (N, Cin, H, W), dtype=jnp.float32)
    x502 = jax.random.normal(k2, (N, Cout, H, W), dtype=jnp.float32)

    # Deterministic synthetic parameters (shapes from Conv2d/BatchNorm2d __init__).
    wconv = jax.random.normal(k3, (Cout, Cin, 1, 1), dtype=jnp.float32) * (1.0 / jnp.sqrt(Cin))
    gamma = jnp.ones((Cout,), dtype=jnp.float32)   # BatchNorm2d affine weight init
    beta = jnp.zeros((Cout,), dtype=jnp.float32)   # BatchNorm2d affine bias init

    out = jax.block_until_ready(conv2d_bn_add_relu(x508, wconv, x502, gamma, beta))

    # Pure-JAX reference for a correctness sanity check.
    y_ref = jax.lax.conv_general_dilated(
        x508, wconv, window_strides=(1, 1), padding="VALID",
        dimension_numbers=("NCHW", "OIHW", "NCHW"))
    mean = jnp.mean(y_ref, axis=(0, 2, 3), keepdims=True)
    var = jnp.mean(jnp.square(y_ref - mean), axis=(0, 2, 3), keepdims=True)
    y_bn = (y_ref - mean) * jax.lax.rsqrt(var + EPS) * gamma.reshape(1, -1, 1, 1) \
           + beta.reshape(1, -1, 1, 1)
    ref = jnp.maximum(y_bn + x502, 0.0)

    assert out.shape == (N, Cout, H, W)
    assert jnp.allclose(out, ref, atol=1e-3, rtol=1e-3), float(jnp.max(jnp.abs(out - ref)))
    print("KERNEL_OK")
</pallas_src>

<mosaic_0001>
module attributes {stable_mosaic.version = 11 : i64} {
  func.func @conv_bn_add_relu_kernel(%arg0: i32, %arg1: memref<1024x512xf32, #tpu.memory_space<vmem>>, %arg2: memref<512x49xf32, #tpu.memory_space<vmem>>, %arg3: memref<1024x49xf32, #tpu.memory_space<vmem>>, %arg4: memref<1024x1xf32, #tpu.memory_space<vmem>>, %arg5: memref<1024x1xf32, #tpu.memory_space<vmem>>, %arg6: memref<1024x49xf32, #tpu.memory_space<vmem>>) attributes {dimension_semantics = [#tpu.dimension_semantics<parallel>], iteration_bounds = array<i64: 2>, scalar_prefetch = 0 : i64, scratch_operands = 0 : i64, tpu.core_type = #tpu.core_type<tc>, window_params = [{transform_indices = @transform_0, window_bounds = array<i64: 1024, 512>}, {pipeline_mode = #tpu.pipeline_mode<synchronous>, transform_indices = @transform_1, window_bounds = array<i64: 512, 49>}, {transform_indices = @transform_2, window_bounds = array<i64: 1024, 49>}, {transform_indices = @transform_3, window_bounds = array<i64: 1024, 1>}, {transform_indices = @transform_4, window_bounds = array<i64: 1024, 1>}, {transform_indices = @transform_5, window_bounds = array<i64: 1024, 49>}]} {
    %c0 = arith.constant 0 : index
    %c0_0 = arith.constant 0 : index
    %0 = vector.load %arg1[%c0, %c0_0] : memref<1024x512xf32, #tpu.memory_space<vmem>>, vector<1024x512xf32>
    %c0_1 = arith.constant 0 : index
    %c0_2 = arith.constant 0 : index
    %1 = vector.load %arg2[%c0_1, %c0_2] : memref<512x49xf32, #tpu.memory_space<vmem>>, vector<512x49xf32>
    %cst = arith.constant dense<0.000000e+00> : vector<1024x49xf32>
    %2 = tpu.matmul %0, %1, %cst {dimension_numbers = #tpu.dot_dimension_numbers<[1], [0], [0], [1], [0, 0, 1, 1], [], []>} : vector<1024x512xf32>, vector<512x49xf32>, vector<1024x49xf32> -> vector<1024x49xf32>
    %cst_3 = arith.constant dense<0.000000e+00> : vector<1024xf32>
    %3 = vector.multi_reduction <add>, %2, %cst_3 [1] : vector<1024x49xf32> to vector<1024xf32>
    %4 = vector.shape_cast %3 : vector<1024xf32> to vector<1024x1xf32>
    %cst_4 = arith.constant 0.0204081628 : f32
    %5 = vector.broadcast %cst_4 : f32 to vector<1024x1xf32>
    %6 = arith.mulf %4, %5 : vector<1024x1xf32>
    %7 = arith.mulf %2, %2 : vector<1024x49xf32>
    %cst_5 = arith.constant dense<0.000000e+00> : vector<1024xf32>
    %8 = vector.multi_reduction <add>, %7, %cst_5 [1] : vector<1024x49xf32> to vector<1024xf32>
    %9 = vector.shape_cast %8 : vector<1024xf32> to vector<1024x1xf32>
    %cst_6 = arith.constant 0.0204081628 : f32
    %10 = vector.broadcast %cst_6 : f32 to vector<1024x1xf32>
    %11 = arith.mulf %9, %10 : vector<1024x1xf32>
    %12 = arith.mulf %6, %6 : vector<1024x1xf32>
    %13 = arith.subf %11, %12 : vector<1024x1xf32>
    %c0_7 = arith.constant 0 : index
    %c0_8 = arith.constant 0 : index
    %14 = vector.load %arg4[%c0_7, %c0_8] : memref<1024x1xf32, #tpu.memory_space<vmem>>, vector<1024x1xf32>
    %cst_9 = arith.constant 9.99999974E-6 : f32
    %15 = vector.broadcast %cst_9 : f32 to vector<1024x1xf32>
    %16 = arith.addf %13, %15 : vector<1024x1xf32>
    %17 = math.rsqrt %16 : vector<1024x1xf32>
    %18 = arith.mulf %14, %17 : vector<1024x1xf32>
    %c0_10 = arith.constant 0 : index
    %c0_11 = arith.constant 0 : index
    %19 = vector.load %arg5[%c0_10, %c0_11] : memref<1024x1xf32, #tpu.memory_space<vmem>>, vector<1024x1xf32>
    %20 = arith.mulf %6, %18 : vector<1024x1xf32>
    %21 = arith.subf %19, %20 : vector<1024x1xf32>
    %22 = vector.broadcast %18 : vector<1024x1xf32> to vector<1024x49xf32>
    %23 = arith.mulf %2, %22 : vector<1024x49xf32>
    %24 = vector.broadcast %21 : vector<1024x1xf32> to vector<1024x49xf32>
    %25 = arith.addf %23, %24 : vector<1024x49xf32>
    %c0_12 = arith.constant 0 : index
    %c0_13 = arith.constant 0 : index
    %26 = vector.load %arg3[%c0_12, %c0_13] : memref<1024x49xf32, #tpu.memory_space<vmem>>, vector<1024x49xf32>
    %27 = arith.addf %25, %26 : vector<1024x49xf32>
    %cst_14 = arith.constant 0.000000e+00 : f32
    %28 = vector.broadcast %cst_14 : f32 to vector<1024x49xf32>
    %29 = arith.maximumf %27, %28 : vector<1024x49xf32>
    %c0_15 = arith.constant 0 : index
    %c0_16 = arith.constant 0 : index
    %30 = vector.load %arg6[%c0_15, %c0_16] : memref<1024x49xf32, #tpu.memory_space<vmem>>, vector<1024x49xf32>
    tpu.vector_store %arg6[%c0_15, %c0_16], %29 {strides = array<i32>} : memref<1024x49xf32, #tpu.memory_space<vmem>>, vector<1024x49xf32>,
    return
  }
  func.func @transform_0(%arg0: i32) -> (i32, i32) {
    %c0_i32 = arith.constant 0 : i32
    %c0_i32_0 = arith.constant 0 : i32
    return %arg0, %c0_i32 : i32, i32
  }
  func.func @transform_1(%arg0: i32) -> (i32, i32) {
    %c0_i32 = arith.constant 0 : i32
    %c0_i32_0 = arith.constant 0 : i32
    %c0_i32_1 = arith.constant 0 : i32
    return %c0_i32, %c0_i32_0 : i32, i32
  }
  func.func @transform_2(%arg0: i32) -> (i32, i32) {
    %c0_i32 = arith.constant 0 : i32
    %c0_i32_0 = arith.constant 0 : i32
    return %arg0, %c0_i32 : i32, i32
  }
  func.func @transform_3(%arg0: i32) -> (i32, i32) {
    %c0_i32 = arith.constant 0 : i32
    %c0_i32_0 = arith.constant 0 : i32
    return %arg0, %c0_i32 : i32, i32
  }
  func.func @transform_4(%arg0: i32) -> (i32, i32) {
    %c0_i32 = arith.constant 0 : i32
    %c0_i32_0 = arith.constant 0 : i32
    return %arg0, %c0_i32 : i32, i32
  }
  func.func @transform_5(%arg0: i32) -> (i32, i32) {
    %c0_i32 = arith.constant 0 : i32
    %c0_i32_0 = arith.constant 0 : i32
    return %arg0, %c0_i32 : i32, i32
  }
}

</mosaic_0001>

<bundles_post_ra>
// kernel: tpu_custom_call.1
= control target key start
LH: loop header
LB: loop body
LE: loop exit
PB: predicated region body
PF: predicated region fallthrough
CT: control target
= control target key end

     0   :  { %10 = vsyncpa [#allocation3], 0  ;;  %s12082_s0 = inlined_call_operand.hbm [shape: f32[2048,512], index: 0, kind: input, shape index: {}]   ;;  %s12083_s1 = inlined_call_operand.vmem [shape: f32[512,49], index: 1, kind: input, shape index: {}]   ;;  %s12084_s2 = inlined_call_operand.vmem [shape: f32[2048,49], index: 2, kind: input, shape index: {}]   ;;  %s12085_s3 = inlined_call_operand.vmem [shape: f32[2048,1], index: 3, kind: input, shape index: {}]   ;;  %s12086_s4 = inlined_call_operand.vmem [shape: f32[2048,1], index: 4, kind: input, shape index: {}]   ;;  %s12087_s5 = inlined_call_operand.vmem [shape: f32[2048,49], index: 5, kind: output, shape index: {}]  }
   0x1   :  { %12 = vsyncpa [#allocation3 + $0x1], 0  ;;  %s7404_s18 = smov 0   ;;  %s7406_s19 = smov 0  }
   0x2   :  { %s7408_s20 = smov 0   ;;  %s7410_s21 = smov 0  }
   0x3 LB: > { %s6756_s22 = sadd.s32 4294967295, %s7367_s21   ;;  %s7424_s23 = sadd.s32 1, %s7367_s21   ;;  %s7367_s21 = sphi %s7410_s21, %s13049_s21   ;;  %s7363_s20 = sphi %s7408_s20, %s13048_s20   ;;  %s7359_s19 = sphi %s7406_s19, %s13047_s19   ;;  %s7355_s18 = sphi %s7404_s18, %s13046_s18  }
   0x4   : > { %s22_s24 = ssub.s32 %s7367_s21, %s7424_s23  ;;  %s25_s25 = sadd.s32 1, %s7363_s20 }
   0x5   : > { %p23_p0 = scmp.eq.s32.totalorder %s22_s24, 0  ;;  %p32_p1 = scmp.ne.s32.totalorder %s7363_s20, %s7359_s19 }
   0x6   : > { %p33_p2 = scmp.eq.s32.totalorder %s7367_s21, 0  ;;  %p38_p3 = scmp.ne.s32.totalorder %s7359_s19, %s7355_s18 }
   0x7   : > { %s7434_s26 = scalar_select %p23_p0, %s7363_s20, %s25_s25  }
   0x8   : > { %p34_p4 = por %p33_p2, %p32_p1  ;;  %p39_p5 = scmp.eq.s32.totalorder %s6756_s22, 0 }
   0x9   : > { %p7008_p6 = scmp.lt.s32.totalorder %s7367_s21, 2  ;;  %s190_s28 = sand.u32 1, %s7363_s20  }
   0xa   : > { %p7439_p7 = por %p39_p5, %p38_p3  ;;  %s6760_s29 = sshll.u32 %s190_s28, 12 }
   0xb   : > { %s6777_s30 = sshll.u32 %s7367_s21, 16  ;;  %s194_s9 = scalar_lea.vmem [#allocation2], %s6760_s29 }
   0xc   : > { %s7448_s8 = scalar_lea.hbm %s12082_s0, %s6777_s30  ;;  %s202_s10 = sshll.u32 %s194_s9, 4  ;;  %s7450_s10 = int_to_ptr.vmem [resolvable:$true] %s202_s10 }
   0xd   : > { %p7452_p8 = pnand %p7008_p6, %p34_p4  ;;  %s7457_s12 = scalar_lea.sflag [#allocation3], %s190_s28 }
   0xe   : > { %s7303_s13 = scalar_lea.hbm %s7448_s8, 65536  ;;  %s7308_s16 = scalar_lea.hbm %s12082_s0, 131072 }
   0xf   : > { %p7304_p10 = scmp.ne.s32.totalorder %s7448_s8, %s7303_s13  ;;  %p7305_p11 = pneg %p7452_p8 }
  0x10   : > { %p7309_p0 = scmp.lt.u32.totalorder %s7448_s8, %s12082_s0  ;;  %p7310_p1 = scmp.lt.u32.totalorder %s7308_s16, %s7303_s13 }
  0x11   : > { %p7306_p12 = pnand %p7305_p11, %p7304_p10  ;;  %p7312_p3 = scmp.lt.u32.totalorder %s7303_s13, %s7448_s8 }
  0x12   : > { %p7311_p2 = por %p7310_p1, %p7309_p0 }
  0x13   : > { %p7307_p13 = pneg %p7306_p12 }
  0x14   : > { %p7313_p4 = por %p7312_p3, %p7311_p2 }
  0x16   : > { %p7314_p5 = pnand %p7313_p4, %p7307_p13 }
  0x18   : > { %7317 = shalt.err (!%p7314_p5)
}
  0x19   : > { %s7318_s24 = scalar_lea.vmem %s7450_s10, 65536  ;;  %s7369_s25 = smov [#allocation2]  }
  0x1a   : > { %p7319_p6 = scmp.ne.s32.totalorder %s7450_s10, %s7318_s24  ;;  %s7323_s28 = sshll.u32 %s7369_s25, 4  ;;  %s7324_s28 = int_to_ptr.vmem [resolvable:$false] %s7323_s28 }
  0x1b   : > { %s7325_s29 = scalar_lea.vmem %s7324_s28, 131072  ;;  %p7326_p9 = scmp.lt.s32.totalorder %s7450_s10, %s7324_s28 }
  0x1c   : > { %p7321_p10 = pnand %p7319_p6, %p7305_p11  ;;  %p7327_p0 = scmp.lt.s32.totalorder %s7325_s29, %s7318_s24 }
  0x1e   : > { %p7322_p12 = pneg %p7321_p10  ;;  %p7328_p1 = por %p7327_p0, %p7326_p9 }
  0x20   : > { %p7329_p2 = pnand %p7328_p1, %p7322_p12 }
  0x22   : > { %7332 = shalt.err (!%p7329_p2)
}
  0x23   : > { %s7370_s30 = smov 512   ;;  %s7371_s6 = smov 32  }
  0x24   : > { %7007 = dma.hbm_to_vmem [thread:$0]  (!%p7452_p8), %s7448_s8, 65536, %s7450_s10, %s7457_s12, %s7370_s30, %s7370_s30, %s7371_s6  }
  0x25   : > { %p237_p11 = scmp.lt.s32.totalorder %s7367_s21, 3  ;;  %p12316_p13 = scmp.ge.s32.totalorder %s7367_s21, 1 }
  0x27   : > { %p238_p3 = pnand %p12316_p13, %p237_p11 }
  0x29   : > { %241 = sbr.rel (%p238_p3) target bundleno = 3456 (0xd80), region = 40 }
  0x30   : > { %s243_s7 = sand.u32 1, %s7359_s19  }
  0x31   : > { %s6765_s9 = sshll.u32 %s243_s7, 12  ;;  %s244_s13 = scalar_lea.sflag [#allocation3], %s243_s7 }
  0x32   : > { %s7489_s14 = scalar_lea.vmem [#allocation2], %s6765_s9 }
  0x33   : > { %7350 = dma.done.wait (%p7439_p7), %s244_s13, 65536  }
  0x34   : > { %7352 = vsyncadd (%p7439_p7), %s244_s13, 4294901760  ;;  %v7372_v0 = vmov 0.0|0.0   ;;  %v826_v1 = vld [vmem:[%s12083_s1] sm:$0xff]  ;;  %v827_v2 = vld [vmem:[%s12083_s1 + $0x8] sm:$0xff]  ;;  %vm2300_vm0 = vcmask 400384   ;;  %s8228_s11 = sshll.u32 %s6756_s22, 7 }
  0x35   : > { %6778 = vmatprep.subr.bf16.mxu1 %v7372_v0  ;;  %6826 = vmatprep.subr.bf16.mxu0 %v7372_v0  ;;  %v858_v3 = vld [vmem:[%s12083_s1 + $0x100] sm:$0xff]  ;;  %v6779_v4 = vpack.c.bf16 %v827_v2, %v826_v1  ;;  %v859_v5 = vld [vmem:[%s12083_s1 + $0x108] sm:$0xff]  ;;  %v828_v6 = vld [vmem:[%s12083_s1 + $0x10] sm:$0xff]  ;;  %p291_p7 = scmp.lt.s32.totalorder %s8228_s11, 255 }
  0x36   : > { %v829_v7 = vld [vmem:[%s12083_s1 + $0x18] sm:$0xff]  ;;  %v6827_v8 = vpack.c.bf16 %v859_v5, %v858_v3  ;;  %v860_v9 = vld [vmem:[%s12083_s1 + $0x110] sm:$0xff]  ;;  %v830_v13 = vld [vmem:[%s12083_s1 + $0x20] sm:$0xff] }
  0x37   : > { %v861_v10 = vld [vmem:[%s12083_s1 + $0x118] sm:$0xff]  ;;  %6780 = vmatpush1.bf16.msra.mxu1 %v6779_v4  ;;  %v6782_v11 = vpack.c.bf16 %v829_v7, %v828_v6  ;;  %v831_v14 = vld [vmem:[%s12083_s1 + $0x28] sm:$0xff]  ;;  %v862_v15 = vld [vmem:[%s12083_s1 + $0x120] sm:$0xff]  ;;  %s13051_s11 = smov (!%p291_p7, %s8228_s11), 255 }
  0x38   : > { %6828 = vmatpush1.bf16.msra.mxu0 %v6827_v8  ;;  %6781 = vmatprep.subr.bf16.mxu1 %v7372_v0  ;;  %v6830_v12 = vpack.c.bf16 %v861_v10, %v860_v9  ;;  %v863_v16 = vld [vmem:[%s12083_s1 + $0x128] sm:$0xff]  ;;  %v6785_v17 = vpack.c.bf16 %v831_v14, %v830_v13  ;;  %v832_v19 = vld [vmem:[%s12083_s1 + $0x30] sm:$0xff]  ;;  %v833_v20 = vld [vmem:[%s12083_s1 + $0x38] sm:$0xff]  ;;  %s8270_s21 = sshll.u32 %s13051_s11, 3 }
  0x39   : > { %6829 = vmatprep.subr.bf16.mxu0 %v7372_v0  ;;  %v6833_v18 = vpack.c.bf16 %v863_v16, %v862_v15  ;;  %v864_v21 = vld [vmem:[%s12083_s1 + $0x130] sm:$0xff]  ;;  %v865_v22 = vld [vmem:[%s12083_s1 + $0x138] sm:$0xff]  ;;  %v6788_v23 = vpack.c.bf16 %v833_v20, %v832_v19  ;;  %v834_v25 = vld [vmem:[%s12083_s1 + $0x40] sm:$0xff]  ;;  %s8280_s15 = scalar_lea.vmem %s12085_s3, %s8270_s21  ;;  %s8300_s17 = scalar_lea.vmem %s12086_s4, %s8270_s21 }
  0x3a   : > { %v6836_v24 = vpack.c.bf16 %v865_v22, %v864_v21  ;;  %v835_v26 = vld [vmem:[%s12083_s1 + $0x48] sm:$0xff]  ;;  %v866_v27 = vld [vmem:[%s12083_s1 + $0x140] sm:$0xff]  ;;  %v836_v31 = vld [vmem:[%s12083_s1 + $0x50] sm:$0xff]  ;;  %s8531_s25 = scalar_lea.vmem %s12084_s2, %s8270_s21  ;;  %s8543_s30 = scalar_lea.vmem %s12087_s5, %s8270_s21 }
  0x3b   : > { %6783 = vmatpush1.bf16.msra.mxu1 %v6782_v11  ;;  %v867_v28 = vld [vmem:[%s12083_s1 + $0x148] sm:$0xff]  ;;  %v6791_v29 = vpack.c.bf16 %v835_v26, %v834_v25  ;;  %v837_v32 = vld [vmem:[%s12083_s1 + $0x58] sm:$0xff]  ;;  %v868_v33 = vld [vmem:[%s12083_s1 + $0x150] sm:$0xff] }
  0x3c   : > { %6831 = vmatpush1.bf16.msra.mxu0 %v6830_v12  ;;  %6784 = vmatprep.subr.bf16.mxu1 %v7372_v0  ;;  %v6839_v30 = vpack.c.bf16 %v867_v28, %v866_v27  ;;  %v869_v34 = vld [vmem:[%s12083_s1 + $0x158] sm:$0xff]  ;;  %v6794_v35 = vpack.c.bf16 %v837_v32, %v836_v31  ;;  %v838_v37 = vld [vmem:[%s12083_s1 + $0x60] sm:$0xff]  ;;  %v839_v38 = vld [vmem:[%s12083_s1 + $0x68] sm:$0xff] }
  0x3d   : > { %6832 = vmatprep.subr.bf16.mxu0 %v7372_v0  ;;  %v6842_v36 = vpack.c.bf16 %v869_v34, %v868_v33  ;;  %v870_v39 = vld [vmem:[%s12083_s1 + $0x160] sm:$0xff]  ;;  %v871_v40 = vld [vmem:[%s12083_s1 + $0x168] sm:$0xff]  ;;  %v317_v42 = vld [vmem:[%s7489_s14 + $0x18] sm:$0xff]  ;;  %v6797_v43 = vpack.c.bf16 %v839_v38, %v838_v37 }
  0x3e   : > { %v315_v41 = vld [vmem:[%s7489_s14 + $0x8] sm:$0xff]  ;;  %1659 = vmatprep.mubr.f32.mxu0 %v317_v42  ;;  %v6845_v44 = vpack.c.bf16 %v871_v40, %v870_v39  ;;  %v840_v45 = vld [vmem:[%s12083_s1 + $0x70] sm:$0xff]  ;;  %v841_v46 = vld [vmem:[%s12083_s1 + $0x78] sm:$0xff] }
  0x3f   : > { %6786 = vmatpush1.bf16.msra.mxu1 %v6785_v17  ;;  %954 = vmatprep.mubr.f32.mxu1 %v315_v41  ;;  %v872_v47 = vld [vmem:[%s12083_s1 + $0x170] sm:$0xff]  ;;  %v873_v48 = vld [vmem:[%s12083_s1 + $0x178] sm:$0xff]  ;;  %v6800_v49 = vpack.c.bf16 %v841_v46, %v840_v45  ;;  %v842_v51 = vld [vmem:[%s12083_s1 + $0x80] sm:$0xff] }
  0x40   : > { %6834 = vmatpush1.bf16.msra.mxu0 %v6833_v18  ;;  %6787 = vmatprep.subr.bf16.mxu1 %v7372_v0  ;;  %v6848_v50 = vpack.c.bf16 %v873_v48, %v872_v47  ;;  %v843_v52 = vld [vmem:[%s12083_s1 + $0x88] sm:$0xff]  ;;  %v874_v53 = vld [vmem:[%s12083_s1 + $0x180] sm:$0xff]  ;;  %v844_v57 = vld [vmem:[%s12083_s1 + $0x90] sm:$0xff] }
  0x41   : > { %6835 = vmatprep.subr.bf16.mxu0 %v7372_v0  ;;  %v875_v54 = vld [vmem:[%s12083_s1 + $0x188] sm:$0xff]  ;;  %v6803_v55 = vpack.c.bf16 %v843_v52, %v842_v51  ;;  %v845_v58 = vld [vmem:[%s12083_s1 + $0x98] sm:$0xff]  ;;  %v876_v59 = vld [vmem:[%s12083_s1 + $0x190] sm:$0xff] }
  0x42   : > { %v6851_v56 = vpack.c.bf16 %v875_v54, %v874_v53  ;;  %v877_v60 = vld [vmem:[%s12083_s1 + $0x198] sm:$0xff]  ;;  %v6806_v61 = vpack.c.bf16 %v845_v58, %v844_v57  ;;  %v846_v63 = vld [vmem:[%s12083_s1 + $0xa0] sm:$0xff]  ;;  %v847_v1 = vld [vmem:[%s12083_s1 + $0xa8] sm:$0xff] }
  0x43   : > { %6789 = vmatpush1.bf16.msra.mxu1 %v6788_v23  ;;  %v6854_v62 = vpack.c.bf16 %v877_v60, %v876_v59  ;;  %v878_v2 = vld [vmem:[%s12083_s1 + $0x1a0] sm:$0xff]  ;;  %v879_v3 = vld [vmem:[%s12083_s1 + $0x1a8] sm:$0xff]  ;;  %v6809_v4 = vpack.c.bf16 %v847_v1, %v846_v63  ;;  %v848_v6 = vld [vmem:[%s12083_s1 + $0xb0] sm:$0xff] }
  0x44   : > { %6837 = vmatpush1.bf16.msra.mxu0 %v6836_v24  ;;  %6790 = vmatprep.subr.bf16.mxu1 %v7372_v0  ;;  %v6857_v5 = vpack.c.bf16 %v879_v3, %v878_v2  ;;  %v849_v7 = vld [vmem:[%s12083_s1 + $0xb8] sm:$0xff]  ;;  %v880_v8 = vld [vmem:[%s12083_s1 + $0x1b0] sm:$0xff]  ;;  %v850_v12 = vld [vmem:[%s12083_s1 + $0xc0] sm:$0xff] }
  0x45   : > { %6838 = vmatprep.subr.bf16.mxu0 %v7372_v0  ;;  %v881_v9 = vld [vmem:[%s12083_s1 + $0x1b8] sm:$0xff]  ;;  %v6812_v10 = vpack.c.bf16 %v849_v7, %v848_v6  ;;  %v851_v13 = vld [vmem:[%s12083_s1 + $0xc8] sm:$0xff]  ;;  %v882_v14 = vld [vmem:[%s12083_s1 + $0x1c0] sm:$0xff] }
  0x46   : > { %v6860_v11 = vpack.c.bf16 %v881_v9, %v880_v8  ;;  %v883_v15 = vld [vmem:[%s12083_s1 + $0x1c8] sm:$0xff]  ;;  %v6815_v16 = vpack.c.bf16 %v851_v13, %v850_v12  ;;  %v852_v18 = vld [vmem:[%s12083_s1 + $0xd0] sm:$0xff]  ;;  %v853_v19 = vld [vmem:[%s12083_s1 + $0xd8] sm:$0xff] }
  0x47   : > { %6792 = vmatpush1.bf16.msra.mxu1 %v6791_v29  ;;  %v6863_v17 = vpack.c.bf16 %v883_v15, %v882_v14  ;;  %v884_v20 = vld [vmem:[%s12083_s1 + $0x1d0] sm:$0xff]  ;;  %v885_v21 = vld [vmem:[%s12083_s1 + $0x1d8] sm:$0xff]  ;;  %v6818_v22 = vpack.c.bf16 %v853_v19, %v852_v18  ;;  %v854_v24 = vld [vmem:[%s12083_s1 + $0xe0] sm:$0xff] }
  0x48   : > { %6840 = vmatpush1.bf16.msra.mxu0 %v6839_v30  ;;  %6793 = vmatprep.subr.bf16.mxu1 %v7372_v0  ;;  %v6866_v23 = vpack.c.bf16 %v885_v21, %v884_v20  ;;  %v855_v25 = vld [vmem:[%s12083_s1 + $0xe8] sm:$0xff]  ;;  %v886_v26 = vld [vmem:[%s12083_s1 + $0x1e0] sm:$0xff]  ;;  %v856_v30 = vld [vmem:[%s12083_s1 + $0xf0] sm:$0xff] }
  0x49   : > { %6841 = vmatprep.subr.bf16.mxu0 %v7372_v0  ;;  %v887_v27 = vld [vmem:[%s12083_s1 + $0x1e8] sm:$0xff]  ;;  %v6821_v28 = vpack.c.bf16 %v855_v25, %v854_v24  ;;  %v857_v31 = vld [vmem:[%s12083_s1 + $0xf8] sm:$0xff]  ;;  %v888_v32 = vld [vmem:[%s12083_s1 + $0x1f0] sm:$0xff] }
  0x4a   : > { %v6869_v29 = vpack.c.bf16 %v887_v27, %v886_v26  ;;  %v889_v33 = vld [vmem:[%s12083_s1 + $0x1f8] sm:$0xff]  ;;  %v6824_v34 = vpack.c.bf16 %v857_v31, %v856_v30  ;;  %v316_v37 = vld [vmem:[%s7489_s14 + $0x10] sm:$0xff]  ;;  %v319_v38 = vld [vmem:[%s7489_s14 + $0x28] sm:$0xff] }
  0x4b   : > { %6795 = vmatpush1.bf16.msra.mxu1 %v6794_v35  ;;  %v6872_v35 = vpack.c.bf16 %v889_v33, %v888_v32  ;;  %v321_v39 = vld [vmem:[%s7489_s14 + $0x38] sm:$0xff]  ;;  %v318_v40 = vld [vmem:[%s7489_s14 + $0x20] sm:$0xff]  ;;  %v320_v41 = vld [vmem:[%s7489_s14 + $0x30] sm:$0xff] }
  0x4c   : > { %6843 = vmatpush1.bf16.msra.mxu0 %v6842_v36  ;;  %6796 = vmatprep.subr.bf16.mxu1 %v7372_v0  ;;  %v314_v36 = vld [vmem:[%s7489_s14] sm:$0xff]  ;;  %v323_v42 = vld [vmem:[%s7489_s14 + $0x48] sm:$0xff]  ;;  %v329_v46 = vld [vmem:[%s7489_s14 + $0x78] sm:$0xff] }
  0x4d   : > { %6844 = vmatprep.subr.bf16.mxu0 %v7372_v0  ;;  %v327_v45 = vld [vmem:[%s7489_s14 + $0x68] sm:$0xff]  ;;  %v326_v47 = vld [vmem:[%s7489_s14 + $0x60] sm:$0xff]  ;;  %v328_v48 = vld [vmem:[%s7489_s14 + $0x70] sm:$0xff] }
  0x4e   : > { %v330_v51 = vld [vmem:[%s7489_s14 + $0x80] sm:$0xff]  ;;  %v332_v52 = vld [vmem:[%s7489_s14 + $0x90] sm:$0xff]  ;;  %v335_v53 = vld [vmem:[%s7489_s14 + $0xa8] sm:$0xff] }
  0x4f   : > { %6798 = vmatpush1.bf16.msra.mxu1 %v6797_v43  ;;  %v322_v43 = vld [vmem:[%s7489_s14 + $0x40] sm:$0xff]  ;;  %v337_v54 = vld [vmem:[%s7489_s14 + $0xb8] sm:$0xff]  ;;  %v339_v57 = vld [vmem:[%s7489_s14 + $0xc8] sm:$0xff] }
  0x50   : > { %6846 = vmatpush1.bf16.msra.mxu0 %v6845_v44  ;;  %6799 = vmatprep.subr.bf16.mxu1 %v7372_v0  ;;  %v324_v44 = vld [vmem:[%s7489_s14 + $0x50] sm:$0xff]  ;;  %v341_v58 = vld [vmem:[%s7489_s14 + $0xd8] sm:$0xff]  ;;  %v338_v59 = vld [vmem:[%s7489_s14 + $0xc0] sm:$0xff] }
  0x51   : > { %6847 = vmatprep.subr.bf16.mxu0 %v7372_v0  ;;  %v340_v60 = vld [vmem:[%s7489_s14 + $0xd0] sm:$0xff]  ;;  %v342_v63 = vld [vmem:[%s7489_s14 + $0xe0] sm:$0xff]  ;;  %v347_v2 = vld [vmem:[%s7489_s14 + $0x108] sm:$0xff] }
  0x52   : > { %v344_v1 = vld [vmem:[%s7489_s14 + $0xf0] sm:$0xff]  ;;  %v349_v3 = vld [vmem:[%s7489_s14 + $0x118] sm:$0xff]  ;;  %v351_v6 = vld [vmem:[%s7489_s14 + $0x128] sm:$0xff] }
  0x53   : > { %6801 = vmatpush1.bf16.msra.mxu1 %v6800_v49  ;;  %v331_v49 = vld [vmem:[%s7489_s14 + $0x88] sm:$0xff]  ;;  %v353_v7 = vld [vmem:[%s7489_s14 + $0x138] sm:$0xff]  ;;  %v350_v8 = vld [vmem:[%s7489_s14 + $0x120] sm:$0xff] }
  0x54   : > { %6849 = vmatpush1.bf16.msra.mxu0 %v6848_v50  ;;  %6802 = vmatprep.subr.bf16.mxu1 %v7372_v0  ;;  %v333_v50 = vld [vmem:[%s7489_s14 + $0x98] sm:$0xff]  ;;  %v352_v9 = vld [vmem:[%s7489_s14 + $0x130] sm:$0xff]  ;;  %v354_v12 = vld [vmem:[%s7489_s14 + $0x140] sm:$0xff] }
  0x55   : > { %6850 = vmatprep.subr.bf16.mxu0 %v7372_v0  ;;  %v356_v13 = vld [vmem:[%s7489_s14 + $0x150] sm:$0xff]  ;;  %v359_v14 = vld [vmem:[%s7489_s14 + $0x168] sm:$0xff]  ;;  %v361_v15 = vld [vmem:[%s7489_s14 + $0x178] sm:$0xff] }
  0x56   : > { %v363_v18 = vld [vmem:[%s7489_s14 + $0x188] sm:$0xff]  ;;  %v365_v19 = vld [vmem:[%s7489_s14 + $0x198] sm:$0xff]  ;;  %v362_v20 = vld [vmem:[%s7489_s14 + $0x180] sm:$0xff] }
  0x57   : > { %6804 = vmatpush1.bf16.msra.mxu1 %v6803_v55  ;;  %v334_v55 = vld [vmem:[%s7489_s14 + $0xa0] sm:$0xff]  ;;  %v364_v21 = vld [vmem:[%s7489_s14 + $0x190] sm:$0xff]  ;;  %v371_v26 = vld [vmem:[%s7489_s14 + $0x1c8] sm:$0xff] }
  0x58   : > { %6852 = vmatpush1.bf16.msra.mxu0 %v6851_v56  ;;  %6805 = vmatprep.subr.bf16.mxu1 %v7372_v0  ;;  %v336_v56 = vld [vmem:[%s7489_s14 + $0xb0] sm:$0xff]  ;;  %v366_v24 = vld [vmem:[%s7489_s14 + $0x1a0] sm:$0xff]  ;;  %v373_v27 = vld [vmem:[%s7489_s14 + $0x1d8] sm:$0xff] }
  0x59   : > { %6853 = vmatprep.subr.bf16.mxu0 %v7372_v0  ;;  %v368_v25 = vld [vmem:[%s7489_s14 + $0x1b0] sm:$0xff]  ;;  %v375_v30 = vld [vmem:[%s7489_s14 + $0x1e8] sm:$0xff]  ;;  %v377_v31 = vld [vmem:[%s7489_s14 + $0x1f8] sm:$0xff] }
  0x5a   : > { %v374_v32 = vld [vmem:[%s7489_s14 + $0x1e0] sm:$0xff]  ;;  %v376_v33 = vld [vmem:[%s7489_s14 + $0x1f0] sm:$0xff] }
  0x5b   : > { %6807 = vmatpush1.bf16.msra.mxu1 %v6806_v61  ;;  %v343_v61 = vld [vmem:[%s7489_s14 + $0xe8] sm:$0xff] }
  0x5c   : > { %6855 = vmatpush1.bf16.msra.mxu0 %v6854_v62  ;;  %6808 = vmatprep.subr.bf16.mxu1 %v7372_v0  ;;  %v345_v62 = vld [vmem:[%s7489_s14 + $0xf8] sm:$0xff] }
  0x5d   : > { %6856 = vmatprep.subr.bf16.mxu0 %v7372_v0 }
  0x5f   : > { %6810 = vmatpush1.bf16.msra.mxu1 %v6809_v4  ;;  %v346_v4 = vld [vmem:[%s7489_s14 + $0x100] sm:$0xff] }
  0x60   : > { %6858 = vmatpush1.bf16.msra.mxu0 %v6857_v5  ;;  %6811 = vmatprep.subr.bf16.mxu1 %v7372_v0  ;;  %v348_v5 = vld [vmem:[%s7489_s14 + $0x110] sm:$0xff] }
  0x61   : > { %6859 = vmatprep.subr.bf16.mxu0 %v7372_v0 }
  0x63   : > { %6813 = vmatpush1.bf16.msra.mxu1 %v6812_v10  ;;  %v355_v10 = vld [vmem:[%s7489_s14 + $0x148] sm:$0xff] }
  0x64   : > { %6861 = vmatpush1.bf16.msra.mxu0 %v6860_v11  ;;  %6814 = vmatprep.subr.bf16.mxu1 %v7372_v0  ;;  %v357_v11 = vld [vmem:[%s7489_s14 + $0x158] sm:$0xff] }
  0x65   : > { %6862 = vmatprep.subr.bf16.mxu0 %v7372_v0 }
  0x67   : > { %6816 = vmatpush1.bf16.msra.mxu1 %v6815_v16  ;;  %v358_v16 = vld [vmem:[%s7489_s14 + $0x160] sm:$0xff] }
  0x68   : > { %6864 = vmatpush1.bf16.msra.mxu0 %v6863_v17  ;;  %6817 = vmatprep.subr.bf16.mxu1 %v7372_v0  ;;  %v360_v17 = vld [vmem:[%s7489_s14 + $0x170] sm:$0xff] }
  0x69   : > { %6865 = vmatprep.subr.bf16.mxu0 %v7372_v0 }
  0x6b   : > { %6819 = vmatpush1.bf16.msra.mxu1 %v6818_v22  ;;  %v367_v22 = vld [vmem:[%s7489_s14 + $0x1a8] sm:$0xff] }
  0x6c   : > { %6867 = vmatpush1.bf16.msra.mxu0 %v6866_v23  ;;  %6820 = vmatprep.subr.bf16.mxu1 %v7372_v0  ;;  %v369_v23 = vld [vmem:[%s7489_s14 + $0x1b8] sm:$0xff] }
  0x6d   : > { %6868 = vmatprep.subr.bf16.mxu0 %v7372_v0 }
  0x6f   : > { %6822 = vmatpush1.bf16.msra.mxu1 %v6821_v28  ;;  %v370_v28 = vld [vmem:[%s7489_s14 + $0x1c0] sm:$0xff] }
  0x70   : > { %6870 = vmatpush1.bf16.msra.mxu0 %v6869_v29  ;;  %6823 = vmatprep.subr.bf16.mxu1 %v7372_v0  ;;  %v372_v29 = vld [vmem:[%s7489_s14 + $0x1d0] sm:$0xff] }
  0x71   : > { %6871 = vmatprep.subr.bf16.mxu0 %v7372_v0  ;;  %v325_v0 = vld [vmem:[%s7489_s14 + $0x58] sm:$0xff] }
  0x73   : > { %6825 = vmatpush1.bf16.msra.mxu1 %v6824_v34  ;;  %v379_v34 = vld [vmem:[%s7489_s14 + $0x208] sm:$0xff] }
  0x74   : > { %6873 = vmatpush1.bf16.msra.mxu0 %v6872_v35  ;;  %v381_v35 = vld [vmem:[%s7489_s14 + $0x218] sm:$0xff] }
  0x76   : > { %955 = vmatmul.mubr.f32.vlgmr.msra.gmra.mrb[0].mxu1 %v314_v36  ;;  %v378_v36 = vld [vmem:[%s7489_s14 + $0x200] sm:$0xff] }
  0x77   : > { %1660 = vmatmul.mubr.f32.vlgmr.msra.gmra.mrb[0].mxu0 %v316_v37  ;;  %959 = vmatprep.mubr.f32.mxu1 %v319_v38  ;;  %v380_v37 = vld [vmem:[%s7489_s14 + $0x210] sm:$0xff]  ;;  %v383_v38 = vld [vmem:[%s7489_s14 + $0x228] sm:$0xff] }
  0x78   : > { %1664 = vmatprep.mubr.f32.mxu0 %v321_v39  ;;  %v385_v39 = vld [vmem:[%s7489_s14 + $0x238] sm:$0xff] }
  0x7a   : > { %960 = vmatmul.mubr.f32.gmra.mrb[2].mxu1 %v318_v40  ;;  %v382_v40 = vld [vmem:[%s7489_s14 + $0x220] sm:$0xff] }
  0x7b   : > { %1665 = vmatmul.mubr.f32.gmra.mrb[2].mxu0 %v320_v41  ;;  %964 = vmatprep.mubr.f32.mxu1 %v323_v42  ;;  %v384_v41 = vld [vmem:[%s7489_s14 + $0x230] sm:$0xff]  ;;  %v387_v42 = vld [vmem:[%s7489_s14 + $0x248] sm:$0xff] }
  0x7c   : > { %1669 = vmatprep.mubr.f32.mxu0 %v325_v0  ;;  %v389_v0 = vld [vmem:[%s7489_s14 + $0x258] sm:$0xff] }
  0x7e   : > { %965 = vmatmul.mubr.f32.gmra.mrb[4].mxu1 %v322_v43  ;;  %v386_v43 = vld [vmem:[%s7489_s14 + $0x240] sm:$0xff] }
  0x7f   : > { %1670 = vmatmul.mubr.f32.gmra.mrb[4].mxu0 %v324_v44  ;;  %969 = vmatprep.mubr.f32.mxu1 %v327_v45  ;;  %v388_v44 = vld [vmem:[%s7489_s14 + $0x250] sm:$0xff]  ;;  %v391_v45 = vld [vmem:[%s7489_s14 + $0x268] sm:$0xff] }
  0x80   : > { %1674 = vmatprep.mubr.f32.mxu0 %v329_v46  ;;  %v393_v46 = vld [vmem:[%s7489_s14 + $0x278] sm:$0xff] }
  0x82   : > { %970 = vmatmul.mubr.f32.gmra.mrb[6].mxu1 %v326_v47  ;;  %v390_v47 = vld [vmem:[%s7489_s14 + $0x260] sm:$0xff] }
  0x83   : > { %1675 = vmatmul.mubr.f32.gmra.mrb[6].mxu0 %v328_v48  ;;  %974 = vmatprep.mubr.f32.mxu1 %v331_v49  ;;  %v392_v48 = vld [vmem:[%s7489_s14 + $0x270] sm:$0xff]  ;;  %v395_v49 = vld [vmem:[%s7489_s14 + $0x288] sm:$0xff] }
  0x84   : > { %1679 = vmatprep.mubr.f32.mxu0 %v333_v50  ;;  %v397_v50 = vld [vmem:[%s7489_s14 + $0x298] sm:$0xff] }
  0x86   : > { %975 = vmatmul.mubr.f32.gmra.mrb[8].mxu1 %v330_v51  ;;  %v394_v51 = vld [vmem:[%s7489_s14 + $0x280] sm:$0xff] }
  0x87   : > { %1680 = vmatmul.mubr.f32.gmra.mrb[8].mxu0 %v332_v52  ;;  %979 = vmatprep.mubr.f32.mxu1 %v335_v53  ;;  %v396_v52 = vld [vmem:[%s7489_s14 + $0x290] sm:$0xff]  ;;  %v399_v53 = vld [vmem:[%s7489_s14 + $0x2a8] sm:$0xff] }
  0x88   : > { %1684 = vmatprep.mubr.f32.mxu0 %v337_v54  ;;  %v401_v54 = vld [vmem:[%s7489_s14 + $0x2b8] sm:$0xff] }
  0x8a   : > { %980 = vmatmul.mubr.f32.gmra.mrb[10].mxu1 %v334_v55  ;;  %v398_v55 = vld [vmem:[%s7489_s14 + $0x2a0] sm:$0xff] }
  0x8b   : > { %1685 = vmatmul.mubr.f32.gmra.mrb[10].mxu0 %v336_v56  ;;  %984 = vmatprep.mubr.f32.mxu1 %v339_v57  ;;  %v400_v56 = vld [vmem:[%s7489_s14 + $0x2b0] sm:$0xff]  ;;  %v403_v57 = vld [vmem:[%s7489_s14 + $0x2c8] sm:$0xff] }
  0x8c   : > { %1689 = vmatprep.mubr.f32.mxu0 %v341_v58  ;;  %v405_v58 = vld [vmem:[%s7489_s14 + $0x2d8] sm:$0xff] }
  0x8e   : > { %985 = vmatmul.mubr.f32.gmra.mrb[12].mxu1 %v338_v59  ;;  %v402_v59 = vld [vmem:[%s7489_s14 + $0x2c0] sm:$0xff] }
  0x8f   : > { %1690 = vmatmul.mubr.f32.gmra.mrb[12].mxu0 %v340_v60  ;;  %989 = vmatprep.mubr.f32.mxu1 %v343_v61  ;;  %v404_v60 = vld [vmem:[%s7489_s14 + $0x2d0] sm:$0xff]  ;;  %v407_v61 = vld [vmem:[%s7489_s14 + $0x2e8] sm:$0xff] }
  0x90   : > { %1694 = vmatprep.mubr.f32.mxu0 %v345_v62  ;;  %v409_v62 = vld [vmem:[%s7489_s14 + $0x2f8] sm:$0xff] }
  0x92   : > { %990 = vmatmul.mubr.f32.gmra.mrb[14].mxu1 %v342_v63  ;;  %v406_v63 = vld [vmem:[%s7489_s14 + $0x2e0] sm:$0xff] }
  0x93   : > { %1695 = vmatmul.mubr.f32.gmra.mrb[14].mxu0 %v344_v1  ;;  %994 = vmatprep.mubr.f32.mxu1 %v347_v2  ;;  %v408_v1 = vld [vmem:[%s7489_s14 + $0x2f0] sm:$0xff]  ;;  %v411_v2 = vld [vmem:[%s7489_s14 + $0x308] sm:$0xff] }
  0x94   : > { %1699 = vmatprep.mubr.f32.mxu0 %v349_v3  ;;  %v413_v3 = vld [vmem:[%s7489_s14 + $0x318] sm:$0xff] }
  0x96   : > { %995 = vmatmul.mubr.f32.gmra.mrb[16].mxu1 %v346_v4  ;;  %v410_v4 = vld [vmem:[%s7489_s14 + $0x300] sm:$0xff] }
  0x97   : > { %1700 = vmatmul.mubr.f32.gmra.mrb[16].mxu0 %v348_v5  ;;  %999 = vmatprep.mubr.f32.mxu1 %v351_v6  ;;  %v412_v5 = vld [vmem:[%s7489_s14 + $0x310] sm:$0xff]  ;;  %v415_v6 = vld [vmem:[%s7489_s14 + $0x328] sm:$0xff] }
  0x98   : > { %1704 = vmatprep.mubr.f32.mxu0 %v353_v7  ;;  %v417_v7 = vld [vmem:[%s7489_s14 + $0x338] sm:$0xff] }
  0x9a   : > { %1000 = vmatmul.mubr.f32.gmra.mrb[18].mxu1 %v350_v8  ;;  %v414_v8 = vld [vmem:[%s7489_s14 + $0x320] sm:$0xff] }
  0x9b   : > { %1705 = vmatmul.mubr.f32.gmra.mrb[18].mxu0 %v352_v9  ;;  %1004 = vmatprep.mubr.f32.mxu1 %v355_v10  ;;  %v416_v9 = vld [vmem:[%s7489_s14 + $0x330] sm:$0xff]  ;;  %v419_v10 = vld [vmem:[%s7489_s14 + $0x348] sm:$0xff] }
  0x9c   : > { %1709 = vmatprep.mubr.f32.mxu0 %v357_v11  ;;  %v421_v11 = vld [vmem:[%s7489_s14 + $0x358] sm:$0xff] }
  0x9e   : > { %1005 = vmatmul.mubr.f32.gmra.mrb[20].mxu1 %v354_v12  ;;  %v418_v12 = vld [vmem:[%s7489_s14 + $0x340] sm:$0xff] }
  0x9f   : > { %1710 = vmatmul.mubr.f32.gmra.mrb[20].mxu0 %v356_v13  ;;  %1009 = vmatprep.mubr.f32.mxu1 %v359_v14  ;;  %v420_v13 = vld [vmem:[%s7489_s14 + $0x350] sm:$0xff]  ;;  %v423_v14 = vld [vmem:[%s7489_s14 + $0x368] sm:$0xff] }
  0xa0   : > { %1714 = vmatprep.mubr.f32.mxu0 %v361_v15  ;;  %v425_v15 = vld [vmem:[%s7489_s14 + $0x378] sm:$0xff] }
  0xa2   : > { %1010 = vmatmul.mubr.f32.gmra.mrb[22].mxu1 %v358_v16  ;;  %v422_v16 = vld [vmem:[%s7489_s14 + $0x360] sm:$0xff] }
  0xa3   : > { %1715 = vmatmul.mubr.f32.gmra.mrb[22].mxu0 %v360_v17  ;;  %1014 = vmatprep.mubr.f32.mxu1 %v363_v18  ;;  %v424_v17 = vld [vmem:[%s7489_s14 + $0x370] sm:$0xff]  ;;  %v427_v18 = vld [vmem:[%s7489_s14 + $0x388] sm:$0xff] }
  0xa4   : > { %1719 = vmatprep.mubr.f32.mxu0 %v365_v19  ;;  %v429_v19 = vld [vmem:[%s7489_s14 + $0x398] sm:$0xff] }
  0xa6   : > { %1015 = vmatmul.mubr.f32.gmra.mrb[24].mxu1 %v362_v20  ;;  %v426_v20 = vld [vmem:[%s7489_s14 + $0x380] sm:$0xff] }
  0xa7   : > { %1720 = vmatmul.mubr.f32.gmra.mrb[24].mxu0 %v364_v21  ;;  %1019 = vmatprep.mubr.f32.mxu1 %v367_v22  ;;  %v428_v21 = vld [vmem:[%s7489_s14 + $0x390] sm:$0xff]  ;;  %v431_v22 = vld [vmem:[%s7489_s14 + $0x3a8] sm:$0xff] }
  0xa8   : > { %1724 = vmatprep.mubr.f32.mxu0 %v369_v23  ;;  %v433_v23 = vld [vmem:[%s7489_s14 + $0x3b8] sm:$0xff] }
  0xaa   : > { %1020 = vmatmul.mubr.f32.gmra.mrb[26].mxu1 %v366_v24  ;;  %v430_v24 = vld [vmem:[%s7489_s14 + $0x3a0] sm:$0xff] }
  0xab   : > { %1725 = vmatmul.mubr.f32.gmra.mrb[26].mxu0 %v368_v25  ;;  %1024 = vmatprep.mubr.f32.mxu1 %v371_v26  ;;  %v432_v25 = vld [vmem:[%s7489_s14 + $0x3b0] sm:$0xff]  ;;  %v435_v26 = vld [vmem:[%s7489_s14 + $0x3c8] sm:$0xff] }
  0xac   : > { %1729 = vmatprep.mubr.f32.mxu0 %v373_v27  ;;  %v437_v27 = vld [vmem:[%s7489_s14 + $0x3d8] sm:$0xff] }
  0xae   : > { %1025 = vmatmul.mubr.f32.gmra.mrb[28].mxu1 %v370_v28  ;;  %v434_v28 = vld [vmem:[%s7489_s14 + $0x3c0] sm:$0xff] }
  0xaf   : > { %1730 = vmatmul.mubr.f32.gmra.mrb[28].mxu0 %v372_v29  ;;  %1029 = vmatprep.mubr.f32.mxu1 %v375_v30  ;;  %v436_v29 = vld [vmem:[%s7489_s14 + $0x3d0] sm:$0xff]  ;;  %v439_v30 = vld [vmem:[%s7489_s14 + $0x3e8] sm:$0xff] }
  0xb0   : > { %1734 = vmatprep.mubr.f32.mxu0 %v377_v31  ;;  %v441_v31 = vld [vmem:[%s7489_s14 + $0x3f8] sm:$0xff] }
  0xb2   : > { %1030 = vmatmul.mubr.f32.gmra.mrb[30].mxu1 %v374_v32  ;;  %v438_v32 = vld [vmem:[%s7489_s14 + $0x3e0] sm:$0xff] }
  0xb3   : > { %1735 = vmatmul.mubr.f32.gmra.mrb[30].mxu0 %v376_v33  ;;  %1034 = vmatprep.mubr.f32.mxu1 %v379_v34  ;;  %v440_v33 = vld [vmem:[%s7489_s14 + $0x3f0] sm:$0xff]  ;;  %v443_v34 = vld [vmem:[%s7489_s14 + $0x408] sm:$0xff] }
  0xb4   : > { %1739 = vmatprep.mubr.f32.mxu0 %v381_v35  ;;  %v445_v35 = vld [vmem:[%s7489_s14 + $0x418] sm:$0xff] }
  0xb6   : > { %1035 = vmatmul.mubr.f32.gmra.mrb[32].mxu1 %v378_v36  ;;  %v442_v36 = vld [vmem:[%s7489_s14 + $0x400] sm:$0xff] }
  0xb7   : > { %1740 = vmatmul.mubr.f32.gmra.mrb[32].mxu0 %v380_v37  ;;  %1039 = vmatprep.mubr.f32.mxu1 %v383_v38  ;;  %v444_v37 = vld [vmem:[%s7489_s14 + $0x410] sm:$0xff]  ;;  %v447_v38 = vld [vmem:[%s7489_s14 + $0x428] sm:$0xff] }
  0xb8   : > { %1744 = vmatprep.mubr.f32.mxu0 %v385_v39  ;;  %v449_v39 = vld [vmem:[%s7489_s14 + $0x438] sm:$0xff] }
  0xba   : > { %1040 = vmatmul.mubr.f32.gmra.mrb[34].mxu1 %v382_v40  ;;  %v446_v40 = vld [vmem:[%s7489_s14 + $0x420] sm:$0xff] }
  0xbb   : > { %1745 = vmatmul.mubr.f32.gmra.mrb[34].mxu0 %v384_v41  ;;  %1044 = vmatprep.mubr.f32.mxu1 %v387_v42  ;;  %v448_v41 = vld [vmem:[%s7489_s14 + $0x430] sm:$0xff]  ;;  %v451_v42 = vld [vmem:[%s7489_s14 + $0x448] sm:$0xff] }
  0xbc   : > { %1749 = vmatprep.mubr.f32.mxu0 %v389_v0  ;;  %v453_v0 = vld [vmem:[%s7489_s14 + $0x458] sm:$0xff] }
  0xbe   : > { %1045 = vmatmul.mubr.f32.gmra.mrb[36].mxu1 %v386_v43  ;;  %v450_v43 = vld [vmem:[%s7489_s14 + $0x440] sm:$0xff] }
  0xbf   : > { %1750 = vmatmul.mubr.f32.gmra.mrb[36].mxu0 %v388_v44  ;;  %1049 = vmatprep.mubr.f32.mxu1 %v391_v45  ;;  %v452_v44 = vld [vmem:[%s7489_s14 + $0x450] sm:$0xff]  ;;  %v455_v45 = vld [vmem:[%s7489_s14 + $0x468] sm:$0xff] }
  0xc0   : > { %1754 = vmatprep.mubr.f32.mxu0 %v393_v46  ;;  %v457_v46 = vld [vmem:[%s7489_s14 + $0x478] sm:$0xff] }
  0xc2   : > { %1050 = vmatmul.mubr.f32.gmra.mrb[38].mxu1 %v390_v47  ;;  %v454_v47 = vld [vmem:[%s7489_s14 + $0x460] sm:$0xff] }
  0xc3   : > { %1755 = vmatmul.mubr.f32.gmra.mrb[38].mxu0 %v392_v48  ;;  %1054 = vmatprep.mubr.f32.mxu1 %v395_v49  ;;  %v456_v48 = vld [vmem:[%s7489_s14 + $0x470] sm:$0xff]  ;;  %v459_v49 = vld [vmem:[%s7489_s14 + $0x488] sm:$0xff] }
  0xc4   : > { %1759 = vmatprep.mubr.f32.mxu0 %v397_v50  ;;  %v461_v50 = vld [vmem:[%s7489_s14 + $0x498] sm:$0xff] }
  0xc6   : > { %1055 = vmatmul.mubr.f32.gmra.mrb[40].mxu1 %v394_v51  ;;  %v458_v51 = vld [vmem:[%s7489_s14 + $0x480] sm:$0xff] }
  0xc7   : > { %1760 = vmatmul.mubr.f32.gmra.mrb[40].mxu0 %v396_v52  ;;  %1059 = vmatprep.mubr.f32.mxu1 %v399_v53  ;;  %v460_v52 = vld [vmem:[%s7489_s14 + $0x490] sm:$0xff]  ;;  %v463_v53 = vld [vmem:[%s7489_s14 + $0x4a8] sm:$0xff] }
  0xc8   : > { %1764 = vmatprep.mubr.f32.mxu0 %v401_v54  ;;  %v465_v54 = vld [vmem:[%s7489_s14 + $0x4b8] sm:$0xff] }
  0xca   : > { %1060 = vmatmul.mubr.f32.gmra.mrb[42].mxu1 %v398_v55  ;;  %v462_v55 = vld [vmem:[%s7489_s14 + $0x4a0] sm:$0xff] }
  0xcb   : > { %1765 = vmatmul.mubr.f32.gmra.mrb[42].mxu0 %v400_v56  ;;  %1064 = vmatprep.mubr.f32.mxu1 %v403_v57  ;;  %v464_v56 = vld [vmem:[%s7489_s14 + $0x4b0] sm:$0xff]  ;;  %v467_v57 = vld [vmem:[%s7489_s14 + $0x4c8] sm:$0xff] }
  0xcc   : > { %1769 = vmatprep.mubr.f32.mxu0 %v405_v58  ;;  %v469_v58 = vld [vmem:[%s7489_s14 + $0x4d8] sm:$0xff] }
  0xce   : > { %1065 = vmatmul.mubr.f32.gmra.mrb[44].mxu1 %v402_v59  ;;  %v466_v59 = vld [vmem:[%s7489_s14 + $0x4c0] sm:$0xff] }
  0xcf   : > { %1770 = vmatmul.mubr.f32.gmra.mrb[44].mxu0 %v404_v60  ;;  %1069 = vmatprep.mubr.f32.mxu1 %v407_v61  ;;  %v468_v60 = vld [vmem:[%s7489_s14 + $0x4d0] sm:$0xff]  ;;  %v471_v61 = vld [vmem:[%s7489_s14 + $0x4e8] sm:$0xff] }
  0xd0   : > { %1774 = vmatprep.mubr.f32.mxu0 %v409_v62  ;;  %v473_v62 = vld [vmem:[%s7489_s14 + $0x4f8] sm:$0xff] }
  0xd2   : > { %1070 = vmatmul.mubr.f32.gmra.mrb[46].mxu1 %v406_v63  ;;  %v470_v63 = vld [vmem:[%s7489_s14 + $0x4e0] sm:$0xff] }
  0xd3   : > { %1775 = vmatmul.mubr.f32.gmra.mrb[46].mxu0 %v408_v1  ;;  %1074 = vmatprep.mubr.f32.mxu1 %v411_v2  ;;  %v472_v1 = vld [vmem:[%s7489_s14 + $0x4f0] sm:$0xff]  ;;  %v475_v2 = vld [vmem:[%s7489_s14 + $0x508] sm:$0xff] }
  0xd4   : > { %1779 = vmatprep.mubr.f32.mxu0 %v413_v3  ;;  %v477_v3 = vld [vmem:[%s7489_s14 + $0x518] sm:$0xff] }
  0xd6   : > { %1075 = vmatmul.mubr.f32.gmra.mrb[48].mxu1 %v410_v4  ;;  %v474_v4 = vld [vmem:[%s7489_s14 + $0x500] sm:$0xff] }
  0xd7   : > { %1780 = vmatmul.mubr.f32.gmra.mrb[48].mxu0 %v412_v5  ;;  %1079 = vmatprep.mubr.f32.mxu1 %v415_v6  ;;  %v476_v5 = vld [vmem:[%s7489_s14 + $0x510] sm:$0xff]  ;;  %v479_v6 = vld [vmem:[%s7489_s14 + $0x528] sm:$0xff] }
  0xd8   : > { %1784 = vmatprep.mubr.f32.mxu0 %v417_v7  ;;  %v481_v7 = vld [vmem:[%s7489_s14 + $0x538] sm:$0xff] }
  0xda   : > { %1080 = vmatmul.mubr.f32.gmra.mrb[50].mxu1 %v414_v8  ;;  %v478_v8 = vld [vmem:[%s7489_s14 + $0x520] sm:$0xff] }
  0xdb   : > { %1785 = vmatmul.mubr.f32.gmra.mrb[50].mxu0 %v416_v9  ;;  %1084 = vmatprep.mubr.f32.mxu1 %v419_v10  ;;  %v480_v9 = vld [vmem:[%s7489_s14 + $0x530] sm:$0xff]  ;;  %v483_v10 = vld [vmem:[%s7489_s14 + $0x548] sm:$0xff] }
  0xdc   : > { %1789 = vmatprep.mubr.f32.mxu0 %v421_v11  ;;  %v485_v11 = vld [vmem:[%s7489_s14 + $0x558] sm:$0xff] }
  0xde   : > { %1085 = vmatmul.mubr.f32.gmra.mrb[52].mxu1 %v418_v12  ;;  %v482_v12 = vld [vmem:[%s7489_s14 + $0x540] sm:$0xff] }
  0xdf   : > { %1790 = vmatmul.mubr.f32.gmra.mrb[52].mxu0 %v420_v13  ;;  %1089 = vmatprep.mubr.f32.mxu1 %v423_v14  ;;  %v484_v13 = vld [vmem:[%s7489_s14 + $0x550] sm:$0xff]  ;;  %v487_v14 = vld [vmem:[%s7489_s14 + $0x568] sm:$0xff] }
  0xe0   : > { %1794 = vmatprep.mubr.f32.mxu0 %v425_v15  ;;  %v489_v15 = vld [vmem:[%s7489_s14 + $0x578] sm:$0xff] }
  0xe2   : > { %1090 = vmatmul.mubr.f32.gmra.mrb[54].mxu1 %v422_v16  ;;  %v486_v16 = vld [vmem:[%s7489_s14 + $0x560] sm:$0xff] }
  0xe3   : > { %1795 = vmatmul.mubr.f32.gmra.mrb[54].mxu0 %v424_v17  ;;  %1094 = vmatprep.mubr.f32.mxu1 %v427_v18  ;;  %v488_v17 = vld [vmem:[%s7489_s14 + $0x570] sm:$0xff]  ;;  %v491_v18 = vld [vmem:[%s7489_s14 + $0x588] sm:$0xff] }
  0xe4   : > { %1799 = vmatprep.mubr.f32.mxu0 %v429_v19  ;;  %v493_v19 = vld [vmem:[%s7489_s14 + $0x598] sm:$0xff] }
  0xe6   : > { %1095 = vmatmul.mubr.f32.gmra.mrb[56].mxu1 %v426_v20  ;;  %v490_v20 = vld [vmem:[%s7489_s14 + $0x580] sm:$0xff] }
  0xe7   : > { %1800 = vmatmul.mubr.f32.gmra.mrb[56].mxu0 %v428_v21  ;;  %1099 = vmatprep.mubr.f32.mxu1 %v431_v22  ;;  %v492_v21 = vld [vmem:[%s7489_s14 + $0x590] sm:$0xff]  ;;  %v495_v22 = vld [vmem:[%s7489_s14 + $0x5a8] sm:$0xff] }
  0xe8   : > { %1804 = vmatprep.mubr.f32.mxu0 %v433_v23  ;;  %v497_v23 = vld [vmem:[%s7489_s14 + $0x5b8] sm:$0xff] }
  0xea   : > { %1100 = vmatmul.mubr.f32.gmra.mrb[58].mxu1 %v430_v24  ;;  %v494_v24 = vld [vmem:[%s7489_s14 + $0x5a0] sm:$0xff] }
  0xeb   : > { %1805 = vmatmul.mubr.f32.gmra.mrb[58].mxu0 %v432_v25  ;;  %1104 = vmatprep.mubr.f32.mxu1 %v435_v26  ;;  %v496_v25 = vld [vmem:[%s7489_s14 + $0x5b0] sm:$0xff]  ;;  %v499_v26 = vld [vmem:[%s7489_s14 + $0x5c8] sm:$0xff] }
  0xec   : > { %1809 = vmatprep.mubr.f32.mxu0 %v437_v27  ;;  %v501_v27 = vld [vmem:[%s7489_s14 + $0x5d8] sm:$0xff] }
  0xee   : > { %1105 = vmatmul.mubr.f32.gmra.mrb[60].mxu1 %v434_v28  ;;  %v498_v28 = vld [vmem:[%s7489_s14 + $0x5c0] sm:$0xff] }
  0xef   : > { %1810 = vmatmul.mubr.f32.gmra.mrb[60].mxu0 %v436_v29  ;;  %1109 = vmatprep.mubr.f32.mxu1 %v439_v30  ;;  %v500_v29 = vld [vmem:[%s7489_s14 + $0x5d0] sm:$0xff] }
  0xf0   : > { %1814 = vmatprep.mubr.f32.mxu0 %v441_v31 }
  0xf2   : > { %1110 = vmatmul.mubr.f32.gmra.mrb[62].mxu1 %v438_v32 }
  0xf3   : > { %1815 = vmatmul.mubr.f32.gmra.mrb[62].mxu0 %v440_v33  ;;  %1114 = vmatprep.mubr.f32.mxu1 %v443_v34 }
  0xf4   : > { %1819 = vmatprep.mubr.f32.mxu0 %v445_v35 }
  0xf6   : > { %1115 = vmatmul.mubr.f32.gmra.mrb[64].mxu1 %v442_v36 }
  0xf7   : > { %1820 = vmatmul.mubr.f32.gmra.mrb[64].mxu0 %v444_v37  ;;  %1119 = vmatprep.mubr.f32.mxu1 %v447_v38 }
  0xf8   : > { %1824 = vmatprep.mubr.f32.mxu0 %v449_v39 }
  0xfa   : > { %1120 = vmatmul.mubr.f32.gmra.mrb[66].mxu1 %v446_v40 }
  0xfb   : > { %1825 = vmatmul.mubr.f32.gmra.mrb[66].mxu0 %v448_v41  ;;  %1124 = vmatprep.mubr.f32.mxu1 %v451_v42 }
  0xfc   : > { %1829 = vmatprep.mubr.f32.mxu0 %v453_v0 }
  0xfe   : > { %1125 = vmatmul.mubr.f32.gmra.mrb[68].mxu1 %v450_v43 }
  0xff   : > { %1830 = vmatmul.mubr.f32.gmra.mrb[68].mxu0 %v452_v44  ;;  %1129 = vmatprep.mubr.f32.mxu1 %v455_v45 }
 0x100   : > { %1834 = vmatprep.mubr.f32.mxu0 %v457_v46 }
 0x102   : > { %1130 = vmatmul.mubr.f32.gmra.mrb[70].mxu1 %v454_v47 }
 0x103   : > { %1835 = vmatmul.mubr.f32.gmra.mrb[70].mxu0 %v456_v48  ;;  %1134 = vmatprep.mubr.f32.mxu1 %v459_v49 }
 0x104   : > { %1839 = vmatprep.mubr.f32.mxu0 %v461_v50 }
 0x106   : > { %1135 = vmatmul.mubr.f32.gmra.mrb[72].mxu1 %v458_v51 }
 0x107   : > { %1840 = vmatmul.mubr.f32.gmra.mrb[72].mxu0 %v460_v52  ;;  %1139 = vmatprep.mubr.f32.mxu1 %v463_v53 }
 0x108   : > { %1844 = vmatprep.mubr.f32.mxu0 %v465_v54 }
 0x10a   : > { %1140 = vmatmul.mubr.f32.gmra.mrb[74].mxu1 %v462_v55 }
 0x10b   : > { %1845 = vmatmul.mubr.f32.gmra.mrb[74].mxu0 %v464_v56  ;;  %1144 = vmatprep.mubr.f32.mxu1 %v467_v57 }
 0x10c   : > { %1849 = vmatprep.mubr.f32.mxu0 %v469_v58 }
 0x10e   : > { %1145 = vmatmul.mubr.f32.gmra.mrb[76].mxu1 %v466_v59 }
 0x10f   : > { %1850 = vmatmul.mubr.f32.gmra.mrb[76].mxu0 %v468_v60  ;;  %1149 = vmatprep.mubr.f32.mxu1 %v471_v61 }
 0x110   : > { %1854 = vmatprep.mubr.f32.mxu0 %v473_v62 }
 0x112   : > { %1150 = vmatmul.mubr.f32.gmra.mrb[78].mxu1 %v470_v63 }
 0x113   : > { %1855 = vmatmul.mubr.f32.gmra.mrb[78].mxu0 %v472_v1  ;;  %1154 = vmatprep.mubr.f32.mxu1 %v475_v2 }
 0x114   : > { %1859 = vmatprep.mubr.f32.mxu0 %v477_v3 }
 0x116   : > { %1155 = vmatmul.mubr.f32.gmra.mrb[80].mxu1 %v474_v4 }
 0x117   : > { %1860 = vmatmul.mubr.f32.gmra.mrb[80].mxu0 %v476_v5  ;;  %1159 = vmatprep.mubr.f32.mxu1 %v479_v6  ;;  %v503_v5 = vld [vmem:[%s7489_s14 + $0x5e8] sm:$0xff]  ;;  %v505_v6 = vld [vmem:[%s7489_s14 + $0x5f8] sm:$0xff] }
 0x118   : > { %1864 = vmatprep.mubr.f32.mxu0 %v481_v7 }
 0x11a   : > { %1160 = vmatmul.mubr.f32.gmra.mrb[82].mxu1 %v478_v8 }
 0x11b   : > { %1865 = vmatmul.mubr.f32.gmra.mrb[82].mxu0 %v480_v9  ;;  %1164 = vmatprep.mubr.f32.mxu1 %v483_v10  ;;  %v502_v9 = vld [vmem:[%s7489_s14 + $0x5e0] sm:$0xff]  ;;  %v504_v10 = vld [vmem:[%s7489_s14 + $0x5f0] sm:$0xff] }
 0x11c   : > { %1869 = vmatprep.mubr.f32.mxu0 %v485_v11 }
 0x11e   : > { %1165 = vmatmul.mubr.f32.gmra.mrb[84].mxu1 %v482_v12 }
 0x11f   : > { %1870 = vmatmul.mubr.f32.gmra.mrb[84].mxu0 %v484_v13  ;;  %1169 = vmatprep.mubr.f32.mxu1 %v487_v14 }
 0x120   : > { %1874 = vmatprep.mubr.f32.mxu0 %v489_v15 }
 0x122   : > { %1170 = vmatmul.mubr.f32.gmra.mrb[86].mxu1 %v486_v16 }
 0x123   : > { %1875 = vmatmul.mubr.f32.gmra.mrb[86].mxu0 %v488_v17  ;;  %1174 = vmatprep.mubr.f32.mxu1 %v491_v18 }
 0x124   : > { %1879 = vmatprep.mubr.f32.mxu0 %v493_v19 }
 0x126   : > { %1175 = vmatmul.mubr.f32.gmra.mrb[88].mxu1 %v490_v20 }
 0x127   : > { %1880 = vmatmul.mubr.f32.gmra.mrb[88].mxu0 %v492_v21  ;;  %1179 = vmatprep.mubr.f32.mxu1 %v495_v22 }
 0x128   : > { %1884 = vmatprep.mubr.f32.mxu0 %v497_v23 }
 0x12a   : > { %1180 = vmatmul.mubr.f32.gmra.mrb[90].mxu1 %v494_v24 }
 0x12b   : > { %1885 = vmatmul.mubr.f32.gmra.mrb[90].mxu0 %v496_v25  ;;  %1184 = vmatprep.mubr.f32.mxu1 %v499_v26 }
 0x12c   : > { %1889 = vmatprep.mubr.f32.mxu0 %v501_v27 }
 0x12e   : > { %1185 = vmatmul.mubr.f32.gmra.mrb[92].mxu1 %v498_v28 }
 0x12f   : > { %1890 = vmatmul.mubr.f32.gmra.mrb[92].mxu0 %v500_v29  ;;  %1189 = vmatprep.mubr.f32.mxu1 %v503_v5 }
 0x130   : > { %1894 = vmatprep.mubr.f32.mxu0 %v505_v6  ;;  %v507_v6 = vld [vmem:[%s7489_s14 + $0x608] sm:$0xff] }
 0x132   : > { %1190 = vmatmul.mubr.f32.gmra.mrb[94].mxu1 %v502_v9 }
 0x133   : > { %1895 = vmatmul.mubr.f32.gmra.mrb[94].mxu0 %v504_v10  ;;  %1194 = vmatprep.mubr.f32.mxu1 %v507_v6  ;;  %v506_v10 = vld [vmem:[%s7489_s14 + $0x600] sm:$0xff] }
 0x136   : > { %1195 = vmatmul.mubr.f32.gmra.mrb[96].mxu1 %v506_v10 }
 0x149   : > { %v956_v30 = vpop.f32.mrb[0].mxu1 }
 0x14a   : > { %v1661_v31 = vpop.f32.mrb[0].mxu0  ;;  %v958_v32 = vpop.f32.mrb[1].mxu1 }
 0x14b   : > { %v7907_v33 = vadd.f32 %v1661_v31, %v956_v30  ;;  %v1663_v34 = vpop.f32.mrb[1].mxu0 }
 0x14d   : > { %v2301_v35 = vsel %vm2300_vm0, %v7907_v33, 0.0  ;;  %v961_v36 = vpop.f32.mrb[2].mxu1  ;;  %v2813_v37 = vmul.f32 %v7907_v33, %v7907_v33 }
 0x14e   : > { %v1666_v38 = vpop.f32.mrb[2].mxu0  ;;  %2302 = vadd.xlane.f32.xlu0 %v2301_v35  ;;  %v963_v39 = vpop.f32.mrb[3].mxu1 }
 0x14f   : > { %v7913_v40 = vadd.f32 %v1666_v38, %v961_v36  ;;  %v1668_v41 = vpop.f32.mrb[3].mxu0  ;;  %v2941_v42 = vsel %vm2300_vm0, %v2813_v37, 0.0 }
 0x151   : > { %v966_v0 = vpop.f32.mrb[4].mxu1  ;;  %v2814_v43 = vmul.f32 %v7913_v40, %v7913_v40  ;;  %v2304_v49 = vsel %vm2300_vm0, %v7913_v40, 0.0 }
 0x152   : > { %2942 = vadd.xlane.f32.xlu0 %v2941_v42  ;;  %v1671_v44 = vpop.f32.mrb[4].mxu0  ;;  %v968_v45 = vpop.f32.mrb[5].mxu1 }
 0x153   : > { %v7918_v46 = vadd.f32 %v1671_v44, %v966_v0  ;;  %v1673_v47 = vpop.f32.mrb[5].mxu0  ;;  %v2944_v48 = vsel %vm2300_vm0, %v2814_v43, 0.0 }
 0x154   : > { %2945 = vadd.xlane.f32.xlu1 %v2944_v48 }
 0x155   : > { %v971_v50 = vpop.f32.mrb[6].mxu1  ;;  %v2307_v51 = vsel %vm2300_vm0, %v7918_v46, 0.0  ;;  %v2815_v52 = vmul.f32 %v7918_v46, %v7918_v46 }
 0x156   : > { %2305 = vadd.xlane.f32.xlu0 %v2304_v49  ;;  %v1676_v53 = vpop.f32.mrb[6].mxu0  ;;  %v973_v54 = vpop.f32.mrb[7].mxu1 }
 0x157   : > { %v7927_v55 = vadd.f32 %v1676_v53, %v971_v50  ;;  %v1678_v56 = vpop.f32.mrb[7].mxu0  ;;  %v2947_v57 = vsel %vm2300_vm0, %v2815_v52, 0.0 }
 0x158   : > { %2308 = vadd.xlane.f32.xlu1 %v2307_v51 }
 0x159   : > { %v976_v58 = vpop.f32.mrb[8].mxu1  ;;  %v2310_v59 = vsel %vm2300_vm0, %v7927_v55, 0.0  ;;  %v2816_v1 = vmul.f32 %v7927_v55, %v7927_v55 }
 0x15a   : > { %v1681_v60 = vpop.f32.mrb[8].mxu0  ;;  %2948 = vadd.xlane.f32.xlu0 %v2947_v57  ;;  %v978_v61 = vpop.f32.mrb[9].mxu1 }
 0x15b   : > { %v7932_v62 = vadd.f32 %v1681_v60, %v976_v58  ;;  %v1683_v63 = vpop.f32.mrb[9].mxu0  ;;  %v2950_v13 = vsel %vm2300_vm0, %v2816_v1, 0.0 }
 0x15c   : > { %2311 = vadd.xlane.f32.xlu1 %v2310_v59 }
 0x15d   : > { %v2313_v2 = vsel %vm2300_vm0, %v7932_v62, 0.0  ;;  %v981_v3 = vpop.f32.mrb[10].mxu1  ;;  %v2817_v4 = vmul.f32 %v7932_v62, %v7932_v62 }
 0x15e   : > { %2314 = vadd.xlane.f32.xlu0 %v2313_v2  ;;  %v1686_v7 = vpop.f32.mrb[10].mxu0  ;;  %v983_v8 = vpop.f32.mrb[11].mxu1 }
 0x15f   : > { %v7944_v11 = vadd.f32 %v1686_v7, %v981_v3  ;;  %v1688_v12 = vpop.f32.mrb[11].mxu0  ;;  %v2953_v14 = vsel %vm2300_vm0, %v2817_v4, 0.0  ;;  %v509_v7 = vld [vmem:[%s7489_s14 + $0x618] sm:$0xff] }
 0x160   : > { %2951 = vadd.xlane.f32.xlu1 %v2950_v13  ;;  %v508_v12 = vld [vmem:[%s7489_s14 + $0x610] sm:$0xff]  ;;  %1899 = vmatprep.mubr.f32.mxu0 %v509_v7 }
 0x161   : > { %v986_v15 = vpop.f32.mrb[12].mxu1  ;;  %v2316_v16 = vsel %vm2300_vm0, %v7944_v11, 0.0  ;;  %v2818_v21 = vmul.f32 %v7944_v11, %v7944_v11  ;;  %1900 = vmatmul.mubr.f32.gmra.mrb[96].mxu0 %v508_v12 }
 0x162   : > { %v1691_v17 = vpop.f32.mrb[12].mxu0  ;;  %2954 = vadd.xlane.f32.xlu0 %v2953_v14  ;;  %v988_v18 = vpop.f32.mrb[13].mxu1 }
 0x163   : > { %v7950_v19 = vadd.f32 %v1691_v17, %v986_v15  ;;  %v1693_v20 = vpop.f32.mrb[13].mxu0  ;;  %v2956_v29 = vsel %vm2300_vm0, %v2818_v21, 0.0 }
 0x164   : > { %2317 = vadd.xlane.f32.xlu1 %v2316_v16 }
 0x165   : > { %v2319_v22 = vsel %vm2300_vm0, %v7950_v19, 0.0  ;;  %v991_v23 = vpop.f32.mrb[14].mxu1  ;;  %v2819_v24 = vmul.f32 %v7950_v19, %v7950_v19 }
 0x166   : > { %2320 = vadd.xlane.f32.xlu0 %v2319_v22  ;;  %v1696_v25 = vpop.f32.mrb[14].mxu0  ;;  %v993_v26 = vpop.f32.mrb[15].mxu1 }
 0x167   : > { %v7958_v27 = vadd.f32 %v1696_v25, %v991_v23  ;;  %v1698_v28 = vpop.f32.mrb[15].mxu0  ;;  %v2959_v30 = vsel %vm2300_vm0, %v2819_v24, 0.0 }
 0x168   : > { %2957 = vadd.xlane.f32.xlu1 %v2956_v29 }
 0x169   : > { %v996_v31 = vpop.f32.mrb[16].mxu1  ;;  %v2322_v32 = vsel %vm2300_vm0, %v7958_v27, 0.0  ;;  %v2820_v38 = vmul.f32 %v7958_v27, %v7958_v27 }
 0x16a   : > { %v1701_v34 = vpop.f32.mrb[16].mxu0  ;;  %2960 = vadd.xlane.f32.xlu0 %v2959_v30  ;;  %v998_v35 = vpop.f32.mrb[17].mxu1 }
 0x16b   : > { %v7964_v36 = vadd.f32 %v1701_v34, %v996_v31  ;;  %v1703_v37 = vpop.f32.mrb[17].mxu0  ;;  %v2962_v47 = vsel %vm2300_vm0, %v2820_v38, 0.0 }
 0x16c   : > { %2323 = vadd.xlane.f32.xlu1 %v2322_v32 }
 0x16d   : > { %v2325_v39 = vsel %vm2300_vm0, %v7964_v36, 0.0  ;;  %v1001_v41 = vpop.f32.mrb[18].mxu1  ;;  %v2821_v42 = vmul.f32 %v7964_v36, %v7964_v36 }
 0x16e   : > { %2326 = vadd.xlane.f32.xlu0 %v2325_v39  ;;  %v1706_v0 = vpop.f32.mrb[18].mxu0  ;;  %v1003_v43 = vpop.f32.mrb[19].mxu1 }
 0x16f   : > { %v7972_v44 = vadd.f32 %v1706_v0, %v1001_v41  ;;  %v1708_v45 = vpop.f32.mrb[19].mxu0  ;;  %v2965_v48 = vsel %vm2300_vm0, %v2821_v42, 0.0 }
 0x170   : > { %2963 = vadd.xlane.f32.xlu1 %v2962_v47  ;;  %v7373_v47 = vmov 0  }
 0x171   : > { %v1006_v49 = vpop.f32.mrb[20].mxu1  ;;  %v2328_v50 = vsel %vm2300_vm0, %v7972_v44, 0.0  ;;  %v2822_v56 = vmul.f32 %v7972_v44, %v7972_v44  ;;  %7045 = vset.pattern.permute.xlu0 %v7373_v47  ;;  %7046 = vset.pattern.permute.xlu1 %v7373_v47 }
 0x172   : > { %v1711_v51 = vpop.f32.mrb[20].mxu0  ;;  %2966 = vadd.xlane.f32.xlu0 %v2965_v48  ;;  %v1008_v52 = vpop.f32.mrb[21].mxu1 }
 0x173   : > { %v7978_v53 = vadd.f32 %v1711_v51, %v1006_v49  ;;  %v1713_v54 = vpop.f32.mrb[21].mxu0  ;;  %v2968_v2 = vsel %vm2300_vm0, %v2822_v56, 0.0 }
 0x174   : > { %2329 = vadd.xlane.f32.xlu1 %v2328_v50 }
 0x175   : > { %v2331_v57 = vsel %vm2300_vm0, %v7978_v53, 0.0  ;;  %v1011_v58 = vpop.f32.mrb[22].mxu1  ;;  %v2823_v59 = vmul.f32 %v7978_v53, %v7978_v53 }
 0x176   : > { %2332 = vadd.xlane.f32.xlu0 %v2331_v57  ;;  %v1716_v60 = vpop.f32.mrb[22].mxu0  ;;  %v1013_v61 = vpop.f32.mrb[23].mxu1 }
 0x177   : > { %v7986_v63 = vadd.f32 %v1716_v60, %v1011_v58  ;;  %v1718_v1 = vpop.f32.mrb[23].mxu0  ;;  %v2971_v3 = vsel %vm2300_vm0, %v2823_v59, 0.0 }
 0x178   : > { %2969 = vadd.xlane.f32.xlu1 %v2968_v2 }
 0x179   : > { %v1016_v4 = vpop.f32.mrb[24].mxu1  ;;  %v2334_v5 = vsel %vm2300_vm0, %v7986_v63, 0.0  ;;  %v2824_v15 = vmul.f32 %v7986_v63, %v7986_v63 }
 0x17a   : > { %v1721_v8 = vpop.f32.mrb[24].mxu0  ;;  %2972 = vadd.xlane.f32.xlu0 %v2971_v3  ;;  %v1018_v9 = vpop.f32.mrb[25].mxu1 }
 0x17b   : > { %v7996_v13 = vadd.f32 %v1721_v8, %v1016_v4  ;;  %v1723_v14 = vpop.f32.mrb[25].mxu0  ;;  %v2974_v24 = vsel %vm2300_vm0, %v2824_v15, 0.0 }
 0x17c   : > { %2335 = vadd.xlane.f32.xlu1 %v2334_v5 }
 0x17d   : > { %12317 = vst [vmem:[#allocation5_spill] sm:$0xff] %v7996_v13  ;;  %v2337_v16 = vsel %vm2300_vm0, %v7996_v13, 0.0  ;;  %v1021_v17 = vpop.f32.mrb[26].mxu1  ;;  %v2825_v18 = vmul.f32 %v7996_v13, %v7996_v13 }
 0x17e   : > { %2338 = vadd.xlane.f32.xlu0 %v2337_v16  ;;  %v1726_v20 = vpop.f32.mrb[26].mxu0  ;;  %v1023_v21 = vpop.f32.mrb[27].mxu1 }
 0x17f   : > { %v8004_v22 = vadd.f32 %v1726_v20, %v1021_v17  ;;  %v1728_v23 = vpop.f32.mrb[27].mxu0  ;;  %v2977_v25 = vsel %vm2300_vm0, %v2825_v18, 0.0 }
 0x180   : > { %2975 = vadd.xlane.f32.xlu1 %v2974_v24 }
 0x181   : > { %12318 = vst [vmem:[#allocation6_spill] sm:$0xff] %v8004_v22  ;;  %v1026_v26 = vpop.f32.mrb[28].mxu1  ;;  %v2340_v28 = vsel %vm2300_vm0, %v8004_v22, 0.0  ;;  %v2826_v34 = vmul.f32 %v8004_v22, %v8004_v22 }
 0x182   : > { %v1731_v29 = vpop.f32.mrb[28].mxu0  ;;  %2978 = vadd.xlane.f32.xlu0 %v2977_v25  ;;  %v1028_v30 = vpop.f32.mrb[29].mxu1 }
 0x183   : > { %v8010_v31 = vadd.f32 %v1731_v29, %v1026_v26  ;;  %v1733_v32 = vpop.f32.mrb[29].mxu0  ;;  %v2980_v43 = vsel %vm2300_vm0, %v2826_v34, 0.0 }
 0x184   : > { %2341 = vadd.xlane.f32.xlu1 %v2340_v28 }
 0x185   : > { %12319 = vst [vmem:[#allocation7_spill] sm:$0xff] %v8010_v31  ;;  %v2343_v35 = vsel %vm2300_vm0, %v8010_v31, 0.0  ;;  %v1031_v37 = vpop.f32.mrb[30].mxu1  ;;  %v2827_v38 = vmul.f32 %v8010_v31, %v8010_v31 }
 0x186   : > { %2344 = vadd.xlane.f32.xlu0 %v2343_v35  ;;  %v1736_v39 = vpop.f32.mrb[30].mxu0  ;;  %v1033_v41 = vpop.f32.mrb[31].mxu1 }
 0x187   : > { %v8018_v42 = vadd.f32 %v1736_v39, %v1031_v37  ;;  %v1738_v0 = vpop.f32.mrb[31].mxu0  ;;  %v2983_v45 = vsel %vm2300_vm0, %v2827_v38, 0.0 }
 0x188   : > { %2981 = vadd.xlane.f32.xlu1 %v2980_v43  ;;  %v511_v0 = vld [vmem:[%s7489_s14 + $0x628] sm:$0xff]  ;;  %v513_v43 = vld [vmem:[%s7489_s14 + $0x638] sm:$0xff] }
 0x189   : > { %12320 = vst [vmem:[#allocation8_spill] sm:$0xff] %v8018_v42  ;;  %v1036_v48 = vpop.f32.mrb[32].mxu1  ;;  %v2346_v49 = vsel %vm2300_vm0, %v8018_v42, 0.0  ;;  %v2828_v56 = vmul.f32 %v8018_v42, %v8018_v42  ;;  %1199 = vmatprep.mubr.f32.mxu1 %v511_v0  ;;  %1904 = vmatprep.mubr.f32.mxu0 %v513_v43 }
 0x18a   : > { %v1741_v50 = vpop.f32.mrb[32].mxu0  ;;  %2984 = vadd.xlane.f32.xlu0 %v2983_v45  ;;  %v1038_v51 = vpop.f32.mrb[33].mxu1 }
 0x18b   : > { %v8024_v52 = vadd.f32 %v1741_v50, %v1036_v48  ;;  %v1743_v54 = vpop.f32.mrb[33].mxu0  ;;  %v2986_v3 = vsel %vm2300_vm0, %v2828_v56, 0.0  ;;  %v510_v50 = vld [vmem:[%s7489_s14 + $0x620] sm:$0xff]  ;;  %v512_v51 = vld [vmem:[%s7489_s14 + $0x630] sm:$0xff] }
 0x18c   : > { %2347 = vadd.xlane.f32.xlu1 %v2346_v49  ;;  %1200 = vmatmul.mubr.f32.gmra.mrb[98].mxu1 %v510_v50 }
 0x18d   : > { %12321 = vst [vmem:[#allocation9_spill] sm:$0xff] %v8024_v52  ;;  %v2349_v57 = vsel %vm2300_vm0, %v8024_v52, 0.0  ;;  %v1041_v58 = vpop.f32.mrb[34].mxu1  ;;  %v2829_v59 = vmul.f32 %v8024_v52, %v8024_v52  ;;  %1905 = vmatmul.mubr.f32.gmra.mrb[98].mxu0 %v512_v51 }
 0x18e   : > { %2350 = vadd.xlane.f32.xlu0 %v2349_v57  ;;  %v1746_v60 = vpop.f32.mrb[34].mxu0  ;;  %v1043_v61 = vpop.f32.mrb[35].mxu1 }
 0x18f   : > { %v8032_v1 = vadd.f32 %v1746_v60, %v1041_v58  ;;  %v1748_v2 = vpop.f32.mrb[35].mxu0  ;;  %v2989_v4 = vsel %vm2300_vm0, %v2829_v59, 0.0 }
 0x190   : > { %2987 = vadd.xlane.f32.xlu1 %v2986_v3 }
 0x191   : > { %12322 = vst [vmem:[#allocation10_spill] sm:$0xff] %v8032_v1  ;;  %v1046_v5 = vpop.f32.mrb[36].mxu1  ;;  %v2352_v6 = vsel %vm2300_vm0, %v8032_v1, 0.0  ;;  %v2830_v12 = vmul.f32 %v8032_v1, %v8032_v1 }
 0x192   : > { %v1751_v7 = vpop.f32.mrb[36].mxu0  ;;  %2990 = vadd.xlane.f32.xlu0 %v2989_v4  ;;  %v1048_v8 = vpop.f32.mrb[37].mxu1 }
 0x193   : > { %v8038_v9 = vadd.f32 %v1751_v7, %v1046_v5  ;;  %v1753_v10 = vpop.f32.mrb[37].mxu0  ;;  %v2992_v23 = vsel %vm2300_vm0, %v2830_v12, 0.0 }
 0x194   : > { %2353 = vadd.xlane.f32.xlu1 %v2352_v6 }
 0x195   : > { %12323 = vst [vmem:[#allocation11_spill] sm:$0xff] %v8038_v9  ;;  %v2355_v14 = vsel %vm2300_vm0, %v8038_v9, 0.0  ;;  %v1051_v15 = vpop.f32.mrb[38].mxu1  ;;  %v2831_v16 = vmul.f32 %v8038_v9, %v8038_v9 }
 0x196   : > { %2356 = vadd.xlane.f32.xlu0 %v2355_v14  ;;  %v1756_v17 = vpop.f32.mrb[38].mxu0  ;;  %v1053_v18 = vpop.f32.mrb[39].mxu1 }
 0x197   : > { %v8046_v20 = vadd.f32 %v1756_v17, %v1051_v15  ;;  %v1758_v21 = vpop.f32.mrb[39].mxu0  ;;  %v2995_v24 = vsel %vm2300_vm0, %v2831_v16, 0.0 }
 0x198   : > { %2993 = vadd.xlane.f32.xlu1 %v2992_v23 }
 0x199   : > { %12324 = vst [vmem:[#allocation12_spill] sm:$0xff] %v8046_v20  ;;  %v1056_v25 = vpop.f32.mrb[40].mxu1  ;;  %v2358_v26 = vsel %vm2300_vm0, %v8046_v20, 0.0  ;;  %v2832_v34 = vmul.f32 %v8046_v20, %v8046_v20  ;;  %v530_v20 = vld [vmem:[%s7489_s14 + $0x6c0] sm:$0xff] }
 0x19a   : > { %v1761_v28 = vpop.f32.mrb[40].mxu0  ;;  %2996 = vadd.xlane.f32.xlu0 %v2995_v24  ;;  %v1058_v29 = vpop.f32.mrb[41].mxu1 }
 0x19b   : > { %v8052_v30 = vadd.f32 %v1761_v28, %v1056_v25  ;;  %v1763_v32 = vpop.f32.mrb[41].mxu0  ;;  %v2998_v48 = vsel %vm2300_vm0, %v2832_v34, 0.0 }
 0x19c   : > { %2359 = vadd.xlane.f32.xlu1 %v2358_v26 }
 0x19d   : > { %12325 = vst [vmem:[#allocation13_spill] sm:$0xff] %v8052_v30  ;;  %v2361_v35 = vsel %vm2300_vm0, %v8052_v30, 0.0  ;;  %v1061_v37 = vpop.f32.mrb[42].mxu1  ;;  %v2833_v38 = vmul.f32 %v8052_v30, %v8052_v30 }
 0x19e   : > { %2362 = vadd.xlane.f32.xlu0 %v2361_v35  ;;  %v1766_v39 = vpop.f32.mrb[42].mxu0  ;;  %v1063_v41 = vpop.f32.mrb[43].mxu1 }
 0x19f   : > { %v8062_v45 = vadd.f32 %v1766_v39, %v1061_v37  ;;  %v1768_v47 = vpop.f32.mrb[43].mxu0  ;;  %v3001_v49 = vsel %vm2300_vm0, %v2833_v38, 0.0 }
 0x1a0   : > { %2999 = vadd.xlane.f32.xlu1 %v2998_v48 }
 0x1a1   : > { %12326 = vst [vmem:[#allocation14_spill] sm:$0xff] %v8062_v45  ;;  %v1066_v54 = vpop.f32.mrb[44].mxu1  ;;  %v2364_v56 = vsel %vm2300_vm0, %v8062_v45, 0.0  ;;  %v2834_v61 = vmul.f32 %v8062_v45, %v8062_v45 }
 0x1a2   : > { %v1771_v57 = vpop.f32.mrb[44].mxu0  ;;  %3002 = vadd.xlane.f32.xlu0 %v3001_v49  ;;  %v1068_v58 = vpop.f32.mrb[45].mxu1 }
 0x1a3   : > { %v8070_v59 = vadd.f32 %v1771_v57, %v1066_v54  ;;  %v1773_v60 = vpop.f32.mrb[45].mxu0  ;;  %v3004_v10 = vsel %vm2300_vm0, %v2834_v61, 0.0  ;;  %v515_v57 = vld [vmem:[%s7489_s14 + $0x648] sm:$0xff]  ;;  %v517_v58 = vld [vmem:[%s7489_s14 + $0x658] sm:$0xff] }
 0x1a4   : > { %2365 = vadd.xlane.f32.xlu1 %v2364_v56  ;;  %1204 = vmatprep.mubr.f32.mxu1 %v515_v57 }
 0x1a5   : > { %12327 = vst [vmem:[#allocation15_spill] sm:$0xff] %v8070_v59  ;;  %v2367_v2 = vsel %vm2300_vm0, %v8070_v59, 0.0  ;;  %v1071_v3 = vpop.f32.mrb[46].mxu1  ;;  %v2835_v4 = vmul.f32 %v8070_v59, %v8070_v59  ;;  %1909 = vmatprep.mubr.f32.mxu0 %v517_v58  ;;  %v528_v59 = vld [vmem:[%s7489_s14 + $0x6b0] sm:$0xff] }
 0x1a6   : > { %2368 = vadd.xlane.f32.xlu0 %v2367_v2  ;;  %v1776_v5 = vpop.f32.mrb[46].mxu0  ;;  %v1073_v6 = vpop.f32.mrb[47].mxu1 }
 0x1a7   : > { %v8078_v7 = vadd.f32 %v1776_v5, %v1071_v3  ;;  %v1778_v8 = vpop.f32.mrb[47].mxu0  ;;  %v3007_v12 = vsel %vm2300_vm0, %v2835_v4, 0.0  ;;  %v514_v4 = vld [vmem:[%s7489_s14 + $0x640] sm:$0xff]  ;;  %v516_v5 = vld [vmem:[%s7489_s14 + $0x650] sm:$0xff] }
 0x1a8   : > { %3005 = vadd.xlane.f32.xlu1 %v3004_v10  ;;  %1205 = vmatmul.mubr.f32.gmra.mrb[100].mxu1 %v514_v4 }
 0x1a9   : > { %12328 = vst [vmem:[#allocation16_spill] sm:$0xff] %v8078_v7  ;;  %v1076_v14 = vpop.f32.mrb[48].mxu1  ;;  %v2370_v15 = vsel %vm2300_vm0, %v8078_v7, 0.0  ;;  %v2836_v23 = vmul.f32 %v8078_v7, %v8078_v7  ;;  %1910 = vmatmul.mubr.f32.gmra.mrb[100].mxu0 %v516_v5  ;;  %v526_v7 = vld [vmem:[%s7489_s14 + $0x6a0] sm:$0xff] }
 0x1aa   : > { %v1781_v16 = vpop.f32.mrb[48].mxu0  ;;  %3008 = vadd.xlane.f32.xlu0 %v3007_v12  ;;  %v1078_v17 = vpop.f32.mrb[49].mxu1 }
 0x1ab   : > { %v8084_v18 = vadd.f32 %v1781_v16, %v1076_v14  ;;  %v1783_v21 = vpop.f32.mrb[49].mxu0  ;;  %v3010_v35 = vsel %vm2300_vm0, %v2836_v23, 0.0 }
 0x1ac   : > { %2371 = vadd.xlane.f32.xlu1 %v2370_v15 }
 0x1ad   : > { %12329 = vst [vmem:[#allocation17_spill] sm:$0xff] %v8084_v18  ;;  %v2373_v24 = vsel %vm2300_vm0, %v8084_v18, 0.0  ;;  %v1081_v25 = vpop.f32.mrb[50].mxu1  ;;  %v2837_v26 = vmul.f32 %v8084_v18, %v8084_v18 }
 0x1ae   : > { %2374 = vadd.xlane.f32.xlu0 %v2373_v24  ;;  %v1786_v28 = vpop.f32.mrb[50].mxu0  ;;  %v1083_v29 = vpop.f32.mrb[51].mxu1 }
 0x1af   : > { %v8092_v32 = vadd.f32 %v1786_v28, %v1081_v25  ;;  %v1788_v34 = vpop.f32.mrb[51].mxu0  ;;  %v3013_v37 = vsel %vm2300_vm0, %v2837_v26, 0.0 }
 0x1b0   : > { %3011 = vadd.xlane.f32.xlu1 %v3010_v35 }
 0x1b1   : > { %12330 = vst [vmem:[#allocation18_spill] sm:$0xff] %v8092_v32  ;;  %v1086_v38 = vpop.f32.mrb[52].mxu1  ;;  %v2376_v39 = vsel %vm2300_vm0, %v8092_v32, 0.0  ;;  %v2838_v48 = vmul.f32 %v8092_v32, %v8092_v32 }
 0x1b2   : > { %v1791_v41 = vpop.f32.mrb[52].mxu0  ;;  %3014 = vadd.xlane.f32.xlu0 %v3013_v37  ;;  %v1088_v0 = vpop.f32.mrb[53].mxu1 }
 0x1b3   : > { %v8098_v43 = vadd.f32 %v1791_v41, %v1086_v38  ;;  %v1793_v47 = vpop.f32.mrb[53].mxu0  ;;  %v3016_v2 = vsel %vm2300_vm0, %v2838_v48, 0.0 }
 0x1b4   : > { %2377 = vadd.xlane.f32.xlu1 %v2376_v39 }
 0x1b5   : > { %12331 = vst [vmem:[#allocation19_spill] sm:$0xff] %v8098_v43  ;;  %v2379_v49 = vsel %vm2300_vm0, %v8098_v43, 0.0  ;;  %v1091_v50 = vpop.f32.mrb[54].mxu1  ;;  %v2839_v51 = vmul.f32 %v8098_v43, %v8098_v43 }
 0x1b6   : > { %2380 = vadd.xlane.f32.xlu0 %v2379_v49  ;;  %v1796_v54 = vpop.f32.mrb[54].mxu0  ;;  %v1093_v56 = vpop.f32.mrb[55].mxu1 }
 0x1b7   : > { %v8108_v60 = vadd.f32 %v1796_v54, %v1091_v50  ;;  %v1798_v61 = vpop.f32.mrb[55].mxu0  ;;  %v3019_v3 = vsel %vm2300_vm0, %v2839_v51, 0.0 }
 0x1b8   : > { %3017 = vadd.xlane.f32.xlu1 %v3016_v2 }
 0x1b9   : > { %12332 = vst [vmem:[#allocation20_spill] sm:$0xff] %v8108_v60  ;;  %v1096_v6 = vpop.f32.mrb[56].mxu1  ;;  %v2382_v8 = vsel %vm2300_vm0, %v8108_v60, 0.0  ;;  %v2840_v16 = vmul.f32 %v8108_v60, %v8108_v60  ;;  %v529_v60 = vld [vmem:[%s7489_s14 + $0x6b8] sm:$0xff] }
 0x1ba   : > { %v1801_v10 = vpop.f32.mrb[56].mxu0  ;;  %3020 = vadd.xlane.f32.xlu0 %v3019_v3  ;;  %v1098_v12 = vpop.f32.mrb[57].mxu1 }
 0x1bb   : > { %v8116_v14 = vadd.f32 %v1801_v10, %v1096_v6  ;;  %v1803_v15 = vpop.f32.mrb[57].mxu0  ;;  %v3022_v29 = vsel %vm2300_vm0, %v2840_v16, 0.0 }
 0x1bc   : > { %2383 = vadd.xlane.f32.xlu1 %v2382_v8 }
 0x1bd   : > { %12333 = vst [vmem:[#allocation21_spill] sm:$0xff] %v8116_v14  ;;  %v2385_v17 = vsel %vm2300_vm0, %v8116_v14, 0.0  ;;  %v1101_v21 = vpop.f32.mrb[58].mxu1  ;;  %v2841_v23 = vmul.f32 %v8116_v14, %v8116_v14  ;;  %v527_v14 = vld [vmem:[%s7489_s14 + $0x6a8] sm:$0xff] }
 0x1be   : > { %2386 = vadd.xlane.f32.xlu0 %v2385_v17  ;;  %v1806_v24 = vpop.f32.mrb[58].mxu0  ;;  %v1103_v25 = vpop.f32.mrb[59].mxu1 }
 0x1bf   : > { %v8124_v26 = vadd.f32 %v1806_v24, %v1101_v21  ;;  %v1808_v28 = vpop.f32.mrb[59].mxu0  ;;  %v3025_v34 = vsel %vm2300_vm0, %v2841_v23, 0.0 }
 0x1c0   : > { %3023 = vadd.xlane.f32.xlu1 %v3022_v29 }
 0x1c1   : > { %12334 = vst [vmem:[#allocation22_spill] sm:$0xff] %v8124_v26  ;;  %v1106_v35 = vpop.f32.mrb[60].mxu1  ;;  %v2388_v37 = vsel %vm2300_vm0, %v8124_v26, 0.0  ;;  %v2842_v47 = vmul.f32 %v8124_v26, %v8124_v26 }
 0x1c2   : > { %v1811_v38 = vpop.f32.mrb[60].mxu0  ;;  %3026 = vadd.xlane.f32.xlu0 %v3025_v34  ;;  %v1108_v39 = vpop.f32.mrb[61].mxu1 }
 0x1c3   : > { %v8130_v41 = vadd.f32 %v1811_v38, %v1106_v35  ;;  %v1813_v0 = vpop.f32.mrb[61].mxu0  ;;  %v3028_v58 = vsel %vm2300_vm0, %v2842_v47, 0.0 }
 0x1c4   : > { %2389 = vadd.xlane.f32.xlu1 %v2388_v37 }
 0x1c5   : > { %12335 = vst [vmem:[#allocation23_spill] sm:$0xff] %v8130_v41  ;;  %v2391_v48 = vsel %vm2300_vm0, %v8130_v41, 0.0  ;;  %v1111_v49 = vpop.f32.mrb[62].mxu1  ;;  %v2843_v50 = vmul.f32 %v8130_v41, %v8130_v41  ;;  %v3711_v41 = vld [vmem:[%s8280_s15 + $0x10] sm:$0xff] }
 0x1c6   : > { %2392 = vadd.xlane.f32.xlu0 %v2391_v48  ;;  %v1816_v51 = vpop.f32.mrb[62].mxu0  ;;  %v1113_v54 = vpop.f32.mrb[63].mxu1 }
 0x1c7   : > { %v8138_v56 = vadd.f32 %v1816_v51, %v1111_v49  ;;  %v1818_v57 = vpop.f32.mrb[63].mxu0  ;;  %v3031_v61 = vsel %vm2300_vm0, %v2843_v50, 0.0 }
 0x1c8   : > { %3029 = vadd.xlane.f32.xlu1 %v3028_v58 }
 0x1c9   : > { %12336 = vst [vmem:[#allocation24_spill] sm:$0xff] %v8138_v56  ;;  %v1116_v2 = vpop.f32.mrb[64].mxu1  ;;  %v2394_v3 = vsel %vm2300_vm0, %v8138_v56, 0.0  ;;  %v2844_v10 = vmul.f32 %v8138_v56, %v8138_v56 }
 0x1ca   : > { %v1821_v4 = vpop.f32.mrb[64].mxu0  ;;  %3032 = vadd.xlane.f32.xlu0 %v3031_v61  ;;  %v1118_v5 = vpop.f32.mrb[65].mxu1 }
 0x1cb   : > { %v8144_v6 = vadd.f32 %v1821_v4, %v1116_v2  ;;  %v1823_v8 = vpop.f32.mrb[65].mxu0  ;;  %v3034_v25 = vsel %vm2300_vm0, %v2844_v10, 0.0 }
 0x1cc   : > { %2395 = vadd.xlane.f32.xlu1 %v2394_v3 }
 0x1cd   : > { %12337 = vst [vmem:[#allocation25_spill] sm:$0xff] %v8144_v6  ;;  %v2397_v12 = vsel %vm2300_vm0, %v8144_v6, 0.0  ;;  %v1121_v15 = vpop.f32.mrb[66].mxu1  ;;  %v2845_v16 = vmul.f32 %v8144_v6, %v8144_v6  ;;  %v3710_v6 = vld [vmem:[%s8280_s15 + $0x8] sm:$0xff] }
 0x1ce   : > { %2398 = vadd.xlane.f32.xlu0 %v2397_v12  ;;  %v1826_v17 = vpop.f32.mrb[66].mxu0  ;;  %v1123_v21 = vpop.f32.mrb[67].mxu1 }
 0x1cf   : > { %v8152_v23 = vadd.f32 %v1826_v17, %v1121_v15  ;;  %v1828_v24 = vpop.f32.mrb[67].mxu0  ;;  %v3037_v28 = vsel %vm2300_vm0, %v2845_v16, 0.0  ;;  %v519_v16 = vld [vmem:[%s7489_s14 + $0x668] sm:$0xff]  ;;  %v521_v17 = vld [vmem:[%s7489_s14 + $0x678] sm:$0xff]  ;;  %v518_v21 = vld [vmem:[%s7489_s14 + $0x660] sm:$0xff] }
 0x1d0   : > { %3035 = vadd.xlane.f32.xlu1 %v3034_v25  ;;  %1209 = vmatprep.mubr.f32.mxu1 %v519_v16  ;;  %v520_v24 = vld [vmem:[%s7489_s14 + $0x670] sm:$0xff] }
 0x1d1   : > { %12338 = vst [vmem:[#allocation26_spill] sm:$0xff] %v8152_v23  ;;  %v1126_v29 = vpop.f32.mrb[68].mxu1  ;;  %v2400_v34 = vsel %vm2300_vm0, %v8152_v23, 0.0  ;;  %v2846_v0 = vmul.f32 %v8152_v23, %v8152_v23  ;;  %1914 = vmatprep.mubr.f32.mxu0 %v521_v17  ;;  %1210 = vmatmul.mubr.f32.gmra.mrb[102].mxu1 %v518_v21 }
 0x1d2   : > { %v1831_v35 = vpop.f32.mrb[68].mxu0  ;;  %3038 = vadd.xlane.f32.xlu0 %v3037_v28  ;;  %v1128_v37 = vpop.f32.mrb[69].mxu1  ;;  %1915 = vmatmul.mubr.f32.gmra.mrb[102].mxu0 %v520_v24 }
 0x1d3   : > { %v8158_v38 = vadd.f32 %v1831_v35, %v1126_v29  ;;  %v1833_v39 = vpop.f32.mrb[69].mxu0  ;;  %v3040_v58 = vsel %vm2300_vm0, %v2846_v0, 0.0 }
 0x1d4   : > { %2401 = vadd.xlane.f32.xlu1 %v2400_v34 }
 0x1d5   : > { %12339 = vst [vmem:[#allocation27_spill] sm:$0xff] %v8158_v38  ;;  %v2403_v47 = vsel %vm2300_vm0, %v8158_v38, 0.0  ;;  %v1131_v48 = vpop.f32.mrb[70].mxu1  ;;  %v2847_v49 = vmul.f32 %v8158_v38, %v8158_v38 }
 0x1d6   : > { %2404 = vadd.xlane.f32.xlu0 %v2403_v47  ;;  %v1836_v50 = vpop.f32.mrb[70].mxu0  ;;  %v1133_v51 = vpop.f32.mrb[71].mxu1 }
 0x1d7   : > { %v8166_v54 = vadd.f32 %v1836_v50, %v1131_v48  ;;  %v1838_v57 = vpop.f32.mrb[71].mxu0  ;;  %v3043_v61 = vsel %vm2300_vm0, %v2847_v49, 0.0 }
 0x1d8   : > { %3041 = vadd.xlane.f32.xlu1 %v3040_v58 }
 0x1d9   : > { %12340 = vst [vmem:[#allocation28_spill] sm:$0xff] %v8166_v54  ;;  %v1136_v2 = vpop.f32.mrb[72].mxu1  ;;  %v2406_v3 = vsel %vm2300_vm0, %v8166_v54, 0.0  ;;  %v2848_v15 = vmul.f32 %v8166_v54, %v8166_v54 }
 0x1da   : > { %v1841_v4 = vpop.f32.mrb[72].mxu0  ;;  %3044 = vadd.xlane.f32.xlu0 %v3043_v61  ;;  %v1138_v5 = vpop.f32.mrb[73].mxu1 }
 0x1db   : > { %v8172_v8 = vadd.f32 %v1841_v4, %v1136_v2  ;;  %v2303_v10 = vpop.xlane.xlu0 %2302  ;;  %v1843_v12 = vpop.f32.mrb[73].mxu0  ;;  %v3046_v47 = vsel %vm2300_vm0, %v2848_v15, 0.0 }
 0x1dc   : > { %2407 = vadd.xlane.f32.xlu1 %v2406_v3 }
 0x1dd   : > { %12341 = vst [vmem:[#allocation29_spill] sm:$0xff] %v8172_v8  ;;  %v2409_v25 = vsel %vm2300_vm0, %v8172_v8, 0.0  ;;  %v1141_v28 = vpop.f32.mrb[74].mxu1  ;;  %v2849_v29 = vmul.f32 %v8172_v8, %v8172_v8  ;;  %v524_v8 = vld [vmem:[%s7489_s14 + $0x690] sm:$0xff] }
 0x1de   : > { %2410 = vadd.xlane.f32.xlu0 %v2409_v25  ;;  %v1846_v34 = vpop.f32.mrb[74].mxu0  ;;  %v1143_v35 = vpop.f32.mrb[75].mxu1 }
 0x1df   : > { %v2943_v37 = vpop.xlane.xlu0 %2942  ;;  %v8184_v39 = vadd.f32 %v1846_v34, %v1141_v28  ;;  %v1848_v0 = vpop.f32.mrb[75].mxu0  ;;  %v3049_v48 = vsel %vm2300_vm0, %v2849_v29, 0.0  ;;  %v8204_v35 = vmul.f32 0.020408163, %v2303_v10 }
 0x1e0   : > { %3047 = vadd.xlane.f32.xlu1 %v3046_v47 }
 0x1e1   : > { %12342 = vst [vmem:[#allocation30_spill] sm:$0xff] %v8184_v39  ;;  %v2946_v49 = vpop.xlane.xlu1 %2945  ;;  %v1146_v50 = vpop.f32.mrb[76].mxu1  ;;  %v2412_v51 = vsel %vm2300_vm0, %v8184_v39, 0.0  ;;  %v2850_v4 = vmul.f32 %v8184_v39, %v8184_v39  ;;  %v525_v39 = vld [vmem:[%s7489_s14 + $0x698] sm:$0xff] }
 0x1e2   : > { %v1851_v57 = vpop.f32.mrb[76].mxu0  ;;  %3050 = vadd.xlane.f32.xlu0 %v3049_v48  ;;  %v1148_v58 = vpop.f32.mrb[77].mxu1  ;;  %1919 = vmatprep.mubr.f32.mxu0 %v525_v39 }
 0x1e3   : > { %v8190_v61 = vadd.f32 %v1851_v57, %v1146_v50  ;;  %v2306_v2 = vpop.xlane.xlu0 %2305  ;;  %v1853_v3 = vpop.f32.mrb[77].mxu0  ;;  %v3052_v29 = vsel %vm2300_vm0, %v2850_v4, 0.0  ;;  %v3325_v50 = vmul.f32 0.020408163, %v2943_v37  ;;  %1920 = vmatmul.mubr.f32.gmra.mrb[104].mxu0 %v524_v8 }
 0x1e4   : > { %2413 = vadd.xlane.f32.xlu1 %v2412_v51  ;;  %v8210_v51 = vmul.f32 0.020408163, %v2306_v2  ;;  %1924 = vmatprep.mubr.f32.mxu0 %v529_v60  ;;  %v533_v60 = vld [vmem:[%s7489_s14 + $0x6d8] sm:$0xff] }
 0x1e5   : > { %12343 = vst [vmem:[#allocation31_spill] sm:$0xff] %v8190_v61  ;;  %v2309_v5 = vpop.xlane.xlu1 %2308  ;;  %v2415_v12 = vsel %vm2300_vm0, %v8190_v61, 0.0  ;;  %v1151_v15 = vpop.f32.mrb[78].mxu1  ;;  %v2851_v16 = vmul.f32 %v8190_v61, %v8190_v61  ;;  %v523_v61 = vld [vmem:[%s7489_s14 + $0x688] sm:$0xff] }
 0x1e6   : > { %2416 = vadd.xlane.f32.xlu0 %v2415_v12  ;;  %v1856_v17 = vpop.f32.mrb[78].mxu0  ;;  %v1153_v21 = vpop.f32.mrb[79].mxu1  ;;  %1214 = vmatprep.mubr.f32.mxu1 %v523_v61 }
 0x1e7   : > { %v8198_v24 = vpop.xlane.xlu0 %2948  ;;  %v8200_v25 = vadd.f32 %v1856_v17, %v1151_v15  ;;  %v1858_v28 = vpop.f32.mrb[79].mxu0  ;;  %v3055_v34 = vsel %vm2300_vm0, %v2851_v16, 0.0  ;;  %v3453_v15 = vmul.f32 %v8204_v35, %v8204_v35  ;;  %1925 = vmatmul.mubr.f32.gmra.mrb[106].mxu0 %v528_v59 }
 0x1e8   : > { %3053 = vadd.xlane.f32.xlu1 %v3052_v29  ;;  %v3454_v28 = vmul.f32 %v8210_v51, %v8210_v51  ;;  %1929 = vmatprep.mubr.f32.mxu0 %v533_v60 }
 0x1e9   : > { %12344 = vst [vmem:[#allocation32_spill] sm:$0xff] %v8200_v25  ;;  %v8206_v0 = vpop.xlane.xlu1 %2311  ;;  %v1156_v47 = vpop.f32.mrb[80].mxu1  ;;  %v2418_v48 = vsel %vm2300_vm0, %v8200_v25, 0.0  ;;  %v2852_v12 = vmul.f32 %v8200_v25, %v8200_v25  ;;  %v3581_v21 = vsub.f32 %v3325_v50, %v3453_v15  ;;  %v3326_v50 = vmul.f32 0.020408163, %v2946_v49 }
 0x1ea   : > { %v1861_v57 = vpop.f32.mrb[80].mxu0  ;;  %3056 = vadd.xlane.f32.xlu0 %v3055_v34  ;;  %v1158_v58 = vpop.f32.mrb[81].mxu1 }
 0x1eb   : > { %v8212_v3 = vadd.f32 %v1861_v57, %v1156_v47  ;;  %v8214_v4 = vpop.xlane.xlu0 %2314  ;;  %v1863_v10 = vpop.f32.mrb[81].mxu0  ;;  %v3058_v58 = vsel %vm2300_vm0, %v2852_v12, 0.0  ;;  %v8243_v12 = vmul.f32 0.020408163, %v2309_v5 }
 0x1ec   : > { %2419 = vadd.xlane.f32.xlu1 %v2418_v48 }
 0x1ed   : > { %12345 = vst [vmem:[#allocation33_spill] sm:$0xff] %v8212_v3  ;;  %v8220_v16 = vpop.xlane.xlu1 %2951  ;;  %v2421_v37 = vsel %vm2300_vm0, %v8212_v3, 0.0  ;;  %v1161_v2 = vpop.f32.mrb[82].mxu1  ;;  %v2853_v17 = vmul.f32 %v8212_v3, %v8212_v3 }
 0x1ee   : > { %2422 = vadd.xlane.f32.xlu0 %v2421_v37  ;;  %v1866_v29 = vpop.f32.mrb[82].mxu0  ;;  %v1163_v34 = vpop.f32.mrb[83].mxu1  ;;  %v3328_v42 = vmul.f32 0.020408163, %v8220_v16 }
 0x1ef   : > { %v8232_v47 = vpop.xlane.xlu0 %2954  ;;  %v8234_v48 = vadd.f32 %v1866_v29, %v1161_v2  ;;  %v1868_v57 = vpop.f32.mrb[83].mxu0  ;;  %v3061_v10 = vsel %vm2300_vm0, %v2853_v17, 0.0  ;;  %v3837_v2 = vadd.f32 1e-05, %v3581_v21  ;;  %v3582_v29 = vsub.f32 %v3326_v50, %v3454_v28  ;;  %v522_v21 = vld [vmem:[%s7489_s14 + $0x680] sm:$0xff] }
 0x1f0   : > { %3059 = vadd.xlane.f32.xlu1 %v3058_v58  ;;  %1215 = vmatmul.mubr.f32.gmra.mrb[104].mxu1 %v522_v21  ;;  %v3455_v50 = vmul.f32 %v8243_v12, %v8243_v12 }
 0x1f1   : > { %12346 = vst [vmem:[#allocation34_spill] sm:$0xff] %v8234_v48  ;;  %v8239_v15 = vpop.xlane.xlu1 %2317  ;;  %v2424_v37 = vsel %vm2300_vm0, %v8234_v48, 0.0  ;;  %v1166_v34 = vpop.f32.mrb[84].mxu1  ;;  %v2854_v58 = vmul.f32 %v8234_v48, %v8234_v48  ;;  %7047 = vrsqrt.f32 %v3837_v2  ;;  %1219 = vmatprep.mubr.f32.mxu1 %v527_v14  ;;  %v531_v14 = vld [vmem:[%s7489_s14 + $0x6c8] sm:$0xff] }
 0x1f2   : > { %3062 = vadd.xlane.f32.xlu0 %v3061_v10  ;;  %v1871_v49 = vpop.f32.mrb[84].mxu0  ;;  %v1168_v17 = vpop.f32.mrb[85].mxu1  ;;  %v3838_v10 = vadd.f32 1e-05, %v3582_v29 }
 0x1f3   : > { %v8245_v57 = vpop.xlane.xlu0 %2320  ;;  %v8249_v3 = vadd.f32 %v1871_v49, %v1166_v34  ;;  %v1873_v25 = vpop.f32.mrb[85].mxu0 }
 0x1f4   : > { %2425 = vadd.xlane.f32.xlu1 %v2424_v37  ;;  %v3327_v25 = vmul.f32 0.020408163, %v8198_v24  ;;  %v3064_v37 = vsel %vm2300_vm0, %v2854_v58, 0.0  ;;  %7049 = vrsqrt.f32 %v3838_v10  ;;  %1220 = vmatmul.mubr.f32.gmra.mrb[106].mxu1 %v526_v7 }
 0x1f5   : > { %12347 = vst [vmem:[#allocation35_spill] sm:$0xff] %v8249_v3  ;;  %v8258_v5 = vpop.xlane.xlu1 %2957  ;;  %v1171_v28 = vpop.f32.mrb[86].mxu1  ;;  %1224 = vmatprep.mubr.f32.mxu1 %v531_v14  ;;  %v2427_v59 = vsel %vm2300_vm0, %v8249_v3, 0.0  ;;  %v2855_v7 = vmul.f32 %v8249_v3, %v8249_v3 }
 0x1f6   : > { %v1876_v34 = vpop.f32.mrb[86].mxu0  ;;  %v1173_v49 = vpop.f32.mrb[87].mxu1  ;;  %v3583_v29 = vsub.f32 %v3327_v25, %v3455_v50 }
 0x1f7   : > { %v8263_v61 = vpop.xlane.xlu0 %2960  ;;  %v8266_v17 = vadd.f32 %v1876_v34, %v1171_v28  ;;  %v1878_v48 = vpop.f32.mrb[87].mxu0  ;;  %v3067_v14 = vsel %vm2300_vm0, %v2855_v7, 0.0 }
 0x1f8   : > { %3065 = vadd.xlane.f32.xlu1 %v3064_v37  ;;  %v3839_v28 = vadd.f32 1e-05, %v3583_v29  ;;  %1225 = vmatmul.mubr.f32.gmra.mrb[108].mxu1 %v530_v20 }
 0x1f9   : > { %12348 = vst [vmem:[#allocation36_spill] sm:$0xff] %v8266_v17  ;;  %v8268_v39 = vpop.xlane.xlu1 %2323  ;;  %v1176_v2 = vpop.f32.mrb[88].mxu1  ;;  %v2430_v7 = vsel %vm2300_vm0, %v8266_v17, 0.0  ;;  %v2856_v16 = vmul.f32 %v8266_v17, %v8266_v17 }
 0x1fa   : > { %v1881_v24 = vpop.f32.mrb[88].mxu0  ;;  %v1178_v21 = vpop.f32.mrb[89].mxu1  ;;  %7051 = vrsqrt.f32 %v3839_v28 }
 0x1fb   : > { %v8272_v49 = vpop.xlane.xlu0 %2326  ;;  %v8274_v8 = vadd.f32 %v1881_v24, %v1176_v2  ;;  %v1883_v54 = vpop.f32.mrb[89].mxu0  ;;  %v3709_v2 = vld [vmem:[%s8280_s15] sm:$0xff] }
 0x1fc   : > { %v7048_v54 = vpop.eup %7047 }
 0x1fd   : > { %12349 = vst [vmem:[#allocation37_spill] sm:$0xff] %v8274_v8  ;;  %v8282_v48 = vpop.xlane.xlu1 %2963  ;;  %v1181_v58 = vpop.f32.mrb[90].mxu1  ;;  %v4093_v38 = vmul.f32 %v7048_v54, %v3709_v2 }
 0x1fe   : > { %v1886_v10 = vpop.f32.mrb[90].mxu0  ;;  %v1183_v50 = vpop.f32.mrb[91].mxu1 }
 0x1ff   : > { %v8284_v25 = vpop.xlane.xlu0 %2966  ;;  %v8286_v34 = vadd.f32 %v1886_v10, %v1181_v58  ;;  %v1888_v37 = vpop.f32.mrb[91].mxu0  ;;  %v4349_v28 = vmul.f32 %v4093_v38, %v8204_v35  ;;  %v4221_v10 = vld [vmem:[%s8300_s17] sm:$0xff] }
 0x200   : > { %v7050_v23 = vpop.eup %7049 }
 0x201   : > { %12350 = vst [vmem:[#allocation38_spill] sm:$0xff] %v8286_v34  ;;  %v8289_v24 = vpop.xlane.xlu1 %2329  ;;  %v8302_v29 = vmul.f32 %v7050_v23, %v3710_v6  ;;  %v4477_v54 = vsub.f32 %v4221_v10, %v4349_v28  ;;  %v1186_v10 = vpop.f32.mrb[92].mxu1 }
 0x203   : > { %v8291_v21 = vpop.xlane.xlu0 %2332 }
 0x204   : > { %v7052_v2 = vpop.eup %7051 }
 0x205   : > { %v8294_v56 = vpop.xlane.xlu1 %2969  ;;  %v8318_v23 = vmul.f32 %v7052_v2, %v3711_v41  ;;  %v1891_v41 = vpop.f32.mrb[92].mxu0 }
 0x206   : > { %v8331_v43 = vadd.f32 %v1891_v41, %v1186_v10  ;;  %v1893_v32 = vpop.f32.mrb[93].mxu0 }
 0x207   : > { %v8304_v58 = vpop.xlane.xlu0 %2972  ;;  %v1896_v13 = vpop.f32.mrb[94].mxu0 }
 0x208   : > { %4607 = vperm.xlu0 %7045, %v4093_v38   ;;  %12351 = vst [vmem:[#allocation39_spill] sm:$0xff] %v8331_v43 }
 0x209   : > { %v8308_v50 = vpop.xlane.xlu1 %2335  ;;  %4612 = vperm.xlu1 %7046, %v8302_v29  }
 0x20b   : > { %v8311_v37 = vpop.xlane.xlu0 %2338 }
 0x20d   : > { %v8314_v26 = vpop.xlane.xlu1 %2975  ;;  %5375 = vperm.xlu1 %7046, %v4477_v54   ;;  %v1188_v54 = vpop.f32.mrb[93].mxu1 }
 0x20e   : > { %v532_v54 = vld [vmem:[%s7489_s14 + $0x6d0] sm:$0xff]  ;;  %v1191_v22 = vpop.f32.mrb[94].mxu1 }
 0x20f   : > { %v8316_v6 = vpop.xlane.xlu0 %2978  ;;  %1930 = vmatmul.mubr.f32.gmra.mrb[108].mxu0 %v532_v54  ;;  %v8365_v54 = vmul.f32 0.020408163, %v8206_v0 }
 0x211   : > { %v8320_v38 = vpop.xlane.xlu1 %2341  ;;  %4617 = vperm.xlu1 %7046, %v8318_v23   ;;  %v3456_v31 = vmul.f32 %v8365_v54, %v8365_v54 }
 0x213   : > { %v8323_v35 = vpop.xlane.xlu0 %2344  ;;  %v3584_v0 = vsub.f32 %v3328_v42, %v3456_v31  ;;  %v3329_v31 = vmul.f32 0.020408163, %v8232_v47 }
 0x215   : > { %v8327_v28 = vpop.xlane.xlu1 %2981 }
 0x217   : > { %v8329_v2 = vpop.xlane.xlu0 %2984 }
 0x219   : > { %v8333_v18 = vpop.xlane.xlu1 %2347 }
 0x21b   : > { %v8337_v45 = vpop.xlane.xlu0 %2350 }
 0x21d   : > { %v8339_v30 = vpop.xlane.xlu1 %2987 }
 0x21f   : > { %v8345_v9 = vpop.xlane.xlu0 %2990 }
 0x221   : > { %v8347_v32 = vpop.xlane.xlu1 %2353 }
 0x223   : > { %v8349_v10 = vpop.xlane.xlu0 %2356 }
 0x224   : > { %12352 = vst [vmem:[#allocation40_spill] sm:$0xff] %v8349_v10 }
 0x225   : > { %v8355_v41 = vpop.xlane.xlu1 %2993 }
 0x227   : > { %v8357_v1 = vpop.xlane.xlu0 %2996  ;;  %2428 = vadd.xlane.f32.xlu0 %v2427_v59 }
 0x228   : > { %12353 = vst [vmem:[#allocation41_spill] sm:$0xff] %v8357_v1 }
 0x229   : > { %v8360_v60 = vpop.xlane.xlu1 %2359 }
 0x22a   : > { %12354 = vst [vmem:[#allocation42_spill] sm:$0xff] %v8360_v60 }
 0x22b   : > { %v8362_v20 = vpop.xlane.xlu0 %2362  ;;  %3068 = vadd.xlane.f32.xlu0 %v3067_v14  ;;  %v8379_v14 = vmul.f32 0.020408163, %v8214_v4  ;;  %v3840_v4 = vadd.f32 1e-05, %v3584_v0 }
 0x22c   : > { %12355 = vst [vmem:[#allocation43_spill] sm:$0xff] %v8362_v20 }
 0x22d   : > { %v8367_v52 = vpop.xlane.xlu1 %2999  ;;  %v3457_v1 = vmul.f32 %v8379_v14, %v8379_v14  ;;  %7053 = vrsqrt.f32 %v3840_v4 }
 0x22e   : > { %12356 = vst [vmem:[#allocation44_spill] sm:$0xff] %v8367_v52  ;;  %v1193_v52 = vpop.f32.mrb[95].mxu1 }
 0x22f   : > { %v8370_v3 = vpop.xlane.xlu0 %3002  ;;  %v4350_v52 = vmul.f32 %v8302_v29, %v8210_v51 }
 0x230   : > { %12357 = vst [vmem:[#allocation45_spill] sm:$0xff] %v8370_v3  ;;  %v1898_v3 = vpop.f32.mrb[95].mxu0 }
 0x231   : > { %v8374_v59 = vpop.xlane.xlu1 %2365  ;;  %v4222_v3 = vld [vmem:[%s8300_s17 + $0x8] sm:$0xff] }
 0x232   : > { %12358 = vst [vmem:[#allocation46_spill] sm:$0xff] %v8374_v59  ;;  %v8387_v59 = vadd.f32 %v1896_v13, %v1191_v22  ;;  %v3585_v13 = vsub.f32 %v3329_v31, %v3457_v1  ;;  %v4478_v17 = vsub.f32 %v4222_v3, %v4350_v52  ;;  %v3712_v1 = vld [vmem:[%s8280_s15 + $0x18] sm:$0xff]  ;;  %v4223_v52 = vld [vmem:[%s8300_s17 + $0x10] sm:$0xff] }
 0x233   : > { %v8381_v20 = vpop.xlane.xlu0 %2368 }
 0x234   : > { %12359 = vst [vmem:[#allocation47_spill] sm:$0xff] %v8381_v20  ;;  %12360 = vst [vmem:[#allocation48_spill] sm:$0xff] %v8387_v59  ;;  %v3070_v20 = vsel %vm2300_vm0, %v2856_v16, 0.0  ;;  %v3841_v47 = vadd.f32 1e-05, %v3585_v13  ;;  %v4351_v13 = vmul.f32 %v8318_v23, %v8243_v12  ;;  %v1901_v12 = vpop.f32.mrb[96].mxu0 }
 0x235   : > { %v8385_v60 = vpop.xlane.xlu1 %3005  ;;  %2431 = vadd.xlane.f32.xlu1 %v2430_v7 }
 0x236   : > { %7055 = vrsqrt.f32 %v3841_v47  ;;  %v4479_v3 = vsub.f32 %v4223_v52, %v4351_v13 }
 0x237   : > { %v8392_v42 = vpop.xlane.xlu0 %3008  ;;  %v7054_v51 = vpop.eup %7053 }
 0x238   : > { %v8415_v31 = vmul.f32 %v7054_v51, %v3712_v1  ;;  %v1196_v51 = vpop.f32.mrb[96].mxu1 }
 0x239   : > { %v8395_v10 = vpop.xlane.xlu1 %2371  ;;  %3071 = vadd.xlane.f32.xlu1 %v3070_v20 }
 0x23b   : > { %v8399_v22 = vpop.xlane.xlu0 %2374 }
 0x23c   : > { %12361 = vst [vmem:[#allocation49_spill] sm:$0xff] %v8399_v22  ;;  %v536_v22 = vld [vmem:[%s7489_s14 + $0x6f0] sm:$0xff] }
 0x23d   : > { %v8402_v7 = vpop.xlane.xlu1 %3011 }
 0x23f   : > { %v8404_v0 = vpop.xlane.xlu0 %3014 }
 0x240   : > { %12362 = vst [vmem:[#allocation50_spill] sm:$0xff] %v8404_v0  ;;  %v7056_v47 = vpop.eup %7055 }
 0x241   : > { %v8406_v16 = vpop.xlane.xlu1 %2377  ;;  %5380 = vperm.xlu0 %7045, %v4478_v17  }
 0x242   : > { %12363 = vst [vmem:[#allocation51_spill] sm:$0xff] %v8406_v16  ;;  %v537_v16 = vld [vmem:[%s7489_s14 + $0x6f8] sm:$0xff] }
 0x243   : > { %v8408_v20 = vpop.xlane.xlu0 %2380  ;;  %1934 = vmatprep.mubr.f32.mxu0 %v537_v16  ;;  %v2857_v16 = vmul.f32 %v8274_v8, %v8274_v8 }
 0x244   : > { %12364 = vst [vmem:[#allocation52_spill] sm:$0xff] %v8408_v20  ;;  %1935 = vmatmul.mubr.f32.gmra.mrb[110].mxu0 %v536_v22 }
 0x245   : > { %v8410_v29 = vpop.xlane.xlu1 %3017 }
 0x246   : > { %12365 = vst [vmem:[#allocation53_spill] sm:$0xff] %v8410_v29  ;;  %v3713_v29 = vld [vmem:[%s8280_s15 + $0x20] sm:$0xff] }
 0x247   : > { %v8413_v4 = vpop.xlane.xlu0 %3020  ;;  %v8430_v23 = vmul.f32 %v7056_v47, %v3713_v29 }
 0x248   : > { %12366 = vst [vmem:[#allocation54_spill] sm:$0xff] %v8413_v4  ;;  %v1198_v4 = vpop.f32.mrb[97].mxu1 }
 0x249   : > { %v8419_v0 = vpop.xlane.xlu1 %2383 }
 0x24a   : > { %12367 = vst [vmem:[#allocation55_spill] sm:$0xff] %v8419_v0  ;;  %4622 = vperm.xlu1 %7046, %v8415_v31   ;;  %v8432_v0 = vadd.f32 %v1901_v12, %v1196_v51  ;;  %v2433_v51 = vsel %vm2300_vm0, %v8274_v8, 0.0 }
 0x24b   : > { %v8423_v17 = vpop.xlane.xlu0 %2386 }
 0x24c   : > { %12368 = vst [vmem:[#allocation56_spill] sm:$0xff] %v8423_v17  ;;  %12371 = vst [vmem:[#allocation59_spill] sm:$0xff] %v8432_v0  ;;  %v1903_v17 = vpop.f32.mrb[97].mxu0 }
 0x24d   : > { %v8425_v20 = vpop.xlane.xlu1 %3023 }
 0x24e   : > { %12369 = vst [vmem:[#allocation57_spill] sm:$0xff] %v8425_v20  ;;  %5385 = vperm.xlu1 %7046, %v4479_v3   ;;  %v535_v3 = vld [vmem:[%s7489_s14 + $0x6e8] sm:$0xff] }
 0x24f   : > { %v8428_v1 = vpop.xlane.xlu0 %3026  ;;  %1229 = vmatprep.mubr.f32.mxu1 %v535_v3 }
 0x250   : > { %12370 = vst [vmem:[#allocation58_spill] sm:$0xff] %v8428_v1  ;;  %v534_v1 = vld [vmem:[%s7489_s14 + $0x6e0] sm:$0xff] }
 0x251   : > { %v8434_v13 = vpop.xlane.xlu1 %2389  ;;  %1230 = vmatmul.mubr.f32.gmra.mrb[110].mxu1 %v534_v1  ;;  %v3073_v1 = vsel %vm2300_vm0, %v2857_v16, 0.0  ;;  %v538_v16 = vld [vmem:[%s7489_s14 + $0x700] sm:$0xff] }
 0x252   : > { %12372 = vst [vmem:[#allocation60_spill] sm:$0xff] %v8434_v13  ;;  %4627 = vperm.xlu1 %7046, %v8430_v23  }
 0x253   : > { %v8437_v52 = vpop.xlane.xlu0 %2392 }
 0x254   : > { %12373 = vst [vmem:[#allocation61_spill] sm:$0xff] %v8437_v52  ;;  %v8477_v52 = vmul.f32 0.020408163, %v8239_v15  ;;  %v2436_v15 = vsel %vm2300_vm0, %v8286_v34, 0.0 }
 0x255   : > { %v8439_v20 = vpop.xlane.xlu1 %3029 }
 0x256   : > { %12374 = vst [vmem:[#allocation62_spill] sm:$0xff] %v8439_v20 }
 0x257   : > { %v8445_v29 = vpop.xlane.xlu0 %3032 }
 0x258   : > { %12375 = vst [vmem:[#allocation63_spill] sm:$0xff] %v8445_v29 }
 0x259   : > { %v8447_v4 = vpop.xlane.xlu1 %2395 }
 0x25a   : > { %12376 = vst [vmem:[#allocation64_spill] sm:$0xff] %v8447_v4 }
 0x25b   : > { %v8449_v17 = vpop.xlane.xlu0 %2398 }
 0x25c   : > { %12377 = vst [vmem:[#allocation65_spill] sm:$0xff] %v8449_v17 }
 0x25d   : > { %v8451_v47 = vpop.xlane.xlu1 %3035 }
 0x25e   : > { %12378 = vst [vmem:[#allocation66_spill] sm:$0xff] %v8451_v47 }
 0x25f   : > { %v8457_v12 = vpop.xlane.xlu0 %3038 }
 0x260   : > { %12379 = vst [vmem:[#allocation67_spill] sm:$0xff] %v8457_v12  ;;  %2434 = vadd.xlane.f32.xlu0 %v2433_v51  ;;  %v539_v12 = vld [vmem:[%s7489_s14 + $0x708] sm:$0xff]  ;;  %v541_v51 = vld [vmem:[%s7489_s14 + $0x718] sm:$0xff] }
 0x261   : > { %v8459_v22 = vpop.xlane.xlu1 %2401  ;;  %1234 = vmatprep.mubr.f32.mxu1 %v539_v12  ;;  %1939 = vmatprep.mubr.f32.mxu0 %v541_v51  ;;  %v1201_v12 = vpop.f32.mrb[98].mxu1  ;;  %v8493_v51 = vmul.f32 0.020408163, %v8245_v57 }
 0x262   : > { %12380 = vst [vmem:[#allocation68_spill] sm:$0xff] %v8459_v22  ;;  %1235 = vmatmul.mubr.f32.gmra.mrb[112].mxu1 %v538_v16  ;;  %v1906_v16 = vpop.f32.mrb[98].mxu0  ;;  %v2858_v22 = vmul.f32 %v8286_v34, %v8286_v34 }
 0x263   : > { %v8462_v3 = vpop.xlane.xlu0 %2404  ;;  %v1908_v20 = vpop.f32.mrb[99].mxu0  ;;  %v3459_v57 = vmul.f32 %v8493_v51, %v8493_v51 }
 0x264   : > { %12381 = vst [vmem:[#allocation69_spill] sm:$0xff] %v8462_v3  ;;  %3074 = vadd.xlane.f32.xlu0 %v3073_v1  ;;  %v540_v3 = vld [vmem:[%s7489_s14 + $0x710] sm:$0xff] }
 0x265   : > { %v8464_v17 = vpop.xlane.xlu1 %3041  ;;  %1940 = vmatmul.mubr.f32.gmra.mrb[112].mxu0 %v540_v3  ;;  %v4352_v3 = vmul.f32 %v8415_v31, %v8365_v54 }
 0x266   : > { %12382 = vst [vmem:[#allocation70_spill] sm:$0xff] %v8464_v17 }
 0x267   : > { %v8466_v47 = vpop.xlane.xlu0 %3044 }
 0x268   : > { %12383 = vst [vmem:[#allocation71_spill] sm:$0xff] %v8466_v47 }
 0x269   : > { %v8468_v4 = vpop.xlane.xlu1 %2407 }
 0x26a   : > { %12384 = vst [vmem:[#allocation72_spill] sm:$0xff] %v8468_v4  ;;  %v3330_v4 = vmul.f32 0.020408163, %v8258_v5  ;;  %v1203_v5 = vpop.f32.mrb[99].mxu1 }
 0x26b   : > { %v8470_v29 = vpop.xlane.xlu0 %2410  ;;  %v3076_v5 = vsel %vm2300_vm0, %v2858_v22, 0.0  ;;  %v3714_v22 = vld [vmem:[%s8280_s15 + $0x28] sm:$0xff] }
 0x26c   : > { %12385 = vst [vmem:[#allocation73_spill] sm:$0xff] %v8470_v29  ;;  %v3458_v29 = vmul.f32 %v8477_v52, %v8477_v52 }
 0x26d   : > { %v8472_v8 = vpop.xlane.xlu1 %3047 }
 0x26e   : > { %12386 = vst [vmem:[#allocation74_spill] sm:$0xff] %v8472_v8  ;;  %v3586_v17 = vsub.f32 %v3330_v4, %v3458_v29  ;;  %v3331_v29 = vmul.f32 0.020408163, %v8263_v61 }
 0x26f   : > { %v8481_v1 = vpop.xlane.xlu0 %3050 }
 0x270   : > { %12387 = vst [vmem:[#allocation75_spill] sm:$0xff] %v8481_v1  ;;  %v3842_v13 = vadd.f32 1e-05, %v3586_v17  ;;  %v3587_v20 = vsub.f32 %v3331_v29, %v3459_v57  ;;  %v4353_v57 = vmul.f32 %v8430_v23, %v8379_v14  ;;  %v4225_v29 = vld [vmem:[%s8300_s17 + $0x20] sm:$0xff] }
 0x271   : > { %v8484_v47 = vpop.xlane.xlu1 %2413 }
 0x272   : > { %12388 = vst [vmem:[#allocation76_spill] sm:$0xff] %v8484_v47  ;;  %v4224_v47 = vld [vmem:[%s8300_s17 + $0x18] sm:$0xff]  ;;  %7057 = vrsqrt.f32 %v3842_v13  ;;  %v3843_v17 = vadd.f32 1e-05, %v3587_v20  ;;  %v4481_v14 = vsub.f32 %v4225_v29, %v4353_v57  ;;  %v543_v57 = vld [vmem:[%s7489_s14 + $0x728] sm:$0xff] }
 0x273   : > { %v8488_v8 = vpop.xlane.xlu0 %2416  ;;  %v4480_v4 = vsub.f32 %v4224_v47, %v4352_v3  ;;  %1239 = vmatprep.mubr.f32.mxu1 %v543_v57  ;;  %v549_v29 = vld [vmem:[%s7489_s14 + $0x758] sm:$0xff]  ;;  %v3332_v57 = vmul.f32 0.020408163, %v8282_v48  ;;  %v2860_v48 = vmul.f32 %v8387_v59, %v8387_v59 }
 0x274   : > { %12389 = vst [vmem:[#allocation77_spill] sm:$0xff] %v8488_v8  ;;  %v8502_v8 = vadd.f32 %v1906_v16, %v1201_v12  ;;  %7059 = vrsqrt.f32 %v3843_v17 }
 0x275   : > { %v8497_v1 = vpop.xlane.xlu1 %3053 }
 0x276   : > { %12390 = vst [vmem:[#allocation78_spill] sm:$0xff] %v8502_v8  ;;  %2437 = vadd.xlane.f32.xlu1 %v2436_v15 }
 0x277   : > { %v8507_v54 = vpop.xlane.xlu0 %3056 }
 0x279   : > { %v8509_v31 = vpop.xlane.xlu1 %2419 }
 0x27a   : > { %12391 = vst [vmem:[#allocation79_spill] sm:$0xff] %v8509_v31  ;;  %5390 = vperm.xlu0 %7045, %v4480_v4   ;;  %3077 = vadd.xlane.f32.xlu1 %v3076_v5 }
 0x27b   : > { %v8514_v12 = vpop.xlane.xlu0 %2422  ;;  %v1206_v20 = vpop.f32.mrb[100].mxu1 }
 0x27c   : > { %12393 = vst [vmem:[#allocation81_spill] sm:$0xff] %v8514_v12  ;;  %v7058_v16 = vpop.eup %7057  ;;  %v1911_v34 = vpop.f32.mrb[100].mxu0 }
 0x27d   : > { %v8512_v15 = vpop.xlane.xlu1 %3059  ;;  %v4098_v13 = vmul.f32 %v7058_v16, %v3714_v22  ;;  %v1208_v16 = vpop.f32.mrb[101].mxu1  ;;  %v6141_v22 = vld [vmem:[%s8531_s25] sm:$0xff]  ;;  %v8536_v23 = vadd.f32 %v1911_v34, %v1206_v20  ;;  %v545_v34 = vld [vmem:[%s7489_s14 + $0x738] sm:$0xff] }
 0x27e   : > { %12392 = vst [vmem:[#allocation80_spill] sm:$0xff] %v8512_v15  ;;  %v3715_v15 = vld [vmem:[%s8280_s15 + $0x30] sm:$0xff]  ;;  %1944 = vmatprep.mubr.f32.mxu0 %v545_v34  ;;  %v546_v20 = vld [vmem:[%s7489_s14 + $0x740] sm:$0xff] }
 0x27f   : > { %v8518_v47 = vpop.xlane.xlu0 %3062  ;;  %12397 = vst [vmem:[#allocation85_spill] sm:$0xff] %v8536_v23  ;;  %v4354_v16 = vmul.f32 %v4098_v13, %v8477_v52  ;;  %v2442_v52 = vsel %vm2300_vm0, %v8387_v59, 0.0 }
 0x280   : > { %12395 = vst [vmem:[#allocation83_spill] sm:$0xff] %v8518_v47  ;;  %v7060_v47 = vpop.eup %7059 }
 0x281   : > { %v8516_v61 = vpop.xlane.xlu1 %2425 }
 0x282   : > { %12394 = vst [vmem:[#allocation82_spill] sm:$0xff] %v8516_v61  ;;  %v1913_v61 = vpop.f32.mrb[101].mxu0 }
 0x283   : > { %v542_v61 = vld [vmem:[%s7489_s14 + $0x720] sm:$0xff] }
 0x284   : > { %1240 = vmatmul.mubr.f32.gmra.mrb[114].mxu1 %v542_v61 }
 0x285   : > { %v8520_v3 = vpop.xlane.xlu1 %3065 }
 0x286   : > { %12396 = vst [vmem:[#allocation84_spill] sm:$0xff] %v8520_v3 }
 0x287   : > { %v4608_v4 = vpop.permute.xlu0 %4607 }
 0x288   : > { %v5245_v17 = vmul.f32 %v4608_v4, %v7907_v33  ;;  %v8545_v33 = vmul.f32 %v7060_v47, %v3715_v15  ;;  %v2859_v15 = vmul.f32 %v8331_v43, %v8331_v43 }
 0x289   : > { %v8523_v5 = vpop.permute.xlu1 %4612 }
 0x28a   : > { %v3079_v47 = vsel %vm2300_vm0, %v2859_v15, 0.0 }
 0x28b   : > { %4632 = vperm.xlu1 %7046, %v4098_v13  }
 0x28d   : > { %v5376_v3 = vpop.permute.xlu1 %5375 }
 0x28e   : > { %v6013_v12 = vadd.f32 %v5376_v3, %v5245_v17  ;;  %v547_v3 = vld [vmem:[%s7489_s14 + $0x748] sm:$0xff]  ;;  %v548_v17 = vld [vmem:[%s7489_s14 + $0x750] sm:$0xff] }
 0x28f   : > { %5395 = vperm.xlu1 %7046, %v4481_v14   ;;  %1244 = vmatprep.mubr.f32.mxu1 %v547_v3  ;;  %v8566_v14 = vmul.f32 0.020408163, %v8268_v39  ;;  %v8576_v39 = vmul.f32 0.020408163, %v8272_v49 }
 0x290   : > { %v6269_v31 = vadd.f32 %v6141_v22, %v6013_v12  ;;  %v544_v12 = vld [vmem:[%s7489_s14 + $0x730] sm:$0xff]  ;;  %1245 = vmatmul.mubr.f32.gmra.mrb[116].mxu1 %v546_v20  ;;  %v4226_v22 = vld [vmem:[%s8300_s17 + $0x28] sm:$0xff] }
 0x291   : > { %1945 = vmatmul.mubr.f32.gmra.mrb[114].mxu0 %v544_v12  ;;  %v4482_v34 = vsub.f32 %v4226_v22, %v4354_v16  ;;  %v3082_v16 = vsel %vm2300_vm0, %v2860_v48, 0.0 }
 0x292   : > { %v6397_v4 = vmax.f32 %v6269_v31, 0.0  ;;  %v2439_v31 = vsel %vm2300_vm0, %v8331_v43, 0.0  ;;  %1949 = vmatprep.mubr.f32.mxu0 %v549_v29  ;;  %v3461_v29 = vmul.f32 %v8576_v39, %v8576_v39 }
 0x293   : > { %4637 = vperm.xlu1 %7046, %v8545_v33  }
 0x294   : > { %6525 = vst.msk [vmem:[%s8543_s30] sm:$0xff] %vm2300_vm0, %v6397_v4 }
 0x295   : > { %1950 = vmatmul.mubr.f32.gmra.mrb[116].mxu0 %v548_v17  ;;  %v3333_v17 = vmul.f32 0.020408163, %v8284_v25 }
 0x297   : > { %v3589_v49 = vsub.f32 %v3333_v17, %v3461_v29  ;;  %v3716_v29 = vld [vmem:[%s8280_s15 + $0x38] sm:$0xff] }
 0x299   : > { %2440 = vadd.xlane.f32.xlu0 %v2439_v31 }
 0x29d   : > { %3080 = vadd.xlane.f32.xlu0 %v3079_v47  ;;  %v3460_v47 = vmul.f32 %v8566_v14, %v8566_v14 }
 0x29f   : > { %v3588_v13 = vsub.f32 %v3332_v57, %v3460_v47  ;;  %v5246_v57 = vmul.f32 %v8523_v5, %v7913_v40 }
 0x2a1   : > { %v3844_v20 = vadd.f32 1e-05, %v3588_v13 }
 0x2a3   : > { %7061 = vrsqrt.f32 %v3844_v20 }
 0x2a4   : > { %v1211_v4 = vpop.f32.mrb[102].mxu1 }
 0x2a5   : > { %v1916_v61 = vpop.f32.mrb[102].mxu0  ;;  %v1213_v12 = vpop.f32.mrb[103].mxu1 }
 0x2a6   : > { %v8569_v31 = vadd.f32 %v1916_v61, %v1211_v4  ;;  %v1918_v15 = vpop.f32.mrb[103].mxu0  ;;  %v4618_v4 = vpop.permute.xlu1 %4617  ;;  %v3845_v12 = vadd.f32 1e-05, %v3589_v49  ;;  %v4355_v49 = vmul.f32 %v8545_v33, %v8493_v51  ;;  %v2861_v51 = vmul.f32 %v8432_v0, %v8432_v0  ;;  %v551_v33 = vld [vmem:[%s7489_s14 + $0x768] sm:$0xff] }
 0x2a7   : > { %1249 = vmatprep.mubr.f32.mxu1 %v551_v33  ;;  %v556_v33 = vld [vmem:[%s7489_s14 + $0x790] sm:$0xff] }
 0x2a8   : > { %12398 = vst [vmem:[#allocation86_spill] sm:$0xff] %v8569_v31  ;;  %7063 = vrsqrt.f32 %v3845_v12  ;;  %v5247_v12 = vmul.f32 %v4618_v4, %v7918_v46 }
 0x2ad   : > { %v7062_v48 = vpop.eup %7061 }
 0x2b3   : > { %5400 = vperm.xlu0 %7045, %v4482_v34   ;;  %v6142_v34 = vld [vmem:[%s8531_s25 + $0x8] sm:$0xff] }
 0x2b4   : > { %v8578_v3 = vpop.xlane.xlu0 %2428 }
 0x2b6   : > { %v1921_v17 = vpop.f32.mrb[104].mxu0 }
 0x2b7   : > { %2443 = vadd.xlane.f32.xlu1 %v2442_v52 }
 0x2b8   : > { %v8586_v22 = vpop.xlane.xlu0 %3068 }
 0x2bb   : > { %3083 = vadd.xlane.f32.xlu1 %v3082_v16  ;;  %v4100_v16 = vmul.f32 %v7062_v48, %v3716_v29  ;;  %v2445_v48 = vsel %vm2300_vm0, %v8432_v0, 0.0  ;;  %v3717_v29 = vld [vmem:[%s8280_s15 + $0x40] sm:$0xff] }
 0x2c0   : > { %v5381_v61 = vpop.permute.xlu0 %5380 }
 0x2c1   : > { %v6014_v15 = vadd.f32 %v5381_v61, %v5246_v57  ;;  %v4227_v61 = vld [vmem:[%s8300_s17 + $0x30] sm:$0xff] }
 0x2c2   : > { %v8591_v47 = vpop.xlane.xlu1 %2431 }
 0x2c3   : > { %v6270_v25 = vadd.f32 %v6142_v34, %v6014_v15  ;;  %v1216_v20 = vpop.f32.mrb[104].mxu1  ;;  %v1923_v34 = vpop.f32.mrb[105].mxu0  ;;  %v6143_v15 = vld [vmem:[%s8531_s25 + $0x10] sm:$0xff] }
 0x2c4   : > { %v1218_v40 = vpop.f32.mrb[105].mxu1  ;;  %v8602_v57 = vadd.f32 %v1921_v17, %v1216_v20  ;;  %v553_v20 = vld [vmem:[%s7489_s14 + $0x778] sm:$0xff]  ;;  %v550_v17 = vld [vmem:[%s7489_s14 + $0x760] sm:$0xff]  ;;  %v552_v34 = vld [vmem:[%s7489_s14 + $0x770] sm:$0xff] }
 0x2c5   : > { %v6398_v52 = vmax.f32 %v6270_v25, 0.0  ;;  %v7064_v40 = vpop.eup %7063  ;;  %1954 = vmatprep.mubr.f32.mxu0 %v553_v20  ;;  %1250 = vmatmul.mubr.f32.gmra.mrb[118].mxu1 %v550_v17  ;;  %v3718_v17 = vld [vmem:[%s8280_s15 + $0x48] sm:$0xff] }
 0x2c6   : > { %v8593_v13 = vpop.xlane.xlu1 %3071  ;;  %12399 = vst [vmem:[#allocation87_spill] sm:$0xff] %v8602_v57  ;;  %v4101_v4 = vmul.f32 %v7064_v40, %v3717_v29  ;;  %1955 = vmatmul.mubr.f32.gmra.mrb[118].mxu0 %v552_v34  ;;  %v4228_v40 = vld [vmem:[%s8300_s17 + $0x38] sm:$0xff] }
 0x2c7   : > { %6526 = vst.msk [vmem:[%s8543_s30 + $0x8] sm:$0xff] %vm2300_vm0, %v6398_v52  ;;  %v4483_v52 = vsub.f32 %v4227_v61, %v4355_v49  ;;  %v8617_v49 = vmul.f32 0.020408163, %v8289_v24  ;;  %v4356_v24 = vmul.f32 %v4100_v16, %v8566_v14  ;;  %v557_v29 = vld [vmem:[%s7489_s14 + $0x798] sm:$0xff]  ;;  %v1221_v34 = vpop.f32.mrb[106].mxu1 }
 0x2c8   : > { %1959 = vmatprep.mubr.f32.mxu0 %v557_v29  ;;  %v2862_v29 = vmul.f32 %v8502_v8, %v8502_v8 }
 0x2ca   : > { %v8598_v5 = vpop.permute.xlu1 %4622  ;;  %1960 = vmatmul.mubr.f32.gmra.mrb[120].mxu0 %v556_v33  ;;  %v6144_v33 = vld [vmem:[%s8531_s25 + $0x18] sm:$0xff] }
 0x2cc   : > { %4642 = vperm.xlu1 %7046, %v4100_v16  }
 0x2ce   : > { %v5386_v25 = vpop.permute.xlu1 %5385 }
 0x2cf   : > { %v6015_v43 = vadd.f32 %v5386_v25, %v5247_v12  ;;  %v3085_v12 = vsel %vm2300_vm0, %v2861_v51, 0.0  ;;  %v3334_v25 = vmul.f32 0.020408163, %v8294_v56  ;;  %v554_v51 = vld [vmem:[%s7489_s14 + $0x780] sm:$0xff]  ;;  %v4484_v56 = vsub.f32 %v4228_v40, %v4356_v24 }
 0x2d0   : > { %5405 = vperm.xlu1 %7046, %v4483_v52   ;;  %v3335_v40 = vmul.f32 0.020408163, %v8304_v58 }
 0x2d1   : > { %v6271_v46 = vadd.f32 %v6143_v15, %v6015_v43  ;;  %v3462_v43 = vmul.f32 %v8617_v49, %v8617_v49 }
 0x2d2   : > { %2446 = vadd.xlane.f32.xlu0 %v2445_v48  ;;  %v555_v48 = vld [vmem:[%s7489_s14 + $0x788] sm:$0xff] }
 0x2d3   : > { %v6399_v61 = vmax.f32 %v6271_v46, 0.0  ;;  %v3590_v15 = vsub.f32 %v3334_v25, %v3462_v43  ;;  %1254 = vmatprep.mubr.f32.mxu1 %v555_v48  ;;  %v8640_v43 = vmul.f32 0.020408163, %v8291_v21  ;;  %v5248_v21 = vmul.f32 %v8598_v5, %v7927_v55 }
 0x2d4   : > { %4647 = vperm.xlu1 %7046, %v4101_v4   ;;  %1255 = vmatmul.mubr.f32.gmra.mrb[120].mxu1 %v554_v51 }
 0x2d5   : > { %6527 = vst.msk [vmem:[%s8543_s30 + $0x10] sm:$0xff] %vm2300_vm0, %v6399_v61  ;;  %v3846_v52 = vadd.f32 1e-05, %v3590_v15  ;;  %v1926_v61 = vpop.f32.mrb[106].mxu0  ;;  %v3463_v24 = vmul.f32 %v8640_v43, %v8640_v43 }
 0x2d6   : > { %3086 = vadd.xlane.f32.xlu0 %v3085_v12  ;;  %v1223_v12 = vpop.f32.mrb[107].mxu1  ;;  %v8636_v16 = vadd.f32 %v1926_v61, %v1221_v34  ;;  %v1928_v25 = vpop.f32.mrb[107].mxu0  ;;  %v3088_v34 = vsel %vm2300_vm0, %v2862_v29, 0.0  ;;  %v4357_v29 = vmul.f32 %v4101_v4, %v8576_v39  ;;  %v6145_v4 = vld [vmem:[%s8531_s25 + $0x20] sm:$0xff] }
 0x2d7   : > { %7065 = vrsqrt.f32 %v3846_v52  ;;  %v2448_v52 = vsel %vm2300_vm0, %v8502_v8, 0.0  ;;  %v4628_v25 = vpop.permute.xlu1 %4627  ;;  %v1226_v5 = vpop.f32.mrb[108].mxu1  ;;  %v621_v8 = vld [vmem:[%s7489_s14 + $0x998] sm:$0xff] }
 0x2d8   : > { %12400 = vst [vmem:[#allocation88_spill] sm:$0xff] %v8636_v16  ;;  %v5249_v39 = vmul.f32 %v4628_v25, %v7932_v62  ;;  %v3336_v62 = vmul.f32 0.020408163, %v8314_v26  ;;  %v562_v26 = vld [vmem:[%s7489_s14 + $0x7c0] sm:$0xff] }
 0x2e1   : > { %v7066_v20 = vpop.eup %7065 }
 0x2e2   : > { %v8632_v46 = vmul.f32 %v7066_v20, %v3718_v17  ;;  %v1931_v48 = vpop.f32.mrb[108].mxu0  ;;  %v3591_v20 = vsub.f32 %v3335_v40, %v3463_v24  ;;  %v1228_v24 = vpop.f32.mrb[109].mxu1 }
 0x2e3   : > { %v1933_v51 = vpop.f32.mrb[109].mxu0 }
 0x2e4   : > { %v3847_v58 = vadd.f32 1e-05, %v3591_v20  ;;  %v4229_v51 = vld [vmem:[%s8300_s17 + $0x40] sm:$0xff]  ;;  %v2451_v20 = vsel %vm2300_vm0, %v8536_v23, 0.0 }
 0x2e6   : > { %7067 = vrsqrt.f32 %v3847_v58  ;;  %v558_v58 = vld [vmem:[%s7489_s14 + $0x7a0] sm:$0xff] }
 0x2ec   : > { %5410 = vperm.xlu0 %7045, %v4484_v56  }
 0x2ed   : > { %v8634_v14 = vpop.xlane.xlu0 %2434 }
 0x2f0   : > { %4652 = vperm.xlu0 %7045, %v8632_v46  }
 0x2f1   : > { %v8642_v15 = vpop.xlane.xlu0 %3074 }
 0x2f8   : > { %2449 = vadd.xlane.f32.xlu1 %v2448_v52  ;;  %v8659_v52 = vadd.f32 %v1931_v48, %v1226_v5  ;;  %v559_v48 = vld [vmem:[%s7489_s14 + $0x7a8] sm:$0xff] }
 0x2f9   : > { %v5391_v56 = vpop.permute.xlu0 %5390  ;;  %1259 = vmatprep.mubr.f32.mxu1 %v559_v48  ;;  %v4230_v48 = vld [vmem:[%s8300_s17 + $0x48] sm:$0xff] }
 0x2fa   : > { %v6016_v17 = vadd.f32 %v5391_v56, %v5248_v21  ;;  %12401 = vst [vmem:[#allocation89_spill] sm:$0xff] %v8659_v52  ;;  %v7068_v56 = vpop.eup %7067  ;;  %1260 = vmatmul.mubr.f32.gmra.mrb[122].mxu1 %v558_v58  ;;  %v565_v58 = vld [vmem:[%s7489_s14 + $0x7d8] sm:$0xff] }
 0x2fc   : > { %v6272_v61 = vadd.f32 %v6144_v33, %v6016_v17  ;;  %3089 = vadd.xlane.f32.xlu1 %v3088_v34  ;;  %v4485_v33 = vsub.f32 %v4229_v51, %v4357_v29  ;;  %v3719_v17 = vld [vmem:[%s8280_s15 + $0x50] sm:$0xff]  ;;  %v2863_v34 = vmul.f32 %v8536_v23, %v8536_v23  ;;  %v8679_v29 = vmul.f32 0.020408163, %v8308_v50  ;;  %v603_v23 = vld [vmem:[%s7489_s14 + $0x908] sm:$0xff] }
 0x2fd   : > { %v8676_v24 = vmul.f32 %v7068_v56, %v3719_v17 }
 0x2fe   : > { %v6400_v12 = vmax.f32 %v6272_v61, 0.0  ;;  %v561_v61 = vld [vmem:[%s7489_s14 + $0x7b8] sm:$0xff]  ;;  %v3464_v56 = vmul.f32 %v8679_v29, %v8679_v29 }
 0x2ff   : > { %1964 = vmatprep.mubr.f32.mxu0 %v561_v61  ;;  %v563_v61 = vld [vmem:[%s7489_s14 + $0x7c8] sm:$0xff] }
 0x300   : > { %6528 = vst.msk [vmem:[%s8543_s30 + $0x18] sm:$0xff] %vm2300_vm0, %v6400_v12  ;;  %v560_v12 = vld [vmem:[%s7489_s14 + $0x7b0] sm:$0xff]  ;;  %v3592_v17 = vsub.f32 %v3336_v62, %v3464_v56  ;;  %1264 = vmatprep.mubr.f32.mxu1 %v563_v61  ;;  %v2454_v61 = vsel %vm2300_vm0, %v8569_v31, 0.0 }
 0x301   : > { %1965 = vmatmul.mubr.f32.gmra.mrb[122].mxu0 %v560_v12  ;;  %v564_v12 = vld [vmem:[%s7489_s14 + $0x7d0] sm:$0xff]  ;;  %1265 = vmatmul.mubr.f32.gmra.mrb[124].mxu1 %v562_v26  ;;  %v3337_v26 = vmul.f32 0.020408163, %v8316_v6 }
 0x302   : > { %v3848_v50 = vadd.f32 1e-05, %v3592_v17  ;;  %1969 = vmatprep.mubr.f32.mxu0 %v565_v58  ;;  %v8706_v17 = vmul.f32 0.020408163, %v8311_v37 }
 0x303   : > { %v8657_v55 = vpop.xlane.xlu1 %2437 }
 0x304   : > { %7069 = vrsqrt.f32 %v3848_v50  ;;  %v3465_v58 = vmul.f32 %v8706_v17, %v8706_v17 }
 0x305   : > { %1970 = vmatmul.mubr.f32.gmra.mrb[124].mxu0 %v564_v12 }
 0x306   : > { %v3593_v37 = vsub.f32 %v3337_v26, %v3465_v58 }
 0x307   : > { %v8661_v40 = vpop.xlane.xlu1 %3077 }
 0x30b   : > { %v4633_v21 = vpop.permute.xlu1 %4632 }
 0x30c   : > { %v5250_v50 = vmul.f32 %v4633_v21, %v7944_v11  ;;  %v3849_v21 = vadd.f32 1e-05, %v3593_v37  ;;  %v2865_v37 = vmul.f32 %v8602_v57, %v8602_v57 }
 0x30d   : > { %5415 = vperm.xlu1 %7046, %v4485_v33   ;;  %v3091_v33 = vsel %vm2300_vm0, %v2863_v34, 0.0  ;;  %v4358_v34 = vmul.f32 %v8632_v46, %v8617_v49 }
 0x30e   : > { %7071 = vrsqrt.f32 %v3849_v21  ;;  %v566_v21 = vld [vmem:[%s7489_s14 + $0x7e0] sm:$0xff] }
 0x30f   : > { %v5396_v5 = vpop.permute.xlu1 %5395  ;;  %2452 = vadd.xlane.f32.xlu0 %v2451_v20 }
 0x310   : > { %v6017_v51 = vadd.f32 %v5396_v5, %v5249_v39  ;;  %v7070_v5 = vpop.eup %7069 }
 0x311   : > { %4657 = vperm.xlu1 %7046, %v8676_v24  }
 0x312   : > { %v6273_v25 = vadd.f32 %v6145_v4, %v6017_v51  ;;  %v4486_v4 = vsub.f32 %v4230_v48, %v4358_v34  ;;  %v3720_v51 = vld [vmem:[%s8280_s15 + $0x58] sm:$0xff]  ;;  %v6146_v34 = vld [vmem:[%s8531_s25 + $0x28] sm:$0xff] }
 0x313   : > { %3092 = vadd.xlane.f32.xlu0 %v3091_v33  ;;  %v8698_v62 = vmul.f32 %v7070_v5, %v3720_v51 }
 0x314   : > { %v6401_v20 = vmax.f32 %v6273_v25, 0.0 }
 0x316   : > { %6529 = vst.msk [vmem:[%s8543_s30 + $0x20] sm:$0xff] %vm2300_vm0, %v6401_v20 }
 0x317   : > { %v1936_v49 = vpop.f32.mrb[110].mxu0 }
 0x318   : > { %v1938_v20 = vpop.f32.mrb[111].mxu0 }
 0x324   : > { %v1231_v33 = vpop.f32.mrb[110].mxu1 }
 0x325   : > { %v1233_v46 = vpop.f32.mrb[111].mxu1  ;;  %v8702_v56 = vadd.f32 %v1936_v49, %v1231_v33  ;;  %v4638_v33 = vpop.permute.xlu1 %4637 }
 0x326   : > { %v8695_v39 = vpop.xlane.xlu0 %2440 }
 0x327   : > { %12402 = vst [vmem:[#allocation90_spill] sm:$0xff] %v8702_v56 }
 0x329   : > { %5420 = vperm.xlu0 %7045, %v4486_v4   ;;  %v2864_v4 = vmul.f32 %v8569_v31, %v8569_v31  ;;  %v619_v31 = vld [vmem:[%s7489_s14 + $0x988] sm:$0xff] }
 0x32a   : > { %v8700_v25 = vpop.xlane.xlu0 %3080 }
 0x32b   : > { %v3094_v11 = vsel %vm2300_vm0, %v2864_v4, 0.0  ;;  %v2457_v4 = vsel %vm2300_vm0, %v8602_v57, 0.0 }
 0x32d   : > { %4662 = vperm.xlu0 %7045, %v8698_v62  }
 0x332   : > { %v5401_v48 = vpop.permute.xlu0 %5400 }
 0x333   : > { %v6018_v12 = vadd.f32 %v5401_v48, %v5250_v50  ;;  %v4359_v48 = vmul.f32 %v8676_v24, %v8640_v43 }
 0x335   : > { %v6274_v5 = vadd.f32 %v6146_v34, %v6018_v12  ;;  %2455 = vadd.xlane.f32.xlu1 %v2454_v61  ;;  %v1236_v49 = vpop.f32.mrb[112].mxu1  ;;  %v4231_v61 = vld [vmem:[%s8300_s17 + $0x50] sm:$0xff]  ;;  %v7072_v12 = vpop.eup %7071 }
 0x336   : > { %v1238_v20 = vpop.f32.mrb[113].mxu1  ;;  %v4487_v26 = vsub.f32 %v4231_v61, %v4359_v48  ;;  %v5251_v48 = vmul.f32 %v4638_v33, %v7950_v19  ;;  %v6147_v61 = vld [vmem:[%s8531_s25 + $0x30] sm:$0xff]  ;;  %v4360_v19 = vmul.f32 %v8698_v62, %v8679_v29  ;;  %v4232_v33 = vld [vmem:[%s8300_s17 + $0x58] sm:$0xff] }
 0x337   : > { %v6402_v51 = vmax.f32 %v6274_v5, 0.0  ;;  %v3721_v5 = vld [vmem:[%s8280_s15 + $0x60] sm:$0xff]  ;;  %v3097_v20 = vsel %vm2300_vm0, %v2865_v37, 0.0 }
 0x338   : > { %v1941_v6 = vpop.f32.mrb[112].mxu0  ;;  %v8738_v24 = vmul.f32 %v7072_v12, %v3721_v5 }
 0x339   : > { %6530 = vst.msk [vmem:[%s8543_s30 + $0x28] sm:$0xff] %vm2300_vm0, %v6402_v51  ;;  %3095 = vadd.xlane.f32.xlu1 %v3094_v11  ;;  %v8720_v46 = vadd.f32 %v1941_v6, %v1236_v49  ;;  %v1943_v50 = vpop.f32.mrb[113].mxu0  ;;  %v567_v51 = vld [vmem:[%s7489_s14 + $0x7e8] sm:$0xff]  ;;  %v569_v11 = vld [vmem:[%s7489_s14 + $0x7f8] sm:$0xff]  ;;  %v568_v6 = vld [vmem:[%s7489_s14 + $0x7f0] sm:$0xff] }
 0x33a   : > { %1269 = vmatprep.mubr.f32.mxu1 %v567_v51  ;;  %1974 = vmatprep.mubr.f32.mxu0 %v569_v11  ;;  %v8741_v49 = vmul.f32 0.020408163, %v8320_v38  ;;  %v3338_v50 = vmul.f32 0.020408163, %v8327_v28  ;;  %v571_v11 = vld [vmem:[%s7489_s14 + $0x808] sm:$0xff] }
 0x33b   : > { %12403 = vst [vmem:[#allocation91_spill] sm:$0xff] %v8720_v46  ;;  %1270 = vmatmul.mubr.f32.gmra.mrb[126].mxu1 %v566_v21  ;;  %1975 = vmatmul.mubr.f32.gmra.mrb[126].mxu0 %v568_v6  ;;  %v573_v21 = vld [vmem:[%s7489_s14 + $0x818] sm:$0xff]  ;;  %v570_v6 = vld [vmem:[%s7489_s14 + $0x800] sm:$0xff] }
 0x33c   : > { %v3466_v12 = vmul.f32 %v8741_v49, %v8741_v49  ;;  %1274 = vmatprep.mubr.f32.mxu1 %v571_v11  ;;  %1979 = vmatprep.mubr.f32.mxu0 %v573_v21 }
 0x33f   : > { %1275 = vmatmul.mubr.f32.gmra.mrb[128].mxu1 %v570_v6  ;;  %v2460_v6 = vsel %vm2300_vm0, %v8636_v16, 0.0 }
 0x344   : > { %v8722_v34 = vpop.xlane.xlu1 %2443 }
 0x348   : > { %v8727_v58 = vpop.xlane.xlu1 %3083 }
 0x34a   : > { %5425 = vperm.xlu1 %7046, %v4487_v26  }
 0x34c   : > { %v4643_v43 = vpop.permute.xlu1 %4642  ;;  %2458 = vadd.xlane.f32.xlu0 %v2457_v4  ;;  %v3594_v4 = vsub.f32 %v3338_v50, %v3466_v12  ;;  %v4488_v50 = vsub.f32 %v4232_v33, %v4360_v19  ;;  %v8772_v33 = vmul.f32 0.020408163, %v8323_v35 }
 0x34e   : > { %4667 = vperm.xlu1 %7046, %v8738_v24   ;;  %v3850_v51 = vadd.f32 1e-05, %v3594_v4 }
 0x350   : > { %v5406_v26 = vpop.permute.xlu1 %5405  ;;  %3098 = vadd.xlane.f32.xlu0 %v3097_v20  ;;  %7073 = vrsqrt.f32 %v3850_v51  ;;  %v572_v20 = vld [vmem:[%s7489_s14 + $0x810] sm:$0xff]  ;;  %v6148_v51 = vld [vmem:[%s8531_s25 + $0x38] sm:$0xff] }
 0x351   : > { %v6019_v38 = vadd.f32 %v5406_v26, %v5251_v48  ;;  %1980 = vmatmul.mubr.f32.gmra.mrb[128].mxu0 %v572_v20  ;;  %v3722_v26 = vld [vmem:[%s8280_s15 + $0x68] sm:$0xff]  ;;  %v3467_v20 = vmul.f32 %v8772_v33, %v8772_v33 }
 0x353   : > { %v6275_v5 = vadd.f32 %v6147_v61, %v6019_v38 }
 0x355   : > { %v6403_v37 = vmax.f32 %v6275_v5, 0.0 }
 0x357   : > { %6531 = vst.msk [vmem:[%s8543_s30 + $0x30] sm:$0xff] %vm2300_vm0, %v6403_v37  ;;  %v1241_v12 = vpop.f32.mrb[114].mxu1  ;;  %v5252_v37 = vmul.f32 %v4643_v43, %v7958_v27  ;;  %v2866_v27 = vmul.f32 %v8636_v16, %v8636_v16 }
 0x358   : > { %v1243_v62 = vpop.f32.mrb[115].mxu1 }
 0x359   : > { %v3100_v43 = vsel %vm2300_vm0, %v2866_v27, 0.0  ;;  %v575_v27 = vld [vmem:[%s7489_s14 + $0x828] sm:$0xff] }
 0x35a   : > { %v7074_v48 = vpop.eup %7073  ;;  %1279 = vmatprep.mubr.f32.mxu1 %v575_v27  ;;  %v4234_v27 = vld [vmem:[%s8300_s17 + $0x68] sm:$0xff] }
 0x35b   : > { %v8764_v38 = vmul.f32 %v7074_v48, %v3722_v26 }
 0x35f   : > { %v8752_v28 = vpop.xlane.xlu0 %2446 }
 0x363   : > { %v8761_v61 = vpop.xlane.xlu0 %3086 }
 0x364   : > { %v1946_v29 = vpop.f32.mrb[114].mxu0 }
 0x365   : > { %v8766_v4 = vadd.f32 %v1946_v29, %v1241_v12  ;;  %v1948_v5 = vpop.f32.mrb[115].mxu0  ;;  %v1246_v29 = vpop.f32.mrb[116].mxu1 }
 0x366   : > { %5430 = vperm.xlu0 %7045, %v4488_v50   ;;  %v3339_v50 = vmul.f32 0.020408163, %v8329_v2  ;;  %v1248_v5 = vpop.f32.mrb[117].mxu1 }
 0x367   : > { %12404 = vst [vmem:[#allocation92_spill] sm:$0xff] %v8766_v4 }
 0x368   : > { %v3595_v35 = vsub.f32 %v3339_v50, %v3467_v20  ;;  %v1951_v12 = vpop.f32.mrb[116].mxu0  ;;  %v2463_v20 = vsel %vm2300_vm0, %v8659_v52, 0.0  ;;  %v3723_v50 = vld [vmem:[%s8280_s15 + $0x70] sm:$0xff] }
 0x369   : > { %v1953_v2 = vpop.f32.mrb[117].mxu0  ;;  %v8784_v62 = vadd.f32 %v1951_v12, %v1246_v29  ;;  %v8805_v12 = vmul.f32 0.020408163, %v8333_v18 }
 0x36a   : > { %4672 = vperm.xlu0 %7045, %v8764_v38   ;;  %v3851_v26 = vadd.f32 1e-05, %v3595_v35  ;;  %v577_v35 = vld [vmem:[%s7489_s14 + $0x838] sm:$0xff]  ;;  %v3340_v2 = vmul.f32 0.020408163, %v8339_v30 }
 0x36b   : > { %v5411_v19 = vpop.permute.xlu0 %5410  ;;  %12405 = vst [vmem:[#allocation93_spill] sm:$0xff] %v8784_v62  ;;  %1984 = vmatprep.mubr.f32.mxu0 %v577_v35  ;;  %v579_v35 = vld [vmem:[%s7489_s14 + $0x848] sm:$0xff] }
 0x36c   : > { %v6020_v11 = vadd.f32 %v5411_v19, %v5252_v37  ;;  %7075 = vrsqrt.f32 %v3851_v26  ;;  %v4648_v37 = vpop.permute.xlu1 %4647  ;;  %v4233_v19 = vld [vmem:[%s8300_s17 + $0x60] sm:$0xff]  ;;  %v576_v26 = vld [vmem:[%s7489_s14 + $0x830] sm:$0xff] }
 0x36d   : > { %1985 = vmatmul.mubr.f32.gmra.mrb[130].mxu0 %v576_v26  ;;  %v5253_v5 = vmul.f32 %v4648_v37, %v7964_v36  ;;  %v4362_v37 = vmul.f32 %v8764_v38, %v8741_v49  ;;  %v578_v26 = vld [vmem:[%s7489_s14 + $0x840] sm:$0xff] }
 0x36e   : > { %v6276_v21 = vadd.f32 %v6148_v51, %v6020_v11  ;;  %v4361_v51 = vmul.f32 %v8738_v24, %v8706_v17 }
 0x36f   : > { %v4653_v36 = vpop.permute.xlu0 %4652 }
 0x370   : > { %v6404_v48 = vmax.f32 %v6276_v21, 0.0  ;;  %v4489_v21 = vsub.f32 %v4233_v19, %v4361_v51  ;;  %v6149_v51 = vld [vmem:[%s8531_s25 + $0x40] sm:$0xff] }
 0x372   : > { %6532 = vst.msk [vmem:[%s8543_s30 + $0x38] sm:$0xff] %vm2300_vm0, %v6404_v48  ;;  %2461 = vadd.xlane.f32.xlu1 %v2460_v6  ;;  %v2867_v48 = vmul.f32 %v8659_v52, %v8659_v52  ;;  %v597_v52 = vld [vmem:[%s7489_s14 + $0x8d8] sm:$0xff] }
 0x374   : > { %v3103_v29 = vsel %vm2300_vm0, %v2867_v48, 0.0 }
 0x376   : > { %3101 = vadd.xlane.f32.xlu1 %v3100_v43  ;;  %v7076_v6 = vpop.eup %7075  ;;  %v574_v43 = vld [vmem:[%s7489_s14 + $0x820] sm:$0xff] }
 0x377   : > { %1280 = vmatmul.mubr.f32.gmra.mrb[130].mxu1 %v574_v43  ;;  %v8802_v24 = vmul.f32 %v7076_v6, %v3723_v50  ;;  %v581_v43 = vld [vmem:[%s7489_s14 + $0x858] sm:$0xff] }
 0x378   : > { %1284 = vmatprep.mubr.f32.mxu1 %v579_v35  ;;  %1989 = vmatprep.mubr.f32.mxu0 %v581_v43 }
 0x37b   : > { %1285 = vmatmul.mubr.f32.gmra.mrb[132].mxu1 %v578_v26  ;;  %v2466_v26 = vsel %vm2300_vm0, %v8702_v56, 0.0 }
 0x385   : > { %v8789_v11 = vpop.xlane.xlu1 %2449 }
 0x387   : > { %5435 = vperm.xlu1 %7046, %v4489_v21   ;;  %v3468_v21 = vmul.f32 %v8805_v12, %v8805_v12 }
 0x389   : > { %v8800_v17 = vpop.xlane.xlu1 %3089  ;;  %2464 = vadd.xlane.f32.xlu0 %v2463_v20  ;;  %v3596_v6 = vsub.f32 %v3340_v2, %v3468_v21  ;;  %v4490_v2 = vsub.f32 %v4234_v27, %v4362_v37  ;;  %v8836_v27 = vmul.f32 0.020408163, %v8337_v45 }
 0x38b   : > { %4677 = vperm.xlu1 %7046, %v8802_v24   ;;  %v3852_v48 = vadd.f32 1e-05, %v3596_v6 }
 0x38d   : > { %v5416_v19 = vpop.permute.xlu1 %5415  ;;  %3104 = vadd.xlane.f32.xlu0 %v3103_v29  ;;  %7077 = vrsqrt.f32 %v3852_v48  ;;  %v580_v29 = vld [vmem:[%s7489_s14 + $0x850] sm:$0xff]  ;;  %v6150_v48 = vld [vmem:[%s8531_s25 + $0x48] sm:$0xff] }
 0x38e   : > { %v6021_v18 = vadd.f32 %v5416_v19, %v5253_v5  ;;  %1990 = vmatmul.mubr.f32.gmra.mrb[132].mxu0 %v580_v29  ;;  %v3724_v19 = vld [vmem:[%s8280_s15 + $0x78] sm:$0xff]  ;;  %v3469_v29 = vmul.f32 %v8836_v27, %v8836_v27 }
 0x390   : > { %v6277_v20 = vadd.f32 %v6149_v51, %v6021_v18 }
 0x392   : > { %v6405_v50 = vmax.f32 %v6277_v20, 0.0 }
 0x394   : > { %6533 = vst.msk [vmem:[%s8543_s30 + $0x40] sm:$0xff] %vm2300_vm0, %v6405_v50  ;;  %v5254_v50 = vmul.f32 %v4653_v36, %v7972_v44  ;;  %v2868_v44 = vmul.f32 %v8702_v56, %v8702_v56 }
 0x396   : > { %v3106_v36 = vsel %vm2300_vm0, %v2868_v44, 0.0  ;;  %v583_v44 = vld [vmem:[%s7489_s14 + $0x868] sm:$0xff] }
 0x397   : > { %v7078_v5 = vpop.eup %7077  ;;  %1289 = vmatprep.mubr.f32.mxu1 %v583_v44  ;;  %v4236_v44 = vld [vmem:[%s8300_s17 + $0x78] sm:$0xff] }
 0x398   : > { %v1251_v21 = vpop.f32.mrb[118].mxu1  ;;  %v8828_v18 = vmul.f32 %v7078_v5, %v3724_v19 }
 0x399   : > { %v1956_v49 = vpop.f32.mrb[118].mxu0  ;;  %v1253_v38 = vpop.f32.mrb[119].mxu1 }
 0x39a   : > { %v8830_v6 = vadd.f32 %v1956_v49, %v1251_v21  ;;  %v1958_v20 = vpop.f32.mrb[119].mxu0 }
 0x39c   : > { %v8816_v30 = vpop.xlane.xlu0 %2452  ;;  %12406 = vst [vmem:[#allocation94_spill] sm:$0xff] %v8830_v6 }
 0x39d   : > { %v1961_v21 = vpop.f32.mrb[120].mxu0 }
 0x39e   : > { %v1963_v20 = vpop.f32.mrb[121].mxu0 }
 0x3a0   : > { %v8825_v51 = vpop.xlane.xlu0 %3092 }
 0x3a3   : > { %5440 = vperm.xlu0 %7045, %v4490_v2   ;;  %v3341_v2 = vmul.f32 0.020408163, %v8345_v9 }
 0x3a5   : > { %v3597_v45 = vsub.f32 %v3341_v2, %v3469_v29  ;;  %v2469_v29 = vsel %vm2300_vm0, %v8720_v46, 0.0  ;;  %v3725_v2 = vld [vmem:[%s8280_s15 + $0x80] sm:$0xff] }
 0x3a7   : > { %4682 = vperm.xlu0 %7045, %v8828_v18   ;;  %v3853_v19 = vadd.f32 1e-05, %v3597_v45  ;;  %v1256_v49 = vpop.f32.mrb[120].mxu1  ;;  %v585_v45 = vld [vmem:[%s7489_s14 + $0x878] sm:$0xff] }
 0x3a8   : > { %v5421_v37 = vpop.permute.xlu0 %5420  ;;  %v8848_v9 = vadd.f32 %v1961_v21, %v1256_v49  ;;  %v1258_v38 = vpop.f32.mrb[121].mxu1  ;;  %1994 = vmatprep.mubr.f32.mxu0 %v585_v45  ;;  %v8869_v21 = vmul.f32 0.020408163, %v8347_v32  ;;  %v587_v45 = vld [vmem:[%s7489_s14 + $0x888] sm:$0xff] }
 0x3a9   : > { %v6022_v35 = vadd.f32 %v5421_v37, %v5254_v50  ;;  %7079 = vrsqrt.f32 %v3853_v19  ;;  %v4658_v50 = vpop.permute.xlu1 %4657  ;;  %v4235_v37 = vld [vmem:[%s8300_s17 + $0x70] sm:$0xff]  ;;  %v3342_v38 = vmul.f32 0.020408163, %v8355_v41 }
 0x3aa   : > { %12407 = vst [vmem:[#allocation95_spill] sm:$0xff] %v8848_v9  ;;  %v584_v19 = vld [vmem:[%s7489_s14 + $0x870] sm:$0xff]  ;;  %v5255_v20 = vmul.f32 %v4658_v50, %v7978_v53  ;;  %v4364_v50 = vmul.f32 %v8828_v18, %v8805_v12 }
 0x3ab   : > { %v6278_v43 = vadd.f32 %v6150_v48, %v6022_v35  ;;  %v4363_v48 = vmul.f32 %v8802_v24, %v8772_v33  ;;  %1995 = vmatmul.mubr.f32.gmra.mrb[134].mxu0 %v584_v19  ;;  %v586_v19 = vld [vmem:[%s7489_s14 + $0x880] sm:$0xff] }
 0x3ac   : > { %v4663_v53 = vpop.permute.xlu0 %4662 }
 0x3ad   : > { %v6406_v5 = vmax.f32 %v6278_v43, 0.0  ;;  %v4491_v43 = vsub.f32 %v4235_v37, %v4363_v48  ;;  %v6151_v48 = vld [vmem:[%s8531_s25 + $0x50] sm:$0xff] }
 0x3af   : > { %6534 = vst.msk [vmem:[%s8543_s30 + $0x48] sm:$0xff] %vm2300_vm0, %v6406_v5  ;;  %2467 = vadd.xlane.f32.xlu1 %v2466_v26  ;;  %v2869_v5 = vmul.f32 %v8720_v46, %v8720_v46  ;;  %v595_v46 = vld [vmem:[%s7489_s14 + $0x8c8] sm:$0xff] }
 0x3b1   : > { %v3109_v49 = vsel %vm2300_vm0, %v2869_v5, 0.0 }
 0x3b3   : > { %3107 = vadd.xlane.f32.xlu1 %v3106_v36  ;;  %v7080_v26 = vpop.eup %7079  ;;  %v582_v36 = vld [vmem:[%s7489_s14 + $0x860] sm:$0xff] }
 0x3b4   : > { %1290 = vmatmul.mubr.f32.gmra.mrb[134].mxu1 %v582_v36  ;;  %v8866_v24 = vmul.f32 %v7080_v26, %v3725_v2  ;;  %v589_v36 = vld [vmem:[%s7489_s14 + $0x898] sm:$0xff] }
 0x3b5   : > { %1294 = vmatprep.mubr.f32.mxu1 %v587_v45  ;;  %1999 = vmatprep.mubr.f32.mxu0 %v589_v36 }
 0x3b8   : > { %1295 = vmatmul.mubr.f32.gmra.mrb[136].mxu1 %v586_v19 }
 0x3c2   : > { %v8853_v35 = vpop.xlane.xlu1 %2455 }
 0x3c4   : > { %5445 = vperm.xlu1 %7046, %v4491_v43   ;;  %v3470_v43 = vmul.f32 %v8869_v21, %v8869_v21 }
 0x3c6   : > { %v8864_v33 = vpop.xlane.xlu1 %3095  ;;  %2470 = vadd.xlane.f32.xlu0 %v2469_v29  ;;  %v3598_v26 = vsub.f32 %v3342_v38, %v3470_v43  ;;  %v4492_v38 = vsub.f32 %v4236_v44, %v4364_v50  ;;  %v12409_v44 = vld [vmem:[#allocation40_spill] sm:$0xff] }
 0x3c7   : > { %v8900_v45 = vmul.f32 0.020408163, %v12409_v44 }
 0x3c8   : > { %4687 = vperm.xlu1 %7046, %v8866_v24   ;;  %v3854_v5 = vadd.f32 1e-05, %v3598_v26 }
 0x3ca   : > { %v5426_v37 = vpop.permute.xlu1 %5425  ;;  %3110 = vadd.xlane.f32.xlu0 %v3109_v49  ;;  %7081 = vrsqrt.f32 %v3854_v5  ;;  %v588_v49 = vld [vmem:[%s7489_s14 + $0x890] sm:$0xff]  ;;  %v6152_v5 = vld [vmem:[%s8531_s25 + $0x58] sm:$0xff] }
 0x3cb   : > { %v6023_v32 = vadd.f32 %v5426_v37, %v5255_v20  ;;  %2000 = vmatmul.mubr.f32.gmra.mrb[136].mxu0 %v588_v49  ;;  %v3726_v37 = vld [vmem:[%s8280_s15 + $0x88] sm:$0xff]  ;;  %v2472_v49 = vsel %vm2300_vm0, %v8766_v4, 0.0 }
 0x3cd   : > { %v6279_v29 = vadd.f32 %v6151_v48, %v6023_v32  ;;  %v1261_v43 = vpop.f32.mrb[122].mxu1 }
 0x3ce   : > { %v1263_v18 = vpop.f32.mrb[123].mxu1 }
 0x3cf   : > { %v6407_v2 = vmax.f32 %v6279_v29, 0.0 }
 0x3d1   : > { %6535 = vst.msk [vmem:[%s8543_s30 + $0x50] sm:$0xff] %vm2300_vm0, %v6407_v2  ;;  %v5256_v2 = vmul.f32 %v4663_v53, %v7986_v63  ;;  %v2870_v63 = vmul.f32 %v8766_v4, %v8766_v4  ;;  %v605_v4 = vld [vmem:[%s7489_s14 + $0x918] sm:$0xff] }
 0x3d4   : > { %v7082_v20 = vpop.eup %7081  ;;  %v1966_v12 = vpop.f32.mrb[122].mxu0 }
 0x3d5   : > { %v8892_v32 = vmul.f32 %v7082_v20, %v3726_v37  ;;  %v8894_v26 = vadd.f32 %v1966_v12, %v1261_v43  ;;  %v1968_v29 = vpop.f32.mrb[123].mxu0  ;;  %v12410_v20 = vld [vmem:[#allocation41_spill] sm:$0xff]  ;;  %v3112_v12 = vsel %vm2300_vm0, %v2870_v63, 0.0  ;;  %v3727_v63 = vld [vmem:[%s8280_s15 + $0x90] sm:$0xff] }
 0x3d6   : > { %v3343_v37 = vmul.f32 0.020408163, %v12410_v20 }
 0x3d7   : > { %12408 = vst [vmem:[#allocation96_spill] sm:$0xff] %v8894_v26 }
 0x3d8   : > { %v1971_v29 = vpop.f32.mrb[124].mxu0 }
 0x3d9   : > { %v8880_v41 = vpop.xlane.xlu0 %2458  ;;  %v1973_v44 = vpop.f32.mrb[125].mxu0 }
 0x3dd   : > { %v8889_v48 = vpop.xlane.xlu0 %3098 }
 0x3e0   : > { %5450 = vperm.xlu0 %7045, %v4492_v38   ;;  %v3471_v38 = vmul.f32 %v8900_v45, %v8900_v45 }
 0x3e2   : > { %v3599_v53 = vsub.f32 %v3343_v37, %v3471_v38 }
 0x3e4   : > { %4692 = vperm.xlu0 %7045, %v8892_v32   ;;  %v3855_v18 = vadd.f32 1e-05, %v3599_v53  ;;  %v2871_v53 = vmul.f32 %v8784_v62, %v8784_v62 }
 0x3e5   : > { %v5431_v50 = vpop.permute.xlu0 %5430 }
 0x3e6   : > { %v6024_v36 = vadd.f32 %v5431_v50, %v5256_v2  ;;  %7083 = vrsqrt.f32 %v3855_v18  ;;  %v1266_v2 = vpop.f32.mrb[124].mxu1  ;;  %v593_v18 = vld [vmem:[%s7489_s14 + $0x8b8] sm:$0xff] }
 0x3e7   : > { %v1268_v50 = vpop.f32.mrb[125].mxu1  ;;  %2004 = vmatprep.mubr.f32.mxu0 %v593_v18 }
 0x3e8   : > { %v6280_v19 = vadd.f32 %v6152_v5, %v6024_v36  ;;  %v8912_v5 = vadd.f32 %v1971_v29, %v1266_v2  ;;  %v4668_v36 = vpop.permute.xlu1 %4667  ;;  %v590_v29 = vld [vmem:[%s7489_s14 + $0x8a0] sm:$0xff]  ;;  %v592_v2 = vld [vmem:[%s7489_s14 + $0x8b0] sm:$0xff]  ;;  %v12412_v50 = vld [vmem:[#allocation42_spill] sm:$0xff] }
 0x3e9   : > { %2005 = vmatmul.mubr.f32.gmra.mrb[138].mxu0 %v592_v2  ;;  %v8933_v44 = vmul.f32 0.020408163, %v12412_v50 }
 0x3ea   : > { %v6408_v43 = vmax.f32 %v6280_v19, 0.0  ;;  %12411 = vst [vmem:[#allocation40_spill] sm:$0xff] %v8912_v5  ;;  %v4365_v19 = vmul.f32 %v8866_v24, %v8836_v27  ;;  %2009 = vmatprep.mubr.f32.mxu0 %v597_v52 }
 0x3ec   : > { %6536 = vst.msk [vmem:[%s8543_s30 + $0x58] sm:$0xff] %vm2300_vm0, %v6408_v43  ;;  %2473 = vadd.xlane.f32.xlu1 %v2472_v49  ;;  %v4237_v49 = vld [vmem:[%s8300_s17 + $0x80] sm:$0xff]  ;;  %v2475_v43 = vsel %vm2300_vm0, %v8784_v62, 0.0 }
 0x3ed   : > { %v4493_v20 = vsub.f32 %v4237_v49, %v4365_v19  ;;  %v3115_v19 = vsel %vm2300_vm0, %v2871_v53, 0.0  ;;  %v12413_v49 = vld [vmem:[#allocation44_spill] sm:$0xff] }
 0x3f0   : > { %3113 = vadd.xlane.f32.xlu1 %v3112_v12  ;;  %v7084_v37 = vpop.eup %7083  ;;  %v591_v12 = vld [vmem:[%s7489_s14 + $0x8a8] sm:$0xff] }
 0x3f1   : > { %1299 = vmatprep.mubr.f32.mxu1 %v591_v12  ;;  %v8930_v24 = vmul.f32 %v7084_v37, %v3727_v63  ;;  %v12414_v12 = vld [vmem:[#allocation5_spill] sm:$0xff]  ;;  %v3472_v37 = vmul.f32 %v8933_v44, %v8933_v44 }
 0x3f2   : > { %1300 = vmatmul.mubr.f32.gmra.mrb[138].mxu1 %v590_v29  ;;  %v5257_v18 = vmul.f32 %v4668_v36, %v12414_v12  ;;  %v6153_v29 = vld [vmem:[%s8531_s25 + $0x60] sm:$0xff]  ;;  %v4673_v36 = vpop.permute.xlu0 %4672  ;;  %v4238_v12 = vld [vmem:[%s8300_s17 + $0x88] sm:$0xff] }
 0x3f3   : > { %1304 = vmatprep.mubr.f32.mxu1 %v595_v46  ;;  %v12416_v46 = vld [vmem:[#allocation6_spill] sm:$0xff] }
 0x3ff   : > { %v8917_v38 = vpop.xlane.xlu1 %2461 }
 0x401   : > { %5455 = vperm.xlu1 %7046, %v4493_v20   ;;  %v3344_v20 = vmul.f32 0.020408163, %v12413_v49 }
 0x403   : > { %v8928_v27 = vpop.xlane.xlu1 %3101  ;;  %2476 = vadd.xlane.f32.xlu0 %v2475_v43  ;;  %v3600_v2 = vsub.f32 %v3344_v20, %v3472_v37  ;;  %v596_v20 = vld [vmem:[%s7489_s14 + $0x8d0] sm:$0xff]  ;;  %v3728_v37 = vld [vmem:[%s8280_s15 + $0x98] sm:$0xff] }
 0x404   : > { %2010 = vmatmul.mubr.f32.gmra.mrb[140].mxu0 %v596_v20 }
 0x405   : > { %4697 = vperm.xlu1 %7046, %v8930_v24   ;;  %v3856_v62 = vadd.f32 1e-05, %v3600_v2 }
 0x407   : > { %v5436_v43 = vpop.permute.xlu1 %5435  ;;  %3116 = vadd.xlane.f32.xlu0 %v3115_v19  ;;  %7085 = vrsqrt.f32 %v3856_v62  ;;  %v4366_v19 = vmul.f32 %v8892_v32, %v8869_v21 }
 0x408   : > { %v6025_v63 = vadd.f32 %v5436_v43, %v5257_v18  ;;  %v594_v18 = vld [vmem:[%s7489_s14 + $0x8c0] sm:$0xff] }
 0x409   : > { %1305 = vmatmul.mubr.f32.gmra.mrb[140].mxu1 %v594_v18  ;;  %v6154_v18 = vld [vmem:[%s8531_s25 + $0x68] sm:$0xff] }
 0x40a   : > { %v6281_v53 = vadd.f32 %v6153_v29, %v6025_v63  ;;  %v4494_v29 = vsub.f32 %v4238_v12, %v4366_v19  ;;  %v12417_v12 = vld [vmem:[#allocation43_spill] sm:$0xff] }
 0x40b   : > { %v8964_v20 = vmul.f32 0.020408163, %v12417_v12 }
 0x40c   : > { %v6409_v50 = vmax.f32 %v6281_v53, 0.0 }
 0x40e   : > { %6537 = vst.msk [vmem:[%s8543_s30 + $0x60] sm:$0xff] %vm2300_vm0, %v6409_v50  ;;  %v1271_v63 = vpop.f32.mrb[126].mxu1  ;;  %v1976_v21 = vpop.f32.mrb[126].mxu0  ;;  %v5258_v50 = vmul.f32 %v4673_v36, %v12416_v46  ;;  %v2872_v36 = vmul.f32 %v8830_v6, %v8830_v6 }
 0x40f   : > { %v1273_v32 = vpop.f32.mrb[127].mxu1  ;;  %v8958_v53 = vadd.f32 %v1976_v21, %v1271_v63  ;;  %v1978_v52 = vpop.f32.mrb[127].mxu0  ;;  %v12418_v63 = vld [vmem:[#allocation45_spill] sm:$0xff] }
 0x410   : > { %v3345_v21 = vmul.f32 0.020408163, %v12418_v63  ;;  %v3118_v46 = vsel %vm2300_vm0, %v2872_v36, 0.0  ;;  %v4678_v63 = vpop.permute.xlu1 %4677 }
 0x411   : > { %v7086_v43 = vpop.eup %7085  ;;  %12415 = vst [vmem:[#allocation41_spill] sm:$0xff] %v8958_v53 }
 0x412   : > { %v8956_v2 = vmul.f32 %v7086_v43, %v3728_v37  ;;  %v2478_v43 = vsel %vm2300_vm0, %v8830_v6, 0.0  ;;  %v3473_v37 = vmul.f32 %v8964_v20, %v8964_v20 }
 0x414   : > { %v3601_v52 = vsub.f32 %v3345_v21, %v3473_v37  ;;  %v4239_v37 = vld [vmem:[%s8300_s17 + $0x90] sm:$0xff] }
 0x416   : > { %v8944_v49 = vpop.xlane.xlu0 %2464 }
 0x41a   : > { %v8953_v62 = vpop.xlane.xlu0 %3104 }
 0x41d   : > { %5460 = vperm.xlu0 %7045, %v4494_v29  }
 0x421   : > { %4702 = vperm.xlu0 %7045, %v8956_v2  }
 0x422   : > { %v5441_v19 = vpop.permute.xlu0 %5440 }
 0x423   : > { %v6026_v57 = vadd.f32 %v5441_v19, %v5258_v50 }
 0x424   : > { %v1981_v50 = vpop.f32.mrb[128].mxu0 }
 0x425   : > { %v6282_v29 = vadd.f32 %v6154_v18, %v6026_v57  ;;  %v3857_v57 = vadd.f32 1e-05, %v3601_v52  ;;  %v1276_v18 = vpop.f32.mrb[128].mxu1  ;;  %v2481_v52 = vsel %vm2300_vm0, %v8848_v9, 0.0 }
 0x426   : > { %v8976_v19 = vadd.f32 %v1981_v50, %v1276_v18  ;;  %v1278_v12 = vpop.f32.mrb[129].mxu1  ;;  %v599_v50 = vld [vmem:[%s7489_s14 + $0x8e8] sm:$0xff]  ;;  %v601_v18 = vld [vmem:[%s7489_s14 + $0x8f8] sm:$0xff] }
 0x427   : > { %v6410_v32 = vmax.f32 %v6282_v29, 0.0  ;;  %7087 = vrsqrt.f32 %v3857_v57  ;;  %v1983_v29 = vpop.f32.mrb[129].mxu0  ;;  %v2873_v57 = vmul.f32 %v8848_v9, %v8848_v9  ;;  %1309 = vmatprep.mubr.f32.mxu1 %v599_v50  ;;  %v598_v12 = vld [vmem:[%s7489_s14 + $0x8e0] sm:$0xff]  ;;  %2014 = vmatprep.mubr.f32.mxu0 %v601_v18  ;;  %v12421_v50 = vld [vmem:[#allocation7_spill] sm:$0xff] }
 0x428   : > { %12419 = vst [vmem:[#allocation42_spill] sm:$0xff] %v8976_v19  ;;  %v600_v29 = vld [vmem:[%s7489_s14 + $0x8f0] sm:$0xff]  ;;  %1310 = vmatmul.mubr.f32.gmra.mrb[142].mxu1 %v598_v12  ;;  %v5259_v18 = vmul.f32 %v4678_v63, %v12421_v50  ;;  %v4240_v50 = vld [vmem:[%s8300_s17 + $0x98] sm:$0xff] }
 0x429   : > { %6538 = vst.msk [vmem:[%s8543_s30 + $0x68] sm:$0xff] %vm2300_vm0, %v6410_v32  ;;  %2479 = vadd.xlane.f32.xlu1 %v2478_v43  ;;  %v4367_v43 = vmul.f32 %v8930_v24, %v8900_v45  ;;  %2015 = vmatmul.mubr.f32.gmra.mrb[142].mxu0 %v600_v29  ;;  %v3121_v9 = vsel %vm2300_vm0, %v2873_v57, 0.0  ;;  %v6155_v12 = vld [vmem:[%s8531_s25 + $0x70] sm:$0xff] }
 0x42a   : > { %1314 = vmatprep.mubr.f32.mxu1 %v603_v23  ;;  %2019 = vmatprep.mubr.f32.mxu0 %v605_v4  ;;  %v12423_v4 = vld [vmem:[#allocation8_spill] sm:$0xff] }
 0x42b   : > { %v4495_v32 = vsub.f32 %v4239_v37, %v4367_v43  ;;  %v12420_v43 = vld [vmem:[#allocation46_spill] sm:$0xff] }
 0x42c   : > { %v8997_v37 = vmul.f32 0.020408163, %v12420_v43 }
 0x42d   : > { %3119 = vadd.xlane.f32.xlu1 %v3118_v46  ;;  %v3729_v46 = vld [vmem:[%s8280_s15 + $0xa0] sm:$0xff] }
 0x431   : > { %v7088_v36 = vpop.eup %7087 }
 0x432   : > { %v8994_v24 = vmul.f32 %v7088_v36, %v3729_v46  ;;  %v3474_v36 = vmul.f32 %v8997_v37, %v8997_v37 }
 0x43c   : > { %v8981_v21 = vpop.xlane.xlu1 %2467 }
 0x43e   : > { %5465 = vperm.xlu1 %7046, %v4495_v32   ;;  %v3346_v32 = vmul.f32 0.020408163, %v8385_v60  ;;  %v4683_v60 = vpop.permute.xlu0 %4682 }
 0x440   : > { %v8992_v45 = vpop.xlane.xlu1 %3107  ;;  %2482 = vadd.xlane.f32.xlu0 %v2481_v52  ;;  %v3602_v29 = vsub.f32 %v3346_v32, %v3474_v36  ;;  %v604_v32 = vld [vmem:[%s7489_s14 + $0x910] sm:$0xff]  ;;  %v3730_v36 = vld [vmem:[%s8280_s15 + $0xa8] sm:$0xff] }
 0x441   : > { %2020 = vmatmul.mubr.f32.gmra.mrb[144].mxu0 %v604_v32 }
 0x442   : > { %4707 = vperm.xlu1 %7046, %v8994_v24   ;;  %v3858_v6 = vadd.f32 1e-05, %v3602_v29 }
 0x444   : > { %v5446_v52 = vpop.permute.xlu1 %5445  ;;  %3122 = vadd.xlane.f32.xlu0 %v3121_v9  ;;  %7089 = vrsqrt.f32 %v3858_v6  ;;  %v4368_v9 = vmul.f32 %v8956_v2, %v8933_v44  ;;  %v1986_v44 = vpop.f32.mrb[130].mxu0 }
 0x445   : > { %v6027_v46 = vadd.f32 %v5446_v52, %v5259_v18  ;;  %v602_v18 = vld [vmem:[%s7489_s14 + $0x900] sm:$0xff]  ;;  %v1988_v23 = vpop.f32.mrb[131].mxu0 }
 0x446   : > { %1315 = vmatmul.mubr.f32.gmra.mrb[144].mxu1 %v602_v18  ;;  %v6156_v18 = vld [vmem:[%s8531_s25 + $0x78] sm:$0xff] }
 0x447   : > { %v6283_v57 = vadd.f32 %v6155_v12, %v6027_v46  ;;  %v4496_v12 = vsub.f32 %v4240_v50, %v4368_v9  ;;  %v12424_v50 = vld [vmem:[#allocation47_spill] sm:$0xff] }
 0x448   : > { %v9028_v32 = vmul.f32 0.020408163, %v12424_v50  ;;  %v4688_v50 = vpop.permute.xlu1 %4687 }
 0x449   : > { %v6411_v43 = vmax.f32 %v6283_v57, 0.0 }
 0x44a   : > { %v1281_v46 = vpop.f32.mrb[130].mxu1 }
 0x44b   : > { %6539 = vst.msk [vmem:[%s8543_s30 + $0x70] sm:$0xff] %vm2300_vm0, %v6411_v43  ;;  %v1283_v2 = vpop.f32.mrb[131].mxu1  ;;  %v9022_v57 = vadd.f32 %v1986_v44, %v1281_v46  ;;  %v5260_v43 = vmul.f32 %v4683_v60, %v12423_v4  ;;  %v3347_v46 = vmul.f32 0.020408163, %v8392_v42  ;;  %v2874_v60 = vmul.f32 %v8894_v26, %v8894_v26 }
 0x44d   : > { %12422 = vst [vmem:[#allocation44_spill] sm:$0xff] %v9022_v57  ;;  %v3124_v23 = vsel %vm2300_vm0, %v2874_v60, 0.0  ;;  %v2487_v60 = vsel %vm2300_vm0, %v8912_v5, 0.0 }
 0x44e   : > { %v7090_v52 = vpop.eup %7089 }
 0x44f   : > { %v9020_v29 = vmul.f32 %v7090_v52, %v3730_v36  ;;  %v2484_v52 = vsel %vm2300_vm0, %v8894_v26, 0.0  ;;  %v3475_v36 = vmul.f32 %v9028_v32, %v9028_v32  ;;  %v613_v26 = vld [vmem:[%s7489_s14 + $0x958] sm:$0xff] }
 0x451   : > { %v3603_v2 = vsub.f32 %v3347_v46, %v3475_v36 }
 0x453   : > { %v9008_v63 = vpop.xlane.xlu0 %2470 }
 0x457   : > { %v9017_v6 = vpop.xlane.xlu0 %3110 }
 0x45a   : > { %5470 = vperm.xlu0 %7045, %v4496_v12  }
 0x45e   : > { %4712 = vperm.xlu0 %7045, %v9020_v29  }
 0x45f   : > { %v5451_v9 = vpop.permute.xlu0 %5450 }
 0x460   : > { %v6028_v0 = vadd.f32 %v5451_v9, %v5260_v43  ;;  %v1286_v43 = vpop.f32.mrb[132].mxu1 }
 0x461   : > { %v1991_v4 = vpop.f32.mrb[132].mxu0 }
 0x462   : > { %v6284_v12 = vadd.f32 %v6156_v18, %v6028_v0  ;;  %v3859_v0 = vadd.f32 1e-05, %v3603_v2  ;;  %v9040_v42 = vadd.f32 %v1991_v4, %v1286_v43  ;;  %v1288_v18 = vpop.f32.mrb[133].mxu1  ;;  %v1993_v9 = vpop.f32.mrb[133].mxu0  ;;  %v3731_v2 = vld [vmem:[%s8280_s15 + $0xb0] sm:$0xff]  ;;  %v609_v4 = vld [vmem:[%s7489_s14 + $0x938] sm:$0xff] }
 0x463   : > { %v606_v43 = vld [vmem:[%s7489_s14 + $0x920] sm:$0xff]  ;;  %v608_v18 = vld [vmem:[%s7489_s14 + $0x930] sm:$0xff]  ;;  %2024 = vmatprep.mubr.f32.mxu0 %v609_v4  ;;  %v9061_v9 = vmul.f32 0.020408163, %v8395_v10 }
 0x464   : > { %v6412_v44 = vmax.f32 %v6284_v12, 0.0  ;;  %7091 = vrsqrt.f32 %v3859_v0  ;;  %12425 = vst [vmem:[#allocation5_spill] sm:$0xff] %v9040_v42  ;;  %v4369_v12 = vmul.f32 %v8994_v24, %v8964_v20  ;;  %v607_v0 = vld [vmem:[%s7489_s14 + $0x928] sm:$0xff]  ;;  %2025 = vmatmul.mubr.f32.gmra.mrb[146].mxu0 %v608_v18  ;;  %v6157_v4 = vld [vmem:[%s8531_s25 + $0x80] sm:$0xff] }
 0x465   : > { %1319 = vmatprep.mubr.f32.mxu1 %v607_v0  ;;  %2029 = vmatprep.mubr.f32.mxu0 %v613_v26 }
 0x466   : > { %6540 = vst.msk [vmem:[%s8543_s30 + $0x78] sm:$0xff] %vm2300_vm0, %v6412_v44  ;;  %2485 = vadd.xlane.f32.xlu1 %v2484_v52  ;;  %v4241_v52 = vld [vmem:[%s8300_s17 + $0xa0] sm:$0xff]  ;;  %1320 = vmatmul.mubr.f32.gmra.mrb[146].mxu1 %v606_v43 }
 0x467   : > { %v4497_v46 = vsub.f32 %v4241_v52, %v4369_v12  ;;  %v3348_v52 = vmul.f32 0.020408163, %v8402_v7  ;;  %v4693_v7 = vpop.permute.xlu0 %4692 }
 0x46a   : > { %3125 = vadd.xlane.f32.xlu1 %v3124_v23  ;;  %v2875_v23 = vmul.f32 %v8912_v5, %v8912_v5  ;;  %v611_v5 = vld [vmem:[%s7489_s14 + $0x948] sm:$0xff] }
 0x46b   : > { %1324 = vmatprep.mubr.f32.mxu1 %v611_v5  ;;  %v12428_v5 = vld [vmem:[#allocation10_spill] sm:$0xff] }
 0x46c   : > { %v3127_v12 = vsel %vm2300_vm0, %v2875_v23, 0.0 }
 0x46e   : > { %v7092_v44 = vpop.eup %7091 }
 0x46f   : > { %v9058_v24 = vmul.f32 %v7092_v44, %v3731_v2  ;;  %v3476_v44 = vmul.f32 %v9061_v9, %v9061_v9 }
 0x471   : > { %v3604_v2 = vsub.f32 %v3348_v52, %v3476_v44  ;;  %v612_v52 = vld [vmem:[%s7489_s14 + $0x950] sm:$0xff] }
 0x472   : > { %2030 = vmatmul.mubr.f32.gmra.mrb[148].mxu0 %v612_v52 }
 0x473   : > { %v3860_v18 = vadd.f32 1e-05, %v3604_v2 }
 0x475   : > { %7093 = vrsqrt.f32 %v3860_v18  ;;  %v5262_v18 = vmul.f32 %v4693_v7, %v12428_v5  ;;  %v2876_v7 = vmul.f32 %v8958_v53, %v8958_v53 }
 0x477   : > { %v3130_v5 = vsel %vm2300_vm0, %v2876_v7, 0.0 }
 0x479   : > { %v9045_v36 = vpop.xlane.xlu1 %2473 }
 0x47b   : > { %5475 = vperm.xlu1 %7046, %v4497_v46   ;;  %v12426_v46 = vld [vmem:[#allocation9_spill] sm:$0xff] }
 0x47c   : > { %v5261_v0 = vmul.f32 %v4688_v50, %v12426_v46  ;;  %v4242_v46 = vld [vmem:[%s8300_s17 + $0xa8] sm:$0xff] }
 0x47d   : > { %v9056_v20 = vpop.xlane.xlu1 %3113  ;;  %2488 = vadd.xlane.f32.xlu0 %v2487_v60 }
 0x47f   : > { %4717 = vperm.xlu1 %7046, %v9058_v24  }
 0x481   : > { %v5456_v60 = vpop.permute.xlu1 %5455  ;;  %3128 = vadd.xlane.f32.xlu0 %v3127_v12  ;;  %v4370_v12 = vmul.f32 %v9020_v29, %v8997_v37  ;;  %v1996_v37 = vpop.f32.mrb[134].mxu0 }
 0x482   : > { %v6029_v10 = vadd.f32 %v5456_v60, %v5261_v0  ;;  %v610_v0 = vld [vmem:[%s7489_s14 + $0x940] sm:$0xff]  ;;  %v7094_v60 = vpop.eup %7093  ;;  %v1998_v26 = vpop.f32.mrb[135].mxu0 }
 0x483   : > { %1325 = vmatmul.mubr.f32.gmra.mrb[148].mxu1 %v610_v0  ;;  %v6158_v0 = vld [vmem:[%s8531_s25 + $0x88] sm:$0xff] }
 0x484   : > { %v6285_v23 = vadd.f32 %v6157_v4, %v6029_v10  ;;  %v4498_v4 = vsub.f32 %v4242_v46, %v4370_v12  ;;  %v3732_v10 = vld [vmem:[%s8280_s15 + $0xb8] sm:$0xff]  ;;  %v12429_v46 = vld [vmem:[#allocation49_spill] sm:$0xff] }
 0x485   : > { %v9092_v52 = vmul.f32 0.020408163, %v12429_v46 }
 0x486   : > { %v6413_v43 = vmax.f32 %v6285_v23, 0.0  ;;  %v9084_v23 = vmul.f32 %v7094_v60, %v3732_v10  ;;  %v2490_v60 = vsel %vm2300_vm0, %v8958_v53, 0.0  ;;  %v12434_v53 = vld [vmem:[#allocation11_spill] sm:$0xff] }
 0x487   : > { %v1291_v2 = vpop.f32.mrb[134].mxu1  ;;  %v3477_v10 = vmul.f32 %v9092_v52, %v9092_v52 }
 0x488   : > { %6541 = vst.msk [vmem:[%s8543_s30 + $0x80] sm:$0xff] %vm2300_vm0, %v6413_v43  ;;  %v1293_v29 = vpop.f32.mrb[135].mxu1  ;;  %v9086_v43 = vadd.f32 %v1996_v37, %v1291_v2  ;;  %v12430_v2 = vld [vmem:[#allocation50_spill] sm:$0xff] }
 0x489   : > { %v3349_v37 = vmul.f32 0.020408163, %v12430_v2  ;;  %v4698_v2 = vpop.permute.xlu1 %4697 }
 0x48a   : > { %12427 = vst [vmem:[#allocation6_spill] sm:$0xff] %v9086_v43 }
 0x48b   : > { %v3605_v26 = vsub.f32 %v3349_v37, %v3477_v10  ;;  %v4243_v10 = vld [vmem:[%s8300_s17 + $0xb0] sm:$0xff] }
 0x490   : > { %v9072_v50 = vpop.xlane.xlu0 %2476 }
 0x494   : > { %v9081_v44 = vpop.xlane.xlu0 %3116 }
 0x497   : > { %5480 = vperm.xlu0 %7045, %v4498_v4  }
 0x49b   : > { %4722 = vperm.xlu0 %7045, %v9084_v23  }
 0x49c   : > { %v5461_v12 = vpop.permute.xlu0 %5460 }
 0x49d   : > { %v6030_v56 = vadd.f32 %v5461_v12, %v5262_v18 }
 0x49e   : > { %v2001_v18 = vpop.f32.mrb[136].mxu0 }
 0x49f   : > { %v6286_v4 = vadd.f32 %v6158_v0, %v6030_v56  ;;  %v3861_v56 = vadd.f32 1e-05, %v3605_v26  ;;  %v1296_v0 = vpop.f32.mrb[136].mxu1  ;;  %v2493_v26 = vsel %vm2300_vm0, %v8976_v19, 0.0 }
 0x4a0   : > { %v9104_v12 = vadd.f32 %v2001_v18, %v1296_v0  ;;  %v1298_v46 = vpop.f32.mrb[137].mxu1  ;;  %v615_v18 = vld [vmem:[%s7489_s14 + $0x968] sm:$0xff]  ;;  %v617_v0 = vld [vmem:[%s7489_s14 + $0x978] sm:$0xff] }
 0x4a1   : > { %v6414_v29 = vmax.f32 %v6286_v4, 0.0  ;;  %7095 = vrsqrt.f32 %v3861_v56  ;;  %v2003_v4 = vpop.f32.mrb[137].mxu0  ;;  %v2877_v56 = vmul.f32 %v8976_v19, %v8976_v19  ;;  %1329 = vmatprep.mubr.f32.mxu1 %v615_v18  ;;  %v614_v46 = vld [vmem:[%s7489_s14 + $0x960] sm:$0xff]  ;;  %2034 = vmatprep.mubr.f32.mxu0 %v617_v0  ;;  %v5263_v0 = vmul.f32 %v4698_v2, %v12434_v53  ;;  %v4703_v53 = vpop.permute.xlu0 %4702 }
 0x4a2   : > { %12431 = vst [vmem:[#allocation43_spill] sm:$0xff] %v9104_v12  ;;  %v616_v4 = vld [vmem:[%s7489_s14 + $0x970] sm:$0xff]  ;;  %1330 = vmatmul.mubr.f32.gmra.mrb[150].mxu1 %v614_v46 }
 0x4a3   : > { %6542 = vst.msk [vmem:[%s8543_s30 + $0x88] sm:$0xff] %vm2300_vm0, %v6414_v29  ;;  %2491 = vadd.xlane.f32.xlu1 %v2490_v60  ;;  %v4371_v60 = vmul.f32 %v9058_v24, %v9028_v32  ;;  %2035 = vmatmul.mubr.f32.gmra.mrb[150].mxu0 %v616_v4  ;;  %v3133_v19 = vsel %vm2300_vm0, %v2877_v56, 0.0  ;;  %v6159_v46 = vld [vmem:[%s8531_s25 + $0x90] sm:$0xff] }
 0x4a4   : > { %1334 = vmatprep.mubr.f32.mxu1 %v619_v31  ;;  %2039 = vmatprep.mubr.f32.mxu0 %v621_v8  ;;  %v12437_v31 = vld [vmem:[#allocation12_spill] sm:$0xff] }
 0x4a5   : > { %v4499_v29 = vsub.f32 %v4243_v10, %v4371_v60  ;;  %v12432_v60 = vld [vmem:[#allocation51_spill] sm:$0xff] }
 0x4a6   : > { %v9125_v10 = vmul.f32 0.020408163, %v12432_v60 }
 0x4a7   : > { %3131 = vadd.xlane.f32.xlu1 %v3130_v5  ;;  %v3733_v5 = vld [vmem:[%s8280_s15 + $0xc0] sm:$0xff] }
 0x4ab   : > { %v7096_v7 = vpop.eup %7095 }
 0x4ac   : > { %v9122_v24 = vmul.f32 %v7096_v7, %v3733_v5  ;;  %v3478_v7 = vmul.f32 %v9125_v10, %v9125_v10 }
 0x4b6   : > { %v9109_v37 = vpop.xlane.xlu1 %2479 }
 0x4b8   : > { %5485 = vperm.xlu1 %7046, %v4499_v29   ;;  %v12433_v29 = vld [vmem:[#allocation53_spill] sm:$0xff] }
 0x4b9   : > { %v3350_v18 = vmul.f32 0.020408163, %v12433_v29  ;;  %v4244_v29 = vld [vmem:[%s8300_s17 + $0xb8] sm:$0xff] }
 0x4ba   : > { %v9120_v32 = vpop.xlane.xlu1 %3119  ;;  %2494 = vadd.xlane.f32.xlu0 %v2493_v26 }
 0x4bb   : > { %v3606_v4 = vsub.f32 %v3350_v18, %v3478_v7  ;;  %v620_v18 = vld [vmem:[%s7489_s14 + $0x990] sm:$0xff]  ;;  %v3734_v7 = vld [vmem:[%s8280_s15 + $0xc8] sm:$0xff] }
 0x4bc   : > { %4727 = vperm.xlu1 %7046, %v9122_v24   ;;  %2040 = vmatmul.mubr.f32.gmra.mrb[152].mxu0 %v620_v18 }
 0x4bd   : > { %v3862_v16 = vadd.f32 1e-05, %v3606_v4 }
 0x4be   : > { %v5466_v26 = vpop.permute.xlu1 %5465  ;;  %3134 = vadd.xlane.f32.xlu0 %v3133_v19  ;;  %v4372_v19 = vmul.f32 %v9084_v23, %v9061_v9  ;;  %v2006_v9 = vpop.f32.mrb[138].mxu0 }
 0x4bf   : > { %v6031_v5 = vadd.f32 %v5466_v26, %v5263_v0  ;;  %7097 = vrsqrt.f32 %v3862_v16  ;;  %v618_v0 = vld [vmem:[%s7489_s14 + $0x980] sm:$0xff]  ;;  %v2008_v8 = vpop.f32.mrb[139].mxu0 }
 0x4c0   : > { %1335 = vmatmul.mubr.f32.gmra.mrb[152].mxu1 %v618_v0  ;;  %v6160_v0 = vld [vmem:[%s8531_s25 + $0x98] sm:$0xff] }
 0x4c1   : > { %v6287_v56 = vadd.f32 %v6159_v46, %v6031_v5  ;;  %v4500_v46 = vsub.f32 %v4244_v29, %v4372_v19  ;;  %v12438_v29 = vld [vmem:[#allocation52_spill] sm:$0xff] }
 0x4c2   : > { %v9156_v18 = vmul.f32 0.020408163, %v12438_v29 }
 0x4c3   : > { %v6415_v60 = vmax.f32 %v6287_v56, 0.0 }
 0x4c5   : > { %6543 = vst.msk [vmem:[%s8543_s30 + $0x90] sm:$0xff] %vm2300_vm0, %v6415_v60  ;;  %v1301_v5 = vpop.f32.mrb[138].mxu1  ;;  %v5264_v60 = vmul.f32 %v4703_v53, %v12437_v31  ;;  %v2878_v53 = vmul.f32 %v9022_v57, %v9022_v57 }
 0x4c6   : > { %v1303_v23 = vpop.f32.mrb[139].mxu1  ;;  %v9150_v56 = vadd.f32 %v2006_v9, %v1301_v5  ;;  %v12439_v5 = vld [vmem:[#allocation54_spill] sm:$0xff] }
 0x4c7   : > { %v3351_v9 = vmul.f32 0.020408163, %v12439_v5  ;;  %v3136_v31 = vsel %vm2300_vm0, %v2878_v53, 0.0  ;;  %v4708_v5 = vpop.permute.xlu1 %4707 }
 0x4c8   : > { %12436 = vst [vmem:[#allocation46_spill] sm:$0xff] %v9150_v56 }
 0x4c9   : > { %v7098_v26 = vpop.eup %7097 }
 0x4ca   : > { %v9148_v4 = vmul.f32 %v7098_v26, %v3734_v7  ;;  %v2496_v26 = vsel %vm2300_vm0, %v9022_v57, 0.0  ;;  %v3479_v7 = vmul.f32 %v9156_v18, %v9156_v18  ;;  %v12445_v57 = vld [vmem:[#allocation13_spill] sm:$0xff] }
 0x4cc   : > { %v3607_v8 = vsub.f32 %v3351_v9, %v3479_v7  ;;  %v4245_v7 = vld [vmem:[%s8300_s17 + $0xc0] sm:$0xff] }
 0x4cd   : > { %v9136_v2 = vpop.xlane.xlu0 %2482 }
 0x4d1   : > { %v9145_v16 = vpop.xlane.xlu0 %3122 }
 0x4d2   : > { %12435 = vst [vmem:[#allocation45_spill] sm:$0xff] %v9145_v16  ;;  %v629_v16 = vld [vmem:[%s7489_s14 + $0x9d8] sm:$0xff] }
 0x4d4   : > { %5490 = vperm.xlu0 %7045, %v4500_v46  }
 0x4d8   : > { %4732 = vperm.xlu0 %7045, %v9148_v4  }
 0x4d9   : > { %v5471_v19 = vpop.permute.xlu0 %5470 }
 0x4da   : > { %v6032_v59 = vadd.f32 %v5471_v19, %v5264_v60  ;;  %v2011_v60 = vpop.f32.mrb[140].mxu0 }
 0x4dc   : > { %v6288_v46 = vadd.f32 %v6160_v0, %v6032_v59  ;;  %v3863_v59 = vadd.f32 1e-05, %v3607_v8  ;;  %v1306_v0 = vpop.f32.mrb[140].mxu1  ;;  %v2499_v8 = vsel %vm2300_vm0, %v9040_v42, 0.0 }
 0x4dd   : > { %v9168_v19 = vadd.f32 %v2011_v60, %v1306_v0  ;;  %v1308_v29 = vpop.f32.mrb[141].mxu1  ;;  %v623_v60 = vld [vmem:[%s7489_s14 + $0x9a8] sm:$0xff]  ;;  %v625_v0 = vld [vmem:[%s7489_s14 + $0x9b8] sm:$0xff] }
 0x4de   : > { %v6416_v23 = vmax.f32 %v6288_v46, 0.0  ;;  %7099 = vrsqrt.f32 %v3863_v59  ;;  %v2013_v46 = vpop.f32.mrb[141].mxu0  ;;  %v2879_v59 = vmul.f32 %v9040_v42, %v9040_v42  ;;  %1339 = vmatprep.mubr.f32.mxu1 %v623_v60  ;;  %v622_v29 = vld [vmem:[%s7489_s14 + $0x9a0] sm:$0xff]  ;;  %2044 = vmatprep.mubr.f32.mxu0 %v625_v0  ;;  %v5265_v0 = vmul.f32 %v4708_v5, %v12445_v57  ;;  %v4713_v57 = vpop.permute.xlu0 %4712 }
 0x4df   : > { %12440 = vst [vmem:[#allocation7_spill] sm:$0xff] %v9168_v19  ;;  %v624_v46 = vld [vmem:[%s7489_s14 + $0x9b0] sm:$0xff]  ;;  %1340 = vmatmul.mubr.f32.gmra.mrb[154].mxu1 %v622_v29  ;;  %v6161_v29 = vld [vmem:[%s8531_s25 + $0xa0] sm:$0xff] }
 0x4e0   : > { %6544 = vst.msk [vmem:[%s8543_s30 + $0x98] sm:$0xff] %vm2300_vm0, %v6416_v23  ;;  %2497 = vadd.xlane.f32.xlu1 %v2496_v26  ;;  %v4373_v26 = vmul.f32 %v9122_v24, %v9092_v52  ;;  %2045 = vmatmul.mubr.f32.gmra.mrb[154].mxu0 %v624_v46  ;;  %v3139_v42 = vsel %vm2300_vm0, %v2879_v59, 0.0 }
 0x4e1   : > { %2049 = vmatprep.mubr.f32.mxu0 %v629_v16 }
 0x4e2   : > { %v4501_v23 = vsub.f32 %v4245_v7, %v4373_v26  ;;  %v12443_v26 = vld [vmem:[#allocation55_spill] sm:$0xff] }
 0x4e3   : > { %v9189_v7 = vmul.f32 0.020408163, %v12443_v26 }
 0x4e4   : > { %3137 = vadd.xlane.f32.xlu1 %v3136_v31  ;;  %v3735_v31 = vld [vmem:[%s8280_s15 + $0xd0] sm:$0xff] }
 0x4e8   : > { %v7100_v53 = vpop.eup %7099 }
 0x4e9   : > { %v9186_v24 = vmul.f32 %v7100_v53, %v3735_v31  ;;  %v3480_v53 = vmul.f32 %v9189_v7, %v9189_v7 }
 0x4f3   : > { %v9173_v9 = vpop.xlane.xlu1 %2485 }
 0x4f4   : > { %12441 = vst [vmem:[#allocation8_spill] sm:$0xff] %v9173_v9  ;;  %v627_v9 = vld [vmem:[%s7489_s14 + $0x9c8] sm:$0xff] }
 0x4f5   : > { %5495 = vperm.xlu1 %7046, %v4501_v23   ;;  %v12444_v23 = vld [vmem:[#allocation57_spill] sm:$0xff]  ;;  %1344 = vmatprep.mubr.f32.mxu1 %v627_v9  ;;  %v12449_v9 = vld [vmem:[#allocation14_spill] sm:$0xff] }
 0x4f6   : > { %v3352_v60 = vmul.f32 0.020408163, %v12444_v23  ;;  %v4246_v23 = vld [vmem:[%s8300_s17 + $0xc8] sm:$0xff] }
 0x4f7   : > { %v9184_v52 = vpop.xlane.xlu1 %3125  ;;  %2500 = vadd.xlane.f32.xlu0 %v2499_v8 }
 0x4f8   : > { %12442 = vst [vmem:[#allocation47_spill] sm:$0xff] %v9184_v52  ;;  %v3608_v46 = vsub.f32 %v3352_v60, %v3480_v53  ;;  %v628_v60 = vld [vmem:[%s7489_s14 + $0x9d0] sm:$0xff]  ;;  %v3736_v53 = vld [vmem:[%s8280_s15 + $0xd8] sm:$0xff] }
 0x4f9   : > { %4737 = vperm.xlu1 %7046, %v9186_v24   ;;  %2050 = vmatmul.mubr.f32.gmra.mrb[156].mxu0 %v628_v60 }
 0x4fa   : > { %v3864_v52 = vadd.f32 1e-05, %v3608_v46 }
 0x4fb   : > { %v5476_v8 = vpop.permute.xlu1 %5475  ;;  %3140 = vadd.xlane.f32.xlu0 %v3139_v42  ;;  %v4374_v42 = vmul.f32 %v9148_v4, %v9125_v10 }
 0x4fc   : > { %v6033_v31 = vadd.f32 %v5476_v8, %v5265_v0  ;;  %7101 = vrsqrt.f32 %v3864_v52  ;;  %v626_v0 = vld [vmem:[%s7489_s14 + $0x9c0] sm:$0xff]  ;;  %v2016_v10 = vpop.f32.mrb[142].mxu0 }
 0x4fd   : > { %1345 = vmatmul.mubr.f32.gmra.mrb[156].mxu1 %v626_v0  ;;  %v2018_v16 = vpop.f32.mrb[143].mxu0  ;;  %v6162_v0 = vld [vmem:[%s8531_s25 + $0xa8] sm:$0xff] }
 0x4fe   : > { %v6289_v59 = vadd.f32 %v6161_v29, %v6033_v31  ;;  %v4502_v29 = vsub.f32 %v4246_v23, %v4374_v42  ;;  %v1311_v31 = vpop.f32.mrb[142].mxu1  ;;  %v12450_v23 = vld [vmem:[#allocation56_spill] sm:$0xff] }
 0x4ff   : > { %v1313_v4 = vpop.f32.mrb[143].mxu1  ;;  %v9220_v60 = vmul.f32 0.020408163, %v12450_v23 }
 0x500   : > { %v6417_v26 = vmax.f32 %v6289_v59, 0.0  ;;  %v9214_v59 = vadd.f32 %v2016_v10, %v1311_v31  ;;  %v12451_v31 = vld [vmem:[#allocation58_spill] sm:$0xff] }
 0x501   : > { %v3353_v10 = vmul.f32 0.020408163, %v12451_v31  ;;  %v4718_v31 = vpop.permute.xlu1 %4717 }
 0x502   : > { %6545 = vst.msk [vmem:[%s8543_s30 + $0xa0] sm:$0xff] %vm2300_vm0, %v6417_v26  ;;  %12448 = vst [vmem:[#allocation49_spill] sm:$0xff] %v9214_v59  ;;  %v5266_v26 = vmul.f32 %v4713_v57, %v12449_v9  ;;  %v2880_v57 = vmul.f32 %v9086_v43, %v9086_v43 }
 0x504   : > { %v3142_v9 = vsel %vm2300_vm0, %v2880_v57, 0.0 }
 0x506   : > { %v7102_v8 = vpop.eup %7101 }
 0x507   : > { %v9212_v46 = vmul.f32 %v7102_v8, %v3736_v53  ;;  %v2502_v8 = vsel %vm2300_vm0, %v9086_v43, 0.0  ;;  %v3481_v53 = vmul.f32 %v9220_v60, %v9220_v60  ;;  %v12457_v43 = vld [vmem:[#allocation15_spill] sm:$0xff] }
 0x509   : > { %v3609_v16 = vsub.f32 %v3353_v10, %v3481_v53  ;;  %v4247_v53 = vld [vmem:[%s8300_s17 + $0xd0] sm:$0xff] }
 0x50a   : > { %v9200_v5 = vpop.xlane.xlu0 %2488 }
 0x50b   : > { %12446 = vst [vmem:[#allocation9_spill] sm:$0xff] %v9200_v5  ;;  %v637_v5 = vld [vmem:[%s7489_s14 + $0xa18] sm:$0xff] }
 0x50e   : > { %v9209_v52 = vpop.xlane.xlu0 %3128 }
 0x50f   : > { %12447 = vst [vmem:[#allocation10_spill] sm:$0xff] %v9209_v52 }
 0x511   : > { %5500 = vperm.xlu0 %7045, %v4502_v29  }
 0x515   : > { %4742 = vperm.xlu0 %7045, %v9212_v46  }
 0x516   : > { %v5481_v42 = vpop.permute.xlu0 %5480 }
 0x517   : > { %v6034_v52 = vadd.f32 %v5481_v42, %v5266_v26  ;;  %v2021_v26 = vpop.f32.mrb[144].mxu0 }
 0x519   : > { %v6290_v29 = vadd.f32 %v6162_v0, %v6034_v52  ;;  %v3865_v52 = vadd.f32 1e-05, %v3609_v16  ;;  %v1316_v0 = vpop.f32.mrb[144].mxu1  ;;  %v2505_v16 = vsel %vm2300_vm0, %v9104_v12, 0.0 }
 0x51a   : > { %v9232_v42 = vadd.f32 %v2021_v26, %v1316_v0  ;;  %v1318_v23 = vpop.f32.mrb[145].mxu1  ;;  %v631_v26 = vld [vmem:[%s7489_s14 + $0x9e8] sm:$0xff]  ;;  %v633_v0 = vld [vmem:[%s7489_s14 + $0x9f8] sm:$0xff] }
 0x51b   : > { %v6418_v4 = vmax.f32 %v6290_v29, 0.0  ;;  %7103 = vrsqrt.f32 %v3865_v52  ;;  %v2023_v29 = vpop.f32.mrb[145].mxu0  ;;  %v2881_v52 = vmul.f32 %v9104_v12, %v9104_v12  ;;  %1349 = vmatprep.mubr.f32.mxu1 %v631_v26  ;;  %v630_v23 = vld [vmem:[%s7489_s14 + $0x9e0] sm:$0xff]  ;;  %2054 = vmatprep.mubr.f32.mxu0 %v633_v0  ;;  %v5267_v0 = vmul.f32 %v4718_v31, %v12457_v43  ;;  %v4723_v43 = vpop.permute.xlu0 %4722 }
 0x51c   : > { %12452 = vst [vmem:[#allocation50_spill] sm:$0xff] %v9232_v42  ;;  %v632_v29 = vld [vmem:[%s7489_s14 + $0x9f0] sm:$0xff]  ;;  %1350 = vmatmul.mubr.f32.gmra.mrb[158].mxu1 %v630_v23 }
 0x51d   : > { %6546 = vst.msk [vmem:[%s8543_s30 + $0xa8] sm:$0xff] %vm2300_vm0, %v6418_v4  ;;  %2503 = vadd.xlane.f32.xlu1 %v2502_v8  ;;  %v4375_v8 = vmul.f32 %v9186_v24, %v9156_v18  ;;  %2055 = vmatmul.mubr.f32.gmra.mrb[158].mxu0 %v632_v29  ;;  %v3145_v12 = vsel %vm2300_vm0, %v2881_v52, 0.0  ;;  %v6163_v23 = vld [vmem:[%s8531_s25 + $0xb0] sm:$0xff] }
 0x51e   : > { %2059 = vmatprep.mubr.f32.mxu0 %v637_v5 }
 0x51f   : > { %v4503_v4 = vsub.f32 %v4247_v53, %v4375_v8  ;;  %v12455_v8 = vld [vmem:[#allocation60_spill] sm:$0xff] }
 0x520   : > { %v9253_v53 = vmul.f32 0.020408163, %v12455_v8 }
 0x521   : > { %3143 = vadd.xlane.f32.xlu1 %v3142_v9  ;;  %v3737_v9 = vld [vmem:[%s8280_s15 + $0xe0] sm:$0xff] }
 0x525   : > { %v7104_v57 = vpop.eup %7103 }
 0x526   : > { %v9250_v24 = vmul.f32 %v7104_v57, %v3737_v9  ;;  %v3482_v57 = vmul.f32 %v9253_v53, %v9253_v53 }
 0x530   : > { %v9237_v10 = vpop.xlane.xlu1 %2491 }
 0x531   : > { %12453 = vst [vmem:[#allocation51_spill] sm:$0xff] %v9237_v10  ;;  %v635_v10 = vld [vmem:[%s7489_s14 + $0xa08] sm:$0xff] }
 0x532   : > { %5505 = vperm.xlu1 %7046, %v4503_v4   ;;  %v12456_v4 = vld [vmem:[#allocation62_spill] sm:$0xff]  ;;  %1354 = vmatprep.mubr.f32.mxu1 %v635_v10  ;;  %v12461_v10 = vld [vmem:[#allocation16_spill] sm:$0xff] }
 0x533   : > { %v3354_v26 = vmul.f32 0.020408163, %v12456_v4  ;;  %v4248_v4 = vld [vmem:[%s8300_s17 + $0xd8] sm:$0xff] }
 0x534   : > { %v9248_v18 = vpop.xlane.xlu1 %3131  ;;  %2506 = vadd.xlane.f32.xlu0 %v2505_v16 }
 0x535   : > { %12454 = vst [vmem:[#allocation53_spill] sm:$0xff] %v9248_v18  ;;  %v3610_v29 = vsub.f32 %v3354_v26, %v3482_v57  ;;  %v636_v26 = vld [vmem:[%s7489_s14 + $0xa10] sm:$0xff]  ;;  %v3738_v57 = vld [vmem:[%s8280_s15 + $0xe8] sm:$0xff] }
 0x536   : > { %4747 = vperm.xlu1 %7046, %v9250_v24   ;;  %2060 = vmatmul.mubr.f32.gmra.mrb[160].mxu0 %v636_v26 }
 0x537   : > { %v3866_v18 = vadd.f32 1e-05, %v3610_v29 }
 0x538   : > { %v5486_v16 = vpop.permute.xlu1 %5485  ;;  %3146 = vadd.xlane.f32.xlu0 %v3145_v12  ;;  %v4376_v12 = vmul.f32 %v9212_v46, %v9189_v7  ;;  %v2026_v7 = vpop.f32.mrb[146].mxu0 }
 0x539   : > { %v6035_v9 = vadd.f32 %v5486_v16, %v5267_v0  ;;  %7105 = vrsqrt.f32 %v3866_v18  ;;  %v634_v0 = vld [vmem:[%s7489_s14 + $0xa00] sm:$0xff]  ;;  %v2028_v5 = vpop.f32.mrb[147].mxu0 }
 0x53a   : > { %1355 = vmatmul.mubr.f32.gmra.mrb[160].mxu1 %v634_v0  ;;  %v6164_v0 = vld [vmem:[%s8531_s25 + $0xb8] sm:$0xff] }
 0x53b   : > { %v6291_v52 = vadd.f32 %v6163_v23, %v6035_v9  ;;  %v4504_v23 = vsub.f32 %v4248_v4, %v4376_v12  ;;  %v1321_v9 = vpop.f32.mrb[146].mxu1  ;;  %v12462_v4 = vld [vmem:[#allocation61_spill] sm:$0xff] }
 0x53c   : > { %v1323_v46 = vpop.f32.mrb[147].mxu1  ;;  %v9284_v26 = vmul.f32 0.020408163, %v12462_v4 }
 0x53d   : > { %v6419_v8 = vmax.f32 %v6291_v52, 0.0  ;;  %v9278_v52 = vadd.f32 %v2026_v7, %v1321_v9  ;;  %v12463_v9 = vld [vmem:[#allocation63_spill] sm:$0xff] }
 0x53e   : > { %v3355_v7 = vmul.f32 0.020408163, %v12463_v9  ;;  %v4728_v9 = vpop.permute.xlu1 %4727 }
 0x53f   : > { %6547 = vst.msk [vmem:[%s8543_s30 + $0xb0] sm:$0xff] %vm2300_vm0, %v6419_v8  ;;  %12460 = vst [vmem:[#allocation52_spill] sm:$0xff] %v9278_v52  ;;  %v5268_v8 = vmul.f32 %v4723_v43, %v12461_v10  ;;  %v2882_v43 = vmul.f32 %v9150_v56, %v9150_v56 }
 0x541   : > { %v3148_v10 = vsel %vm2300_vm0, %v2882_v43, 0.0 }
 0x543   : > { %v7106_v16 = vpop.eup %7105 }
 0x544   : > { %v9276_v29 = vmul.f32 %v7106_v16, %v3738_v57  ;;  %v2508_v16 = vsel %vm2300_vm0, %v9150_v56, 0.0  ;;  %v3483_v57 = vmul.f32 %v9284_v26, %v9284_v26  ;;  %v12469_v56 = vld [vmem:[#allocation17_spill] sm:$0xff] }
 0x546   : > { %v3611_v5 = vsub.f32 %v3355_v7, %v3483_v57  ;;  %v4249_v57 = vld [vmem:[%s8300_s17 + $0xe0] sm:$0xff] }
 0x547   : > { %v9264_v31 = vpop.xlane.xlu0 %2494 }
 0x548   : > { %12458 = vst [vmem:[#allocation11_spill] sm:$0xff] %v9264_v31  ;;  %v645_v31 = vld [vmem:[%s7489_s14 + $0xa58] sm:$0xff] }
 0x54b   : > { %v9273_v18 = vpop.xlane.xlu0 %3134 }
 0x54c   : > { %12459 = vst [vmem:[#allocation12_spill] sm:$0xff] %v9273_v18 }
 0x54e   : > { %5510 = vperm.xlu0 %7045, %v4504_v23  }
 0x552   : > { %4752 = vperm.xlu0 %7045, %v9276_v29  }
 0x553   : > { %v5491_v12 = vpop.permute.xlu0 %5490 }
 0x554   : > { %v6036_v18 = vadd.f32 %v5491_v12, %v5268_v8  ;;  %v2031_v8 = vpop.f32.mrb[148].mxu0 }
 0x556   : > { %v6292_v23 = vadd.f32 %v6164_v0, %v6036_v18  ;;  %v3867_v18 = vadd.f32 1e-05, %v3611_v5  ;;  %v1326_v0 = vpop.f32.mrb[148].mxu1  ;;  %v2511_v5 = vsel %vm2300_vm0, %v9168_v19, 0.0 }
 0x557   : > { %v9296_v12 = vadd.f32 %v2031_v8, %v1326_v0  ;;  %v1328_v4 = vpop.f32.mrb[149].mxu1  ;;  %v639_v8 = vld [vmem:[%s7489_s14 + $0xa28] sm:$0xff]  ;;  %v641_v0 = vld [vmem:[%s7489_s14 + $0xa38] sm:$0xff] }
 0x558   : > { %v6420_v46 = vmax.f32 %v6292_v23, 0.0  ;;  %7107 = vrsqrt.f32 %v3867_v18  ;;  %v2033_v23 = vpop.f32.mrb[149].mxu0  ;;  %v2883_v18 = vmul.f32 %v9168_v19, %v9168_v19  ;;  %1359 = vmatprep.mubr.f32.mxu1 %v639_v8  ;;  %v638_v4 = vld [vmem:[%s7489_s14 + $0xa20] sm:$0xff]  ;;  %2064 = vmatprep.mubr.f32.mxu0 %v641_v0  ;;  %v5269_v0 = vmul.f32 %v4728_v9, %v12469_v56  ;;  %v4733_v56 = vpop.permute.xlu0 %4732 }
 0x559   : > { %12464 = vst [vmem:[#allocation54_spill] sm:$0xff] %v9296_v12  ;;  %v640_v23 = vld [vmem:[%s7489_s14 + $0xa30] sm:$0xff]  ;;  %1360 = vmatmul.mubr.f32.gmra.mrb[162].mxu1 %v638_v4  ;;  %v6165_v4 = vld [vmem:[%s8531_s25 + $0xc0] sm:$0xff] }
 0x55a   : > { %6548 = vst.msk [vmem:[%s8543_s30 + $0xb8] sm:$0xff] %vm2300_vm0, %v6420_v46  ;;  %2509 = vadd.xlane.f32.xlu1 %v2508_v16  ;;  %v4377_v16 = vmul.f32 %v9250_v24, %v9220_v60  ;;  %2065 = vmatmul.mubr.f32.gmra.mrb[162].mxu0 %v640_v23  ;;  %v3151_v19 = vsel %vm2300_vm0, %v2883_v18, 0.0 }
 0x55b   : > { %2069 = vmatprep.mubr.f32.mxu0 %v645_v31 }
 0x55c   : > { %v4505_v46 = vsub.f32 %v4249_v57, %v4377_v16  ;;  %v12467_v16 = vld [vmem:[#allocation64_spill] sm:$0xff] }
 0x55d   : > { %v9317_v57 = vmul.f32 0.020408163, %v12467_v16 }
 0x55e   : > { %3149 = vadd.xlane.f32.xlu1 %v3148_v10  ;;  %v3739_v10 = vld [vmem:[%s8280_s15 + $0xf0] sm:$0xff] }
 0x562   : > { %v7108_v43 = vpop.eup %7107 }
 0x563   : > { %v9314_v24 = vmul.f32 %v7108_v43, %v3739_v10  ;;  %v3484_v43 = vmul.f32 %v9317_v57, %v9317_v57 }
 0x56d   : > { %v9301_v7 = vpop.xlane.xlu1 %2497 }
 0x56e   : > { %12465 = vst [vmem:[#allocation55_spill] sm:$0xff] %v9301_v7  ;;  %v643_v7 = vld [vmem:[%s7489_s14 + $0xa48] sm:$0xff] }
 0x56f   : > { %5515 = vperm.xlu1 %7046, %v4505_v46   ;;  %v12468_v46 = vld [vmem:[#allocation66_spill] sm:$0xff]  ;;  %1364 = vmatprep.mubr.f32.mxu1 %v643_v7 }
 0x570   : > { %v3356_v8 = vmul.f32 0.020408163, %v12468_v46  ;;  %v4250_v46 = vld [vmem:[%s8300_s17 + $0xe8] sm:$0xff] }
 0x571   : > { %v9312_v60 = vpop.xlane.xlu1 %3137  ;;  %2512 = vadd.xlane.f32.xlu0 %v2511_v5  ;;  %v12473_v7 = vld [vmem:[#allocation18_spill] sm:$0xff] }
 0x572   : > { %12466 = vst [vmem:[#allocation57_spill] sm:$0xff] %v9312_v60  ;;  %v3612_v23 = vsub.f32 %v3356_v8, %v3484_v43  ;;  %v644_v8 = vld [vmem:[%s7489_s14 + $0xa50] sm:$0xff]  ;;  %v3740_v43 = vld [vmem:[%s8280_s15 + $0xf8] sm:$0xff] }
 0x573   : > { %4757 = vperm.xlu1 %7046, %v9314_v24   ;;  %2070 = vmatmul.mubr.f32.gmra.mrb[164].mxu0 %v644_v8 }
 0x574   : > { %v3868_v60 = vadd.f32 1e-05, %v3612_v23 }
 0x575   : > { %v5496_v5 = vpop.permute.xlu1 %5495  ;;  %3152 = vadd.xlane.f32.xlu0 %v3151_v19  ;;  %v4378_v19 = vmul.f32 %v9276_v29, %v9253_v53 }
 0x576   : > { %v6037_v10 = vadd.f32 %v5496_v5, %v5269_v0  ;;  %7109 = vrsqrt.f32 %v3868_v60  ;;  %v642_v0 = vld [vmem:[%s7489_s14 + $0xa40] sm:$0xff]  ;;  %v2036_v53 = vpop.f32.mrb[150].mxu0 }
 0x577   : > { %1365 = vmatmul.mubr.f32.gmra.mrb[164].mxu1 %v642_v0  ;;  %v2038_v31 = vpop.f32.mrb[151].mxu0  ;;  %v6166_v0 = vld [vmem:[%s8531_s25 + $0xc8] sm:$0xff] }
 0x578   : > { %v6293_v18 = vadd.f32 %v6165_v4, %v6037_v10  ;;  %v4506_v4 = vsub.f32 %v4250_v46, %v4378_v19  ;;  %v1331_v10 = vpop.f32.mrb[150].mxu1  ;;  %v12474_v46 = vld [vmem:[#allocation65_spill] sm:$0xff] }
 0x579   : > { %v1333_v29 = vpop.f32.mrb[151].mxu1  ;;  %v9348_v8 = vmul.f32 0.020408163, %v12474_v46 }
 0x57a   : > { %v6421_v16 = vmax.f32 %v6293_v18, 0.0  ;;  %v9342_v18 = vadd.f32 %v2036_v53, %v1331_v10  ;;  %v12475_v10 = vld [vmem:[#allocation67_spill] sm:$0xff] }
 0x57b   : > { %v3357_v53 = vmul.f32 0.020408163, %v12475_v10  ;;  %v4738_v10 = vpop.permute.xlu1 %4737 }
 0x57c   : > { %6549 = vst.msk [vmem:[%s8543_s30 + $0xc0] sm:$0xff] %vm2300_vm0, %v6421_v16  ;;  %12472 = vst [vmem:[#allocation56_spill] sm:$0xff] %v9342_v18  ;;  %v5270_v16 = vmul.f32 %v4733_v56, %v12473_v7  ;;  %v2884_v56 = vmul.f32 %v9214_v59, %v9214_v59 }
 0x57e   : > { %v3154_v7 = vsel %vm2300_vm0, %v2884_v56, 0.0 }
 0x580   : > { %v7110_v5 = vpop.eup %7109 }
 0x581   : > { %v9340_v23 = vmul.f32 %v7110_v5, %v3740_v43  ;;  %v2514_v5 = vsel %vm2300_vm0, %v9214_v59, 0.0  ;;  %v3485_v43 = vmul.f32 %v9348_v8, %v9348_v8  ;;  %v12481_v59 = vld [vmem:[#allocation19_spill] sm:$0xff] }
 0x583   : > { %v3613_v31 = vsub.f32 %v3357_v53, %v3485_v43  ;;  %v4251_v43 = vld [vmem:[%s8300_s17 + $0xf0] sm:$0xff] }
 0x584   : > { %v9328_v9 = vpop.xlane.xlu0 %2500 }
 0x585   : > { %12470 = vst [vmem:[#allocation13_spill] sm:$0xff] %v9328_v9  ;;  %v653_v9 = vld [vmem:[%s7489_s14 + $0xa98] sm:$0xff] }
 0x588   : > { %v9337_v60 = vpop.xlane.xlu0 %3140 }
 0x589   : > { %12471 = vst [vmem:[#allocation14_spill] sm:$0xff] %v9337_v60 }
 0x58b   : > { %5520 = vperm.xlu0 %7045, %v4506_v4  }
 0x58f   : > { %4762 = vperm.xlu0 %7045, %v9340_v23  }
 0x590   : > { %v5501_v19 = vpop.permute.xlu0 %5500 }
 0x591   : > { %v6038_v60 = vadd.f32 %v5501_v19, %v5270_v16  ;;  %v2041_v16 = vpop.f32.mrb[152].mxu0 }
 0x593   : > { %v6294_v4 = vadd.f32 %v6166_v0, %v6038_v60  ;;  %v3869_v60 = vadd.f32 1e-05, %v3613_v31  ;;  %v1336_v0 = vpop.f32.mrb[152].mxu1  ;;  %v2517_v31 = vsel %vm2300_vm0, %v9232_v42, 0.0 }
 0x594   : > { %v9360_v19 = vadd.f32 %v2041_v16, %v1336_v0  ;;  %v1338_v46 = vpop.f32.mrb[153].mxu1  ;;  %v647_v16 = vld [vmem:[%s7489_s14 + $0xa68] sm:$0xff]  ;;  %v649_v0 = vld [vmem:[%s7489_s14 + $0xa78] sm:$0xff] }
 0x595   : > { %v6422_v29 = vmax.f32 %v6294_v4, 0.0  ;;  %7111 = vrsqrt.f32 %v3869_v60  ;;  %v2043_v4 = vpop.f32.mrb[153].mxu0  ;;  %v2885_v60 = vmul.f32 %v9232_v42, %v9232_v42  ;;  %1369 = vmatprep.mubr.f32.mxu1 %v647_v16  ;;  %v646_v46 = vld [vmem:[%s7489_s14 + $0xa60] sm:$0xff]  ;;  %2074 = vmatprep.mubr.f32.mxu0 %v649_v0  ;;  %v5271_v0 = vmul.f32 %v4738_v10, %v12481_v59  ;;  %v4743_v59 = vpop.permute.xlu0 %4742 }
 0x596   : > { %12476 = vst [vmem:[#allocation58_spill] sm:$0xff] %v9360_v19  ;;  %v648_v4 = vld [vmem:[%s7489_s14 + $0xa70] sm:$0xff]  ;;  %1370 = vmatmul.mubr.f32.gmra.mrb[166].mxu1 %v646_v46 }
 0x597   : > { %6550 = vst.msk [vmem:[%s8543_s30 + $0xc8] sm:$0xff] %vm2300_vm0, %v6422_v29  ;;  %2515 = vadd.xlane.f32.xlu1 %v2514_v5  ;;  %v4379_v5 = vmul.f32 %v9314_v24, %v9284_v26  ;;  %2075 = vmatmul.mubr.f32.gmra.mrb[166].mxu0 %v648_v4  ;;  %v3157_v42 = vsel %vm2300_vm0, %v2885_v60, 0.0  ;;  %v6167_v46 = vld [vmem:[%s8531_s25 + $0xd0] sm:$0xff] }
 0x598   : > { %2079 = vmatprep.mubr.f32.mxu0 %v653_v9 }
 0x599   : > { %v4507_v29 = vsub.f32 %v4251_v43, %v4379_v5  ;;  %v12479_v5 = vld [vmem:[#allocation68_spill] sm:$0xff] }
 0x59a   : > { %v9381_v43 = vmul.f32 0.020408163, %v12479_v5 }
 0x59b   : > { %3155 = vadd.xlane.f32.xlu1 %v3154_v7  ;;  %v3741_v7 = vld [vmem:[%s8280_s15 + $0x100] sm:$0xff] }
 0x59f   : > { %v7112_v56 = vpop.eup %7111 }
 0x5a0   : > { %v9378_v24 = vmul.f32 %v7112_v56, %v3741_v7  ;;  %v3486_v56 = vmul.f32 %v9381_v43, %v9381_v43 }
 0x5aa   : > { %v9365_v53 = vpop.xlane.xlu1 %2503 }
 0x5ab   : > { %12477 = vst [vmem:[#allocation60_spill] sm:$0xff] %v9365_v53  ;;  %v651_v53 = vld [vmem:[%s7489_s14 + $0xa88] sm:$0xff] }
 0x5ac   : > { %5525 = vperm.xlu1 %7046, %v4507_v29   ;;  %v12480_v29 = vld [vmem:[#allocation70_spill] sm:$0xff]  ;;  %1374 = vmatprep.mubr.f32.mxu1 %v651_v53  ;;  %v12485_v53 = vld [vmem:[#allocation20_spill] sm:$0xff] }
 0x5ad   : > { %v3358_v16 = vmul.f32 0.020408163, %v12480_v29  ;;  %v4252_v29 = vld [vmem:[%s8300_s17 + $0xf8] sm:$0xff] }
 0x5ae   : > { %v9376_v26 = vpop.xlane.xlu1 %3143  ;;  %2518 = vadd.xlane.f32.xlu0 %v2517_v31 }
 0x5af   : > { %12478 = vst [vmem:[#allocation62_spill] sm:$0xff] %v9376_v26  ;;  %v3614_v4 = vsub.f32 %v3358_v16, %v3486_v56  ;;  %v652_v16 = vld [vmem:[%s7489_s14 + $0xa90] sm:$0xff]  ;;  %v3742_v56 = vld [vmem:[%s8280_s15 + $0x108] sm:$0xff] }
 0x5b0   : > { %4767 = vperm.xlu1 %7046, %v9378_v24   ;;  %2080 = vmatmul.mubr.f32.gmra.mrb[168].mxu0 %v652_v16 }
 0x5b1   : > { %v3870_v26 = vadd.f32 1e-05, %v3614_v4 }
 0x5b2   : > { %v5506_v31 = vpop.permute.xlu1 %5505  ;;  %3158 = vadd.xlane.f32.xlu0 %v3157_v42  ;;  %v4380_v42 = vmul.f32 %v9340_v23, %v9317_v57 }
 0x5b3   : > { %v6039_v7 = vadd.f32 %v5506_v31, %v5271_v0  ;;  %7113 = vrsqrt.f32 %v3870_v26  ;;  %v650_v0 = vld [vmem:[%s7489_s14 + $0xa80] sm:$0xff]  ;;  %v2046_v57 = vpop.f32.mrb[154].mxu0 }
 0x5b4   : > { %1375 = vmatmul.mubr.f32.gmra.mrb[168].mxu1 %v650_v0  ;;  %v2048_v9 = vpop.f32.mrb[155].mxu0  ;;  %v6168_v0 = vld [vmem:[%s8531_s25 + $0xd8] sm:$0xff] }
 0x5b5   : > { %v6295_v60 = vadd.f32 %v6167_v46, %v6039_v7  ;;  %v4508_v46 = vsub.f32 %v4252_v29, %v4380_v42  ;;  %v1341_v7 = vpop.f32.mrb[154].mxu1  ;;  %v12486_v29 = vld [vmem:[#allocation69_spill] sm:$0xff] }
 0x5b6   : > { %v1343_v23 = vpop.f32.mrb[155].mxu1  ;;  %v9412_v16 = vmul.f32 0.020408163, %v12486_v29 }
 0x5b7   : > { %v6423_v5 = vmax.f32 %v6295_v60, 0.0  ;;  %v9406_v60 = vadd.f32 %v2046_v57, %v1341_v7  ;;  %v12487_v7 = vld [vmem:[#allocation71_spill] sm:$0xff] }
 0x5b8   : > { %v3359_v57 = vmul.f32 0.020408163, %v12487_v7  ;;  %v4748_v7 = vpop.permute.xlu1 %4747 }
 0x5b9   : > { %6551 = vst.msk [vmem:[%s8543_s30 + $0xd0] sm:$0xff] %vm2300_vm0, %v6423_v5  ;;  %12484 = vst [vmem:[#allocation61_spill] sm:$0xff] %v9406_v60  ;;  %v5272_v5 = vmul.f32 %v4743_v59, %v12485_v53  ;;  %v2886_v59 = vmul.f32 %v9278_v52, %v9278_v52 }
 0x5bb   : > { %v3160_v53 = vsel %vm2300_vm0, %v2886_v59, 0.0 }
 0x5bd   : > { %v7114_v31 = vpop.eup %7113 }
 0x5be   : > { %v9404_v4 = vmul.f32 %v7114_v31, %v3742_v56  ;;  %v2520_v31 = vsel %vm2300_vm0, %v9278_v52, 0.0  ;;  %v3487_v56 = vmul.f32 %v9412_v16, %v9412_v16  ;;  %v6169_v52 = vld [vmem:[%s8531_s25 + $0xe0] sm:$0xff] }
 0x5c0   : > { %v3615_v9 = vsub.f32 %v3359_v57, %v3487_v56  ;;  %v4253_v56 = vld [vmem:[%s8300_s17 + $0x100] sm:$0xff] }
 0x5c1   : > { %v9392_v10 = vpop.xlane.xlu0 %2506 }
 0x5c2   : > { %12482 = vst [vmem:[#allocation15_spill] sm:$0xff] %v9392_v10 }
 0x5c5   : > { %v9401_v26 = vpop.xlane.xlu0 %3146 }
 0x5c6   : > { %12483 = vst [vmem:[#allocation16_spill] sm:$0xff] %v9401_v26 }
 0x5c8   : > { %5530 = vperm.xlu0 %7045, %v4508_v46  }
 0x5cc   : > { %4772 = vperm.xlu0 %7045, %v9404_v4  }
 0x5cd   : > { %v5511_v42 = vpop.permute.xlu0 %5510 }
 0x5ce   : > { %v6040_v26 = vadd.f32 %v5511_v42, %v5272_v5  ;;  %v2051_v5 = vpop.f32.mrb[156].mxu0 }
 0x5d0   : > { %v6296_v46 = vadd.f32 %v6168_v0, %v6040_v26  ;;  %v3871_v26 = vadd.f32 1e-05, %v3615_v9  ;;  %v1346_v0 = vpop.f32.mrb[156].mxu1  ;;  %v2523_v9 = vsel %vm2300_vm0, %v9296_v12, 0.0 }
 0x5d1   : > { %v9424_v42 = vadd.f32 %v2051_v5, %v1346_v0  ;;  %v1348_v29 = vpop.f32.mrb[157].mxu1  ;;  %v655_v5 = vld [vmem:[%s7489_s14 + $0xaa8] sm:$0xff]  ;;  %v657_v0 = vld [vmem:[%s7489_s14 + $0xab8] sm:$0xff] }
 0x5d2   : > { %v6424_v23 = vmax.f32 %v6296_v46, 0.0  ;;  %7115 = vrsqrt.f32 %v3871_v26  ;;  %v2053_v46 = vpop.f32.mrb[157].mxu0  ;;  %v2887_v26 = vmul.f32 %v9296_v12, %v9296_v12  ;;  %1379 = vmatprep.mubr.f32.mxu1 %v655_v5  ;;  %v654_v29 = vld [vmem:[%s7489_s14 + $0xaa0] sm:$0xff]  ;;  %2084 = vmatprep.mubr.f32.mxu0 %v657_v0 }
 0x5d3   : > { %12488 = vst [vmem:[#allocation63_spill] sm:$0xff] %v9424_v42  ;;  %v656_v46 = vld [vmem:[%s7489_s14 + $0xab0] sm:$0xff]  ;;  %1380 = vmatmul.mubr.f32.gmra.mrb[170].mxu1 %v654_v29  ;;  %v12493_v0 = vld [vmem:[#allocation21_spill] sm:$0xff] }
 0x5d4   : > { %6552 = vst.msk [vmem:[%s8543_s30 + $0xd8] sm:$0xff] %vm2300_vm0, %v6424_v23  ;;  %2521 = vadd.xlane.f32.xlu1 %v2520_v31  ;;  %v4381_v31 = vmul.f32 %v9378_v24, %v9348_v8  ;;  %2085 = vmatmul.mubr.f32.gmra.mrb[170].mxu0 %v656_v46  ;;  %v3163_v12 = vsel %vm2300_vm0, %v2887_v26, 0.0  ;;  %v5273_v29 = vmul.f32 %v4748_v7, %v12493_v0  ;;  %v661_v7 = vld [vmem:[%s7489_s14 + $0xad8] sm:$0xff]  ;;  %v658_v0 = vld [vmem:[%s7489_s14 + $0xac0] sm:$0xff] }
 0x5d5   : > { %2089 = vmatprep.mubr.f32.mxu0 %v661_v7 }
 0x5d6   : > { %v4509_v23 = vsub.f32 %v4253_v56, %v4381_v31  ;;  %v12491_v31 = vld [vmem:[#allocation72_spill] sm:$0xff] }
 0x5d7   : > { %v9445_v56 = vmul.f32 0.020408163, %v12491_v31 }
 0x5d8   : > { %3161 = vadd.xlane.f32.xlu1 %v3160_v53  ;;  %v3743_v53 = vld [vmem:[%s8280_s15 + $0x110] sm:$0xff] }
 0x5dc   : > { %v7116_v59 = vpop.eup %7115 }
 0x5dd   : > { %v9442_v24 = vmul.f32 %v7116_v59, %v3743_v53  ;;  %v3488_v59 = vmul.f32 %v9445_v56, %v9445_v56 }
 0x5e7   : > { %v9429_v57 = vpop.xlane.xlu1 %2509 }
 0x5e8   : > { %12489 = vst [vmem:[#allocation64_spill] sm:$0xff] %v9429_v57  ;;  %v659_v57 = vld [vmem:[%s7489_s14 + $0xac8] sm:$0xff] }
 0x5e9   : > { %5535 = vperm.xlu1 %7046, %v4509_v23   ;;  %v12492_v23 = vld [vmem:[#allocation74_spill] sm:$0xff]  ;;  %1384 = vmatprep.mubr.f32.mxu1 %v659_v57 }
 0x5ea   : > { %v3360_v5 = vmul.f32 0.020408163, %v12492_v23  ;;  %v4753_v23 = vpop.permute.xlu0 %4752  ;;  %1385 = vmatmul.mubr.f32.gmra.mrb[172].mxu1 %v658_v0  ;;  %v12497_v0 = vld [vmem:[#allocation22_spill] sm:$0xff] }
 0x5eb   : > { %v9440_v8 = vpop.xlane.xlu1 %3149  ;;  %2524 = vadd.xlane.f32.xlu0 %v2523_v9 }
 0x5ec   : > { %12490 = vst [vmem:[#allocation66_spill] sm:$0xff] %v9440_v8  ;;  %v3616_v46 = vsub.f32 %v3360_v5, %v3488_v59  ;;  %v4254_v5 = vld [vmem:[%s8300_s17 + $0x108] sm:$0xff]  ;;  %v3744_v59 = vld [vmem:[%s8280_s15 + $0x118] sm:$0xff] }
 0x5ed   : > { %4777 = vperm.xlu1 %7046, %v9442_v24  }
 0x5ee   : > { %v3872_v8 = vadd.f32 1e-05, %v3616_v46 }
 0x5ef   : > { %v5516_v9 = vpop.permute.xlu1 %5515  ;;  %3164 = vadd.xlane.f32.xlu0 %v3163_v12  ;;  %v660_v12 = vld [vmem:[%s7489_s14 + $0xad0] sm:$0xff] }
 0x5f0   : > { %v6041_v53 = vadd.f32 %v5516_v9, %v5273_v29  ;;  %7117 = vrsqrt.f32 %v3872_v8  ;;  %2090 = vmatmul.mubr.f32.gmra.mrb[172].mxu0 %v660_v12  ;;  %v2056_v57 = vpop.f32.mrb[158].mxu0  ;;  %v5274_v12 = vmul.f32 %v4753_v23, %v12497_v0  ;;  %v2888_v23 = vmul.f32 %v9342_v18, %v9342_v18 }
 0x5f1   : > { %v2058_v7 = vpop.f32.mrb[159].mxu0 }
 0x5f2   : > { %v6297_v31 = vadd.f32 %v6169_v52, %v6041_v53  ;;  %v4382_v52 = vmul.f32 %v9404_v4, %v9381_v43  ;;  %v1351_v53 = vpop.f32.mrb[158].mxu1  ;;  %v6170_v43 = vld [vmem:[%s8531_s25 + $0xe8] sm:$0xff] }
 0x5f4   : > { %v6425_v26 = vmax.f32 %v6297_v31, 0.0  ;;  %v4510_v29 = vsub.f32 %v4254_v5, %v4382_v52  ;;  %v1353_v31 = vpop.f32.mrb[159].mxu1  ;;  %v12498_v52 = vld [vmem:[#allocation73_spill] sm:$0xff] }
 0x5f5   : > { %v9476_v5 = vmul.f32 0.020408163, %v12498_v52 }
 0x5f6   : > { %6553 = vst.msk [vmem:[%s8543_s30 + $0xe0] sm:$0xff] %vm2300_vm0, %v6425_v26  ;;  %v9470_v26 = vadd.f32 %v2056_v57, %v1351_v53  ;;  %v12499_v53 = vld [vmem:[#allocation75_spill] sm:$0xff] }
 0x5f7   : > { %v3361_v57 = vmul.f32 0.020408163, %v12499_v53  ;;  %v4758_v53 = vpop.permute.xlu1 %4757 }
 0x5f8   : > { %12496 = vst [vmem:[#allocation65_spill] sm:$0xff] %v9470_v26 }
 0x5fa   : > { %v7118_v9 = vpop.eup %7117 }
 0x5fb   : > { %v9468_v46 = vmul.f32 %v7118_v9, %v3744_v59  ;;  %v2526_v9 = vsel %vm2300_vm0, %v9342_v18, 0.0  ;;  %v3489_v59 = vmul.f32 %v9476_v5, %v9476_v5  ;;  %v669_v18 = vld [vmem:[%s7489_s14 + $0xb18] sm:$0xff] }
 0x5fd   : > { %v3617_v7 = vsub.f32 %v3361_v57, %v3489_v59  ;;  %v663_v59 = vld [vmem:[%s7489_s14 + $0xae8] sm:$0xff]  ;;  %v665_v57 = vld [vmem:[%s7489_s14 + $0xaf8] sm:$0xff] }
 0x5fe   : > { %v9460_v10 = vpop.xlane.xlu0 %2512  ;;  %1389 = vmatprep.mubr.f32.mxu1 %v663_v59  ;;  %2094 = vmatprep.mubr.f32.mxu0 %v665_v57  ;;  %v12503_v59 = vld [vmem:[#allocation76_spill] sm:$0xff]  ;;  %v3362_v57 = vmul.f32 0.020408163, %v8497_v1 }
 0x5ff   : > { %12494 = vst [vmem:[#allocation17_spill] sm:$0xff] %v9460_v10  ;;  %v3873_v0 = vadd.f32 1e-05, %v3617_v7 }
 0x601   : > { %7119 = vrsqrt.f32 %v3873_v0 }
 0x602   : > { %v9465_v8 = vpop.xlane.xlu0 %3152 }
 0x603   : > { %12495 = vst [vmem:[#allocation18_spill] sm:$0xff] %v9465_v8 }
 0x605   : > { %5540 = vperm.xlu0 %7045, %v4510_v29  }
 0x609   : > { %4782 = vperm.xlu0 %7045, %v9468_v46  }
 0x60a   : > { %v5521_v4 = vpop.permute.xlu0 %5520 }
 0x60b   : > { %v6042_v8 = vadd.f32 %v5521_v4, %v5274_v12  ;;  %v2061_v12 = vpop.f32.mrb[160].mxu0 }
 0x60d   : > { %v6298_v29 = vadd.f32 %v6170_v43, %v6042_v8  ;;  %v3166_v8 = vsel %vm2300_vm0, %v2888_v23, 0.0  ;;  %v1356_v43 = vpop.f32.mrb[160].mxu1  ;;  %v662_v23 = vld [vmem:[%s7489_s14 + $0xae0] sm:$0xff] }
 0x60e   : > { %v9488_v4 = vadd.f32 %v2061_v12, %v1356_v43  ;;  %v1358_v52 = vpop.f32.mrb[161].mxu1  ;;  %1390 = vmatmul.mubr.f32.gmra.mrb[174].mxu1 %v662_v23  ;;  %v7120_v12 = vpop.eup %7119  ;;  %v2529_v43 = vsel %vm2300_vm0, %v9360_v19, 0.0  ;;  %v12504_v23 = vld [vmem:[#allocation23_spill] sm:$0xff] }
 0x60f   : > { %v6426_v31 = vmax.f32 %v6298_v29, 0.0  ;;  %v2063_v29 = vpop.f32.mrb[161].mxu0  ;;  %v3745_v52 = vld [vmem:[%s8280_s15 + $0x120] sm:$0xff] }
 0x610   : > { %12500 = vst [vmem:[#allocation67_spill] sm:$0xff] %v9488_v4  ;;  %v9506_v29 = vmul.f32 %v7120_v12, %v3745_v52  ;;  %v667_v52 = vld [vmem:[%s7489_s14 + $0xb08] sm:$0xff] }
 0x611   : > { %6554 = vst.msk [vmem:[%s8543_s30 + $0xe8] sm:$0xff] %vm2300_vm0, %v6426_v31  ;;  %2527 = vadd.xlane.f32.xlu1 %v2526_v9  ;;  %v4383_v31 = vmul.f32 %v9442_v24, %v9412_v16  ;;  %v4255_v9 = vld [vmem:[%s8300_s17 + $0x110] sm:$0xff]  ;;  %v2889_v16 = vmul.f32 %v9360_v19, %v9360_v19  ;;  %1394 = vmatprep.mubr.f32.mxu1 %v667_v52 }
 0x612   : > { %v6171_v19 = vld [vmem:[%s8531_s25 + $0xf0] sm:$0xff] }
 0x613   : > { %v4511_v0 = vsub.f32 %v4255_v9, %v4383_v31  ;;  %v9509_v31 = vmul.f32 0.020408163, %v12503_v59  ;;  %v3169_v9 = vsel %vm2300_vm0, %v2889_v16, 0.0  ;;  %v666_v59 = vld [vmem:[%s7489_s14 + $0xb00] sm:$0xff]  ;;  %v668_v16 = vld [vmem:[%s7489_s14 + $0xb10] sm:$0xff] }
 0x614   : > { %1395 = vmatmul.mubr.f32.gmra.mrb[176].mxu1 %v666_v59 }
 0x615   : > { %3167 = vadd.xlane.f32.xlu1 %v3166_v8  ;;  %v664_v8 = vld [vmem:[%s7489_s14 + $0xaf0] sm:$0xff]  ;;  %v3490_v12 = vmul.f32 %v9509_v31, %v9509_v31 }
 0x616   : > { %2095 = vmatmul.mubr.f32.gmra.mrb[174].mxu0 %v664_v8  ;;  %v5275_v8 = vmul.f32 %v4758_v53, %v12504_v23 }
 0x617   : > { %2099 = vmatprep.mubr.f32.mxu0 %v669_v18 }
 0x61a   : > { %2100 = vmatmul.mubr.f32.gmra.mrb[176].mxu0 %v668_v16 }
 0x624   : > { %v9497_v7 = vpop.xlane.xlu1 %2515 }
 0x625   : > { %12501 = vst [vmem:[#allocation68_spill] sm:$0xff] %v9497_v7 }
 0x626   : > { %5545 = vperm.xlu1 %7046, %v4511_v0  }
 0x628   : > { %v9504_v24 = vpop.xlane.xlu1 %3155  ;;  %2530 = vadd.xlane.f32.xlu0 %v2529_v43 }
 0x629   : > { %12502 = vst [vmem:[#allocation70_spill] sm:$0xff] %v9504_v24  ;;  %v3618_v24 = vsub.f32 %v3362_v57, %v3490_v12 }
 0x62a   : > { %4787 = vperm.xlu1 %7046, %v9506_v29  }
 0x62b   : > { %v3874_v23 = vadd.f32 1e-05, %v3618_v24 }
 0x62c   : > { %v5526_v0 = vpop.permute.xlu1 %5525  ;;  %3170 = vadd.xlane.f32.xlu0 %v3169_v9  ;;  %v4763_v9 = vpop.permute.xlu0 %4762 }
 0x62d   : > { %v6043_v43 = vadd.f32 %v5526_v0, %v5275_v8  ;;  %7121 = vrsqrt.f32 %v3874_v23  ;;  %v4384_v8 = vmul.f32 %v9468_v46, %v9445_v56  ;;  %v4256_v0 = vld [vmem:[%s8300_s17 + $0x118] sm:$0xff]  ;;  %v1361_v57 = vpop.f32.mrb[162].mxu1  ;;  %v2066_v24 = vpop.f32.mrb[162].mxu0  ;;  %v12508_v23 = vld [vmem:[#allocation77_spill] sm:$0xff] }
 0x62e   : > { %v9534_v59 = vadd.f32 %v2066_v24, %v1361_v57  ;;  %v2068_v16 = vpop.f32.mrb[163].mxu0  ;;  %v6172_v56 = vld [vmem:[%s8531_s25 + $0xf8] sm:$0xff]  ;;  %v3363_v57 = vmul.f32 0.020408163, %v8507_v54  ;;  %v671_v24 = vld [vmem:[%s7489_s14 + $0xb28] sm:$0xff] }
 0x62f   : > { %v6299_v1 = vadd.f32 %v6171_v19, %v6043_v43  ;;  %v4512_v18 = vsub.f32 %v4256_v0, %v4384_v8  ;;  %v3746_v19 = vld [vmem:[%s8280_s15 + $0x128] sm:$0xff]  ;;  %v1363_v43 = vpop.f32.mrb[163].mxu1  ;;  %v9540_v8 = vmul.f32 0.020408163, %v12508_v23  ;;  %v2890_v16 = vmul.f32 %v9406_v60, %v9406_v60  ;;  %1399 = vmatprep.mubr.f32.mxu1 %v671_v24  ;;  %v670_v23 = vld [vmem:[%s7489_s14 + $0xb20] sm:$0xff] }
 0x630   : > { %12506 = vst [vmem:[#allocation20_spill] sm:$0xff] %v9534_v59  ;;  %v673_v43 = vld [vmem:[%s7489_s14 + $0xb38] sm:$0xff]  ;;  %1400 = vmatmul.mubr.f32.gmra.mrb[178].mxu1 %v670_v23 }
 0x631   : > { %v6427_v53 = vmax.f32 %v6299_v1, 0.0  ;;  %v12507_v1 = vld [vmem:[#allocation24_spill] sm:$0xff]  ;;  %2104 = vmatprep.mubr.f32.mxu0 %v673_v43 }
 0x633   : > { %6555 = vst.msk [vmem:[%s8543_s30 + $0xf0] sm:$0xff] %vm2300_vm0, %v6427_v53  ;;  %v5276_v53 = vmul.f32 %v4763_v9, %v12507_v1 }
 0x637   : > { %v7122_v52 = vpop.eup %7121 }
 0x638   : > { %v9532_v12 = vmul.f32 %v7122_v52, %v3746_v19  ;;  %v2532_v52 = vsel %vm2300_vm0, %v9406_v60, 0.0  ;;  %v3491_v19 = vmul.f32 %v9540_v8, %v9540_v8  ;;  %v677_v60 = vld [vmem:[%s7489_s14 + $0xb58] sm:$0xff] }
 0x63a   : > { %v3619_v1 = vsub.f32 %v3363_v57, %v3491_v19  ;;  %v4257_v19 = vld [vmem:[%s8300_s17 + $0x120] sm:$0xff] }
 0x63b   : > { %v9524_v7 = vpop.xlane.xlu0 %2518 }
 0x63f   : > { %v9529_v10 = vpop.xlane.xlu0 %3158 }
 0x640   : > { %12505 = vst [vmem:[#allocation19_spill] sm:$0xff] %v9529_v10 }
 0x642   : > { %5550 = vperm.xlu0 %7045, %v4512_v18  }
 0x646   : > { %4792 = vperm.xlu0 %7045, %v9532_v12   ;;  %v2071_v54 = vpop.f32.mrb[164].mxu0 }
 0x647   : > { %v5531_v46 = vpop.permute.xlu0 %5530  ;;  %v2073_v43 = vpop.f32.mrb[165].mxu0 }
 0x648   : > { %v6044_v0 = vadd.f32 %v5531_v46, %v5276_v53  ;;  %v3172_v53 = vsel %vm2300_vm0, %v2890_v16, 0.0 }
 0x64a   : > { %v6300_v18 = vadd.f32 %v6172_v56, %v6044_v0  ;;  %v3875_v56 = vadd.f32 1e-05, %v3619_v1  ;;  %v1366_v46 = vpop.f32.mrb[164].mxu1  ;;  %v672_v0 = vld [vmem:[%s7489_s14 + $0xb30] sm:$0xff] }
 0x64b   : > { %2105 = vmatmul.mubr.f32.gmra.mrb[178].mxu0 %v672_v0  ;;  %v1368_v24 = vpop.f32.mrb[165].mxu1 }
 0x64c   : > { %v6428_v9 = vmax.f32 %v6300_v18, 0.0  ;;  %7123 = vrsqrt.f32 %v3875_v56  ;;  %v9556_v18 = vadd.f32 %v2071_v54, %v1366_v46  ;;  %v3747_v56 = vld [vmem:[%s8280_s15 + $0x130] sm:$0xff]  ;;  %v2891_v54 = vmul.f32 %v9424_v42, %v9424_v42  ;;  %v12513_v24 = vld [vmem:[#allocation80_spill] sm:$0xff]  ;;  %2109 = vmatprep.mubr.f32.mxu0 %v677_v60 }
 0x64d   : > { %v3364_v43 = vmul.f32 0.020408163, %v12513_v24 }
 0x64e   : > { %6556 = vst.msk [vmem:[%s8543_s30 + $0xf8] sm:$0xff] %vm2300_vm0, %v6428_v9  ;;  %2533 = vadd.xlane.f32.xlu1 %v2532_v52  ;;  %12509 = vst [vmem:[#allocation69_spill] sm:$0xff] %v9556_v18  ;;  %v4768_v9 = vpop.permute.xlu1 %4767  ;;  %v4385_v52 = vmul.f32 %v9506_v29, %v9476_v5  ;;  %v12512_v29 = vld [vmem:[#allocation79_spill] sm:$0xff]  ;;  %v3175_v0 = vsel %vm2300_vm0, %v2891_v54, 0.0 }
 0x64f   : > { %v9573_v23 = vmul.f32 0.020408163, %v12512_v29  ;;  %v674_v29 = vld [vmem:[%s7489_s14 + $0xb40] sm:$0xff]  ;;  %v676_v54 = vld [vmem:[%s7489_s14 + $0xb50] sm:$0xff] }
 0x650   : > { %v4513_v16 = vsub.f32 %v4257_v19, %v4385_v52  ;;  %v12514_v52 = vld [vmem:[#allocation25_spill] sm:$0xff]  ;;  %2110 = vmatmul.mubr.f32.gmra.mrb[180].mxu0 %v676_v54 }
 0x651   : > { %v5277_v19 = vmul.f32 %v4768_v9, %v12514_v52 }
 0x652   : > { %3173 = vadd.xlane.f32.xlu1 %v3172_v53  ;;  %v2535_v53 = vsel %vm2300_vm0, %v9424_v42, 0.0  ;;  %v6173_v42 = vld [vmem:[%s8531_s25 + $0x100] sm:$0xff] }
 0x656   : > { %v7124_v1 = vpop.eup %7123 }
 0x657   : > { %v9570_v5 = vmul.f32 %v7124_v1, %v3747_v56  ;;  %v3492_v1 = vmul.f32 %v9573_v23, %v9573_v23  ;;  %v675_v56 = vld [vmem:[%s7489_s14 + $0xb48] sm:$0xff] }
 0x658   : > { %1404 = vmatprep.mubr.f32.mxu1 %v675_v56 }
 0x659   : > { %1405 = vmatmul.mubr.f32.gmra.mrb[180].mxu1 %v674_v29 }
 0x661   : > { %v9561_v57 = vpop.xlane.xlu1 %2521 }
 0x662   : > { %12510 = vst [vmem:[#allocation71_spill] sm:$0xff] %v9561_v57 }
 0x663   : > { %5555 = vperm.xlu1 %7046, %v4513_v16  }
 0x665   : > { %v9568_v46 = vpop.xlane.xlu1 %3161  ;;  %2536 = vadd.xlane.f32.xlu0 %v2535_v53 }
 0x666   : > { %12511 = vst [vmem:[#allocation72_spill] sm:$0xff] %v9568_v46  ;;  %v3620_v46 = vsub.f32 %v3364_v43, %v3492_v1 }
 0x667   : > { %4797 = vperm.xlu1 %7046, %v9570_v5  }
 0x668   : > { %v3876_v52 = vadd.f32 1e-05, %v3620_v46 }
 0x669   : > { %v5536_v16 = vpop.permute.xlu1 %5535  ;;  %3176 = vadd.xlane.f32.xlu0 %v3175_v0  ;;  %v4773_v0 = vpop.permute.xlu0 %4772 }
 0x66a   : > { %v6045_v53 = vadd.f32 %v5536_v16, %v5277_v19  ;;  %7125 = vrsqrt.f32 %v3876_v52  ;;  %v4386_v19 = vmul.f32 %v9532_v12, %v9509_v31  ;;  %v4258_v16 = vld [vmem:[%s8300_s17 + $0x128] sm:$0xff]  ;;  %v1371_v43 = vpop.f32.mrb[166].mxu1  ;;  %v2076_v46 = vpop.f32.mrb[166].mxu0  ;;  %v12519_v52 = vld [vmem:[#allocation81_spill] sm:$0xff] }
 0x66b   : > { %v9598_v29 = vadd.f32 %v2076_v46, %v1371_v43  ;;  %v2078_v54 = vpop.f32.mrb[167].mxu0  ;;  %v6174_v12 = vld [vmem:[%s8531_s25 + $0x108] sm:$0xff]  ;;  %v12520_v43 = vld [vmem:[#allocation83_spill] sm:$0xff] }
 0x66c   : > { %v6301_v24 = vadd.f32 %v6173_v42, %v6045_v53  ;;  %v4514_v60 = vsub.f32 %v4258_v16, %v4386_v19  ;;  %v3748_v42 = vld [vmem:[%s8280_s15 + $0x138] sm:$0xff]  ;;  %v1373_v53 = vpop.f32.mrb[167].mxu1  ;;  %v9604_v19 = vmul.f32 0.020408163, %v12519_v52  ;;  %v3365_v46 = vmul.f32 0.020408163, %v12520_v43 }
 0x66d   : > { %12517 = vst [vmem:[#allocation22_spill] sm:$0xff] %v9598_v29  ;;  %v679_v53 = vld [vmem:[%s7489_s14 + $0xb68] sm:$0xff]  ;;  %v681_v54 = vld [vmem:[%s7489_s14 + $0xb78] sm:$0xff]  ;;  %v680_v52 = vld [vmem:[%s7489_s14 + $0xb70] sm:$0xff] }
 0x66e   : > { %v6429_v9 = vmax.f32 %v6301_v24, 0.0  ;;  %v12518_v24 = vld [vmem:[#allocation26_spill] sm:$0xff]  ;;  %1409 = vmatprep.mubr.f32.mxu1 %v679_v53  ;;  %2114 = vmatprep.mubr.f32.mxu0 %v681_v54 }
 0x66f   : > { %v5278_v31 = vmul.f32 %v4773_v0, %v12518_v24  ;;  %v678_v24 = vld [vmem:[%s7489_s14 + $0xb60] sm:$0xff]  ;;  %2115 = vmatmul.mubr.f32.gmra.mrb[182].mxu0 %v680_v52 }
 0x670   : > { %6557 = vst.msk [vmem:[%s8543_s30 + $0x100] sm:$0xff] %vm2300_vm0, %v6429_v9  ;;  %1410 = vmatmul.mubr.f32.gmra.mrb[182].mxu1 %v678_v24  ;;  %v3749_v52 = vld [vmem:[%s8280_s15 + $0x140] sm:$0xff] }
 0x674   : > { %v7126_v56 = vpop.eup %7125 }
 0x675   : > { %v9596_v1 = vmul.f32 %v7126_v56, %v3748_v42  ;;  %v2538_v56 = vsel %vm2300_vm0, %v9470_v26, 0.0  ;;  %v3493_v42 = vmul.f32 %v9604_v19, %v9604_v19 }
 0x678   : > { %v9588_v57 = vpop.xlane.xlu0 %2524 }
 0x679   : > { %12515 = vst [vmem:[#allocation74_spill] sm:$0xff] %v9588_v57 }
 0x67c   : > { %v9593_v10 = vpop.xlane.xlu0 %3164 }
 0x67d   : > { %12516 = vst [vmem:[#allocation21_spill] sm:$0xff] %v9593_v10  ;;  %v2892_v10 = vmul.f32 %v9470_v26, %v9470_v26  ;;  %v4778_v26 = vpop.permute.xlu1 %4777 }
 0x67f   : > { %5560 = vperm.xlu0 %7045, %v4514_v60  }
 0x683   : > { %4802 = vperm.xlu0 %7045, %v9596_v1  }
 0x684   : > { %v5541_v9 = vpop.permute.xlu0 %5540 }
 0x685   : > { %v6046_v16 = vadd.f32 %v5541_v9, %v5278_v31  ;;  %v3621_v31 = vsub.f32 %v3365_v46, %v3493_v42  ;;  %v2541_v46 = vsel %vm2300_vm0, %v9488_v4, 0.0 }
 0x687   : > { %v6302_v60 = vadd.f32 %v6174_v12, %v6046_v16  ;;  %v3178_v12 = vsel %vm2300_vm0, %v2892_v10, 0.0  ;;  %v3877_v9 = vadd.f32 1e-05, %v3621_v31  ;;  %v2081_v16 = vpop.f32.mrb[168].mxu0  ;;  %v2893_v31 = vmul.f32 %v9488_v4, %v9488_v4  ;;  %v685_v4 = vld [vmem:[%s7489_s14 + $0xb98] sm:$0xff] }
 0x688   : > { %v2083_v54 = vpop.f32.mrb[169].mxu0  ;;  %2119 = vmatprep.mubr.f32.mxu0 %v685_v4 }
 0x689   : > { %v6430_v0 = vmax.f32 %v6302_v60, 0.0  ;;  %7127 = vrsqrt.f32 %v3877_v9  ;;  %v1376_v60 = vpop.f32.mrb[168].mxu1  ;;  %v12526_v54 = vld [vmem:[#allocation27_spill] sm:$0xff] }
 0x68a   : > { %v9620_v43 = vadd.f32 %v2081_v16, %v1376_v60  ;;  %v1378_v53 = vpop.f32.mrb[169].mxu1  ;;  %v3181_v16 = vsel %vm2300_vm0, %v2893_v31, 0.0  ;;  %v12525_v60 = vld [vmem:[#allocation84_spill] sm:$0xff]  ;;  %v684_v31 = vld [vmem:[%s7489_s14 + $0xb90] sm:$0xff] }
 0x68b   : > { %6558 = vst.msk [vmem:[%s8543_s30 + $0x108] sm:$0xff] %vm2300_vm0, %v6430_v0  ;;  %2539 = vadd.xlane.f32.xlu1 %v2538_v56  ;;  %v4387_v0 = vmul.f32 %v9570_v5, %v9540_v8  ;;  %v4259_v56 = vld [vmem:[%s8300_s17 + $0x130] sm:$0xff]  ;;  %v12524_v5 = vld [vmem:[#allocation82_spill] sm:$0xff]  ;;  %v3366_v53 = vmul.f32 0.020408163, %v12525_v60  ;;  %2120 = vmatmul.mubr.f32.gmra.mrb[184].mxu0 %v684_v31 }
 0x68c   : > { %12521 = vst [vmem:[#allocation73_spill] sm:$0xff] %v9620_v43  ;;  %v9637_v9 = vmul.f32 0.020408163, %v12524_v5  ;;  %v682_v5 = vld [vmem:[%s7489_s14 + $0xb80] sm:$0xff] }
 0x68d   : > { %v4515_v42 = vsub.f32 %v4259_v56, %v4387_v0  ;;  %v5279_v0 = vmul.f32 %v4778_v26, %v12526_v54  ;;  %v6175_v56 = vld [vmem:[%s8531_s25 + $0x110] sm:$0xff] }
 0x68f   : > { %3179 = vadd.xlane.f32.xlu1 %v3178_v12 }
 0x693   : > { %v7128_v10 = vpop.eup %7127 }
 0x694   : > { %v9634_v8 = vmul.f32 %v7128_v10, %v3749_v52  ;;  %v3494_v10 = vmul.f32 %v9637_v9, %v9637_v9  ;;  %v683_v52 = vld [vmem:[%s7489_s14 + $0xb88] sm:$0xff] }
 0x695   : > { %1414 = vmatprep.mubr.f32.mxu1 %v683_v52 }
 0x696   : > { %1415 = vmatmul.mubr.f32.gmra.mrb[184].mxu1 %v682_v5 }
 0x69e   : > { %v9625_v24 = vpop.xlane.xlu1 %2527 }
 0x69f   : > { %12522 = vst [vmem:[#allocation75_spill] sm:$0xff] %v9625_v24 }
 0x6a0   : > { %5565 = vperm.xlu1 %7046, %v4515_v42  }
 0x6a2   : > { %v9632_v12 = vpop.xlane.xlu1 %3167  ;;  %2542 = vadd.xlane.f32.xlu0 %v2541_v46 }
 0x6a3   : > { %12523 = vst [vmem:[#allocation76_spill] sm:$0xff] %v9632_v12  ;;  %v3622_v12 = vsub.f32 %v3366_v53, %v3494_v10  ;;  %v3750_v53 = vld [vmem:[%s8280_s15 + $0x148] sm:$0xff] }
 0x6a4   : > { %4807 = vperm.xlu1 %7046, %v9634_v8  }
 0x6a5   : > { %v3878_v54 = vadd.f32 1e-05, %v3622_v12 }
 0x6a6   : > { %v5546_v42 = vpop.permute.xlu1 %5545  ;;  %3182 = vadd.xlane.f32.xlu0 %v3181_v16  ;;  %v4783_v16 = vpop.permute.xlu0 %4782 }
 0x6a7   : > { %v6047_v46 = vadd.f32 %v5546_v42, %v5279_v0  ;;  %7129 = vrsqrt.f32 %v3878_v54  ;;  %v4388_v0 = vmul.f32 %v9596_v1, %v9573_v23  ;;  %v4260_v42 = vld [vmem:[%s8300_s17 + $0x138] sm:$0xff]  ;;  %v2086_v12 = vpop.f32.mrb[170].mxu0  ;;  %v9668_v54 = vmul.f32 0.020408163, %v8578_v3  ;;  %v688_v3 = vld [vmem:[%s7489_s14 + $0xbb0] sm:$0xff] }
 0x6a8   : > { %v2088_v31 = vpop.f32.mrb[171].mxu0  ;;  %v6176_v1 = vld [vmem:[%s8531_s25 + $0x118] sm:$0xff] }
 0x6a9   : > { %v6303_v60 = vadd.f32 %v6175_v56, %v6047_v46  ;;  %v4516_v4 = vsub.f32 %v4260_v42, %v4388_v0  ;;  %v1381_v56 = vpop.f32.mrb[170].mxu1  ;;  %v2894_v31 = vmul.f32 %v9534_v59, %v9534_v59 }
 0x6aa   : > { %v1383_v46 = vpop.f32.mrb[171].mxu1  ;;  %v9662_v5 = vadd.f32 %v2086_v12, %v1381_v56  ;;  %v687_v56 = vld [vmem:[%s7489_s14 + $0xba8] sm:$0xff]  ;;  %v689_v12 = vld [vmem:[%s7489_s14 + $0xbb8] sm:$0xff] }
 0x6ab   : > { %v6431_v26 = vmax.f32 %v6303_v60, 0.0  ;;  %v12528_v60 = vld [vmem:[#allocation28_spill] sm:$0xff]  ;;  %v686_v46 = vld [vmem:[%s7489_s14 + $0xba0] sm:$0xff]  ;;  %1419 = vmatprep.mubr.f32.mxu1 %v687_v56  ;;  %2124 = vmatprep.mubr.f32.mxu0 %v689_v12  ;;  %v4788_v12 = vpop.permute.xlu1 %4787 }
 0x6ac   : > { %12527 = vst [vmem:[#allocation23_spill] sm:$0xff] %v9662_v5  ;;  %v5280_v23 = vmul.f32 %v4783_v16, %v12528_v60  ;;  %1420 = vmatmul.mubr.f32.gmra.mrb[186].mxu1 %v686_v46  ;;  %2125 = vmatmul.mubr.f32.gmra.mrb[186].mxu0 %v688_v3  ;;  %v3751_v3 = vld [vmem:[%s8280_s15 + $0x150] sm:$0xff] }
 0x6ad   : > { %6559 = vst.msk [vmem:[%s8543_s30 + $0x110] sm:$0xff] %vm2300_vm0, %v6431_v26 }
 0x6b1   : > { %v7130_v52 = vpop.eup %7129 }
 0x6b2   : > { %v9660_v10 = vmul.f32 %v7130_v52, %v3750_v53  ;;  %v3495_v52 = vmul.f32 %v9668_v54, %v9668_v54  ;;  %v3367_v53 = vmul.f32 0.020408163, %v8586_v22 }
 0x6b4   : > { %v3623_v60 = vsub.f32 %v3367_v53, %v3495_v52 }
 0x6b5   : > { %v9652_v24 = vpop.xlane.xlu0 %2530 }
 0x6b6   : > { %v3879_v22 = vadd.f32 1e-05, %v3623_v60  ;;  %v2895_v60 = vmul.f32 %v9556_v18, %v9556_v18 }
 0x6b8   : > { %7131 = vrsqrt.f32 %v3879_v22  ;;  %v3187_v22 = vsel %vm2300_vm0, %v2895_v60, 0.0 }
 0x6b9   : > { %v9657_v57 = vpop.xlane.xlu0 %3170 }
 0x6bc   : > { %5570 = vperm.xlu0 %7045, %v4516_v4   ;;  %v2544_v4 = vsel %vm2300_vm0, %v9534_v59, 0.0 }
 0x6c0   : > { %4812 = vperm.xlu0 %7045, %v9660_v10  }
 0x6c1   : > { %v5551_v26 = vpop.permute.xlu0 %5550 }
 0x6c2   : > { %v6048_v0 = vadd.f32 %v5551_v26, %v5280_v23  ;;  %v3184_v23 = vsel %vm2300_vm0, %v2894_v31, 0.0  ;;  %v7132_v46 = vpop.eup %7131  ;;  %v2547_v31 = vsel %vm2300_vm0, %v9556_v18, 0.0 }
 0x6c3   : > { %v2091_v26 = vpop.f32.mrb[172].mxu0 }
 0x6c4   : > { %v6304_v42 = vadd.f32 %v6176_v1, %v6048_v0  ;;  %v1386_v1 = vpop.f32.mrb[172].mxu1  ;;  %v2093_v56 = vpop.f32.mrb[173].mxu0 }
 0x6c5   : > { %v9684_v0 = vadd.f32 %v2091_v26, %v1386_v1  ;;  %v691_v1 = vld [vmem:[%s7489_s14 + $0xbc8] sm:$0xff]  ;;  %v693_v26 = vld [vmem:[%s7489_s14 + $0xbd8] sm:$0xff]  ;;  %v692_v56 = vld [vmem:[%s7489_s14 + $0xbd0] sm:$0xff] }
 0x6c6   : > { %v6432_v16 = vmax.f32 %v6304_v42, 0.0  ;;  %v1388_v42 = vpop.f32.mrb[173].mxu1  ;;  %1424 = vmatprep.mubr.f32.mxu1 %v691_v1  ;;  %2129 = vmatprep.mubr.f32.mxu0 %v693_v26  ;;  %v4262_v26 = vld [vmem:[%s8300_s17 + $0x148] sm:$0xff] }
 0x6c7   : > { %12529 = vst [vmem:[#allocation24_spill] sm:$0xff] %v9684_v0  ;;  %v690_v42 = vld [vmem:[%s7489_s14 + $0xbc0] sm:$0xff]  ;;  %2130 = vmatmul.mubr.f32.gmra.mrb[188].mxu0 %v692_v56 }
 0x6c8   : > { %6560 = vst.msk [vmem:[%s8543_s30 + $0x118] sm:$0xff] %vm2300_vm0, %v6432_v16  ;;  %2545 = vadd.xlane.f32.xlu1 %v2544_v4  ;;  %v4389_v4 = vmul.f32 %v9634_v8, %v9604_v19  ;;  %v4261_v16 = vld [vmem:[%s8300_s17 + $0x140] sm:$0xff]  ;;  %v9698_v19 = vmul.f32 %v7132_v46, %v3751_v3  ;;  %v9701_v8 = vmul.f32 0.020408163, %v8591_v47  ;;  %1425 = vmatmul.mubr.f32.gmra.mrb[188].mxu1 %v690_v42 }
 0x6c9   : > { %v6177_v46 = vld [vmem:[%s8531_s25 + $0x120] sm:$0xff] }
 0x6ca   : > { %v4517_v53 = vsub.f32 %v4261_v16, %v4389_v4  ;;  %12530 = vst [vmem:[#allocation77_spill] sm:$0xff] %v9701_v8  ;;  %v3368_v4 = vmul.f32 0.020408163, %v8593_v13  ;;  %v12531_v16 = vld [vmem:[#allocation29_spill] sm:$0xff]  ;;  %v4793_v13 = vpop.permute.xlu0 %4792 }
 0x6cc   : > { %3185 = vadd.xlane.f32.xlu1 %v3184_v23 }
 0x6db   : > { %v9689_v52 = vpop.xlane.xlu1 %2533 }
 0x6dd   : > { %5575 = vperm.xlu1 %7046, %v4517_v53   ;;  %v5281_v53 = vmul.f32 %v4788_v12, %v12531_v16 }
 0x6df   : > { %v9696_v23 = vpop.xlane.xlu1 %3173  ;;  %2548 = vadd.xlane.f32.xlu0 %v2547_v31  ;;  %v3496_v31 = vmul.f32 %v9701_v8, %v9701_v8  ;;  %v694_v8 = vld [vmem:[%s7489_s14 + $0xbe0] sm:$0xff] }
 0x6e1   : > { %4817 = vperm.xlu1 %7046, %v9698_v19   ;;  %v3624_v60 = vsub.f32 %v3368_v4, %v3496_v31  ;;  %v1391_v42 = vpop.f32.mrb[174].mxu1 }
 0x6e2   : > { %v1393_v4 = vpop.f32.mrb[175].mxu1 }
 0x6e3   : > { %v5556_v47 = vpop.permute.xlu1 %5555  ;;  %3188 = vadd.xlane.f32.xlu0 %v3187_v22  ;;  %v3880_v59 = vadd.f32 1e-05, %v3624_v60  ;;  %v4390_v22 = vmul.f32 %v9660_v10, %v9637_v9  ;;  %v12533_v9 = vld [vmem:[#allocation30_spill] sm:$0xff]  ;;  %v697_v4 = vld [vmem:[%s7489_s14 + $0xbf8] sm:$0xff] }
 0x6e4   : > { %v6049_v3 = vadd.f32 %v5556_v47, %v5281_v53  ;;  %v5282_v10 = vmul.f32 %v4793_v13, %v12533_v9  ;;  %2134 = vmatprep.mubr.f32.mxu0 %v697_v4  ;;  %v2550_v13 = vsel %vm2300_vm0, %v9598_v29, 0.0  ;;  %v4391_v4 = vmul.f32 %v9698_v19, %v9668_v54  ;;  %v698_v54 = vld [vmem:[%s7489_s14 + $0xc00] sm:$0xff]  ;;  %v700_v19 = vld [vmem:[%s7489_s14 + $0xc10] sm:$0xff] }
 0x6e5   : > { %7133 = vrsqrt.f32 %v3880_v59  ;;  %v4518_v56 = vsub.f32 %v4262_v26, %v4390_v22  ;;  %v695_v26 = vld [vmem:[%s7489_s14 + $0xbe8] sm:$0xff] }
 0x6e6   : > { %v6305_v1 = vadd.f32 %v6177_v46, %v6049_v3  ;;  %v6178_v3 = vld [vmem:[%s8531_s25 + $0x128] sm:$0xff]  ;;  %1429 = vmatprep.mubr.f32.mxu1 %v695_v26 }
 0x6e7   : > { %1430 = vmatmul.mubr.f32.gmra.mrb[190].mxu1 %v694_v8  ;;  %v4798_v26 = vpop.permute.xlu1 %4797 }
 0x6e8   : > { %v6433_v18 = vmax.f32 %v6305_v1, 0.0  ;;  %v9732_v1 = vmul.f32 0.020408163, %v8634_v14  ;;  %v3369_v14 = vmul.f32 0.020408163, %v8642_v15 }
 0x6e9   : > { %v2096_v16 = vpop.f32.mrb[174].mxu0 }
 0x6ea   : > { %6561 = vst.msk [vmem:[%s8543_s30 + $0x120] sm:$0xff] %vm2300_vm0, %v6433_v18  ;;  %v3752_v18 = vld [vmem:[%s8280_s15 + $0x158] sm:$0xff]  ;;  %v9724_v59 = vadd.f32 %v2096_v16, %v1391_v42  ;;  %v2098_v47 = vpop.f32.mrb[175].mxu0  ;;  %12534 = vst [vmem:[#allocation80_spill] sm:$0xff] %v9732_v1  ;;  %v696_v42 = vld [vmem:[%s7489_s14 + $0xbf0] sm:$0xff]  ;;  %v1396_v16 = vpop.f32.mrb[176].mxu1 }
 0x6eb   : > { %2135 = vmatmul.mubr.f32.gmra.mrb[190].mxu0 %v696_v42  ;;  %v1398_v9 = vpop.f32.mrb[177].mxu1  ;;  %v4263_v42 = vld [vmem:[%s8300_s17 + $0x150] sm:$0xff] }
 0x6ec   : > { %12532 = vst [vmem:[#allocation79_spill] sm:$0xff] %v9724_v59  ;;  %v699_v9 = vld [vmem:[%s7489_s14 + $0xc08] sm:$0xff] }
 0x6ed   : > { %v2101_v47 = vpop.f32.mrb[176].mxu0  ;;  %1434 = vmatprep.mubr.f32.mxu1 %v699_v9 }
 0x6ee   : > { %v2103_v8 = vpop.f32.mrb[177].mxu0  ;;  %1435 = vmatmul.mubr.f32.gmra.mrb[192].mxu1 %v698_v54 }
 0x6ef   : > { %v7134_v53 = vpop.eup %7133  ;;  %v3370_v8 = vmul.f32 0.020408163, %v8661_v40  ;;  %v6179_v40 = vld [vmem:[%s8531_s25 + $0x130] sm:$0xff] }
 0x6f0   : > { %v9726_v31 = vmul.f32 %v7134_v53, %v3752_v18  ;;  %v3497_v53 = vmul.f32 %v9732_v1, %v9732_v1 }
 0x6f2   : > { %v9716_v12 = vpop.xlane.xlu0 %2536 }
 0x6f6   : > { %v9721_v46 = vpop.xlane.xlu0 %3176 }
 0x6f9   : > { %5580 = vperm.xlu0 %7045, %v4518_v56  }
 0x6fd   : > { %4822 = vperm.xlu0 %7045, %v9726_v31  }
 0x6fe   : > { %v5561_v60 = vpop.permute.xlu0 %5560 }
 0x6ff   : > { %v6050_v22 = vadd.f32 %v5561_v60, %v5282_v10  ;;  %v2896_v10 = vmul.f32 %v9598_v29, %v9598_v29  ;;  %v9745_v60 = vadd.f32 %v2101_v47, %v1396_v16  ;;  %v4519_v16 = vsub.f32 %v4263_v42, %v4391_v4  ;;  %v12537_v42 = vld [vmem:[#allocation31_spill] sm:$0xff] }
 0x700   : > { %v2897_v47 = vmul.f32 %v9620_v43, %v9620_v43  ;;  %v2556_v29 = vsel %vm2300_vm0, %v9662_v5, 0.0 }
 0x701   : > { %v6306_v56 = vadd.f32 %v6178_v3, %v6050_v22  ;;  %12535 = vst [vmem:[#allocation25_spill] sm:$0xff] %v9745_v60  ;;  %v3625_v3 = vsub.f32 %v3369_v14, %v3497_v53  ;;  %v3190_v22 = vsel %vm2300_vm0, %v2896_v10, 0.0  ;;  %v2553_v53 = vsel %vm2300_vm0, %v9620_v43, 0.0  ;;  %v3753_v14 = vld [vmem:[%s8280_s15 + $0x160] sm:$0xff]  ;;  %v701_v10 = vld [vmem:[%s7489_s14 + $0xc18] sm:$0xff] }
 0x702   : > { %2139 = vmatprep.mubr.f32.mxu0 %v701_v10 }
 0x703   : > { %v6434_v18 = vmax.f32 %v6306_v56, 0.0  ;;  %v3881_v15 = vadd.f32 1e-05, %v3625_v3  ;;  %2140 = vmatmul.mubr.f32.gmra.mrb[192].mxu0 %v700_v19  ;;  %v1401_v19 = vpop.f32.mrb[178].mxu1 }
 0x705   : > { %6562 = vst.msk [vmem:[%s8543_s30 + $0x128] sm:$0xff] %vm2300_vm0, %v6434_v18  ;;  %2551 = vadd.xlane.f32.xlu1 %v2550_v13  ;;  %7135 = vrsqrt.f32 %v3881_v15  ;;  %v9756_v13 = vmul.f32 0.020408163, %v8657_v55  ;;  %v3193_v15 = vsel %vm2300_vm0, %v2897_v47, 0.0 }
 0x709   : > { %3191 = vadd.xlane.f32.xlu1 %v3190_v22  ;;  %v3498_v22 = vmul.f32 %v9756_v13, %v9756_v13 }
 0x70b   : > { %v3626_v4 = vsub.f32 %v3370_v8, %v3498_v22  ;;  %v1403_v8 = vpop.f32.mrb[179].mxu1 }
 0x70c   : > { %v12540_v8 = vld [vmem:[#allocation32_spill] sm:$0xff] }
 0x70f   : > { %v7136_v18 = vpop.eup %7135 }
 0x710   : > { %v9770_v3 = vmul.f32 %v7136_v18, %v3753_v14  ;;  %v4803_v14 = vpop.permute.xlu0 %4802 }
 0x711   : > { %v5284_v43 = vmul.f32 %v4803_v14, %v12540_v8 }
 0x712   : > { %12536 = vst [vmem:[#allocation26_spill] sm:$0xff] %v9770_v3 }
 0x718   : > { %v9753_v56 = vpop.xlane.xlu1 %2539 }
 0x71a   : > { %5585 = vperm.xlu1 %7046, %v4519_v16   ;;  %v5283_v16 = vmul.f32 %v4798_v26, %v12537_v42  ;;  %v3754_v42 = vld [vmem:[%s8280_s15 + $0x168] sm:$0xff] }
 0x71c   : > { %v9768_v55 = vpop.xlane.xlu1 %3179  ;;  %2554 = vadd.xlane.f32.xlu0 %v2553_v53  ;;  %v3882_v53 = vadd.f32 1e-05, %v3626_v4 }
 0x71e   : > { %4827 = vperm.xlu1 %7046, %v9770_v3   ;;  %7137 = vrsqrt.f32 %v3882_v53  ;;  %v2106_v26 = vpop.f32.mrb[178].mxu0  ;;  %v705_v53 = vld [vmem:[%s7489_s14 + $0xc38] sm:$0xff] }
 0x71f   : > { %v2108_v4 = vpop.f32.mrb[179].mxu0  ;;  %2144 = vmatprep.mubr.f32.mxu0 %v705_v53 }
 0x720   : > { %v5566_v9 = vpop.permute.xlu1 %5565  ;;  %3194 = vadd.xlane.f32.xlu0 %v3193_v15  ;;  %v9783_v15 = vadd.f32 %v2106_v26, %v1401_v19  ;;  %v6180_v19 = vld [vmem:[%s8531_s25 + $0x138] sm:$0xff] }
 0x721   : > { %v6051_v10 = vadd.f32 %v5566_v9, %v5283_v16  ;;  %v9791_v9 = vmul.f32 0.020408163, %v8695_v39 }
 0x722   : > { %12538 = vst [vmem:[#allocation81_spill] sm:$0xff] %v9783_v15 }
 0x723   : > { %v6307_v54 = vadd.f32 %v6179_v40, %v6051_v10  ;;  %12539 = vst [vmem:[#allocation83_spill] sm:$0xff] %v9791_v9  ;;  %v703_v10 = vld [vmem:[%s7489_s14 + $0xc28] sm:$0xff]  ;;  %v2111_v14 = vpop.f32.mrb[180].mxu0 }
 0x724   : > { %1439 = vmatprep.mubr.f32.mxu1 %v703_v10 }
 0x725   : > { %v6435_v18 = vmax.f32 %v6307_v54, 0.0  ;;  %v702_v54 = vld [vmem:[%s7489_s14 + $0xc20] sm:$0xff] }
 0x726   : > { %1440 = vmatmul.mubr.f32.gmra.mrb[194].mxu1 %v702_v54 }
 0x727   : > { %6563 = vst.msk [vmem:[%s8543_s30 + $0x130] sm:$0xff] %vm2300_vm0, %v6435_v18  ;;  %v704_v18 = vld [vmem:[%s7489_s14 + $0xc30] sm:$0xff] }
 0x728   : > { %v7138_v22 = vpop.eup %7137  ;;  %2145 = vmatmul.mubr.f32.gmra.mrb[194].mxu0 %v704_v18  ;;  %v2898_v18 = vmul.f32 %v9662_v5, %v9662_v5 }
 0x729   : > { %v9785_v16 = vmul.f32 %v7138_v22, %v3754_v42  ;;  %v3499_v22 = vmul.f32 %v9791_v9, %v9791_v9  ;;  %v3371_v42 = vmul.f32 0.020408163, %v8700_v25  ;;  %v2113_v9 = vpop.f32.mrb[181].mxu0 }
 0x72a   : > { %v707_v9 = vld [vmem:[%s7489_s14 + $0xc48] sm:$0xff] }
 0x72b   : > { %v3627_v53 = vsub.f32 %v3371_v42, %v3499_v22  ;;  %v9812_v22 = vmul.f32 0.020408163, %v8722_v34  ;;  %v2559_v42 = vsel %vm2300_vm0, %v9684_v0, 0.0  ;;  %1444 = vmatprep.mubr.f32.mxu1 %v707_v9  ;;  %v12543_v9 = vld [vmem:[#allocation33_spill] sm:$0xff] }
 0x72c   : > { %v1406_v10 = vpop.f32.mrb[180].mxu1 }
 0x72d   : > { %v1408_v54 = vpop.f32.mrb[181].mxu1  ;;  %v9806_v8 = vadd.f32 %v2111_v14, %v1406_v10  ;;  %v3883_v25 = vadd.f32 1e-05, %v3627_v53  ;;  %v708_v10 = vld [vmem:[%s7489_s14 + $0xc50] sm:$0xff]  ;;  %v3372_v53 = vmul.f32 0.020408163, %v8727_v58 }
 0x72e   : > { %v3500_v54 = vmul.f32 %v9812_v22, %v9812_v22 }
 0x72f   : > { %v9780_v47 = vpop.xlane.xlu0 %2542  ;;  %12541 = vst [vmem:[#allocation82_spill] sm:$0xff] %v9806_v8  ;;  %7139 = vrsqrt.f32 %v3883_v25 }
 0x730   : > { %v3628_v25 = vsub.f32 %v3372_v53, %v3500_v54 }
 0x732   : > { %v3884_v58 = vadd.f32 1e-05, %v3628_v25 }
 0x733   : > { %v9787_v40 = vpop.xlane.xlu0 %3182 }
 0x734   : > { %7141 = vrsqrt.f32 %v3884_v58 }
 0x736   : > { %4832 = vperm.xlu0 %7045, %v9785_v16  }
 0x73b   : > { %v5571_v26 = vpop.permute.xlu0 %5570 }
 0x73c   : > { %v6052_v39 = vadd.f32 %v5571_v26, %v5284_v43  ;;  %v3196_v43 = vsel %vm2300_vm0, %v2898_v18, 0.0  ;;  %v7140_v26 = vpop.eup %7139 }
 0x73e   : > { %v6308_v4 = vadd.f32 %v6180_v19, %v6052_v39  ;;  %v4808_v19 = vpop.permute.xlu1 %4807  ;;  %v3755_v39 = vld [vmem:[%s8280_s15 + $0x170] sm:$0xff] }
 0x73f   : > { %v9826_v14 = vmul.f32 %v7140_v26, %v3755_v39 }
 0x740   : > { %v6436_v3 = vmax.f32 %v6308_v4, 0.0  ;;  %v706_v4 = vld [vmem:[%s7489_s14 + $0xc40] sm:$0xff] }
 0x741   : > { %1445 = vmatmul.mubr.f32.gmra.mrb[196].mxu1 %v706_v4  ;;  %12542 = vst [vmem:[#allocation84_spill] sm:$0xff] %v9826_v14  ;;  %v6181_v4 = vld [vmem:[%s8531_s25 + $0x140] sm:$0xff] }
 0x742   : > { %6564 = vst.msk [vmem:[%s8543_s30 + $0x138] sm:$0xff] %vm2300_vm0, %v6436_v3  ;;  %2557 = vadd.xlane.f32.xlu1 %v2556_v29  ;;  %v2899_v3 = vmul.f32 %v9684_v0, %v9684_v0  ;;  %v709_v29 = vld [vmem:[%s7489_s14 + $0xc58] sm:$0xff]  ;;  %v2116_v53 = vpop.f32.mrb[182].mxu0  ;;  %v4813_v0 = vpop.permute.xlu0 %4812 }
 0x743   : > { %2149 = vmatprep.mubr.f32.mxu0 %v709_v29  ;;  %v5285_v29 = vmul.f32 %v4808_v19, %v12543_v9  ;;  %v2118_v25 = vpop.f32.mrb[183].mxu0  ;;  %v7142_v19 = vpop.eup %7141  ;;  %v3756_v9 = vld [vmem:[%s8280_s15 + $0x178] sm:$0xff] }
 0x744   : > { %2150 = vmatmul.mubr.f32.gmra.mrb[196].mxu0 %v708_v10  ;;  %v3199_v18 = vsel %vm2300_vm0, %v2899_v3, 0.0  ;;  %v1411_v3 = vpop.f32.mrb[182].mxu1  ;;  %v9843_v58 = vmul.f32 %v7142_v19, %v3756_v9  ;;  %v6182_v19 = vld [vmem:[%s8531_s25 + $0x148] sm:$0xff]  ;;  %v2562_v9 = vsel %vm2300_vm0, %v9724_v59, 0.0 }
 0x745   : > { %v9838_v54 = vadd.f32 %v2116_v53, %v1411_v3  ;;  %v3373_v53 = vmul.f32 0.020408163, %v8761_v61 }
 0x746   : > { %3197 = vadd.xlane.f32.xlu1 %v3196_v43  ;;  %12545 = vst [vmem:[#allocation28_spill] sm:$0xff] %v9843_v58 }
 0x747   : > { %12544 = vst [vmem:[#allocation27_spill] sm:$0xff] %v9838_v54 }
 0x755   : > { %v9824_v34 = vpop.xlane.xlu1 %2545  ;;  %2560 = vadd.xlane.f32.xlu0 %v2559_v42 }
 0x757   : > { %4837 = vperm.xlu1 %7046, %v9826_v14  }
 0x759   : > { %v9832_v43 = vpop.xlane.xlu1 %3185  ;;  %3200 = vadd.xlane.f32.xlu0 %v3199_v18  ;;  %v1413_v18 = vpop.f32.mrb[183].mxu1 }
 0x75a   : > { %v12547_v18 = vld [vmem:[#allocation34_spill] sm:$0xff] }
 0x75b   : > { %v5286_v25 = vmul.f32 %v4813_v0, %v12547_v18 }
 0x75d   : > { %v5576_v42 = vpop.permute.xlu1 %5575 }
 0x75e   : > { %v6053_v10 = vadd.f32 %v5576_v42, %v5285_v29  ;;  %v9847_v29 = vmul.f32 0.020408163, %v8752_v28  ;;  %v713_v42 = vld [vmem:[%s7489_s14 + $0xc78] sm:$0xff]  ;;  %v2121_v0 = vpop.f32.mrb[184].mxu0 }
 0x75f   : > { %2154 = vmatprep.mubr.f32.mxu0 %v713_v42 }
 0x760   : > { %v6309_v26 = vadd.f32 %v6181_v4, %v6053_v10  ;;  %12546 = vst [vmem:[#allocation29_spill] sm:$0xff] %v9847_v29  ;;  %v711_v4 = vld [vmem:[%s7489_s14 + $0xc68] sm:$0xff]  ;;  %v710_v10 = vld [vmem:[%s7489_s14 + $0xc60] sm:$0xff]  ;;  %v3501_v3 = vmul.f32 %v9847_v29, %v9847_v29 }
 0x761   : > { %1449 = vmatprep.mubr.f32.mxu1 %v711_v4  ;;  %v2900_v4 = vmul.f32 %v9724_v59, %v9724_v59 }
 0x762   : > { %v6437_v39 = vmax.f32 %v6309_v26, 0.0  ;;  %1450 = vmatmul.mubr.f32.gmra.mrb[198].mxu1 %v710_v10  ;;  %v3629_v14 = vsub.f32 %v3373_v53, %v3501_v3  ;;  %v2123_v3 = vpop.f32.mrb[185].mxu0  ;;  %v9870_v53 = vmul.f32 0.020408163, %v8789_v11  ;;  %v4818_v11 = vpop.permute.xlu1 %4817 }
 0x763   : > { %v3202_v29 = vsel %vm2300_vm0, %v2900_v4, 0.0  ;;  %v714_v4 = vld [vmem:[%s7489_s14 + $0xc80] sm:$0xff] }
 0x764   : > { %6565 = vst.msk [vmem:[%s8543_s30 + $0x140] sm:$0xff] %vm2300_vm0, %v6437_v39  ;;  %v712_v39 = vld [vmem:[%s7489_s14 + $0xc70] sm:$0xff] }
 0x765   : > { %2155 = vmatmul.mubr.f32.gmra.mrb[198].mxu0 %v712_v39  ;;  %v3885_v39 = vadd.f32 1e-05, %v3629_v14  ;;  %v2565_v14 = vsel %vm2300_vm0, %v9745_v60, 0.0 }
 0x767   : > { %7143 = vrsqrt.f32 %v3885_v39  ;;  %v3502_v39 = vmul.f32 %v9870_v53, %v9870_v53 }
 0x769   : > { %v1416_v10 = vpop.f32.mrb[184].mxu1 }
 0x76a   : > { %v1418_v18 = vpop.f32.mrb[185].mxu1 }
 0x76c   : > { %v9841_v5 = vpop.xlane.xlu0 %2548 }
 0x76f   : > { %4842 = vperm.xlu0 %7045, %v9843_v58   ;;  %v9865_v58 = vadd.f32 %v2121_v0, %v1416_v10 }
 0x770   : > { %v9852_v26 = vpop.xlane.xlu0 %3188 }
 0x771   : > { %12548 = vst [vmem:[#allocation30_spill] sm:$0xff] %v9865_v58 }
 0x778   : > { %v5581_v28 = vpop.permute.xlu0 %5580 }
 0x779   : > { %v6054_v1 = vadd.f32 %v5581_v28, %v5286_v25  ;;  %v3757_v25 = vld [vmem:[%s8280_s15 + $0x180] sm:$0xff]  ;;  %v715_v28 = vld [vmem:[%s7489_s14 + $0xc88] sm:$0xff] }
 0x77a   : > { %1454 = vmatprep.mubr.f32.mxu1 %v715_v28 }
 0x77b   : > { %v6310_v42 = vadd.f32 %v6182_v19, %v6054_v1  ;;  %2563 = vadd.xlane.f32.xlu1 %v2562_v9  ;;  %v7144_v1 = vpop.eup %7143  ;;  %v2901_v19 = vmul.f32 %v9745_v60, %v9745_v60  ;;  %v717_v9 = vld [vmem:[%s7489_s14 + $0xc98] sm:$0xff]  ;;  %1455 = vmatmul.mubr.f32.gmra.mrb[200].mxu1 %v714_v4  ;;  %v3758_v60 = vld [vmem:[%s8280_s15 + $0x188] sm:$0xff] }
 0x77c   : > { %2159 = vmatprep.mubr.f32.mxu0 %v717_v9  ;;  %v9882_v10 = vmul.f32 %v7144_v1, %v3757_v25  ;;  %v6183_v25 = vld [vmem:[%s8531_s25 + $0x150] sm:$0xff] }
 0x77d   : > { %v6438_v61 = vmax.f32 %v6310_v42, 0.0  ;;  %v716_v42 = vld [vmem:[%s7489_s14 + $0xc90] sm:$0xff] }
 0x77e   : > { %2160 = vmatmul.mubr.f32.gmra.mrb[200].mxu0 %v716_v42 }
 0x77f   : > { %6566 = vst.msk [vmem:[%s8543_s30 + $0x148] sm:$0xff] %vm2300_vm0, %v6438_v61  ;;  %3203 = vadd.xlane.f32.xlu1 %v3202_v29  ;;  %v3374_v29 = vmul.f32 0.020408163, %v8800_v17  ;;  %v3205_v61 = vsel %vm2300_vm0, %v2901_v19, 0.0  ;;  %v1421_v4 = vpop.f32.mrb[186].mxu1 }
 0x781   : > { %v3630_v0 = vsub.f32 %v3374_v29, %v3502_v39  ;;  %v2126_v29 = vpop.f32.mrb[186].mxu0  ;;  %v1423_v39 = vpop.f32.mrb[187].mxu1 }
 0x783   : > { %v3886_v17 = vadd.f32 1e-05, %v3630_v0  ;;  %v2128_v0 = vpop.f32.mrb[187].mxu0 }
 0x785   : > { %7145 = vrsqrt.f32 %v3886_v17 }
 0x78e   : > { %2566 = vadd.xlane.f32.xlu0 %v2565_v14  ;;  %v12549_v14 = vld [vmem:[#allocation35_spill] sm:$0xff] }
 0x78f   : > { %v5287_v1 = vmul.f32 %v4818_v11, %v12549_v14  ;;  %v7146_v17 = vpop.eup %7145  ;;  %v9903_v14 = vmul.f32 0.020408163, %v8816_v30  ;;  %v2902_v30 = vmul.f32 %v9783_v15, %v9783_v15 }
 0x790   : > { %4847 = vperm.xlu1 %7046, %v9882_v10   ;;  %v9899_v11 = vmul.f32 %v7146_v17, %v3758_v60  ;;  %v2568_v60 = vsel %vm2300_vm0, %v9783_v15, 0.0 }
 0x791   : > { %12551 = vst [vmem:[#allocation32_spill] sm:$0xff] %v9903_v14 }
 0x792   : > { %v9888_v18 = vpop.xlane.xlu1 %2551  ;;  %3206 = vadd.xlane.f32.xlu0 %v3205_v61  ;;  %v9894_v61 = vadd.f32 %v2126_v29, %v1421_v4  ;;  %v3375_v4 = vmul.f32 0.020408163, %v8825_v51 }
 0x794   : > { %12550 = vst [vmem:[#allocation31_spill] sm:$0xff] %v9894_v61 }
 0x796   : > { %v9890_v3 = vpop.xlane.xlu1 %3191 }
 0x79a   : > { %v5586_v28 = vpop.permute.xlu1 %5585  ;;  %v2131_v0 = vpop.f32.mrb[188].mxu0 }
 0x79b   : > { %v6055_v9 = vadd.f32 %v5586_v28, %v5287_v1  ;;  %v719_v1 = vld [vmem:[%s7489_s14 + $0xca8] sm:$0xff]  ;;  %v718_v28 = vld [vmem:[%s7489_s14 + $0xca0] sm:$0xff]  ;;  %v1426_v29 = vpop.f32.mrb[188].mxu1 }
 0x79c   : > { %1459 = vmatprep.mubr.f32.mxu1 %v719_v1  ;;  %v1428_v17 = vpop.f32.mrb[189].mxu1  ;;  %v3208_v1 = vsel %vm2300_vm0, %v2902_v30, 0.0  ;;  %v9917_v51 = vadd.f32 %v2131_v0, %v1426_v29  ;;  %v722_v30 = vld [vmem:[%s7489_s14 + $0xcc0] sm:$0xff]  ;;  %v724_v29 = vld [vmem:[%s7489_s14 + $0xcd0] sm:$0xff]  ;;  %v3376_v0 = vmul.f32 0.020408163, %v8864_v33 }
 0x79d   : > { %v6311_v19 = vadd.f32 %v6183_v25, %v6055_v9  ;;  %v721_v25 = vld [vmem:[%s7489_s14 + $0xcb8] sm:$0xff]  ;;  %v720_v9 = vld [vmem:[%s7489_s14 + $0xcb0] sm:$0xff]  ;;  %1460 = vmatmul.mubr.f32.gmra.mrb[202].mxu1 %v718_v28 }
 0x79e   : > { %2164 = vmatprep.mubr.f32.mxu0 %v721_v25  ;;  %12552 = vst [vmem:[#allocation33_spill] sm:$0xff] %v9917_v51  ;;  %v2133_v25 = vpop.f32.mrb[189].mxu0  ;;  %v725_v17 = vld [vmem:[%s7489_s14 + $0xcd8] sm:$0xff] }
 0x79f   : > { %v6439_v42 = vmax.f32 %v6311_v19, 0.0  ;;  %2165 = vmatmul.mubr.f32.gmra.mrb[202].mxu0 %v720_v9  ;;  %v3503_v19 = vmul.f32 %v9903_v14, %v9903_v14  ;;  %v9920_v9 = vmul.f32 0.020408163, %v8853_v35 }
 0x7a0   : > { %2169 = vmatprep.mubr.f32.mxu0 %v725_v17 }
 0x7a1   : > { %6567 = vst.msk [vmem:[%s8543_s30 + $0x150] sm:$0xff] %vm2300_vm0, %v6439_v42  ;;  %v3631_v42 = vsub.f32 %v3375_v4, %v3503_v19  ;;  %v2571_v19 = vsel %vm2300_vm0, %v9806_v8, 0.0  ;;  %v3759_v4 = vld [vmem:[%s8280_s15 + $0x190] sm:$0xff] }
 0x7a3   : > { %v3887_v39 = vadd.f32 1e-05, %v3631_v42  ;;  %v723_v42 = vld [vmem:[%s7489_s14 + $0xcc8] sm:$0xff]  ;;  %2170 = vmatmul.mubr.f32.gmra.mrb[204].mxu0 %v724_v29  ;;  %v3760_v29 = vld [vmem:[%s8280_s15 + $0x198] sm:$0xff] }
 0x7a4   : > { %1464 = vmatprep.mubr.f32.mxu1 %v723_v42 }
 0x7a5   : > { %7147 = vrsqrt.f32 %v3887_v39  ;;  %1465 = vmatmul.mubr.f32.gmra.mrb[204].mxu1 %v722_v30  ;;  %v3504_v39 = vmul.f32 %v9920_v9, %v9920_v9 }
 0x7a7   : > { %v3632_v25 = vsub.f32 %v3376_v0, %v3504_v39  ;;  %v727_v0 = vld [vmem:[%s7489_s14 + $0xce8] sm:$0xff]  ;;  %v729_v39 = vld [vmem:[%s7489_s14 + $0xcf8] sm:$0xff] }
 0x7a8   : > { %4852 = vperm.xlu0 %7045, %v9899_v11   ;;  %1469 = vmatprep.mubr.f32.mxu1 %v727_v0 }
 0x7a9   : > { %v3888_v42 = vadd.f32 1e-05, %v3632_v25  ;;  %2174 = vmatprep.mubr.f32.mxu0 %v729_v39  ;;  %v728_v25 = vld [vmem:[%s7489_s14 + $0xcf0] sm:$0xff] }
 0x7aa   : > { %2175 = vmatmul.mubr.f32.gmra.mrb[206].mxu0 %v728_v25 }
 0x7ab   : > { %7149 = vrsqrt.f32 %v3888_v42 }
 0x7af   : > { %v7148_v28 = vpop.eup %7147 }
 0x7b0   : > { %v9932_v35 = vmul.f32 %v7148_v28, %v3759_v4 }
 0x7b2   : > { %12553 = vst [vmem:[#allocation34_spill] sm:$0xff] %v9932_v35 }
 0x7b4   : > { %2569 = vadd.xlane.f32.xlu1 %v2568_v60  ;;  %v2903_v60 = vmul.f32 %v9806_v8, %v9806_v8 }
 0x7b5   : > { %v7150_v30 = vpop.eup %7149 }
 0x7b6   : > { %v9941_v8 = vmul.f32 %v7150_v30, %v3760_v29 }
 0x7b8   : > { %3209 = vadd.xlane.f32.xlu1 %v3208_v1  ;;  %v3211_v1 = vsel %vm2300_vm0, %v2903_v60, 0.0  ;;  %v9945_v60 = vmul.f32 0.020408163, %v8880_v41  ;;  %v2904_v41 = vmul.f32 %v9838_v54, %v9838_v54 }
 0x7ba   : > { %v1431_v33 = vpop.f32.mrb[190].mxu1  ;;  %12555 = vst [vmem:[#allocation97_spill] sm:$0xff] %v9945_v60  ;;  %v3505_v42 = vmul.f32 %v9945_v60, %v9945_v60  ;;  %v3214_v39 = vsel %vm2300_vm0, %v2904_v41, 0.0  ;;  %v730_v41 = vld [vmem:[%s7489_s14 + $0xd00] sm:$0xff] }
 0x7be   : > { %v2136_v17 = vpop.f32.mrb[190].mxu0 }
 0x7bf   : > { %v9938_v28 = vadd.f32 %v2136_v17, %v1431_v33  ;;  %v2138_v4 = vpop.f32.mrb[191].mxu0  ;;  %v3377_v33 = vmul.f32 0.020408163, %v8889_v48  ;;  %v2574_v17 = vsel %vm2300_vm0, %v9838_v54, 0.0  ;;  %v733_v54 = vld [vmem:[%s7489_s14 + $0xd18] sm:$0xff] }
 0x7c0   : > { %2179 = vmatprep.mubr.f32.mxu0 %v733_v54 }
 0x7c1   : > { %12554 = vst [vmem:[#allocation35_spill] sm:$0xff] %v9938_v28 }
 0x7c7   : > { %2572 = vadd.xlane.f32.xlu0 %v2571_v19  ;;  %v1433_v19 = vpop.f32.mrb[191].mxu1 }
 0x7c8   : > { %v3633_v19 = vsub.f32 %v3377_v33, %v3505_v42  ;;  %v1436_v4 = vpop.f32.mrb[192].mxu1  ;;  %v9962_v42 = vmul.f32 0.020408163, %v8917_v38  ;;  %v2577_v33 = vsel %vm2300_vm0, %v9865_v58, 0.0 }
 0x7c9   : > { %4857 = vperm.xlu1 %7046, %v9932_v35   ;;  %v1438_v0 = vpop.f32.mrb[193].mxu1 }
 0x7ca   : > { %v3889_v30 = vadd.f32 1e-05, %v3633_v19  ;;  %v2905_v19 = vmul.f32 %v9865_v58, %v9865_v58  ;;  %v731_v0 = vld [vmem:[%s7489_s14 + $0xd08] sm:$0xff] }
 0x7cb   : > { %3212 = vadd.xlane.f32.xlu0 %v3211_v1  ;;  %v726_v1 = vld [vmem:[%s7489_s14 + $0xce0] sm:$0xff] }
 0x7cc   : > { %1470 = vmatmul.mubr.f32.gmra.mrb[206].mxu1 %v726_v1  ;;  %7151 = vrsqrt.f32 %v3889_v30  ;;  %v3506_v30 = vmul.f32 %v9962_v42, %v9962_v42 }
 0x7cd   : > { %1474 = vmatprep.mubr.f32.mxu1 %v731_v0 }
 0x7d0   : > { %1475 = vmatmul.mubr.f32.gmra.mrb[208].mxu1 %v730_v41 }
 0x7d6   : > { %v2141_v29 = vpop.f32.mrb[192].mxu0  ;;  %v7152_v25 = vpop.eup %7151 }
 0x7d7   : > { %v9959_v48 = vadd.f32 %v2141_v29, %v1436_v4  ;;  %v2143_v1 = vpop.f32.mrb[193].mxu0  ;;  %v732_v4 = vld [vmem:[%s7489_s14 + $0xd10] sm:$0xff]  ;;  %v3378_v29 = vmul.f32 0.020408163, %v8928_v27 }
 0x7d8   : > { %2180 = vmatmul.mubr.f32.gmra.mrb[208].mxu0 %v732_v4  ;;  %v3762_v4 = vld [vmem:[%s8280_s15 + $0x1a8] sm:$0xff] }
 0x7d9   : > { %12556 = vst [vmem:[#allocation98_spill] sm:$0xff] %v9959_v48  ;;  %v3634_v54 = vsub.f32 %v3378_v29, %v3506_v30  ;;  %v735_v29 = vld [vmem:[%s7489_s14 + $0xd28] sm:$0xff]  ;;  %v737_v30 = vld [vmem:[%s7489_s14 + $0xd38] sm:$0xff] }
 0x7da   : > { %1479 = vmatprep.mubr.f32.mxu1 %v735_v29  ;;  %2184 = vmatprep.mubr.f32.mxu0 %v737_v30 }
 0x7db   : > { %v3890_v1 = vadd.f32 1e-05, %v3634_v54  ;;  %v736_v54 = vld [vmem:[%s7489_s14 + $0xd30] sm:$0xff] }
 0x7dc   : > { %2185 = vmatmul.mubr.f32.gmra.mrb[210].mxu0 %v736_v54 }
 0x7dd   : > { %7153 = vrsqrt.f32 %v3890_v1 }
 0x7e1   : > { %4862 = vperm.xlu0 %7045, %v9941_v8  }
 0x7e7   : > { %v7154_v41 = vpop.eup %7153 }
 0x7e8   : > { %v9983_v58 = vmul.f32 %v7154_v41, %v3762_v4 }
 0x7ed   : > { %2575 = vadd.xlane.f32.xlu1 %v2574_v17  ;;  %v3761_v17 = vld [vmem:[%s8280_s15 + $0x1a0] sm:$0xff] }
 0x7ee   : > { %v9974_v38 = vmul.f32 %v7152_v25, %v3761_v17 }
 0x7f0   : > { %12557 = vst [vmem:[#allocation99_spill] sm:$0xff] %v9974_v38 }
 0x7f1   : > { %3215 = vadd.xlane.f32.xlu1 %v3214_v39  ;;  %v3217_v39 = vsel %vm2300_vm0, %v2905_v19, 0.0  ;;  %v9987_v19 = vmul.f32 0.020408163, %v8944_v49  ;;  %v2906_v49 = vmul.f32 %v9894_v61, %v9894_v61 }
 0x7f3   : > { %12559 = vst [vmem:[#allocation101_spill] sm:$0xff] %v9987_v19  ;;  %v3507_v1 = vmul.f32 %v9987_v19, %v9987_v19  ;;  %v3220_v30 = vsel %vm2300_vm0, %v2906_v49, 0.0  ;;  %v738_v49 = vld [vmem:[%s7489_s14 + $0xd40] sm:$0xff] }
 0x7f9   : > { %v1441_v27 = vpop.f32.mrb[194].mxu1 }
 0x7fb   : > { %v2146_v0 = vpop.f32.mrb[194].mxu0 }
 0x7fc   : > { %v9980_v25 = vadd.f32 %v2146_v0, %v1441_v27  ;;  %v2148_v17 = vpop.f32.mrb[195].mxu0  ;;  %v3379_v27 = vmul.f32 0.020408163, %v8953_v62  ;;  %v2580_v0 = vsel %vm2300_vm0, %v9894_v61, 0.0  ;;  %v741_v61 = vld [vmem:[%s7489_s14 + $0xd58] sm:$0xff] }
 0x7fd   : > { %2189 = vmatprep.mubr.f32.mxu0 %v741_v61 }
 0x7fe   : > { %12558 = vst [vmem:[#allocation100_spill] sm:$0xff] %v9980_v25 }
 0x800   : > { %2578 = vadd.xlane.f32.xlu0 %v2577_v33  ;;  %v1443_v33 = vpop.f32.mrb[195].mxu1 }
 0x801   : > { %v3635_v33 = vsub.f32 %v3379_v27, %v3507_v1  ;;  %v10004_v1 = vmul.f32 0.020408163, %v8981_v21  ;;  %v2583_v27 = vsel %vm2300_vm0, %v9917_v51, 0.0 }
 0x802   : > { %4867 = vperm.xlu1 %7046, %v9974_v38  }
 0x803   : > { %v3891_v41 = vadd.f32 1e-05, %v3635_v33  ;;  %v2907_v33 = vmul.f32 %v9917_v51, %v9917_v51 }
 0x804   : > { %3218 = vadd.xlane.f32.xlu0 %v3217_v39  ;;  %v734_v39 = vld [vmem:[%s7489_s14 + $0xd20] sm:$0xff] }
 0x805   : > { %1480 = vmatmul.mubr.f32.gmra.mrb[210].mxu1 %v734_v39  ;;  %7155 = vrsqrt.f32 %v3891_v41  ;;  %v3508_v41 = vmul.f32 %v10004_v1, %v10004_v1 }
 0x80f   : > { %v7156_v54 = vpop.eup %7155 }
 0x814   : > { %v1446_v17 = vpop.f32.mrb[196].mxu1 }
 0x815   : > { %v1448_v29 = vpop.f32.mrb[197].mxu1 }
 0x816   : > { %v739_v29 = vld [vmem:[%s7489_s14 + $0xd48] sm:$0xff] }
 0x817   : > { %v2151_v4 = vpop.f32.mrb[196].mxu0  ;;  %1484 = vmatprep.mubr.f32.mxu1 %v739_v29 }
 0x818   : > { %v10001_v62 = vadd.f32 %v2151_v4, %v1446_v17  ;;  %v2153_v39 = vpop.f32.mrb[197].mxu0  ;;  %v740_v17 = vld [vmem:[%s7489_s14 + $0xd50] sm:$0xff]  ;;  %v3380_v4 = vmul.f32 0.020408163, %v8992_v45  ;;  %1485 = vmatmul.mubr.f32.gmra.mrb[212].mxu1 %v738_v49 }
 0x819   : > { %2190 = vmatmul.mubr.f32.gmra.mrb[212].mxu0 %v740_v17  ;;  %v3764_v17 = vld [vmem:[%s8280_s15 + $0x1b8] sm:$0xff] }
 0x81a   : > { %4872 = vperm.xlu0 %7045, %v9983_v58   ;;  %12560 = vst [vmem:[#allocation102_spill] sm:$0xff] %v10001_v62  ;;  %v3636_v61 = vsub.f32 %v3380_v4, %v3508_v41  ;;  %v743_v4 = vld [vmem:[%s7489_s14 + $0xd68] sm:$0xff]  ;;  %v745_v41 = vld [vmem:[%s7489_s14 + $0xd78] sm:$0xff] }
 0x81b   : > { %1489 = vmatprep.mubr.f32.mxu1 %v743_v4  ;;  %2194 = vmatprep.mubr.f32.mxu0 %v745_v41 }
 0x81c   : > { %v3892_v39 = vadd.f32 1e-05, %v3636_v61  ;;  %v744_v61 = vld [vmem:[%s7489_s14 + $0xd70] sm:$0xff] }
 0x81d   : > { %2195 = vmatmul.mubr.f32.gmra.mrb[214].mxu0 %v744_v61  ;;  %v10045_v61 = vpop.permute.xlu1 %4827 }
 0x81e   : > { %7157 = vrsqrt.f32 %v3892_v39  ;;  %12565 = vst [vmem:[#allocation107_spill] sm:$0xff] %v10045_v61  ;;  %v750_v61 = vld [vmem:[%s7489_s14 + $0xda0] sm:$0xff] }
 0x826   : > { %2581 = vadd.xlane.f32.xlu1 %v2580_v0  ;;  %v3763_v0 = vld [vmem:[%s8280_s15 + $0x1b0] sm:$0xff] }
 0x827   : > { %v10016_v21 = vmul.f32 %v7156_v54, %v3763_v0 }
 0x828   : > { %v7158_v49 = vpop.eup %7157 }
 0x829   : > { %12561 = vst [vmem:[#allocation103_spill] sm:$0xff] %v10016_v21  ;;  %v10025_v51 = vmul.f32 %v7158_v49, %v3764_v17 }
 0x82a   : > { %3221 = vadd.xlane.f32.xlu1 %v3220_v30  ;;  %v3223_v30 = vsel %vm2300_vm0, %v2907_v33, 0.0  ;;  %v10029_v33 = vmul.f32 0.020408163, %v9008_v63  ;;  %v2908_v63 = vmul.f32 %v9938_v28, %v9938_v28 }
 0x82c   : > { %12563 = vst [vmem:[#allocation105_spill] sm:$0xff] %v10029_v33  ;;  %v3509_v39 = vmul.f32 %v10029_v33, %v10029_v33  ;;  %v3226_v41 = vsel %vm2300_vm0, %v2908_v63, 0.0  ;;  %v747_v63 = vld [vmem:[%s7489_s14 + $0xd88] sm:$0xff] }
 0x835   : > { %v1451_v45 = vpop.f32.mrb[198].mxu1 }
 0x838   : > { %v2156_v29 = vpop.f32.mrb[198].mxu0 }
 0x839   : > { %2584 = vadd.xlane.f32.xlu0 %v2583_v27  ;;  %v1453_v27 = vpop.f32.mrb[199].mxu1  ;;  %v10022_v54 = vadd.f32 %v2156_v29, %v1451_v45  ;;  %v2158_v0 = vpop.f32.mrb[199].mxu0  ;;  %v3381_v45 = vmul.f32 0.020408163, %v9017_v6  ;;  %v2586_v29 = vsel %vm2300_vm0, %v9938_v28, 0.0  ;;  %v749_v28 = vld [vmem:[%s7489_s14 + $0xd98] sm:$0xff] }
 0x83a   : > { %2199 = vmatprep.mubr.f32.mxu0 %v749_v28 }
 0x83b   : > { %4877 = vperm.xlu1 %7046, %v10016_v21   ;;  %12562 = vst [vmem:[#allocation104_spill] sm:$0xff] %v10022_v54  ;;  %v3637_v27 = vsub.f32 %v3381_v45, %v3509_v39  ;;  %v10048_v45 = vmul.f32 0.020408163, %v9045_v36 }
 0x83d   : > { %3224 = vadd.xlane.f32.xlu0 %v3223_v30  ;;  %v742_v30 = vld [vmem:[%s7489_s14 + $0xd60] sm:$0xff]  ;;  %v3893_v49 = vadd.f32 1e-05, %v3637_v27 }
 0x83e   : > { %1490 = vmatmul.mubr.f32.gmra.mrb[214].mxu1 %v742_v30  ;;  %v3765_v27 = vld [vmem:[%s8280_s15 + $0x1c0] sm:$0xff] }
 0x83f   : > { %7159 = vrsqrt.f32 %v3893_v49  ;;  %1494 = vmatprep.mubr.f32.mxu1 %v747_v63  ;;  %v3382_v49 = vmul.f32 0.020408163, %v9056_v20 }
 0x849   : > { %v7160_v39 = vpop.eup %7159 }
 0x84a   : > { %v10062_v36 = vmul.f32 %v7160_v39, %v3765_v27 }
 0x84c   : > { %12566 = vst [vmem:[#allocation108_spill] sm:$0xff] %v10062_v36 }
 0x84e   : > { %v1456_v0 = vpop.f32.mrb[200].mxu1 }
 0x84f   : > { %v1458_v4 = vpop.f32.mrb[201].mxu1 }
 0x850   : > { %v2909_v4 = vmul.f32 %v9959_v48, %v9959_v48 }
 0x851   : > { %v2161_v17 = vpop.f32.mrb[200].mxu0 }
 0x852   : > { %v10043_v6 = vadd.f32 %v2161_v17, %v1456_v0  ;;  %v2163_v30 = vpop.f32.mrb[201].mxu0  ;;  %v746_v0 = vld [vmem:[%s7489_s14 + $0xd80] sm:$0xff]  ;;  %v748_v17 = vld [vmem:[%s7489_s14 + $0xd90] sm:$0xff] }
 0x853   : > { %4882 = vperm.xlu0 %7045, %v10025_v51   ;;  %1495 = vmatmul.mubr.f32.gmra.mrb[216].mxu1 %v746_v0  ;;  %v3510_v30 = vmul.f32 %v10048_v45, %v10048_v45 }
 0x854   : > { %12564 = vst [vmem:[#allocation106_spill] sm:$0xff] %v10043_v6  ;;  %2200 = vmatmul.mubr.f32.gmra.mrb[216].mxu0 %v748_v17 }
 0x855   : > { %v3638_v28 = vsub.f32 %v3382_v49, %v3510_v30 }
 0x857   : > { %v3894_v20 = vadd.f32 1e-05, %v3638_v28  ;;  %v10083_v28 = vmul.f32 0.020408163, %v9072_v50  ;;  %v2592_v50 = vsel %vm2300_vm0, %v9980_v25, 0.0 }
 0x859   : > { %7161 = vrsqrt.f32 %v3894_v20  ;;  %12569 = vst [vmem:[#allocation111_spill] sm:$0xff] %v10083_v28  ;;  %v751_v20 = vld [vmem:[%s7489_s14 + $0xda8] sm:$0xff] }
 0x85a   : > { %1499 = vmatprep.mubr.f32.mxu1 %v751_v20 }
 0x85b   : > { %1500 = vmatmul.mubr.f32.gmra.mrb[218].mxu1 %v750_v61 }
 0x85f   : > { %2587 = vadd.xlane.f32.xlu1 %v2586_v29  ;;  %v2589_v29 = vsel %vm2300_vm0, %v9959_v48, 0.0  ;;  %v3229_v48 = vsel %vm2300_vm0, %v2909_v4, 0.0 }
 0x863   : > { %3227 = vadd.xlane.f32.xlu1 %v3226_v41  ;;  %v10060_v41 = vpop.xlane.xlu1 %2557  ;;  %v7162_v49 = vpop.eup %7161 }
 0x867   : > { %v10068_v63 = vpop.xlane.xlu1 %3197 }
 0x870   : > { %v1461_v27 = vpop.f32.mrb[202].mxu1 }
 0x871   : > { %v1463_v17 = vpop.f32.mrb[203].mxu1 }
 0x872   : > { %2590 = vadd.xlane.f32.xlu0 %v2589_v29  ;;  %v10070_v29 = vpop.permute.xlu1 %4837  ;;  %v2166_v0 = vpop.f32.mrb[202].mxu0 }
 0x873   : > { %12567 = vst [vmem:[#allocation109_spill] sm:$0xff] %v10070_v29  ;;  %v10074_v4 = vadd.f32 %v2166_v0, %v1461_v27  ;;  %v2168_v15 = vpop.f32.mrb[203].mxu0  ;;  %v753_v29 = vld [vmem:[%s7489_s14 + $0xdb8] sm:$0xff]  ;;  %v752_v27 = vld [vmem:[%s7489_s14 + $0xdb0] sm:$0xff]  ;;  %v3383_v0 = vmul.f32 0.020408163, %v9081_v44 }
 0x874   : > { %4887 = vperm.xlu1 %7046, %v10062_v36   ;;  %2204 = vmatprep.mubr.f32.mxu0 %v753_v29  ;;  %v3511_v15 = vmul.f32 %v10083_v28, %v10083_v28 }
 0x875   : > { %12568 = vst [vmem:[#allocation110_spill] sm:$0xff] %v10074_v4  ;;  %2205 = vmatmul.mubr.f32.gmra.mrb[218].mxu0 %v752_v27 }
 0x876   : > { %3230 = vadd.xlane.f32.xlu0 %v3229_v48  ;;  %v10072_v39 = vpop.xlane.xlu1 %2563  ;;  %v3766_v48 = vld [vmem:[%s8280_s15 + $0x1c8] sm:$0xff]  ;;  %v2171_v27 = vpop.f32.mrb[204].mxu0 }
 0x877   : > { %v10079_v59 = vmul.f32 %v7162_v49, %v3766_v48  ;;  %v3639_v49 = vsub.f32 %v3383_v0, %v3511_v15  ;;  %v2910_v48 = vmul.f32 %v9980_v25, %v9980_v25  ;;  %v2173_v33 = vpop.f32.mrb[205].mxu0  ;;  %v10110_v25 = vmul.f32 0.020408163, %v9109_v37 }
 0x878   : > { %v1466_v61 = vpop.f32.mrb[204].mxu1  ;;  %v757_v33 = vld [vmem:[%s7489_s14 + $0xdd8] sm:$0xff] }
 0x879   : > { %v3895_v20 = vadd.f32 1e-05, %v3639_v49  ;;  %v3232_v44 = vsel %vm2300_vm0, %v2910_v48, 0.0  ;;  %v10103_v28 = vadd.f32 %v2171_v27, %v1466_v61  ;;  %12573 = vst [vmem:[#allocation115_spill] sm:$0xff] %v10110_v25  ;;  %v3767_v49 = vld [vmem:[%s8280_s15 + $0x1d0] sm:$0xff]  ;;  %v2911_v48 = vmul.f32 %v10001_v62, %v10001_v62  ;;  %v755_v61 = vld [vmem:[%s7489_s14 + $0xdc8] sm:$0xff]  ;;  %2209 = vmatprep.mubr.f32.mxu0 %v757_v33 }
 0x87a   : > { %v10077_v30 = vpop.xlane.xlu1 %3203  ;;  %1504 = vmatprep.mubr.f32.mxu1 %v755_v61  ;;  %v3512_v21 = vmul.f32 %v10110_v25, %v10110_v25 }
 0x87b   : > { %12571 = vst [vmem:[#allocation113_spill] sm:$0xff] %v10103_v28  ;;  %7163 = vrsqrt.f32 %v3895_v20  ;;  %v754_v20 = vld [vmem:[%s7489_s14 + $0xdc0] sm:$0xff] }
 0x87c   : > { %1505 = vmatmul.mubr.f32.gmra.mrb[220].mxu1 %v754_v20 }
 0x87e   : > { %v10088_v36 = vpop.permute.xlu1 %4847 }
 0x87f   : > { %12570 = vst [vmem:[#allocation112_spill] sm:$0xff] %v10088_v36  ;;  %v1468_v36 = vpop.f32.mrb[205].mxu1 }
 0x880   : > { %v2595_v36 = vsel %vm2300_vm0, %v10001_v62, 0.0  ;;  %v3235_v62 = vsel %vm2300_vm0, %v2911_v48, 0.0 }
 0x882   : > { %v10094_v17 = vpop.xlane.xlu1 %2569 }
 0x886   : > { %v10100_v29 = vpop.xlane.xlu1 %3209 }
 0x88a   : > { %v10105_v15 = vpop.permute.xlu1 %4857 }
 0x88b   : > { %12572 = vst [vmem:[#allocation114_spill] sm:$0xff] %v10105_v15  ;;  %v3384_v15 = vmul.f32 0.020408163, %v9120_v32 }
 0x88c   : > { %4892 = vperm.xlu0 %7045, %v10079_v59  }
 0x88d   : > { %v3640_v19 = vsub.f32 %v3384_v15, %v3512_v21  ;;  %v760_v21 = vld [vmem:[%s7489_s14 + $0xdf0] sm:$0xff] }
 0x88e   : > { %v10107_v0 = vpop.xlane.xlu1 %2575 }
 0x88f   : > { %v3896_v61 = vadd.f32 1e-05, %v3640_v19  ;;  %v2176_v19 = vpop.f32.mrb[206].mxu0 }
 0x890   : > { %v2178_v20 = vpop.f32.mrb[207].mxu0 }
 0x891   : > { %7165 = vrsqrt.f32 %v3896_v61  ;;  %v3768_v61 = vld [vmem:[%s8280_s15 + $0x1d8] sm:$0xff]  ;;  %v2598_v20 = vsel %vm2300_vm0, %v10022_v54, 0.0 }
 0x892   : > { %v10119_v27 = vpop.xlane.xlu1 %3215 }
 0x896   : > { %v10130_v38 = vpop.permute.xlu1 %4867 }
 0x897   : > { %12575 = vst [vmem:[#allocation117_spill] sm:$0xff] %v10130_v38  ;;  %v10149_v38 = vmul.f32 0.020408163, %v9136_v2  ;;  %v2912_v2 = vmul.f32 %v10022_v54, %v10022_v54  ;;  %v3769_v54 = vld [vmem:[%s8280_s15 + $0x1e0] sm:$0xff] }
 0x898   : > { %2593 = vadd.xlane.f32.xlu1 %v2592_v50  ;;  %v7164_v50 = vpop.eup %7163 }
 0x899   : > { %v10124_v37 = vmul.f32 %v7164_v50, %v3767_v49  ;;  %12579 = vst [vmem:[#allocation121_spill] sm:$0xff] %v10149_v38 }
 0x89b   : > { %12574 = vst [vmem:[#allocation116_spill] sm:$0xff] %v10124_v37 }
 0x89c   : > { %3233 = vadd.xlane.f32.xlu1 %v3232_v44  ;;  %v756_v44 = vld [vmem:[%s7489_s14 + $0xdd0] sm:$0xff] }
 0x89d   : > { %2210 = vmatmul.mubr.f32.gmra.mrb[220].mxu0 %v756_v44  ;;  %v7166_v44 = vpop.eup %7165 }
 0x8ab   : > { %2596 = vadd.xlane.f32.xlu0 %v2595_v36 }
 0x8ad   : > { %4897 = vperm.xlu1 %7046, %v10124_v37   ;;  %v758_v37 = vld [vmem:[%s7489_s14 + $0xde0] sm:$0xff] }
 0x8af   : > { %3236 = vadd.xlane.f32.xlu0 %v3235_v62  ;;  %v1471_v62 = vpop.f32.mrb[206].mxu1 }
 0x8b0   : > { %v1473_v15 = vpop.f32.mrb[207].mxu1  ;;  %v10142_v48 = vadd.f32 %v2176_v19, %v1471_v62  ;;  %v3513_v62 = vmul.f32 %v10149_v38, %v10149_v38  ;;  %v12580_v19 = vld [vmem:[#allocation45_spill] sm:$0xff] }
 0x8b1   : > { %v3385_v15 = vmul.f32 0.020408163, %v12580_v19 }
 0x8b2   : > { %12577 = vst [vmem:[#allocation119_spill] sm:$0xff] %v10142_v48 }
 0x8b3   : > { %v2582_v33 = vpop.xlane.xlu1 %2581 }
 0x8b4   : > { %v10132_v32 = vmul.f32 0.020408163, %v2582_v33  ;;  %v10145_v33 = vmul.f32 %v7166_v44, %v3768_v61  ;;  %v3641_v44 = vsub.f32 %v3385_v15, %v3513_v62  ;;  %v12582_v15 = vld [vmem:[#allocation8_spill] sm:$0xff] }
 0x8b5   : > { %v10166_v60 = vmul.f32 0.020408163, %v12582_v15 }
 0x8b6   : > { %12576 = vst [vmem:[#allocation118_spill] sm:$0xff] %v10132_v32  ;;  %v10136_v36 = vmul.f32 %v10132_v32, %v10132_v32  ;;  %12578 = vst [vmem:[#allocation120_spill] sm:$0xff] %v10145_v33  ;;  %v761_v32 = vld [vmem:[%s7489_s14 + $0xdf8] sm:$0xff]  ;;  %v3897_v61 = vadd.f32 1e-05, %v3641_v44  ;;  %v2913_v44 = vmul.f32 %v10043_v6, %v10043_v6 }
 0x8b7   : > { %v3222_v50 = vpop.xlane.xlu1 %3221  ;;  %2214 = vmatprep.mubr.f32.mxu0 %v761_v32  ;;  %v1476_v32 = vpop.f32.mrb[208].mxu1  ;;  %12583 = vst [vmem:[#allocation8_spill] sm:$0xff] %v10166_v60 }
 0x8b8   : > { %v10138_v49 = vmul.f32 0.020408163, %v3222_v50  ;;  %v759_v50 = vld [vmem:[%s7489_s14 + $0xde8] sm:$0xff]  ;;  %2215 = vmatmul.mubr.f32.gmra.mrb[222].mxu0 %v760_v21  ;;  %v1478_v21 = vpop.f32.mrb[209].mxu1  ;;  %7167 = vrsqrt.f32 %v3897_v61  ;;  %v3241_v15 = vsel %vm2300_vm0, %v2913_v44, 0.0  ;;  %v12588_v44 = vld [vmem:[#allocation9_spill] sm:$0xff] }
 0x8b9   : > { %1509 = vmatprep.mubr.f32.mxu1 %v759_v50  ;;  %v3238_v50 = vsel %vm2300_vm0, %v2912_v2, 0.0  ;;  %v763_v21 = vld [vmem:[%s7489_s14 + $0xe08] sm:$0xff]  ;;  %v762_v2 = vld [vmem:[%s7489_s14 + $0xe00] sm:$0xff] }
 0x8ba   : > { %1510 = vmatmul.mubr.f32.gmra.mrb[222].mxu1 %v758_v37  ;;  %v2181_v37 = vpop.f32.mrb[208].mxu0 }
 0x8bb   : > { %v10163_v19 = vadd.f32 %v2181_v37, %v1476_v32  ;;  %v2183_v38 = vpop.f32.mrb[209].mxu0  ;;  %1514 = vmatprep.mubr.f32.mxu1 %v763_v21  ;;  %v764_v32 = vld [vmem:[%s7489_s14 + $0xe10] sm:$0xff] }
 0x8bc   : > { %v12584_v38 = vld [vmem:[#allocation47_spill] sm:$0xff] }
 0x8bd   : > { %12581 = vst [vmem:[#allocation45_spill] sm:$0xff] %v10163_v19  ;;  %v3386_v37 = vmul.f32 0.020408163, %v12584_v38 }
 0x8be   : > { %1515 = vmatmul.mubr.f32.gmra.mrb[224].mxu1 %v762_v2 }
 0x8c2   : > { %v7168_v62 = vpop.eup %7167 }
 0x8c3   : > { %v10178_v61 = vmul.f32 %v7168_v62, %v3769_v54 }
 0x8c5   : > { %4902 = vperm.xlu0 %7045, %v10145_v33   ;;  %v765_v33 = vld [vmem:[%s7489_s14 + $0xe18] sm:$0xff]  ;;  %12585 = vst [vmem:[#allocation47_spill] sm:$0xff] %v10178_v61 }
 0x8c6   : > { %2219 = vmatprep.mubr.f32.mxu0 %v765_v33 }
 0x8c7   : > { %2220 = vmatmul.mubr.f32.gmra.mrb[224].mxu0 %v764_v32  ;;  %v2186_v32 = vpop.f32.mrb[210].mxu0 }
 0x8c8   : > { %v2188_v62 = vpop.f32.mrb[211].mxu0 }
 0x8c9   : > { %v2914_v62 = vmul.f32 %v10074_v4, %v10074_v4 }
 0x8d1   : > { %2599 = vadd.xlane.f32.xlu1 %v2598_v20  ;;  %v2601_v20 = vsel %vm2300_vm0, %v10043_v6, 0.0  ;;  %v3770_v6 = vld [vmem:[%s8280_s15 + $0x1e8] sm:$0xff] }
 0x8d5   : > { %3239 = vadd.xlane.f32.xlu1 %v3238_v50  ;;  %v3514_v50 = vmul.f32 %v10166_v60, %v10166_v60 }
 0x8d7   : > { %v3642_v33 = vsub.f32 %v3386_v37, %v3514_v50  ;;  %v767_v37 = vld [vmem:[%s7489_s14 + $0xe28] sm:$0xff]  ;;  %v769_v50 = vld [vmem:[%s7489_s14 + $0xe38] sm:$0xff] }
 0x8d8   : > { %v1481_v2 = vpop.f32.mrb[210].mxu1  ;;  %1519 = vmatprep.mubr.f32.mxu1 %v767_v37  ;;  %2224 = vmatprep.mubr.f32.mxu0 %v769_v50 }
 0x8d9   : > { %v3898_v21 = vadd.f32 1e-05, %v3642_v33  ;;  %v10184_v54 = vadd.f32 %v2186_v32, %v1481_v2  ;;  %v768_v33 = vld [vmem:[%s7489_s14 + $0xe30] sm:$0xff]  ;;  %v12590_v2 = vld [vmem:[#allocation10_spill] sm:$0xff] }
 0x8da   : > { %2225 = vmatmul.mubr.f32.gmra.mrb[226].mxu0 %v768_v33  ;;  %v3387_v32 = vmul.f32 0.020408163, %v12590_v2 }
 0x8db   : > { %7169 = vrsqrt.f32 %v3898_v21  ;;  %12586 = vst [vmem:[#allocation122_spill] sm:$0xff] %v10184_v54 }
 0x8e4   : > { %2602 = vadd.xlane.f32.xlu0 %v2601_v20  ;;  %v1483_v20 = vpop.f32.mrb[211].mxu1 }
 0x8e5   : > { %v7170_v38 = vpop.eup %7169 }
 0x8e6   : > { %4907 = vperm.xlu1 %7046, %v10178_v61   ;;  %v10187_v60 = vmul.f32 %v7170_v38, %v3770_v6  ;;  %v10191_v61 = vmul.f32 0.020408163, %v12588_v44  ;;  %v2604_v6 = vsel %vm2300_vm0, %v10074_v4, 0.0  ;;  %v3771_v4 = vld [vmem:[%s8280_s15 + $0x1f0] sm:$0xff] }
 0x8e8   : > { %3242 = vadd.xlane.f32.xlu0 %v3241_v15  ;;  %12587 = vst [vmem:[#allocation123_spill] sm:$0xff] %v10187_v60  ;;  %12589 = vst [vmem:[#allocation9_spill] sm:$0xff] %v10191_v61  ;;  %v766_v15 = vld [vmem:[%s7489_s14 + $0xe20] sm:$0xff]  ;;  %v3515_v21 = vmul.f32 %v10191_v61, %v10191_v61 }
 0x8e9   : > { %1520 = vmatmul.mubr.f32.gmra.mrb[226].mxu1 %v766_v15  ;;  %v3244_v15 = vsel %vm2300_vm0, %v2914_v62, 0.0  ;;  %v770_v62 = vld [vmem:[%s7489_s14 + $0xe40] sm:$0xff] }
 0x8ea   : > { %v3643_v20 = vsub.f32 %v3387_v32, %v3515_v21  ;;  %v12592_v32 = vld [vmem:[#allocation51_spill] sm:$0xff] }
 0x8eb   : > { %v1486_v38 = vpop.f32.mrb[212].mxu1  ;;  %v10208_v61 = vmul.f32 0.020408163, %v12592_v32 }
 0x8ec   : > { %v3899_v44 = vadd.f32 1e-05, %v3643_v20  ;;  %v2191_v37 = vpop.f32.mrb[212].mxu0  ;;  %v1488_v50 = vpop.f32.mrb[213].mxu1  ;;  %v2915_v20 = vmul.f32 %v10103_v28, %v10103_v28 }
 0x8ed   : > { %v10205_v33 = vadd.f32 %v2191_v37, %v1486_v38  ;;  %v2193_v2 = vpop.f32.mrb[213].mxu0  ;;  %12593 = vst [vmem:[#allocation51_spill] sm:$0xff] %v10208_v61  ;;  %v771_v50 = vld [vmem:[%s7489_s14 + $0xe48] sm:$0xff]  ;;  %v772_v38 = vld [vmem:[%s7489_s14 + $0xe50] sm:$0xff]  ;;  %v12594_v37 = vld [vmem:[#allocation53_spill] sm:$0xff] }
 0x8ee   : > { %7171 = vrsqrt.f32 %v3899_v44  ;;  %1524 = vmatprep.mubr.f32.mxu1 %v771_v50  ;;  %v3516_v2 = vmul.f32 %v10208_v61, %v10208_v61  ;;  %v3247_v32 = vsel %vm2300_vm0, %v2915_v20, 0.0  ;;  %v12598_v20 = vld [vmem:[#allocation11_spill] sm:$0xff] }
 0x8ef   : > { %12591 = vst [vmem:[#allocation10_spill] sm:$0xff] %v10205_v33  ;;  %1525 = vmatmul.mubr.f32.gmra.mrb[228].mxu1 %v770_v62 }
 0x8f8   : > { %v7172_v21 = vpop.eup %7171 }
 0x8f9   : > { %v10220_v44 = vmul.f32 %v7172_v21, %v3771_v4 }
 0x8fb   : > { %12595 = vst [vmem:[#allocation53_spill] sm:$0xff] %v10220_v44 }
 0x8fe   : > { %4912 = vperm.xlu0 %7045, %v10187_v60   ;;  %v773_v60 = vld [vmem:[%s7489_s14 + $0xe58] sm:$0xff] }
 0x8ff   : > { %2229 = vmatprep.mubr.f32.mxu0 %v773_v60 }
 0x900   : > { %2230 = vmatmul.mubr.f32.gmra.mrb[228].mxu0 %v772_v38  ;;  %v2196_v38 = vpop.f32.mrb[214].mxu0 }
 0x901   : > { %v2198_v21 = vpop.f32.mrb[215].mxu0 }
 0x902   : > { %v2916_v21 = vmul.f32 %v10142_v48, %v10142_v48 }
 0x90a   : > { %2605 = vadd.xlane.f32.xlu1 %v2604_v6  ;;  %v2607_v6 = vsel %vm2300_vm0, %v10103_v28, 0.0  ;;  %v3772_v28 = vld [vmem:[%s8280_s15 + $0x1f8] sm:$0xff] }
 0x90e   : > { %3245 = vadd.xlane.f32.xlu1 %v3244_v15  ;;  %v3388_v15 = vmul.f32 0.020408163, %v12594_v37 }
 0x910   : > { %v3644_v60 = vsub.f32 %v3388_v15, %v3516_v2  ;;  %v775_v15 = vld [vmem:[%s7489_s14 + $0xe68] sm:$0xff]  ;;  %v777_v2 = vld [vmem:[%s7489_s14 + $0xe78] sm:$0xff] }
 0x911   : > { %v1491_v62 = vpop.f32.mrb[214].mxu1  ;;  %1529 = vmatprep.mubr.f32.mxu1 %v775_v15  ;;  %2234 = vmatprep.mubr.f32.mxu0 %v777_v2 }
 0x912   : > { %v3900_v50 = vadd.f32 1e-05, %v3644_v60  ;;  %v10226_v4 = vadd.f32 %v2196_v38, %v1491_v62  ;;  %v776_v60 = vld [vmem:[%s7489_s14 + $0xe70] sm:$0xff]  ;;  %v12600_v62 = vld [vmem:[#allocation12_spill] sm:$0xff] }
 0x913   : > { %2235 = vmatmul.mubr.f32.gmra.mrb[230].mxu0 %v776_v60  ;;  %v3389_v38 = vmul.f32 0.020408163, %v12600_v62 }
 0x914   : > { %7173 = vrsqrt.f32 %v3900_v50  ;;  %12596 = vst [vmem:[#allocation124_spill] sm:$0xff] %v10226_v4 }
 0x91d   : > { %2608 = vadd.xlane.f32.xlu0 %v2607_v6  ;;  %v1493_v6 = vpop.f32.mrb[215].mxu1 }
 0x91e   : > { %v7174_v37 = vpop.eup %7173 }
 0x91f   : > { %4917 = vperm.xlu1 %7046, %v10220_v44   ;;  %v10229_v61 = vmul.f32 %v7174_v37, %v3772_v28  ;;  %v10233_v44 = vmul.f32 0.020408163, %v12598_v20  ;;  %v2610_v28 = vsel %vm2300_vm0, %v10142_v48, 0.0  ;;  %v3773_v48 = vld [vmem:[%s8280_s15 + $0x200] sm:$0xff] }
 0x921   : > { %3248 = vadd.xlane.f32.xlu0 %v3247_v32  ;;  %12597 = vst [vmem:[#allocation125_spill] sm:$0xff] %v10229_v61  ;;  %12599 = vst [vmem:[#allocation11_spill] sm:$0xff] %v10233_v44  ;;  %v774_v32 = vld [vmem:[%s7489_s14 + $0xe60] sm:$0xff]  ;;  %v3517_v50 = vmul.f32 %v10233_v44, %v10233_v44 }
 0x922   : > { %1530 = vmatmul.mubr.f32.gmra.mrb[230].mxu1 %v774_v32  ;;  %v3250_v32 = vsel %vm2300_vm0, %v2916_v21, 0.0  ;;  %v778_v21 = vld [vmem:[%s7489_s14 + $0xe80] sm:$0xff] }
 0x923   : > { %v3645_v6 = vsub.f32 %v3389_v38, %v3517_v50  ;;  %v12602_v38 = vld [vmem:[#allocation55_spill] sm:$0xff] }
 0x924   : > { %v10250_v44 = vmul.f32 0.020408163, %v12602_v38 }
 0x925   : > { %v3901_v20 = vadd.f32 1e-05, %v3645_v6  ;;  %v2917_v6 = vmul.f32 %v10163_v19, %v10163_v19 }
 0x926   : > { %v1496_v37 = vpop.f32.mrb[216].mxu1  ;;  %12603 = vst [vmem:[#allocation55_spill] sm:$0xff] %v10250_v44 }
 0x927   : > { %v2201_v15 = vpop.f32.mrb[216].mxu0  ;;  %v1498_v2 = vpop.f32.mrb[217].mxu1  ;;  %7175 = vrsqrt.f32 %v3901_v20  ;;  %v3253_v38 = vsel %vm2300_vm0, %v2917_v6, 0.0  ;;  %v12608_v6 = vld [vmem:[#allocation13_spill] sm:$0xff] }
 0x928   : > { %v10247_v60 = vadd.f32 %v2201_v15, %v1496_v37  ;;  %v2203_v62 = vpop.f32.mrb[217].mxu0  ;;  %v779_v2 = vld [vmem:[%s7489_s14 + $0xe88] sm:$0xff]  ;;  %v780_v37 = vld [vmem:[%s7489_s14 + $0xe90] sm:$0xff]  ;;  %v12604_v15 = vld [vmem:[#allocation57_spill] sm:$0xff] }
 0x929   : > { %1534 = vmatprep.mubr.f32.mxu1 %v779_v2  ;;  %v3518_v62 = vmul.f32 %v10250_v44, %v10250_v44 }
 0x92a   : > { %12601 = vst [vmem:[#allocation12_spill] sm:$0xff] %v10247_v60  ;;  %1535 = vmatmul.mubr.f32.gmra.mrb[232].mxu1 %v778_v21 }
 0x92e   : > { %v1501_v21 = vpop.f32.mrb[218].mxu1 }
 0x931   : > { %v7176_v50 = vpop.eup %7175 }
 0x932   : > { %v10262_v20 = vmul.f32 %v7176_v50, %v3773_v48 }
 0x934   : > { %12605 = vst [vmem:[#allocation57_spill] sm:$0xff] %v10262_v20 }
 0x937   : > { %4922 = vperm.xlu0 %7045, %v10229_v61   ;;  %v781_v61 = vld [vmem:[%s7489_s14 + $0xe98] sm:$0xff] }
 0x938   : > { %2239 = vmatprep.mubr.f32.mxu0 %v781_v61 }
 0x939   : > { %2240 = vmatmul.mubr.f32.gmra.mrb[232].mxu0 %v780_v37 }
 0x943   : > { %2611 = vadd.xlane.f32.xlu1 %v2610_v28  ;;  %v2613_v28 = vsel %vm2300_vm0, %v10163_v19, 0.0  ;;  %v3774_v19 = vld [vmem:[%s8280_s15 + $0x208] sm:$0xff] }
 0x947   : > { %3251 = vadd.xlane.f32.xlu1 %v3250_v32  ;;  %v3390_v32 = vmul.f32 0.020408163, %v12604_v15 }
 0x948   : > { %v2206_v37 = vpop.f32.mrb[218].mxu0 }
 0x949   : > { %v3646_v61 = vsub.f32 %v3390_v32, %v3518_v62  ;;  %v10268_v48 = vadd.f32 %v2206_v37, %v1501_v21  ;;  %v2208_v50 = vpop.f32.mrb[219].mxu0  ;;  %v783_v32 = vld [vmem:[%s7489_s14 + $0xea8] sm:$0xff]  ;;  %v785_v62 = vld [vmem:[%s7489_s14 + $0xeb8] sm:$0xff] }
 0x94a   : > { %1539 = vmatprep.mubr.f32.mxu1 %v783_v32  ;;  %2244 = vmatprep.mubr.f32.mxu0 %v785_v62  ;;  %v12610_v21 = vld [vmem:[#allocation14_spill] sm:$0xff]  ;;  %v2918_v50 = vmul.f32 %v10184_v54, %v10184_v54 }
 0x94b   : > { %v3902_v2 = vadd.f32 1e-05, %v3646_v61  ;;  %12606 = vst [vmem:[#allocation126_spill] sm:$0xff] %v10268_v48  ;;  %v784_v61 = vld [vmem:[%s7489_s14 + $0xeb0] sm:$0xff]  ;;  %v3391_v37 = vmul.f32 0.020408163, %v12610_v21 }
 0x94c   : > { %2245 = vmatmul.mubr.f32.gmra.mrb[234].mxu0 %v784_v61 }
 0x94d   : > { %7177 = vrsqrt.f32 %v3902_v2 }
 0x956   : > { %2614 = vadd.xlane.f32.xlu0 %v2613_v28  ;;  %v1503_v28 = vpop.f32.mrb[219].mxu1 }
 0x957   : > { %v7178_v15 = vpop.eup %7177 }
 0x958   : > { %4927 = vperm.xlu1 %7046, %v10262_v20   ;;  %v10271_v44 = vmul.f32 %v7178_v15, %v3774_v19  ;;  %v10275_v20 = vmul.f32 0.020408163, %v12608_v6  ;;  %v2616_v19 = vsel %vm2300_vm0, %v10184_v54, 0.0  ;;  %v1506_v15 = vpop.f32.mrb[220].mxu1  ;;  %v3775_v54 = vld [vmem:[%s8280_s15 + $0x210] sm:$0xff] }
 0x959   : > { %v1508_v62 = vpop.f32.mrb[221].mxu1 }
 0x95a   : > { %3254 = vadd.xlane.f32.xlu0 %v3253_v38  ;;  %12607 = vst [vmem:[#allocation127_spill] sm:$0xff] %v10271_v44  ;;  %12609 = vst [vmem:[#allocation13_spill] sm:$0xff] %v10275_v20  ;;  %v782_v38 = vld [vmem:[%s7489_s14 + $0xea0] sm:$0xff]  ;;  %v3519_v2 = vmul.f32 %v10275_v20, %v10275_v20  ;;  %v787_v62 = vld [vmem:[%s7489_s14 + $0xec8] sm:$0xff] }
 0x95b   : > { %1540 = vmatmul.mubr.f32.gmra.mrb[234].mxu1 %v782_v38  ;;  %v3256_v38 = vsel %vm2300_vm0, %v2918_v50, 0.0  ;;  %v786_v50 = vld [vmem:[%s7489_s14 + $0xec0] sm:$0xff] }
 0x95c   : > { %v3647_v28 = vsub.f32 %v3391_v37, %v3519_v2  ;;  %v12612_v37 = vld [vmem:[#allocation60_spill] sm:$0xff]  ;;  %1544 = vmatprep.mubr.f32.mxu1 %v787_v62 }
 0x95d   : > { %v10292_v20 = vmul.f32 0.020408163, %v12612_v37 }
 0x95e   : > { %v3903_v6 = vadd.f32 1e-05, %v3647_v28  ;;  %v2919_v28 = vmul.f32 %v10205_v33, %v10205_v33 }
 0x95f   : > { %12613 = vst [vmem:[#allocation60_spill] sm:$0xff] %v10292_v20  ;;  %1545 = vmatmul.mubr.f32.gmra.mrb[236].mxu1 %v786_v50 }
 0x960   : > { %7179 = vrsqrt.f32 %v3903_v6  ;;  %v3259_v37 = vsel %vm2300_vm0, %v2919_v28, 0.0  ;;  %v12618_v28 = vld [vmem:[#allocation15_spill] sm:$0xff] }
 0x96a   : > { %v7180_v2 = vpop.eup %7179 }
 0x96b   : > { %v10304_v6 = vmul.f32 %v7180_v2, %v3775_v54 }
 0x970   : > { %4932 = vperm.xlu0 %7045, %v10271_v44   ;;  %v2211_v32 = vpop.f32.mrb[220].mxu0  ;;  %v789_v44 = vld [vmem:[%s7489_s14 + $0xed8] sm:$0xff] }
 0x971   : > { %v10289_v61 = vadd.f32 %v2211_v32, %v1506_v15  ;;  %v2213_v21 = vpop.f32.mrb[221].mxu0  ;;  %2249 = vmatprep.mubr.f32.mxu0 %v789_v44  ;;  %v788_v15 = vld [vmem:[%s7489_s14 + $0xed0] sm:$0xff]  ;;  %v12614_v32 = vld [vmem:[#allocation62_spill] sm:$0xff] }
 0x972   : > { %2250 = vmatmul.mubr.f32.gmra.mrb[236].mxu0 %v788_v15  ;;  %12615 = vst [vmem:[#allocation62_spill] sm:$0xff] %v10304_v6  ;;  %v3520_v21 = vmul.f32 %v10292_v20, %v10292_v20 }
 0x973   : > { %12611 = vst [vmem:[#allocation14_spill] sm:$0xff] %v10289_v61 }
 0x97c   : > { %2617 = vadd.xlane.f32.xlu1 %v2616_v19  ;;  %v2619_v19 = vsel %vm2300_vm0, %v10205_v33, 0.0  ;;  %v3776_v33 = vld [vmem:[%s8280_s15 + $0x218] sm:$0xff] }
 0x980   : > { %3257 = vadd.xlane.f32.xlu1 %v3256_v38  ;;  %v3392_v38 = vmul.f32 0.020408163, %v12614_v32 }
 0x982   : > { %v3648_v44 = vsub.f32 %v3392_v38, %v3520_v21  ;;  %v791_v38 = vld [vmem:[%s7489_s14 + $0xee8] sm:$0xff]  ;;  %v793_v21 = vld [vmem:[%s7489_s14 + $0xef8] sm:$0xff] }
 0x983   : > { %1549 = vmatprep.mubr.f32.mxu1 %v791_v38  ;;  %2254 = vmatprep.mubr.f32.mxu0 %v793_v21 }
 0x984   : > { %v3904_v62 = vadd.f32 1e-05, %v3648_v44  ;;  %v792_v44 = vld [vmem:[%s7489_s14 + $0xef0] sm:$0xff] }
 0x985   : > { %2255 = vmatmul.mubr.f32.gmra.mrb[238].mxu0 %v792_v44 }
 0x986   : > { %7181 = vrsqrt.f32 %v3904_v62 }
 0x98b   : > { %v2216_v15 = vpop.f32.mrb[222].mxu0 }
 0x98c   : > { %v2218_v2 = vpop.f32.mrb[223].mxu0 }
 0x98d   : > { %v1511_v50 = vpop.f32.mrb[222].mxu1  ;;  %v2920_v2 = vmul.f32 %v10226_v4, %v10226_v4 }
 0x98e   : > { %v10310_v54 = vadd.f32 %v2216_v15, %v1511_v50  ;;  %v12620_v50 = vld [vmem:[#allocation16_spill] sm:$0xff] }
 0x98f   : > { %2620 = vadd.xlane.f32.xlu0 %v2619_v19  ;;  %v1513_v19 = vpop.f32.mrb[223].mxu1  ;;  %v3393_v15 = vmul.f32 0.020408163, %v12620_v50 }
 0x990   : > { %12616 = vst [vmem:[#allocation128_spill] sm:$0xff] %v10310_v54  ;;  %v7182_v32 = vpop.eup %7181 }
 0x991   : > { %4937 = vperm.xlu1 %7046, %v10304_v6   ;;  %v10313_v20 = vmul.f32 %v7182_v32, %v3776_v33  ;;  %v10317_v6 = vmul.f32 0.020408163, %v12618_v28  ;;  %v2622_v33 = vsel %vm2300_vm0, %v10226_v4, 0.0  ;;  %v1516_v32 = vpop.f32.mrb[224].mxu1  ;;  %v3777_v4 = vld [vmem:[%s8280_s15 + $0x220] sm:$0xff] }
 0x992   : > { %v1518_v21 = vpop.f32.mrb[225].mxu1 }
 0x993   : > { %3260 = vadd.xlane.f32.xlu0 %v3259_v37  ;;  %12617 = vst [vmem:[#allocation129_spill] sm:$0xff] %v10313_v20  ;;  %12619 = vst [vmem:[#allocation15_spill] sm:$0xff] %v10317_v6  ;;  %v790_v37 = vld [vmem:[%s7489_s14 + $0xee0] sm:$0xff]  ;;  %v3521_v62 = vmul.f32 %v10317_v6, %v10317_v6  ;;  %v795_v21 = vld [vmem:[%s7489_s14 + $0xf08] sm:$0xff] }
 0x994   : > { %1550 = vmatmul.mubr.f32.gmra.mrb[238].mxu1 %v790_v37  ;;  %v3262_v37 = vsel %vm2300_vm0, %v2920_v2, 0.0  ;;  %v794_v2 = vld [vmem:[%s7489_s14 + $0xf00] sm:$0xff] }
 0x995   : > { %v3649_v19 = vsub.f32 %v3393_v15, %v3521_v62  ;;  %v12622_v15 = vld [vmem:[#allocation64_spill] sm:$0xff]  ;;  %1554 = vmatprep.mubr.f32.mxu1 %v795_v21 }
 0x996   : > { %v10334_v6 = vmul.f32 0.020408163, %v12622_v15 }
 0x997   : > { %v3905_v28 = vadd.f32 1e-05, %v3649_v19  ;;  %v2921_v19 = vmul.f32 %v10247_v60, %v10247_v60 }
 0x998   : > { %12623 = vst [vmem:[#allocation64_spill] sm:$0xff] %v10334_v6  ;;  %1555 = vmatmul.mubr.f32.gmra.mrb[240].mxu1 %v794_v2 }
 0x999   : > { %7183 = vrsqrt.f32 %v3905_v28  ;;  %v3265_v15 = vsel %vm2300_vm0, %v2921_v19, 0.0  ;;  %v12628_v19 = vld [vmem:[#allocation17_spill] sm:$0xff] }
 0x99a   : > { %v2221_v38 = vpop.f32.mrb[224].mxu0 }
 0x99b   : > { %v10331_v44 = vadd.f32 %v2221_v38, %v1516_v32  ;;  %v2223_v50 = vpop.f32.mrb[225].mxu0  ;;  %v796_v32 = vld [vmem:[%s7489_s14 + $0xf10] sm:$0xff]  ;;  %v12624_v38 = vld [vmem:[#allocation66_spill] sm:$0xff] }
 0x99c   : > { %v3522_v50 = vmul.f32 %v10334_v6, %v10334_v6 }
 0x99d   : > { %12621 = vst [vmem:[#allocation16_spill] sm:$0xff] %v10331_v44 }
 0x9a3   : > { %v7184_v62 = vpop.eup %7183 }
 0x9a4   : > { %v10346_v28 = vmul.f32 %v7184_v62, %v3777_v4 }
 0x9a6   : > { %12625 = vst [vmem:[#allocation66_spill] sm:$0xff] %v10346_v28 }
 0x9a9   : > { %4942 = vperm.xlu0 %7045, %v10313_v20   ;;  %v797_v20 = vld [vmem:[%s7489_s14 + $0xf18] sm:$0xff] }
 0x9aa   : > { %2259 = vmatprep.mubr.f32.mxu0 %v797_v20 }
 0x9ab   : > { %2260 = vmatmul.mubr.f32.gmra.mrb[240].mxu0 %v796_v32 }
 0x9ad   : > { %v2226_v32 = vpop.f32.mrb[226].mxu0 }
 0x9ae   : > { %v2228_v62 = vpop.f32.mrb[227].mxu0 }
 0x9af   : > { %v2922_v62 = vmul.f32 %v10268_v48, %v10268_v48 }
 0x9b5   : > { %2623 = vadd.xlane.f32.xlu1 %v2622_v33  ;;  %v2625_v33 = vsel %vm2300_vm0, %v10247_v60, 0.0  ;;  %v3778_v60 = vld [vmem:[%s8280_s15 + $0x228] sm:$0xff] }
 0x9b9   : > { %3263 = vadd.xlane.f32.xlu1 %v3262_v37  ;;  %v3394_v37 = vmul.f32 0.020408163, %v12624_v38 }
 0x9bb   : > { %v3650_v20 = vsub.f32 %v3394_v37, %v3522_v50  ;;  %v799_v37 = vld [vmem:[%s7489_s14 + $0xf28] sm:$0xff]  ;;  %v801_v50 = vld [vmem:[%s7489_s14 + $0xf38] sm:$0xff] }
 0x9bc   : > { %v1521_v2 = vpop.f32.mrb[226].mxu1  ;;  %1559 = vmatprep.mubr.f32.mxu1 %v799_v37  ;;  %2264 = vmatprep.mubr.f32.mxu0 %v801_v50 }
 0x9bd   : > { %v3906_v21 = vadd.f32 1e-05, %v3650_v20  ;;  %v10352_v4 = vadd.f32 %v2226_v32, %v1521_v2  ;;  %v800_v20 = vld [vmem:[%s7489_s14 + $0xf30] sm:$0xff]  ;;  %v12630_v2 = vld [vmem:[#allocation18_spill] sm:$0xff] }
 0x9be   : > { %2265 = vmatmul.mubr.f32.gmra.mrb[242].mxu0 %v800_v20  ;;  %v3395_v32 = vmul.f32 0.020408163, %v12630_v2 }
 0x9bf   : > { %7185 = vrsqrt.f32 %v3906_v21  ;;  %12626 = vst [vmem:[#allocation130_spill] sm:$0xff] %v10352_v4 }
 0x9c8   : > { %2626 = vadd.xlane.f32.xlu0 %v2625_v33  ;;  %v1523_v33 = vpop.f32.mrb[227].mxu1 }
 0x9c9   : > { %v7186_v38 = vpop.eup %7185 }
 0x9ca   : > { %4947 = vperm.xlu1 %7046, %v10346_v28   ;;  %v10355_v6 = vmul.f32 %v7186_v38, %v3778_v60  ;;  %v10359_v28 = vmul.f32 0.020408163, %v12628_v19  ;;  %v2628_v60 = vsel %vm2300_vm0, %v10268_v48, 0.0  ;;  %v1526_v38 = vpop.f32.mrb[228].mxu1  ;;  %v3779_v48 = vld [vmem:[%s8280_s15 + $0x230] sm:$0xff] }
 0x9cb   : > { %v1528_v50 = vpop.f32.mrb[229].mxu1 }
 0x9cc   : > { %3266 = vadd.xlane.f32.xlu0 %v3265_v15  ;;  %12627 = vst [vmem:[#allocation131_spill] sm:$0xff] %v10355_v6  ;;  %12629 = vst [vmem:[#allocation17_spill] sm:$0xff] %v10359_v28  ;;  %v798_v15 = vld [vmem:[%s7489_s14 + $0xf20] sm:$0xff]  ;;  %v3523_v21 = vmul.f32 %v10359_v28, %v10359_v28  ;;  %v803_v50 = vld [vmem:[%s7489_s14 + $0xf48] sm:$0xff] }
 0x9cd   : > { %1560 = vmatmul.mubr.f32.gmra.mrb[242].mxu1 %v798_v15  ;;  %v3268_v15 = vsel %vm2300_vm0, %v2922_v62, 0.0  ;;  %v802_v62 = vld [vmem:[%s7489_s14 + $0xf40] sm:$0xff] }
 0x9ce   : > { %v3651_v33 = vsub.f32 %v3395_v32, %v3523_v21  ;;  %v12632_v32 = vld [vmem:[#allocation68_spill] sm:$0xff]  ;;  %1564 = vmatprep.mubr.f32.mxu1 %v803_v50 }
 0x9cf   : > { %v10376_v28 = vmul.f32 0.020408163, %v12632_v32 }
 0x9d0   : > { %v3907_v19 = vadd.f32 1e-05, %v3651_v33  ;;  %v2923_v33 = vmul.f32 %v10289_v61, %v10289_v61 }
 0x9d1   : > { %12633 = vst [vmem:[#allocation68_spill] sm:$0xff] %v10376_v28  ;;  %1565 = vmatmul.mubr.f32.gmra.mrb[244].mxu1 %v802_v62 }
 0x9d2   : > { %7187 = vrsqrt.f32 %v3907_v19  ;;  %v3271_v32 = vsel %vm2300_vm0, %v2923_v33, 0.0  ;;  %v10401_v33 = vmul.f32 0.020408163, %v9524_v7  ;;  %v2924_v7 = vmul.f32 %v10310_v54, %v10310_v54 }
 0x9d3   : > { %v2231_v37 = vpop.f32.mrb[228].mxu0 }
 0x9d4   : > { %v10373_v20 = vadd.f32 %v2231_v37, %v1526_v38  ;;  %v2233_v2 = vpop.f32.mrb[229].mxu0  ;;  %v804_v38 = vld [vmem:[%s7489_s14 + $0xf50] sm:$0xff]  ;;  %v12634_v37 = vld [vmem:[#allocation70_spill] sm:$0xff]  ;;  %12638 = vst [vmem:[#allocation134_spill] sm:$0xff] %v10401_v33 }
 0x9d5   : > { %v3524_v2 = vmul.f32 %v10376_v28, %v10376_v28 }
 0x9d6   : > { %12631 = vst [vmem:[#allocation18_spill] sm:$0xff] %v10373_v20 }
 0x9dc   : > { %v7188_v21 = vpop.eup %7187 }
 0x9dd   : > { %v10388_v19 = vmul.f32 %v7188_v21, %v3779_v48 }
 0x9df   : > { %12635 = vst [vmem:[#allocation70_spill] sm:$0xff] %v10388_v19 }
 0x9e2   : > { %4952 = vperm.xlu0 %7045, %v10355_v6   ;;  %v805_v6 = vld [vmem:[%s7489_s14 + $0xf58] sm:$0xff] }
 0x9e3   : > { %2269 = vmatprep.mubr.f32.mxu0 %v805_v6 }
 0x9e4   : > { %2270 = vmatmul.mubr.f32.gmra.mrb[244].mxu0 %v804_v38 }
 0x9e6   : > { %v2236_v38 = vpop.f32.mrb[230].mxu0 }
 0x9e7   : > { %v2238_v21 = vpop.f32.mrb[231].mxu0 }
 0x9ee   : > { %2629 = vadd.xlane.f32.xlu1 %v2628_v60  ;;  %v2631_v60 = vsel %vm2300_vm0, %v10289_v61, 0.0  ;;  %v3780_v61 = vld [vmem:[%s8280_s15 + $0x238] sm:$0xff] }
 0x9f2   : > { %3269 = vadd.xlane.f32.xlu1 %v3268_v15  ;;  %v3396_v15 = vmul.f32 0.020408163, %v12634_v37 }
 0x9f4   : > { %v3652_v6 = vsub.f32 %v3396_v15, %v3524_v2  ;;  %v807_v15 = vld [vmem:[%s7489_s14 + $0xf68] sm:$0xff]  ;;  %v809_v2 = vld [vmem:[%s7489_s14 + $0xf78] sm:$0xff] }
 0x9f5   : > { %v1531_v62 = vpop.f32.mrb[230].mxu1  ;;  %1569 = vmatprep.mubr.f32.mxu1 %v807_v15  ;;  %2274 = vmatprep.mubr.f32.mxu0 %v809_v2 }
 0x9f6   : > { %v3908_v50 = vadd.f32 1e-05, %v3652_v6  ;;  %v10394_v48 = vadd.f32 %v2236_v38, %v1531_v62  ;;  %v808_v6 = vld [vmem:[%s7489_s14 + $0xf70] sm:$0xff] }
 0x9f7   : > { %2275 = vmatmul.mubr.f32.gmra.mrb[246].mxu0 %v808_v6  ;;  %v12639_v62 = vld [vmem:[#allocation19_spill] sm:$0xff] }
 0x9f8   : > { %7189 = vrsqrt.f32 %v3908_v50  ;;  %12636 = vst [vmem:[#allocation132_spill] sm:$0xff] %v10394_v48  ;;  %v3525_v50 = vmul.f32 %v10401_v33, %v10401_v33  ;;  %v3397_v38 = vmul.f32 0.020408163, %v12639_v62 }
 0xa01   : > { %2632 = vadd.xlane.f32.xlu0 %v2631_v60  ;;  %v1533_v60 = vpop.f32.mrb[231].mxu1 }
 0xa02   : > { %v7190_v37 = vpop.eup %7189  ;;  %v3653_v60 = vsub.f32 %v3397_v38, %v3525_v50  ;;  %v1536_v21 = vpop.f32.mrb[232].mxu1  ;;  %v12641_v38 = vld [vmem:[#allocation71_spill] sm:$0xff] }
 0xa03   : > { %4957 = vperm.xlu1 %7046, %v10388_v19   ;;  %v10397_v28 = vmul.f32 %v7190_v37, %v3780_v61  ;;  %v2634_v61 = vsel %vm2300_vm0, %v10310_v54, 0.0  ;;  %v1538_v2 = vpop.f32.mrb[233].mxu1  ;;  %v10418_v33 = vmul.f32 0.020408163, %v12641_v38  ;;  %v3781_v54 = vld [vmem:[%s8280_s15 + $0x240] sm:$0xff]  ;;  %v813_v19 = vld [vmem:[%s7489_s14 + $0xf98] sm:$0xff] }
 0xa04   : > { %v3909_v37 = vadd.f32 1e-05, %v3653_v60  ;;  %v2925_v60 = vmul.f32 %v10331_v44, %v10331_v44  ;;  %v811_v2 = vld [vmem:[%s7489_s14 + $0xf88] sm:$0xff]  ;;  %2279 = vmatprep.mubr.f32.mxu0 %v813_v19 }
 0xa05   : > { %3272 = vadd.xlane.f32.xlu0 %v3271_v32  ;;  %12637 = vst [vmem:[#allocation133_spill] sm:$0xff] %v10397_v28  ;;  %v806_v32 = vld [vmem:[%s7489_s14 + $0xf60] sm:$0xff]  ;;  %12642 = vst [vmem:[#allocation71_spill] sm:$0xff] %v10418_v33 }
 0xa06   : > { %1570 = vmatmul.mubr.f32.gmra.mrb[246].mxu1 %v806_v32  ;;  %v3274_v32 = vsel %vm2300_vm0, %v2924_v7, 0.0  ;;  %7191 = vrsqrt.f32 %v3909_v37  ;;  %v810_v7 = vld [vmem:[%s7489_s14 + $0xf80] sm:$0xff]  ;;  %v3277_v38 = vsel %vm2300_vm0, %v2925_v60, 0.0  ;;  %v12647_v60 = vld [vmem:[#allocation74_spill] sm:$0xff] }
 0xa07   : > { %1574 = vmatprep.mubr.f32.mxu1 %v811_v2 }
 0xa0a   : > { %1575 = vmatmul.mubr.f32.gmra.mrb[248].mxu1 %v810_v7 }
 0xa0c   : > { %v2241_v15 = vpop.f32.mrb[232].mxu0 }
 0xa0d   : > { %v10415_v6 = vadd.f32 %v2241_v15, %v1536_v21  ;;  %v2243_v62 = vpop.f32.mrb[233].mxu0  ;;  %v812_v21 = vld [vmem:[%s7489_s14 + $0xf90] sm:$0xff]  ;;  %v12643_v15 = vld [vmem:[#allocation72_spill] sm:$0xff] }
 0xa0e   : > { %2280 = vmatmul.mubr.f32.gmra.mrb[248].mxu0 %v812_v21  ;;  %v3526_v62 = vmul.f32 %v10418_v33, %v10418_v33 }
 0xa0f   : > { %12640 = vst [vmem:[#allocation19_spill] sm:$0xff] %v10415_v6 }
 0xa10   : > { %v7192_v50 = vpop.eup %7191 }
 0xa11   : > { %v10430_v37 = vmul.f32 %v7192_v50, %v3781_v54 }
 0xa13   : > { %12644 = vst [vmem:[#allocation72_spill] sm:$0xff] %v10430_v37 }
 0xa1b   : > { %4962 = vperm.xlu0 %7045, %v10397_v28  }
 0xa1f   : > { %v2246_v21 = vpop.f32.mrb[234].mxu0 }
 0xa20   : > { %v2248_v50 = vpop.f32.mrb[235].mxu0 }
 0xa21   : > { %v2926_v50 = vmul.f32 %v10352_v4, %v10352_v4 }
 0xa27   : > { %2635 = vadd.xlane.f32.xlu1 %v2634_v61  ;;  %v2637_v61 = vsel %vm2300_vm0, %v10331_v44, 0.0  ;;  %v3782_v44 = vld [vmem:[%s8280_s15 + $0x248] sm:$0xff] }
 0xa2b   : > { %3275 = vadd.xlane.f32.xlu1 %v3274_v32  ;;  %v3398_v32 = vmul.f32 0.020408163, %v12643_v15 }
 0xa2d   : > { %v3654_v19 = vsub.f32 %v3398_v32, %v3526_v62  ;;  %v815_v32 = vld [vmem:[%s7489_s14 + $0xfa8] sm:$0xff]  ;;  %v817_v62 = vld [vmem:[%s7489_s14 + $0xfb8] sm:$0xff] }
 0xa2e   : > { %v1541_v7 = vpop.f32.mrb[234].mxu1  ;;  %1579 = vmatprep.mubr.f32.mxu1 %v815_v32  ;;  %2284 = vmatprep.mubr.f32.mxu0 %v817_v62 }
 0xa2f   : > { %v3910_v2 = vadd.f32 1e-05, %v3654_v19  ;;  %v10436_v54 = vadd.f32 %v2246_v21, %v1541_v7  ;;  %v816_v19 = vld [vmem:[%s7489_s14 + $0xfb0] sm:$0xff]  ;;  %v12649_v7 = vld [vmem:[#allocation21_spill] sm:$0xff] }
 0xa30   : > { %2285 = vmatmul.mubr.f32.gmra.mrb[250].mxu0 %v816_v19  ;;  %v3399_v21 = vmul.f32 0.020408163, %v12649_v7 }
 0xa31   : > { %7193 = vrsqrt.f32 %v3910_v2  ;;  %12645 = vst [vmem:[#allocation135_spill] sm:$0xff] %v10436_v54 }
 0xa3a   : > { %2638 = vadd.xlane.f32.xlu0 %v2637_v61  ;;  %v1543_v61 = vpop.f32.mrb[235].mxu1 }
 0xa3b   : > { %v7194_v15 = vpop.eup %7193 }
 0xa3c   : > { %4967 = vperm.xlu1 %7046, %v10430_v37   ;;  %v10439_v33 = vmul.f32 %v7194_v15, %v3782_v44  ;;  %v10443_v37 = vmul.f32 0.020408163, %v12647_v60  ;;  %v2640_v44 = vsel %vm2300_vm0, %v10352_v4, 0.0  ;;  %v1546_v15 = vpop.f32.mrb[236].mxu1  ;;  %v3783_v4 = vld [vmem:[%s8280_s15 + $0x250] sm:$0xff] }
 0xa3d   : > { %v1548_v62 = vpop.f32.mrb[237].mxu1 }
 0xa3e   : > { %3278 = vadd.xlane.f32.xlu0 %v3277_v38  ;;  %12646 = vst [vmem:[#allocation136_spill] sm:$0xff] %v10439_v33  ;;  %12648 = vst [vmem:[#allocation74_spill] sm:$0xff] %v10443_v37  ;;  %v814_v38 = vld [vmem:[%s7489_s14 + $0xfa0] sm:$0xff]  ;;  %v3527_v2 = vmul.f32 %v10443_v37, %v10443_v37  ;;  %v819_v62 = vld [vmem:[%s7489_s14 + $0xfc8] sm:$0xff] }
 0xa3f   : > { %1580 = vmatmul.mubr.f32.gmra.mrb[250].mxu1 %v814_v38  ;;  %v3280_v38 = vsel %vm2300_vm0, %v2926_v50, 0.0  ;;  %v818_v50 = vld [vmem:[%s7489_s14 + $0xfc0] sm:$0xff] }
 0xa40   : > { %v3655_v61 = vsub.f32 %v3399_v21, %v3527_v2  ;;  %v12651_v21 = vld [vmem:[#allocation75_spill] sm:$0xff]  ;;  %1584 = vmatprep.mubr.f32.mxu1 %v819_v62 }
 0xa41   : > { %v10460_v37 = vmul.f32 0.020408163, %v12651_v21 }
 0xa42   : > { %v3911_v60 = vadd.f32 1e-05, %v3655_v61  ;;  %v2927_v61 = vmul.f32 %v10373_v20, %v10373_v20 }
 0xa43   : > { %12652 = vst [vmem:[#allocation75_spill] sm:$0xff] %v10460_v37  ;;  %1585 = vmatmul.mubr.f32.gmra.mrb[252].mxu1 %v818_v50 }
 0xa44   : > { %7195 = vrsqrt.f32 %v3911_v60  ;;  %v3283_v21 = vsel %vm2300_vm0, %v2927_v61, 0.0  ;;  %v10485_v61 = vmul.f32 0.020408163, %v9652_v24  ;;  %v2928_v24 = vmul.f32 %v10394_v48, %v10394_v48 }
 0xa45   : > { %v2251_v32 = vpop.f32.mrb[236].mxu0 }
 0xa46   : > { %v10457_v19 = vadd.f32 %v2251_v32, %v1546_v15  ;;  %v2253_v7 = vpop.f32.mrb[237].mxu0  ;;  %v820_v15 = vld [vmem:[%s7489_s14 + $0xfd0] sm:$0xff]  ;;  %v12653_v32 = vld [vmem:[#allocation76_spill] sm:$0xff]  ;;  %12657 = vst [vmem:[#allocation139_spill] sm:$0xff] %v10485_v61 }
 0xa47   : > { %v3528_v7 = vmul.f32 %v10460_v37, %v10460_v37 }
 0xa48   : > { %12650 = vst [vmem:[#allocation21_spill] sm:$0xff] %v10457_v19 }
 0xa4e   : > { %v7196_v2 = vpop.eup %7195 }
 0xa4f   : > { %v10472_v60 = vmul.f32 %v7196_v2, %v3783_v4 }
 0xa51   : > { %12654 = vst [vmem:[#allocation76_spill] sm:$0xff] %v10472_v60 }
 0xa54   : > { %4972 = vperm.xlu0 %7045, %v10439_v33   ;;  %v821_v33 = vld [vmem:[%s7489_s14 + $0xfd8] sm:$0xff] }
 0xa55   : > { %2289 = vmatprep.mubr.f32.mxu0 %v821_v33 }
 0xa56   : > { %2290 = vmatmul.mubr.f32.gmra.mrb[252].mxu0 %v820_v15 }
 0xa58   : > { %v2256_v15 = vpop.f32.mrb[238].mxu0 }
 0xa59   : > { %v2258_v2 = vpop.f32.mrb[239].mxu0 }
 0xa60   : > { %2641 = vadd.xlane.f32.xlu1 %v2640_v44  ;;  %v2643_v44 = vsel %vm2300_vm0, %v10373_v20, 0.0  ;;  %v3784_v20 = vld [vmem:[%s8280_s15 + $0x258] sm:$0xff] }
 0xa64   : > { %3281 = vadd.xlane.f32.xlu1 %v3280_v38  ;;  %v3400_v38 = vmul.f32 0.020408163, %v12653_v32 }
 0xa66   : > { %v3656_v33 = vsub.f32 %v3400_v38, %v3528_v7  ;;  %v823_v38 = vld [vmem:[%s7489_s14 + $0xfe8] sm:$0xff]  ;;  %v825_v7 = vld [vmem:[%s7489_s14 + $0xff8] sm:$0xff] }
 0xa67   : > { %v1551_v50 = vpop.f32.mrb[238].mxu1  ;;  %1589 = vmatprep.mubr.f32.mxu1 %v823_v38  ;;  %2294 = vmatprep.mubr.f32.mxu0 %v825_v7  ;;  %v3286_v7 = vsel %vm2300_vm0, %v2928_v24, 0.0 }
 0xa68   : > { %v3912_v62 = vadd.f32 1e-05, %v3656_v33  ;;  %v10478_v4 = vadd.f32 %v2256_v15, %v1551_v50  ;;  %v824_v33 = vld [vmem:[%s7489_s14 + $0xff0] sm:$0xff]  ;;  %v3401_v50 = vmul.f32 0.020408163, %v9657_v57 }
 0xa69   : > { %2295 = vmatmul.mubr.f32.gmra.mrb[254].mxu0 %v824_v33 }
 0xa6a   : > { %7197 = vrsqrt.f32 %v3912_v62  ;;  %12655 = vst [vmem:[#allocation137_spill] sm:$0xff] %v10478_v4  ;;  %v3529_v62 = vmul.f32 %v10485_v61, %v10485_v61  ;;  %v10502_v61 = vmul.f32 0.020408163, %v9689_v52 }
 0xa6c   : > { %v3657_v15 = vsub.f32 %v3401_v50, %v3529_v62  ;;  %12659 = vst [vmem:[#allocation141_spill] sm:$0xff] %v10502_v61  ;;  %v2649_v62 = vsel %vm2300_vm0, %v10415_v6, 0.0  ;;  %v3785_v50 = vld [vmem:[%s8280_s15 + $0x260] sm:$0xff] }
 0xa6e   : > { %v3913_v2 = vadd.f32 1e-05, %v3657_v15  ;;  %v3402_v15 = vmul.f32 0.020408163, %v9696_v23 }
 0xa70   : > { %7199 = vrsqrt.f32 %v3913_v2 }
 0xa73   : > { %2644 = vadd.xlane.f32.xlu0 %v2643_v44  ;;  %v1553_v44 = vpop.f32.mrb[239].mxu1 }
 0xa74   : > { %v7198_v32 = vpop.eup %7197  ;;  %v1556_v44 = vpop.f32.mrb[240].mxu1 }
 0xa75   : > { %4977 = vperm.xlu1 %7046, %v10472_v60   ;;  %v10481_v37 = vmul.f32 %v7198_v32, %v3784_v20  ;;  %v2646_v20 = vsel %vm2300_vm0, %v10394_v48, 0.0  ;;  %v1558_v38 = vpop.f32.mrb[241].mxu1  ;;  %v3786_v48 = vld [vmem:[%s8280_s15 + $0x268] sm:$0xff] }
 0xa76   : > { %v10510_v38 = vpop.permute.xlu0 %4822 }
 0xa77   : > { %3284 = vadd.xlane.f32.xlu0 %v3283_v21  ;;  %12656 = vst [vmem:[#allocation138_spill] sm:$0xff] %v10481_v37  ;;  %v822_v21 = vld [vmem:[%s7489_s14 + $0xfe0] sm:$0xff]  ;;  %12660 = vst [vmem:[#allocation142_spill] sm:$0xff] %v10510_v38 }
 0xa78   : > { %1590 = vmatmul.mubr.f32.gmra.mrb[254].mxu1 %v822_v21 }
 0xa7a   : > { %v7200_v57 = vpop.eup %7199 }
 0xa7b   : > { %v10512_v24 = vmul.f32 %v7200_v57, %v3785_v50 }
 0xa7d   : > { %12661 = vst [vmem:[#allocation143_spill] sm:$0xff] %v10512_v24 }
 0xa7e   : > { %v2261_v32 = vpop.f32.mrb[240].mxu0 }
 0xa7f   : > { %v10499_v21 = vadd.f32 %v2261_v32, %v1556_v44  ;;  %v2263_v33 = vpop.f32.mrb[241].mxu0  ;;  %v3530_v44 = vmul.f32 %v10502_v61, %v10502_v61  ;;  %v10518_v32 = vpop.xlane.xlu0 %2554 }
 0xa81   : > { %12658 = vst [vmem:[#allocation140_spill] sm:$0xff] %v10499_v21  ;;  %v3658_v2 = vsub.f32 %v3402_v15, %v3530_v44  ;;  %v3403_v44 = vmul.f32 0.020408163, %v9721_v46 }
 0xa83   : > { %v10525_v61 = vpop.xlane.xlu0 %3194 }
 0xa8d   : > { %4982 = vperm.xlu0 %7045, %v10481_v37  }
 0xa91   : > { %v2266_v33 = vpop.f32.mrb[242].mxu0 }
 0xa92   : > { %v2268_v57 = vpop.f32.mrb[243].mxu0 }
 0xa99   : > { %2647 = vadd.xlane.f32.xlu1 %v2646_v20  ;;  %v2929_v20 = vmul.f32 %v10415_v6, %v10415_v6 }
 0xa9b   : > { %v3289_v52 = vsel %vm2300_vm0, %v2929_v20, 0.0  ;;  %v10529_v20 = vmul.f32 0.020408163, %v9716_v12 }
 0xa9d   : > { %3287 = vadd.xlane.f32.xlu1 %v3286_v7  ;;  %v3914_v7 = vadd.f32 1e-05, %v3658_v2  ;;  %12664 = vst [vmem:[#allocation146_spill] sm:$0xff] %v10529_v20  ;;  %v3531_v15 = vmul.f32 %v10529_v20, %v10529_v20  ;;  %v10542_v20 = vmul.f32 0.020408163, %v9753_v56 }
 0xa9f   : > { %7201 = vrsqrt.f32 %v3914_v7  ;;  %12666 = vst [vmem:[#allocation148_spill] sm:$0xff] %v10542_v20 }
 0xaa0   : > { %v1561_v23 = vpop.f32.mrb[242].mxu1 }
 0xaa1   : > { %v1563_v6 = vpop.f32.mrb[243].mxu1 }
 0xaa2   : > { %v2652_v6 = vsel %vm2300_vm0, %v10436_v54, 0.0 }
 0xaa4   : > { %v1566_v2 = vpop.f32.mrb[244].mxu1 }
 0xaa9   : > { %v7202_v50 = vpop.eup %7201 }
 0xaaa   : > { %v10523_v60 = vmul.f32 %v7202_v50, %v3786_v48  ;;  %v2930_v48 = vmul.f32 %v10436_v54, %v10436_v54  ;;  %v3788_v54 = vld [vmem:[%s8280_s15 + $0x278] sm:$0xff] }
 0xaac   : > { %2650 = vadd.xlane.f32.xlu0 %v2649_v62  ;;  %v10520_v62 = vadd.f32 %v2266_v33, %v1561_v23  ;;  %12663 = vst [vmem:[#allocation145_spill] sm:$0xff] %v10523_v60  ;;  %v1568_v33 = vpop.f32.mrb[245].mxu1  ;;  %v3292_v12 = vsel %vm2300_vm0, %v2930_v48, 0.0 }
 0xaad   : > { %v10550_v33 = vpop.permute.xlu0 %4832 }
 0xaae   : > { %4987 = vperm.xlu1 %7046, %v10512_v24   ;;  %12662 = vst [vmem:[#allocation144_spill] sm:$0xff] %v10520_v62  ;;  %12667 = vst [vmem:[#allocation149_spill] sm:$0xff] %v10550_v33 }
 0xab0   : > { %3290 = vadd.xlane.f32.xlu0 %v3289_v52  ;;  %v3659_v52 = vsub.f32 %v3403_v44, %v3531_v15  ;;  %v2655_v15 = vsel %vm2300_vm0, %v10457_v19, 0.0  ;;  %v3787_v44 = vld [vmem:[%s8280_s15 + $0x270] sm:$0xff] }
 0xab2   : > { %v3915_v7 = vadd.f32 1e-05, %v3659_v52  ;;  %v3404_v52 = vmul.f32 0.020408163, %v9768_v55 }
 0xab4   : > { %7203 = vrsqrt.f32 %v3915_v7 }
 0xab7   : > { %v2271_v23 = vpop.f32.mrb[244].mxu0 }
 0xab8   : > { %v10539_v57 = vadd.f32 %v2271_v23, %v1566_v2  ;;  %v2273_v50 = vpop.f32.mrb[245].mxu0  ;;  %v3532_v2 = vmul.f32 %v10542_v20, %v10542_v20  ;;  %v10558_v23 = vpop.xlane.xlu0 %2560 }
 0xaba   : > { %12665 = vst [vmem:[#allocation147_spill] sm:$0xff] %v10539_v57  ;;  %v3660_v7 = vsub.f32 %v3404_v52, %v3532_v2  ;;  %v3405_v2 = vmul.f32 0.020408163, %v9787_v40 }
 0xabc   : > { %v10565_v20 = vpop.xlane.xlu0 %3200 }
 0xabe   : > { %v7204_v46 = vpop.eup %7203 }
 0xabf   : > { %v10552_v48 = vmul.f32 %v7204_v46, %v3787_v44 }
 0xac1   : > { %12668 = vst [vmem:[#allocation150_spill] sm:$0xff] %v10552_v48 }
 0xac6   : > { %4992 = vperm.xlu0 %7045, %v10523_v60   ;;  %v10683_v60 = vmul.f32 0.020408163, %v10518_v32 }
 0xac8   : > { %12692 = vst [vmem:[#allocation174_spill] sm:$0xff] %v10683_v60 }
 0xaca   : > { %v2276_v50 = vpop.f32.mrb[246].mxu0 }
 0xacb   : > { %v2278_v46 = vpop.f32.mrb[247].mxu0 }
 0xad2   : > { %2653 = vadd.xlane.f32.xlu1 %v2652_v6  ;;  %v2931_v6 = vmul.f32 %v10457_v19, %v10457_v19 }
 0xad4   : > { %v3295_v56 = vsel %vm2300_vm0, %v2931_v6, 0.0  ;;  %v10569_v6 = vmul.f32 0.020408163, %v9780_v47 }
 0xad6   : > { %3293 = vadd.xlane.f32.xlu1 %v3292_v12  ;;  %v3916_v12 = vadd.f32 1e-05, %v3660_v7  ;;  %12671 = vst [vmem:[#allocation153_spill] sm:$0xff] %v10569_v6  ;;  %v3533_v52 = vmul.f32 %v10569_v6, %v10569_v6  ;;  %v10582_v6 = vmul.f32 0.020408163, %v9824_v34 }
 0xad8   : > { %7205 = vrsqrt.f32 %v3916_v12  ;;  %12673 = vst [vmem:[#allocation155_spill] sm:$0xff] %v10582_v6 }
 0xad9   : > { %v1571_v55 = vpop.f32.mrb[246].mxu1 }
 0xada   : > { %v1573_v19 = vpop.f32.mrb[247].mxu1 }
 0xadb   : > { %v2658_v19 = vsel %vm2300_vm0, %v10478_v4, 0.0 }
 0xadd   : > { %v1576_v7 = vpop.f32.mrb[248].mxu1 }
 0xae2   : > { %v7206_v44 = vpop.eup %7205 }
 0xae3   : > { %v10563_v24 = vmul.f32 %v7206_v44, %v3788_v54  ;;  %v2932_v54 = vmul.f32 %v10478_v4, %v10478_v4 }
 0xae5   : > { %2656 = vadd.xlane.f32.xlu0 %v2655_v15  ;;  %v10560_v15 = vadd.f32 %v2276_v50, %v1571_v55  ;;  %12670 = vst [vmem:[#allocation152_spill] sm:$0xff] %v10563_v24  ;;  %v2281_v55 = vpop.f32.mrb[248].mxu0  ;;  %v1578_v50 = vpop.f32.mrb[249].mxu1  ;;  %v3298_v47 = vsel %vm2300_vm0, %v2932_v54, 0.0 }
 0xae6   : > { %v10579_v46 = vadd.f32 %v2281_v55, %v1576_v7  ;;  %v2283_v44 = vpop.f32.mrb[249].mxu0  ;;  %v10590_v50 = vpop.permute.xlu0 %4842  ;;  %v3534_v7 = vmul.f32 %v10582_v6, %v10582_v6 }
 0xae7   : > { %4997 = vperm.xlu1 %7046, %v10552_v48   ;;  %12669 = vst [vmem:[#allocation151_spill] sm:$0xff] %v10560_v15  ;;  %12674 = vst [vmem:[#allocation156_spill] sm:$0xff] %v10590_v50  ;;  %v2936_v32 = vmul.f32 %v10560_v15, %v10560_v15 }
 0xae8   : > { %12672 = vst [vmem:[#allocation154_spill] sm:$0xff] %v10579_v46 }
 0xae9   : > { %3296 = vadd.xlane.f32.xlu0 %v3295_v56  ;;  %v3661_v56 = vsub.f32 %v3405_v2, %v3533_v52  ;;  %v2661_v52 = vsel %vm2300_vm0, %v10499_v21, 0.0  ;;  %v3789_v2 = vld [vmem:[%s8280_s15 + $0x280] sm:$0xff] }
 0xaea   : > { %v10598_v55 = vpop.xlane.xlu0 %2566 }
 0xaeb   : > { %v3917_v12 = vadd.f32 1e-05, %v3661_v56  ;;  %v3406_v56 = vmul.f32 0.020408163, %v9832_v43 }
 0xaed   : > { %7207 = vrsqrt.f32 %v3917_v12  ;;  %v3662_v12 = vsub.f32 %v3406_v56, %v3534_v7  ;;  %v10613_v7 = vmul.f32 0.020408163, %v9841_v5 }
 0xaee   : > { %v10600_v43 = vpop.xlane.xlu0 %3206 }
 0xaef   : > { %12679 = vst [vmem:[#allocation161_spill] sm:$0xff] %v10613_v7 }
 0xaf2   : > { %v10604_v4 = vpop.permute.xlu0 %4852 }
 0xaf3   : > { %12677 = vst [vmem:[#allocation159_spill] sm:$0xff] %v10604_v4 }
 0xaf6   : > { %v10607_v6 = vpop.xlane.xlu0 %2572 }
 0xaf7   : > { %v7208_v40 = vpop.eup %7207 }
 0xaf8   : > { %v10592_v54 = vmul.f32 %v7208_v40, %v3789_v2 }
 0xafa   : > { %12675 = vst [vmem:[#allocation157_spill] sm:$0xff] %v10592_v54 }
 0xaff   : > { %5002 = vperm.xlu0 %7045, %v10563_v24  }
 0xb0b   : > { %2659 = vadd.xlane.f32.xlu1 %v2658_v19  ;;  %v2933_v19 = vmul.f32 %v10499_v21, %v10499_v21 }
 0xb0d   : > { %v3301_v34 = vsel %vm2300_vm0, %v2933_v19, 0.0  ;;  %v3790_v19 = vld [vmem:[%s8280_s15 + $0x288] sm:$0xff] }
 0xb0f   : > { %3299 = vadd.xlane.f32.xlu1 %v3298_v47  ;;  %v3918_v47 = vadd.f32 1e-05, %v3662_v12  ;;  %v3535_v12 = vmul.f32 %v10613_v7, %v10613_v7 }
 0xb11   : > { %7209 = vrsqrt.f32 %v3918_v47 }
 0xb12   : > { %v1581_v44 = vpop.f32.mrb[250].mxu1 }
 0xb13   : > { %v1583_v40 = vpop.f32.mrb[251].mxu1 }
 0xb16   : > { %v1586_v5 = vpop.f32.mrb[252].mxu1 }
 0xb17   : > { %v1588_v4 = vpop.f32.mrb[253].mxu1 }
 0xb18   : > { %v2667_v4 = vsel %vm2300_vm0, %v10539_v57, 0.0 }
 0xb1b   : > { %v7210_v48 = vpop.eup %7209 }
 0xb1c   : > { %v10609_v56 = vmul.f32 %v7210_v48, %v3790_v19  ;;  %v2934_v48 = vmul.f32 %v10520_v62, %v10520_v62 }
 0xb1e   : > { %2662 = vadd.xlane.f32.xlu0 %v2661_v52  ;;  %v2286_v52 = vpop.f32.mrb[250].mxu0  ;;  %12678 = vst [vmem:[#allocation160_spill] sm:$0xff] %v10609_v56  ;;  %v3304_v7 = vsel %vm2300_vm0, %v2934_v48, 0.0 }
 0xb1f   : > { %v10602_v2 = vadd.f32 %v2286_v52, %v1581_v44  ;;  %v2288_v21 = vpop.f32.mrb[251].mxu0  ;;  %v2664_v44 = vsel %vm2300_vm0, %v10520_v62, 0.0 }
 0xb20   : > { %5007 = vperm.xlu1 %7046, %v10592_v54   ;;  %v3407_v21 = vmul.f32 0.020408163, %v9852_v26 }
 0xb21   : > { %12676 = vst [vmem:[#allocation158_spill] sm:$0xff] %v10602_v2 }
 0xb22   : > { %3302 = vadd.xlane.f32.xlu0 %v3301_v34  ;;  %v10615_v34 = vpop.xlane.xlu0 %3212  ;;  %v3663_v52 = vsub.f32 %v3407_v21, %v3535_v12  ;;  %v10633_v12 = vpop.permute.xlu1 %4877 }
 0xb23   : > { %12682 = vst [vmem:[#allocation164_spill] sm:$0xff] %v10633_v12 }
 0xb24   : > { %v3919_v19 = vadd.f32 1e-05, %v3663_v52  ;;  %v10640_v52 = vmul.f32 0.020408163, %v9888_v18 }
 0xb26   : > { %v10620_v47 = vpop.permute.xlu0 %4862  ;;  %7211 = vrsqrt.f32 %v3919_v19  ;;  %12684 = vst [vmem:[#allocation166_spill] sm:$0xff] %v10640_v52  ;;  %v3536_v19 = vmul.f32 %v10640_v52, %v10640_v52 }
 0xb27   : > { %12680 = vst [vmem:[#allocation162_spill] sm:$0xff] %v10620_v47 }
 0xb29   : > { %v2291_v54 = vpop.f32.mrb[252].mxu0 }
 0xb2a   : > { %v10626_v40 = vpop.xlane.xlu0 %2578  ;;  %v10629_v26 = vadd.f32 %v2291_v54, %v1586_v5  ;;  %v2293_v47 = vpop.f32.mrb[253].mxu0  ;;  %v3791_v54 = vld [vmem:[%s8280_s15 + $0x290] sm:$0xff] }
 0xb2b   : > { %v3408_v47 = vmul.f32 0.020408163, %v9890_v3 }
 0xb2c   : > { %12681 = vst [vmem:[#allocation163_spill] sm:$0xff] %v10629_v26 }
 0xb30   : > { %v7212_v62 = vpop.eup %7211 }
 0xb31   : > { %v10650_v5 = vmul.f32 %v7212_v62, %v3791_v54 }
 0xb33   : > { %12685 = vst [vmem:[#allocation167_spill] sm:$0xff] %v10650_v5 }
 0xb38   : > { %5012 = vperm.xlu0 %7045, %v10609_v56   ;;  %v10631_v56 = vpop.xlane.xlu0 %3218 }
 0xb3c   : > { %v10635_v21 = vpop.permute.xlu0 %4872  ;;  %v2296_v52 = vpop.f32.mrb[254].mxu0 }
 0xb3d   : > { %12683 = vst [vmem:[#allocation165_spill] sm:$0xff] %v10635_v21  ;;  %v3664_v21 = vsub.f32 %v3408_v47, %v3536_v19  ;;  %v2298_v19 = vpop.f32.mrb[255].mxu0 }
 0xb3e   : > { %v3409_v19 = vmul.f32 0.020408163, %v10525_v61 }
 0xb3f   : > { %v3920_v3 = vadd.f32 1e-05, %v3664_v21  ;;  %v3792_v21 = vld [vmem:[%s8280_s15 + $0x298] sm:$0xff] }
 0xb40   : > { %v10648_v48 = vpop.xlane.xlu0 %2584 }
 0xb41   : > { %7213 = vrsqrt.f32 %v3920_v3 }
 0xb44   : > { %2665 = vadd.xlane.f32.xlu1 %v2664_v44  ;;  %v10637_v44 = vpop.xlane.xlu1 %2587 }
 0xb48   : > { %3305 = vadd.xlane.f32.xlu1 %v3304_v7  ;;  %v2935_v7 = vmul.f32 %v10539_v57, %v10539_v57  ;;  %v10655_v12 = vpop.xlane.xlu1 %3227  ;;  %v10658_v57 = vpop.xlane.xlu0 %3224 }
 0xb4a   : > { %v3307_v18 = vsel %vm2300_vm0, %v2935_v7, 0.0 }
 0xb4b   : > { %v1591_v7 = vpop.f32.mrb[254].mxu1 }
 0xb4c   : > { %v10660_v50 = vpop.permute.xlu1 %4887  ;;  %v10662_v62 = vpop.permute.xlu0 %4882  ;;  %v10670_v47 = vadd.f32 %v2296_v52, %v1591_v7  ;;  %v3537_v7 = vmul.f32 %v10683_v60, %v10683_v60  ;;  %v3310_v60 = vsel %vm2300_vm0, %v2936_v32, 0.0  ;;  %v3793_v32 = vld [vmem:[%s8280_s15 + $0x2a0] sm:$0xff] }
 0xb4d   : > { %12686 = vst [vmem:[#allocation168_spill] sm:$0xff] %v10660_v50  ;;  %12687 = vst [vmem:[#allocation169_spill] sm:$0xff] %v10662_v62  ;;  %v1593_v24 = vpop.f32.mrb[255].mxu1 }
 0xb4e   : > { %12688 = vst [vmem:[#allocation170_spill] sm:$0xff] %v10670_v47 }
 0xb50   : > { %v10666_v54 = vpop.xlane.xlu0 %2590 }
 0xb57   : > { %2668 = vadd.xlane.f32.xlu0 %v2667_v4  ;;  %v10664_v4 = vpop.xlane.xlu1 %2593 }
 0xb59   : > { %5017 = vperm.xlu1 %7046, %v10650_v5   ;;  %v10672_v5 = vpop.xlane.xlu0 %3230 }
 0xb5b   : > { %3308 = vadd.xlane.f32.xlu0 %v3307_v18  ;;  %v10668_v33 = vpop.xlane.xlu1 %3233  ;;  %v7214_v18 = vpop.eup %7213 }
 0xb5c   : > { %v10677_v3 = vmul.f32 %v7214_v18, %v3792_v21  ;;  %v2670_v18 = vsel %vm2300_vm0, %v10560_v15, 0.0  ;;  %v3665_v21 = vsub.f32 %v3409_v19, %v3537_v7 }
 0xb5d   : > { %v10680_v62 = vpop.permute.xlu0 %4892 }
 0xb5e   : > { %12690 = vst [vmem:[#allocation172_spill] sm:$0xff] %v10677_v3  ;;  %12691 = vst [vmem:[#allocation173_spill] sm:$0xff] %v10680_v62  ;;  %v3921_v62 = vadd.f32 1e-05, %v3665_v21  ;;  %v2673_v21 = vsel %vm2300_vm0, %v10579_v46, 0.0 }
 0xb5f   : > { %v10675_v50 = vpop.permute.xlu1 %4897 }
 0xb60   : > { %12689 = vst [vmem:[#allocation171_spill] sm:$0xff] %v10675_v50  ;;  %7215 = vrsqrt.f32 %v3921_v62  ;;  %v3410_v62 = vmul.f32 0.020408163, %v10068_v63 }
 0xb61   : > { %v10687_v52 = vpop.xlane.xlu0 %2596 }
 0xb63   : > { %v10685_v24 = vpop.xlane.xlu1 %2599 }
 0xb65   : > { %v10696_v50 = vpop.xlane.xlu0 %3236 }
 0xb67   : > { %v10692_v38 = vpop.xlane.xlu1 %3239 }
 0xb69   : > { %v10703_v61 = vpop.permute.xlu0 %4902 }
 0xb6a   : > { %12694 = vst [vmem:[#allocation176_spill] sm:$0xff] %v10703_v61  ;;  %v7216_v25 = vpop.eup %7215 }
 0xb6d   : > { %v10707_v28 = vpop.xlane.xlu0 %2602 }
 0xb71   : > { %5022 = vperm.xlu0 %7045, %v10677_v3   ;;  %v10700_v3 = vpop.permute.xlu1 %4907  ;;  %v10711_v19 = vpop.xlane.xlu0 %3242 }
 0xb72   : > { %12693 = vst [vmem:[#allocation175_spill] sm:$0xff] %v10700_v3  ;;  %12695 = vst [vmem:[#allocation177_spill] sm:$0xff] %v10711_v19  ;;  %v10724_v3 = vmul.f32 %v7216_v25, %v3793_v32 }
 0xb74   : > { %12698 = vst [vmem:[#allocation180_spill] sm:$0xff] %v10724_v3 }
 0xb75   : > { %v10705_v37 = vpop.xlane.xlu1 %2605  ;;  %v10729_v35 = vpop.permute.xlu0 %4912 }
 0xb76   : > { %12699 = vst [vmem:[#allocation181_spill] sm:$0xff] %v10729_v35 }
 0xb79   : > { %v10709_v7 = vpop.xlane.xlu1 %3245  ;;  %v10734_v63 = vpop.xlane.xlu0 %2608 }
 0xb7a   : > { %12700 = vst [vmem:[#allocation182_spill] sm:$0xff] %v10734_v63 }
 0xb7d   : > { %2671 = vadd.xlane.f32.xlu1 %v2670_v18  ;;  %v10714_v18 = vmul.f32 0.020408163, %v10060_v41  ;;  %v10722_v15 = vpop.permute.xlu1 %4917  ;;  %v10738_v25 = vpop.xlane.xlu0 %3248 }
 0xb7e   : > { %12697 = vst [vmem:[#allocation179_spill] sm:$0xff] %v10722_v15  ;;  %12701 = vst [vmem:[#allocation183_spill] sm:$0xff] %v10738_v25 }
 0xb7f   : > { %12696 = vst [vmem:[#allocation178_spill] sm:$0xff] %v10714_v18  ;;  %v3538_v61 = vmul.f32 %v10714_v18, %v10714_v18  ;;  %v3411_v18 = vmul.f32 0.020408163, %v10565_v20 }
 0xb81   : > { %3311 = vadd.xlane.f32.xlu1 %v3310_v60  ;;  %v2937_v60 = vmul.f32 %v10579_v46, %v10579_v46  ;;  %v3666_v14 = vsub.f32 %v3410_v62, %v3538_v61  ;;  %v10732_v19 = vpop.xlane.xlu1 %2611  ;;  %v10742_v15 = vpop.permute.xlu0 %4922 }
 0xb82   : > { %12703 = vst [vmem:[#allocation185_spill] sm:$0xff] %v10742_v15 }
 0xb83   : > { %v3313_v41 = vsel %vm2300_vm0, %v2937_v60, 0.0  ;;  %v3922_v46 = vadd.f32 1e-05, %v3666_v14  ;;  %v10755_v14 = vmul.f32 0.020408163, %v10558_v23  ;;  %v2938_v23 = vmul.f32 %v10602_v2, %v10602_v2 }
 0xb85   : > { %7217 = vrsqrt.f32 %v3922_v46  ;;  %v10747_v61 = vpop.xlane.xlu0 %2614  ;;  %12706 = vst [vmem:[#allocation188_spill] sm:$0xff] %v10755_v14  ;;  %v3539_v15 = vmul.f32 %v10755_v14, %v10755_v14  ;;  %v3316_v20 = vsel %vm2300_vm0, %v2938_v23, 0.0  ;;  %v3795_v23 = vld [vmem:[%s8280_s15 + $0x2b0] sm:$0xff] }
 0xb86   : > { %12704 = vst [vmem:[#allocation186_spill] sm:$0xff] %v10747_v61 }
 0xb89   : > { %v10757_v46 = vpop.xlane.xlu0 %3254 }
 0xb8a   : > { %12707 = vst [vmem:[#allocation189_spill] sm:$0xff] %v10757_v46 }
 0xb8d   : > { %v10764_v25 = vpop.permute.xlu0 %4932 }
 0xb8e   : > { %12709 = vst [vmem:[#allocation191_spill] sm:$0xff] %v10764_v25 }
 0xb8f   : > { %v7218_v35 = vpop.eup %7217 }
 0xb90   : > { %2674 = vadd.xlane.f32.xlu0 %v2673_v21  ;;  %v10736_v21 = vpop.xlane.xlu1 %3251 }
 0xb91   : > { %v10772_v46 = vpop.xlane.xlu0 %2620 }
 0xb92   : > { %5027 = vperm.xlu1 %7046, %v10724_v3   ;;  %v3794_v3 = vld [vmem:[%s8280_s15 + $0x2a8] sm:$0xff]  ;;  %12710 = vst [vmem:[#allocation192_spill] sm:$0xff] %v10772_v46 }
 0xb93   : > { %v10749_v62 = vmul.f32 %v7218_v35, %v3794_v3  ;;  %v2676_v3 = vsel %vm2300_vm0, %v10602_v2, 0.0  ;;  %v10786_v2 = vmul.f32 0.020408163, %v10072_v39 }
 0xb94   : > { %3314 = vadd.xlane.f32.xlu0 %v3313_v41  ;;  %v10740_v32 = vpop.permute.xlu1 %4927 }
 0xb95   : > { %12702 = vst [vmem:[#allocation184_spill] sm:$0xff] %v10740_v32  ;;  %12705 = vst [vmem:[#allocation187_spill] sm:$0xff] %v10749_v62  ;;  %v10777_v25 = vpop.xlane.xlu0 %3260  ;;  %v3540_v39 = vmul.f32 %v10786_v2, %v10786_v2 }
 0xb96   : > { %12711 = vst [vmem:[#allocation193_spill] sm:$0xff] %v10777_v25  ;;  %12714 = vst [vmem:[#allocation196_spill] sm:$0xff] %v10786_v2 }
 0xb98   : > { %v10744_v60 = vpop.xlane.xlu1 %2617 }
 0xb99   : > { %v10781_v63 = vpop.permute.xlu0 %4942 }
 0xb9a   : > { %12713 = vst [vmem:[#allocation195_spill] sm:$0xff] %v10781_v63 }
 0xb9c   : > { %v10751_v41 = vpop.xlane.xlu1 %3257 }
 0xba0   : > { %v10759_v32 = vpop.permute.xlu1 %4937 }
 0xba1   : > { %12708 = vst [vmem:[#allocation190_spill] sm:$0xff] %v10759_v32 }
 0xba4   : > { %v10766_v35 = vpop.xlane.xlu1 %2623 }
 0xba8   : > { %v10774_v61 = vpop.xlane.xlu1 %3263 }
 0xbaa   : > { %5032 = vperm.xlu0 %7045, %v10749_v62   ;;  %v3667_v62 = vsub.f32 %v3411_v18, %v3539_v15 }
 0xbac   : > { %v3923_v32 = vadd.f32 1e-05, %v3667_v62  ;;  %v10779_v14 = vpop.permute.xlu1 %4947  ;;  %v2679_v62 = vsel %vm2300_vm0, %v10629_v26, 0.0 }
 0xbad   : > { %12712 = vst [vmem:[#allocation194_spill] sm:$0xff] %v10779_v14 }
 0xbae   : > { %7219 = vrsqrt.f32 %v3923_v32  ;;  %v2939_v32 = vmul.f32 %v10629_v26, %v10629_v26  ;;  %v10807_v26 = vmul.f32 0.020408163, %v10094_v17 }
 0xbb0   : > { %v10783_v15 = vpop.xlane.xlu1 %2629  ;;  %v3319_v25 = vsel %vm2300_vm0, %v2939_v32, 0.0  ;;  %12719 = vst [vmem:[#allocation201_spill] sm:$0xff] %v10807_v26 }
 0xbb4   : > { %v10796_v14 = vpop.xlane.xlu1 %3269 }
 0xbb5   : > { %12716 = vst [vmem:[#allocation198_spill] sm:$0xff] %v10796_v14 }
 0xbb6   : > { %2677 = vadd.xlane.f32.xlu1 %v2676_v3  ;;  %v10788_v3 = vpop.xlane.xlu0 %2626 }
 0xbb7   : > { %12715 = vst [vmem:[#allocation197_spill] sm:$0xff] %v10788_v3 }
 0xbb8   : > { %v7220_v18 = vpop.eup %7219 }
 0xbb9   : > { %v10798_v63 = vmul.f32 %v7220_v18, %v3795_v23  ;;  %v3414_v18 = vmul.f32 0.020408163, %v10100_v29 }
 0xbba   : > { %3317 = vadd.xlane.f32.xlu1 %v3316_v20  ;;  %v3412_v20 = vmul.f32 0.020408163, %v10077_v30  ;;  %v10804_v46 = vpop.xlane.xlu0 %3266  ;;  %v10809_v30 = vpop.permute.xlu1 %4957 }
 0xbbb   : > { %12717 = vst [vmem:[#allocation199_spill] sm:$0xff] %v10798_v63  ;;  %12718 = vst [vmem:[#allocation200_spill] sm:$0xff] %v10804_v46 }
 0xbbc   : > { %v3668_v3 = vsub.f32 %v3412_v20, %v3540_v39  ;;  %12720 = vst [vmem:[#allocation202_spill] sm:$0xff] %v10809_v30 }
 0xbbe   : > { %v3924_v14 = vadd.f32 1e-05, %v3668_v3  ;;  %v10814_v23 = vpop.permute.xlu0 %4952  ;;  %v10816_v32 = vpop.xlane.xlu1 %2635  ;;  %v3416_v3 = vmul.f32 0.020408163, %v10119_v27 }
 0xbbf   : > { %12721 = vst [vmem:[#allocation203_spill] sm:$0xff] %v10814_v23 }
 0xbc0   : > { %7221 = vrsqrt.f32 %v3924_v14 }
 0xbc2   : > { %v10821_v17 = vpop.xlane.xlu0 %2632  ;;  %v10824_v29 = vpop.xlane.xlu1 %3275 }
 0xbc3   : > { %12722 = vst [vmem:[#allocation204_spill] sm:$0xff] %v10821_v17  ;;  %v4264_v17 = vld [vmem:[%s8300_s17 + $0x158] sm:$0xff] }
 0xbc9   : > { %2680 = vadd.xlane.f32.xlu0 %v2679_v62  ;;  %v3542_v62 = vmul.f32 %v10807_v26, %v10807_v26 }
 0xbca   : > { %v7222_v14 = vpop.eup %7221 }
 0xbcb   : > { %5037 = vperm.xlu1 %7046, %v10798_v63   ;;  %v3670_v20 = vsub.f32 %v3414_v18, %v3542_v62  ;;  %v10828_v63 = vpop.xlane.xlu0 %3272  ;;  %v3796_v18 = vld [vmem:[%s8280_s15 + $0x2b8] sm:$0xff] }
 0xbcc   : > { %v10833_v26 = vmul.f32 %v7222_v14, %v3796_v18  ;;  %v12727_v18 = vsub.f32 %v10138_v49, %v10136_v36  ;;  %v4266_v36 = vld [vmem:[%s8300_s17 + $0x168] sm:$0xff] }
 0xbcd   : > { %3320 = vadd.xlane.f32.xlu0 %v3319_v25  ;;  %v10819_v25 = vmul.f32 0.020408163, %v10107_v0  ;;  %v3926_v39 = vadd.f32 1e-05, %v3670_v20  ;;  %v10831_v0 = vpop.permute.xlu1 %4967  ;;  %v12724_v20 = vld [vmem:[#allocation77_spill] sm:$0xff] }
 0xbce   : > { %12723 = vst [vmem:[#allocation205_spill] sm:$0xff] %v10831_v0  ;;  %v4392_v27 = vmul.f32 %v9726_v31, %v12724_v20  ;;  %v3798_v31 = vld [vmem:[%s8280_s15 + $0x2c8] sm:$0xff]  ;;  %v3930_v20 = vadd.f32 1e-05, %v12727_v18  ;;  %v3420_v0 = vmul.f32 0.020408163, %v10655_v12 }
 0xbcf   : > { %v3544_v30 = vmul.f32 %v10819_v25, %v10819_v25  ;;  %7223 = vrsqrt.f32 %v3926_v39  ;;  %v10837_v2 = vpop.permute.xlu0 %4962 }
 0xbd0   : > { %12725 = vst [vmem:[#allocation77_spill] sm:$0xff] %v10837_v2  ;;  %v4520_v39 = vsub.f32 %v4264_v17, %v4392_v27  ;;  %v4394_v27 = vmul.f32 %v9785_v16, %v9756_v13  ;;  %v10877_v13 = vmul.f32 0.020408163, %v10664_v4  ;;  %v3800_v16 = vld [vmem:[%s8280_s15 + $0x2d8] sm:$0xff] }
 0xbd1   : > { %v3672_v23 = vsub.f32 %v3416_v3, %v3544_v30  ;;  %v10840_v46 = vpop.xlane.xlu1 %2641  ;;  %v10844_v30 = vmul.f32 0.020408163, %v10598_v55  ;;  %v3413_v55 = vmul.f32 0.020408163, %v10600_v43  ;;  %v2682_v43 = vsel %vm2300_vm0, %v10670_v47, 0.0 }
 0xbd3   : > { %v3928_v62 = vadd.f32 1e-05, %v3672_v23  ;;  %v10847_v23 = vmul.f32 0.020408163, %v10637_v44  ;;  %v10849_v14 = vpop.xlane.xlu0 %2638 }
 0xbd5   : > { %7225 = vrsqrt.f32 %v3928_v62  ;;  %12726 = vst [vmem:[#allocation206_spill] sm:$0xff] %v10847_v23  ;;  %v3541_v62 = vmul.f32 %v10844_v30, %v10844_v30  ;;  %v10859_v17 = vpop.xlane.xlu1 %3281 }
 0xbd6   : > { %7227 = vrsqrt.f32 %v3930_v20  ;;  %v2940_v20 = vmul.f32 %v10670_v47, %v10670_v47  ;;  %v3550_v47 = vmul.f32 %v10877_v13, %v10877_v13 }
 0xbd7   : > { %v10869_v12 = vpop.xlane.xlu0 %3278  ;;  %v3669_v18 = vsub.f32 %v3413_v55, %v3541_v62  ;;  %v3422_v62 = vmul.f32 0.020408163, %v10668_v33  ;;  %v4268_v33 = vld [vmem:[%s8300_s17 + $0x178] sm:$0xff] }
 0xbd9   : > { %v7224_v3 = vpop.eup %7223 }
 0xbda   : > { %v10861_v44 = vmul.f32 %v7224_v3, %v3798_v31  ;;  %v10874_v3 = vmul.f32 0.020408163, %v10607_v6  ;;  %v4522_v31 = vsub.f32 %v4266_v36, %v4394_v27  ;;  %v12729_v6 = vld [vmem:[#allocation28_spill] sm:$0xff]  ;;  %v3925_v27 = vadd.f32 1e-05, %v3669_v18 }
 0xbdb   : > { %v4396_v55 = vmul.f32 %v12729_v6, %v9812_v22  ;;  %v3415_v36 = vmul.f32 0.020408163, %v10615_v34  ;;  %v3678_v22 = vsub.f32 %v3422_v62, %v3550_v47  ;;  %v10905_v6 = vmul.f32 0.020408163, %v10685_v24 }
 0xbdc   : > { %v3543_v4 = vmul.f32 %v10874_v3, %v10874_v3  ;;  %v4398_v47 = vmul.f32 %v9899_v11, %v9870_v53  ;;  %v3417_v62 = vmul.f32 0.020408163, %v10631_v56 }
 0xbdd   : > { %v4524_v18 = vsub.f32 %v4268_v33, %v4396_v55 }
 0xbde   : > { %v3671_v34 = vsub.f32 %v3415_v36, %v3543_v4  ;;  %v4270_v4 = vld [vmem:[%s8300_s17 + $0x188] sm:$0xff]  ;;  %v10927_v36 = vmul.f32 0.020408163, %v10648_v48  ;;  %v4400_v48 = vmul.f32 %v9941_v8, %v9920_v9 }
 0xbdf   : > { %v7226_v2 = vpop.eup %7225  ;;  %v4526_v56 = vsub.f32 %v4270_v4, %v4398_v47 }
 0xbe0   : > { %v3547_v47 = vmul.f32 %v10927_v36, %v10927_v36 }
 0xbe3   : > { %5042 = vperm.xlu0 %7045, %v10833_v26  }
 0xbe7   : > { %5590 = vperm.xlu0 %7045, %v4520_v39   ;;  %v3548_v39 = vmul.f32 %v10847_v23, %v10847_v23  ;;  %v10890_v23 = vmul.f32 %v7226_v2, %v3800_v16  ;;  %v10902_v2 = vmul.f32 0.020408163, %v10626_v40  ;;  %v7228_v16 = vpop.eup %7227 }
 0xbe9   : > { %v3676_v49 = vsub.f32 %v3420_v0, %v3548_v39  ;;  %v10882_v0 = vpop.permute.xlu1 %4977  ;;  %v3545_v40 = vmul.f32 %v10902_v2, %v10902_v2 }
 0xbea   : > { %12728 = vst [vmem:[#allocation207_spill] sm:$0xff] %v10882_v0  ;;  %v3802_v0 = vld [vmem:[%s8280_s15 + $0x2e8] sm:$0xff] }
 0xbeb   : > { %5052 = vperm.xlu0 %7045, %v10861_v44   ;;  %v3932_v39 = vadd.f32 1e-05, %v3676_v49  ;;  %v3322_v49 = vsel %vm2300_vm0, %v2940_v20, 0.0  ;;  %v10918_v24 = vmul.f32 %v7228_v16, %v3802_v0  ;;  %v10930_v0 = vmul.f32 0.020408163, %v10705_v37 }
 0xbec   : > { %v3419_v37 = vmul.f32 0.020408163, %v10658_v57  ;;  %v4265_v57 = vld [vmem:[%s8300_s17 + $0x160] sm:$0xff] }
 0xbed   : > { %7229 = vrsqrt.f32 %v3932_v39  ;;  %v3927_v39 = vadd.f32 1e-05, %v3671_v34  ;;  %12731 = vst [vmem:[#allocation208_spill] sm:$0xff] %v10930_v0 }
 0xbee   : > { %7231 = vrsqrt.f32 %v3925_v27  ;;  %v3552_v27 = vmul.f32 %v10905_v6, %v10905_v6 }
 0xbef   : > { %5600 = vperm.xlu0 %7045, %v4522_v31   ;;  %2683 = vadd.xlane.f32.xlu1 %v2682_v43  ;;  %v10894_v31 = vpop.permute.xlu0 %4972  ;;  %v10898_v43 = vpop.xlane.xlu1 %2647 }
 0xbf0   : > { %12730 = vst [vmem:[#allocation28_spill] sm:$0xff] %v10894_v31  ;;  %v3934_v31 = vadd.f32 1e-05, %v3678_v22  ;;  %v3804_v22 = vld [vmem:[%s8280_s15 + $0x2f8] sm:$0xff] }
 0xbf2   : > { %7233 = vrsqrt.f32 %v3934_v31  ;;  %v3797_v31 = vld [vmem:[%s8280_s15 + $0x2c0] sm:$0xff] }
 0xbf3   : > { %5062 = vperm.xlu0 %7045, %v10890_v23   ;;  %3323 = vadd.xlane.f32.xlu1 %v3322_v49  ;;  %v10907_v20 = vpop.xlane.xlu0 %2644  ;;  %v3424_v49 = vmul.f32 0.020408163, %v10692_v38  ;;  %v10916_v55 = vpop.xlane.xlu1 %3287  ;;  %7235 = vrsqrt.f32 %v3927_v39  ;;  %v3673_v38 = vsub.f32 %v3417_v62, %v3545_v40  ;;  %v3554_v62 = vmul.f32 %v10930_v0, %v10930_v0 }
 0xbf5   : > { %v3680_v53 = vsub.f32 %v3424_v49, %v3552_v27  ;;  %v3426_v49 = vmul.f32 0.020408163, %v10709_v7  ;;  %v3929_v39 = vadd.f32 1e-05, %v3673_v38  ;;  %v12734_v7 = vld [vmem:[#allocation80_spill] sm:$0xff] }
 0xbf7   : > { %5610 = vperm.xlu0 %7045, %v4524_v18   ;;  %v10924_v11 = vpop.xlane.xlu0 %3284  ;;  %v7230_v33 = vpop.eup %7229  ;;  %v3936_v16 = vadd.f32 1e-05, %v3680_v53  ;;  %v4272_v53 = vld [vmem:[%s8300_s17 + $0x198] sm:$0xff]  ;;  %v3682_v38 = vsub.f32 %v3426_v49, %v3554_v62 }
 0xbf8   : > { %v7232_v34 = vpop.eup %7231  ;;  %v10933_v18 = vpop.permute.xlu1 %4987  ;;  %v10942_v40 = vmul.f32 %v7230_v33, %v3804_v22  ;;  %v3675_v33 = vsub.f32 %v3419_v37, %v3547_v47  ;;  %v10959_v22 = vmul.f32 0.020408163, %v10666_v54  ;;  %v4402_v54 = vmul.f32 %v9983_v58, %v9962_v42  ;;  %v4267_v42 = vld [vmem:[%s8300_s17 + $0x170] sm:$0xff] }
 0xbf9   : > { %12732 = vst [vmem:[#allocation209_spill] sm:$0xff] %v10933_v18  ;;  %v10948_v4 = vmul.f32 %v7232_v34, %v3797_v31  ;;  %7237 = vrsqrt.f32 %v3936_v16  ;;  %v4528_v34 = vsub.f32 %v4272_v53, %v4400_v48  ;;  %v10962_v18 = vmul.f32 0.020408163, %v10732_v19  ;;  %v3799_v16 = vld [vmem:[%s8280_s15 + $0x2d0] sm:$0xff] }
 0xbfa   : > { %7239 = vrsqrt.f32 %v3929_v39  ;;  %v3938_v49 = vadd.f32 1e-05, %v3682_v38  ;;  %v3428_v39 = vmul.f32 0.020408163, %v10736_v21  ;;  %v3931_v48 = vadd.f32 1e-05, %v3675_v33 }
 0xbfb   : > { %5072 = vperm.xlu0 %7045, %v10918_v24   ;;  %v10946_v27 = vpop.permute.xlu0 %4982  ;;  %12736 = vst [vmem:[#allocation80_spill] sm:$0xff] %v10962_v18  ;;  %v3549_v19 = vmul.f32 %v10959_v22, %v10959_v22  ;;  %v3421_v47 = vmul.f32 0.020408163, %v10672_v5  ;;  %v3556_v53 = vmul.f32 %v10962_v18, %v10962_v18  ;;  %v4274_v21 = vld [vmem:[%s8300_s17 + $0x1a8] sm:$0xff]  ;;  %v12738_v38 = vld [vmem:[#allocation84_spill] sm:$0xff]  ;;  %v12769_v18 = vld [vmem:[#allocation103_spill] sm:$0xff] }
 0xbfc   : > { %12733 = vst [vmem:[#allocation210_spill] sm:$0xff] %v10946_v27  ;;  %v10953_v9 = vpop.xlane.xlu1 %2653  ;;  %v7234_v31 = vpop.eup %7233  ;;  %v3806_v27 = vld [vmem:[%s8280_s15 + $0x308] sm:$0xff]  ;;  %7241 = vrsqrt.f32 %v3938_v49 }
 0xbfd   : > { %v7236_v0 = vpop.eup %7235  ;;  %v10976_v62 = vmul.f32 %v7234_v31, %v3806_v27  ;;  %v3684_v5 = vsub.f32 %v3428_v39, %v3556_v53  ;;  %7243 = vrsqrt.f32 %v3931_v48  ;;  %v3677_v27 = vsub.f32 %v3421_v47, %v3549_v19  ;;  %v3801_v39 = vld [vmem:[%s8280_s15 + $0x2e0] sm:$0xff] }
 0xbfe   : > { %v3430_v48 = vmul.f32 0.020408163, %v10751_v41  ;;  %v3423_v19 = vmul.f32 0.020408163, %v10696_v50  ;;  %v4276_v41 = vld [vmem:[%s8300_s17 + $0x1b8] sm:$0xff]  ;;  %v4269_v50 = vld [vmem:[%s8300_s17 + $0x180] sm:$0xff] }
 0xbff   : > { %5620 = vperm.xlu0 %7045, %v4526_v56   ;;  %v12735_v56 = vld [vmem:[#allocation26_spill] sm:$0xff]  ;;  %v3940_v53 = vadd.f32 1e-05, %v3684_v5  ;;  %v12742_v5 = vld [vmem:[#allocation29_spill] sm:$0xff] }
 0xc00   : > { %v4393_v8 = vmul.f32 %v12735_v56, %v12734_v7  ;;  %v10964_v7 = vpop.xlane.xlu0 %2650  ;;  %v10974_v37 = vpop.xlane.xlu1 %3293 }
 0xc01   : > { %7245 = vrsqrt.f32 %v3940_v53  ;;  %v3803_v53 = vld [vmem:[%s8280_s15 + $0x2f0] sm:$0xff] }
 0xc02   : > { %v4521_v56 = vsub.f32 %v4265_v57, %v4393_v8  ;;  %v10980_v8 = vmul.f32 %v7236_v0, %v3799_v16  ;;  %v12737_v57 = vld [vmem:[#allocation83_spill] sm:$0xff]  ;;  %v10991_v0 = vmul.f32 0.020408163, %v10687_v52  ;;  %v4404_v52 = vmul.f32 %v10025_v51, %v10004_v1 }
 0xc03   : > { %5082 = vperm.xlu0 %7045, %v10942_v40   ;;  %v4395_v58 = vmul.f32 %v12738_v38, %v12737_v57  ;;  %v7238_v31 = vpop.eup %7237  ;;  %v3808_v57 = vld [vmem:[%s8280_s15 + $0x318] sm:$0xff]  ;;  %v4397_v51 = vmul.f32 %v9882_v10, %v12742_v5  ;;  %v3810_v5 = vld [vmem:[%s8280_s15 + $0x328] sm:$0xff] }
 0xc04   : > { %5047 = vperm.xlu1 %7046, %v10948_v4   ;;  %v10987_v33 = vpop.xlane.xlu0 %3290  ;;  %v7240_v38 = vpop.eup %7239  ;;  %v11006_v47 = vmul.f32 %v7238_v31, %v3808_v57  ;;  %v11023_v31 = vmul.f32 0.020408163, %v10707_v28  ;;  %v4406_v28 = vmul.f32 %v10079_v59, %v10048_v45  ;;  %v4271_v45 = vld [vmem:[%s8300_s17 + $0x190] sm:$0xff] }
 0xc05   : > { %v4523_v16 = vsub.f32 %v4267_v42, %v4395_v58  ;;  %v10997_v49 = vpop.permute.xlu1 %4997  ;;  %v11012_v42 = vmul.f32 %v7240_v38, %v3801_v39  ;;  %v11026_v38 = vmul.f32 0.020408163, %v10766_v35  ;;  %v4525_v39 = vsub.f32 %v4269_v50, %v4397_v51 }
 0xc06   : > { %12740 = vst [vmem:[#allocation83_spill] sm:$0xff] %v10997_v49  ;;  %12743 = vst [vmem:[#allocation29_spill] sm:$0xff] %v11023_v31  ;;  %v7242_v57 = vpop.eup %7241  ;;  %v3553_v35 = vmul.f32 %v11023_v31, %v11023_v31 }
 0xc07   : > { %5630 = vperm.xlu0 %7045, %v4528_v34   ;;  %v4530_v34 = vsub.f32 %v4274_v21, %v4402_v54  ;;  %v3933_v54 = vadd.f32 1e-05, %v3677_v27  ;;  %12744 = vst [vmem:[#allocation211_spill] sm:$0xff] %v11026_v38  ;;  %v7244_v49 = vpop.eup %7243  ;;  %v3560_v51 = vmul.f32 %v11026_v38, %v11026_v38 }
 0xc08   : > { %5595 = vperm.xlu1 %7046, %v4521_v56   ;;  %v10994_v56 = vmul.f32 0.020408163, %v10744_v60  ;;  %v3551_v60 = vmul.f32 %v10991_v0, %v10991_v0  ;;  %v11010_v58 = vpop.permute.xlu0 %4992  ;;  %v11044_v50 = vmul.f32 %v7244_v49, %v3803_v53 }
 0xc09   : > { %12741 = vst [vmem:[#allocation84_spill] sm:$0xff] %v11010_v58  ;;  %v11017_v1 = vpop.xlane.xlu1 %2659  ;;  %7247 = vrsqrt.f32 %v3933_v54  ;;  %v3432_v54 = vmul.f32 0.020408163, %v10774_v61  ;;  %v4278_v61 = vld [vmem:[%s8300_s17 + $0x1c8] sm:$0xff]  ;;  %v11058_v58 = vmul.f32 0.020408163, %v10783_v15 }
 0xc0a   : > { %12739 = vst [vmem:[#allocation26_spill] sm:$0xff] %v10994_v56  ;;  %v3558_v21 = vmul.f32 %v10994_v56, %v10994_v56  ;;  %v4534_v53 = vsub.f32 %v4278_v61, %v4406_v28  ;;  %v12759_v56 = vld [vmem:[#allocation99_spill] sm:$0xff] }
 0xc0b   : > { %5092 = vperm.xlu0 %7045, %v10976_v62  }
 0xc0c   : > { %5057 = vperm.xlu1 %7046, %v10980_v8   ;;  %v3686_v27 = vsub.f32 %v3430_v48, %v3558_v21  ;;  %v11028_v10 = vpop.xlane.xlu0 %2656 }
 0xc0d   : > { %v11038_v21 = vpop.xlane.xlu1 %3299 }
 0xc0e   : > { %v3942_v48 = vadd.f32 1e-05, %v3686_v27  ;;  %v12746_v27 = vld [vmem:[#allocation32_spill] sm:$0xff] }
 0xc0f   : > { %5640 = vperm.xlu0 %7045, %v4530_v34   ;;  %v3679_v34 = vsub.f32 %v3423_v19, %v3551_v60  ;;  %v12745_v60 = vld [vmem:[#allocation177_spill] sm:$0xff]  ;;  %12750 = vst [vmem:[#allocation32_spill] sm:$0xff] %v11058_v58 }
 0xc10   : > { %5605 = vperm.xlu1 %7046, %v4523_v16   ;;  %v4532_v16 = vsub.f32 %v4276_v41, %v4404_v52  ;;  %v3425_v19 = vmul.f32 0.020408163, %v12745_v60  ;;  %v11040_v41 = vmul.f32 %v7242_v57, %v3810_v5  ;;  %7249 = vrsqrt.f32 %v3942_v48  ;;  %v12748_v5 = vld [vmem:[#allocation182_spill] sm:$0xff]  ;;  %v7246_v60 = vpop.eup %7245 }
 0xc11   : > { %v3935_v52 = vadd.f32 1e-05, %v3679_v34  ;;  %v3688_v34 = vsub.f32 %v3432_v54, %v3560_v51  ;;  %v11055_v49 = vmul.f32 0.020408163, %v12748_v5  ;;  %v11061_v48 = vpop.permute.xlu1 %5007  ;;  %v3805_v54 = vld [vmem:[%s8280_s15 + $0x300] sm:$0xff]  ;;  %v12754_v5 = vld [vmem:[#allocation120_spill] sm:$0xff] }
 0xc12   : > { %v3681_v57 = vsub.f32 %v3425_v19, %v3553_v35  ;;  %v12753_v19 = vld [vmem:[#allocation115_spill] sm:$0xff] }
 0xc13   : > { %5102 = vperm.xlu0 %7045, %v11006_v47   ;;  %7251 = vrsqrt.f32 %v3935_v52  ;;  %12749 = vst [vmem:[#allocation177_spill] sm:$0xff] %v11055_v49  ;;  %v7248_v38 = vpop.eup %7247  ;;  %v3944_v51 = vadd.f32 1e-05, %v3688_v34  ;;  %v12752_v52 = vld [vmem:[#allocation198_spill] sm:$0xff]  ;;  %v4408_v28 = vmul.f32 %v12754_v5, %v12753_v19  ;;  %v3555_v15 = vmul.f32 %v11055_v49, %v11055_v49  ;;  %v4273_v5 = vld [vmem:[%s8300_s17 + $0x1a0] sm:$0xff] }
 0xc14   : > { %5067 = vperm.xlu1 %7046, %v11012_v42   ;;  %v3434_v35 = vmul.f32 0.020408163, %v12752_v52  ;;  %v3937_v61 = vadd.f32 1e-05, %v3681_v57  ;;  %v11076_v34 = vmul.f32 %v7248_v38, %v3805_v54  ;;  %v4280_v52 = vld [vmem:[%s8300_s17 + $0x1d8] sm:$0xff]  ;;  %v3814_v49 = vld [vmem:[%s8280_s15 + $0x348] sm:$0xff] }
 0xc15   : > { %v11081_v57 = vpop.xlane.xlu1 %2665  ;;  %7253 = vrsqrt.f32 %v3944_v51  ;;  %v4536_v54 = vsub.f32 %v4280_v52, %v4408_v28  ;;  %v3807_v51 = vld [vmem:[%s8280_s15 + $0x310] sm:$0xff]  ;;  %v12765_v52 = vld [vmem:[#allocation189_spill] sm:$0xff] }
 0xc16   : > { %7255 = vrsqrt.f32 %v3937_v61  ;;  %v3436_v61 = vmul.f32 0.020408163, %v10824_v29  ;;  %v4282_v29 = vld [vmem:[%s8300_s17 + $0x1e8] sm:$0xff] }
 0xc17   : > { %5650 = vperm.xlu0 %7045, %v4532_v16   ;;  %v12747_v16 = vld [vmem:[#allocation34_spill] sm:$0xff] }
 0xc18   : > { %5615 = vperm.xlu1 %7046, %v4525_v39   ;;  %v4399_v59 = vmul.f32 %v12747_v16, %v12746_v27  ;;  %v11051_v39 = vpop.xlane.xlu0 %3296  ;;  %v3812_v16 = vld [vmem:[%s8280_s15 + $0x338] sm:$0xff]  ;;  %12751 = vst [vmem:[#allocation34_spill] sm:$0xff] %v11061_v48 }
 0xc19   : > { %v11070_v31 = vmul.f32 %v7246_v60, %v3812_v16 }
 0xc1a   : > { %v4527_v27 = vsub.f32 %v4271_v45, %v4399_v59  ;;  %v12755_v59 = vld [vmem:[#allocation183_spill] sm:$0xff] }
 0xc1b   : > { %5112 = vperm.xlu0 %7045, %v11040_v41   ;;  %v3427_v45 = vmul.f32 0.020408163, %v12755_v59  ;;  %12756 = vst [vmem:[#allocation182_spill] sm:$0xff] %v11070_v31  ;;  %v12760_v59 = vld [vmem:[#allocation186_spill] sm:$0xff] }
 0xc1c   : > { %5077 = vperm.xlu1 %7046, %v11044_v50   ;;  %v11074_v48 = vpop.permute.xlu0 %5002  ;;  %v11087_v38 = vmul.f32 0.020408163, %v12760_v59  ;;  %v3429_v59 = vmul.f32 0.020408163, %v12765_v52 }
 0xc1d   : > { %12757 = vst [vmem:[#allocation198_spill] sm:$0xff] %v11074_v48  ;;  %v3683_v16 = vsub.f32 %v3427_v45, %v3555_v15  ;;  %v7250_v48 = vpop.eup %7249  ;;  %v12763_v15 = vld [vmem:[#allocation8_spill] sm:$0xff]  ;;  %v12764_v45 = vld [vmem:[#allocation123_spill] sm:$0xff] }
 0xc1e   : > { %12761 = vst [vmem:[#allocation115_spill] sm:$0xff] %v11087_v38  ;;  %v4410_v28 = vmul.f32 %v12764_v45, %v12763_v15 }
 0xc1f   : > { %5660 = vperm.xlu0 %7045, %v4534_v53   ;;  %v3562_v53 = vmul.f32 %v11058_v58, %v11058_v58  ;;  %v11090_v58 = vmul.f32 0.020408163, %v10816_v32  ;;  %v3557_v32 = vmul.f32 %v11087_v38, %v11087_v38  ;;  %v11122_v38 = vmul.f32 0.020408163, %v10840_v46 }
 0xc20   : > { %5625 = vperm.xlu1 %7046, %v4527_v27   ;;  %v12758_v27 = vld [vmem:[#allocation97_spill] sm:$0xff] }
 0xc21   : > { %v4401_v19 = vmul.f32 %v12759_v56, %v12758_v27  ;;  %v3690_v60 = vsub.f32 %v3434_v35, %v3562_v53  ;;  %12762 = vst [vmem:[#allocation120_spill] sm:$0xff] %v11090_v58  ;;  %v11092_v56 = vpop.xlane.xlu0 %2662  ;;  %v3939_v53 = vadd.f32 1e-05, %v3683_v16  ;;  %v4275_v16 = vld [vmem:[%s8300_s17 + $0x1b0] sm:$0xff]  ;;  %12772 = vst [vmem:[#allocation186_spill] sm:$0xff] %v11122_v38 }
 0xc23   : > { %5122 = vperm.xlu0 %7045, %v11070_v31   ;;  %v4529_v27 = vsub.f32 %v4273_v5, %v4401_v19  ;;  %v7252_v31 = vpop.eup %7251  ;;  %v3946_v35 = vadd.f32 1e-05, %v3690_v60  ;;  %v11102_v19 = vpop.xlane.xlu1 %3305  ;;  %v11104_v5 = vmul.f32 %v7250_v48, %v3814_v49  ;;  %v3685_v49 = vsub.f32 %v3429_v59, %v3557_v32  ;;  %v12770_v48 = vld [vmem:[#allocation192_spill] sm:$0xff]  ;;  %v12774_v32 = vld [vmem:[#allocation51_spill] sm:$0xff]  ;;  %v12775_v59 = vld [vmem:[#allocation125_spill] sm:$0xff] }
 0xc24   : > { %5087 = vperm.xlu1 %7046, %v11076_v34   ;;  %v11108_v60 = vmul.f32 %v7252_v31, %v3807_v51  ;;  %v11119_v31 = vmul.f32 0.020408163, %v12770_v48  ;;  %v4538_v51 = vsub.f32 %v4282_v29, %v4410_v28  ;;  %v4412_v28 = vmul.f32 %v12775_v59, %v12774_v32  ;;  %v4277_v59 = vld [vmem:[%s8300_s17 + $0x1c0] sm:$0xff] }
 0xc25   : > { %12766 = vst [vmem:[#allocation183_spill] sm:$0xff] %v11104_v5  ;;  %7257 = vrsqrt.f32 %v3946_v35  ;;  %v11115_v52 = vpop.xlane.xlu0 %3302  ;;  %v3941_v29 = vadd.f32 1e-05, %v3685_v49 }
 0xc26   : > { %12767 = vst [vmem:[#allocation97_spill] sm:$0xff] %v11108_v60  ;;  %7259 = vrsqrt.f32 %v3939_v53  ;;  %12771 = vst [vmem:[#allocation99_spill] sm:$0xff] %v11119_v31  ;;  %v3438_v53 = vmul.f32 0.020408163, %v10859_v17  ;;  %v3559_v46 = vmul.f32 %v11119_v31, %v11119_v31  ;;  %v4284_v17 = vld [vmem:[%s8300_s17 + $0x1f8] sm:$0xff]  ;;  %v3818_v31 = vld [vmem:[%s8280_s15 + $0x368] sm:$0xff] }
 0xc27   : > { %5670 = vperm.xlu0 %7045, %v4536_v54   ;;  %v3564_v54 = vmul.f32 %v11090_v58, %v11090_v58  ;;  %v7254_v58 = vpop.eup %7253  ;;  %v11125_v35 = vpop.permute.xlu1 %5017 }
 0xc28   : > { %5635 = vperm.xlu1 %7046, %v4529_v27   ;;  %v12768_v27 = vld [vmem:[#allocation101_spill] sm:$0xff]  ;;  %12773 = vst [vmem:[#allocation8_spill] sm:$0xff] %v11125_v35 }
 0xc29   : > { %v4403_v15 = vmul.f32 %v12769_v18, %v12768_v27  ;;  %v3692_v45 = vsub.f32 %v3436_v61, %v3564_v54  ;;  %v3816_v27 = vld [vmem:[%s8280_s15 + $0x358] sm:$0xff]  ;;  %v3809_v61 = vld [vmem:[%s8280_s15 + $0x320] sm:$0xff]  ;;  %v11138_v35 = vpop.permute.xlu0 %5012 }
 0xc2a   : > { %v11134_v48 = vmul.f32 %v7254_v58, %v3816_v27  ;;  %12778 = vst [vmem:[#allocation189_spill] sm:$0xff] %v11138_v35 }
 0xc2b   : > { %5132 = vperm.xlu0 %7045, %v11104_v5   ;;  %v4531_v18 = vsub.f32 %v4275_v16, %v4403_v15  ;;  %v7256_v5 = vpop.eup %7255  ;;  %v3948_v54 = vadd.f32 1e-05, %v3692_v45  ;;  %v12776_v15 = vld [vmem:[#allocation193_spill] sm:$0xff]  ;;  %v11145_v49 = vpop.xlane.xlu1 %2671 }
 0xc2c   : > { %5097 = vperm.xlu1 %7046, %v11108_v60   ;;  %v3431_v16 = vmul.f32 0.020408163, %v12776_v15  ;;  %12777 = vst [vmem:[#allocation123_spill] sm:$0xff] %v11134_v48  ;;  %v11140_v45 = vmul.f32 %v7256_v5, %v3809_v61  ;;  %v12781_v60 = vld [vmem:[#allocation108_spill] sm:$0xff]  ;;  %v12782_v15 = vld [vmem:[#allocation197_spill] sm:$0xff]  ;;  %v4540_v61 = vsub.f32 %v4284_v17, %v4412_v28 }
 0xc2d   : > { %7261 = vrsqrt.f32 %v3948_v54  ;;  %v11151_v5 = vmul.f32 0.020408163, %v12782_v15  ;;  %v3811_v54 = vld [vmem:[%s8280_s15 + $0x330] sm:$0xff]  ;;  %v12787_v17 = vld [vmem:[#allocation200_spill] sm:$0xff] }
 0xc2e   : > { %12779 = vst [vmem:[#allocation101_spill] sm:$0xff] %v11140_v45  ;;  %7263 = vrsqrt.f32 %v3941_v29  ;;  %v3687_v27 = vsub.f32 %v3431_v16, %v3559_v46  ;;  %v3440_v29 = vmul.f32 0.020408163, %v10916_v55  ;;  %v12785_v46 = vld [vmem:[#allocation55_spill] sm:$0xff]  ;;  %v3433_v15 = vmul.f32 0.020408163, %v12787_v17 }
 0xc2f   : > { %5680 = vperm.xlu0 %7045, %v4538_v51   ;;  %v3566_v51 = vmul.f32 %v11122_v38, %v11122_v38  ;;  %12783 = vst [vmem:[#allocation103_spill] sm:$0xff] %v11151_v5  ;;  %v7258_v35 = vpop.eup %7257  ;;  %v11154_v38 = vmul.f32 0.020408163, %v10898_v43  ;;  %v12786_v16 = vld [vmem:[#allocation127_spill] sm:$0xff]  ;;  %v3561_v43 = vmul.f32 %v11151_v5, %v11151_v5  ;;  %v4286_v55 = vld [vmem:[%s8300_s17 + $0x208] sm:$0xff] }
 0xc30   : > { %5645 = vperm.xlu1 %7046, %v4531_v18   ;;  %v12780_v18 = vld [vmem:[#allocation105_spill] sm:$0xff]  ;;  %v4414_v28 = vmul.f32 %v12786_v16, %v12785_v46  ;;  %v11186_v5 = vmul.f32 0.020408163, %v10953_v9 }
 0xc31   : > { %v4405_v32 = vmul.f32 %v12781_v60, %v12780_v18  ;;  %v3694_v58 = vsub.f32 %v3438_v53, %v3566_v51  ;;  %12784 = vst [vmem:[#allocation192_spill] sm:$0xff] %v11154_v38  ;;  %v11156_v60 = vpop.xlane.xlu0 %2668  ;;  %v3943_v51 = vadd.f32 1e-05, %v3687_v27  ;;  %v4279_v27 = vld [vmem:[%s8300_s17 + $0x1d0] sm:$0xff] }
 0xc32   : > { %12794 = vst [vmem:[#allocation105_spill] sm:$0xff] %v11186_v5 }
 0xc33   : > { %5142 = vperm.xlu0 %7045, %v11134_v48   ;;  %v4533_v18 = vsub.f32 %v4277_v59, %v4405_v32  ;;  %v7260_v48 = vpop.eup %7259  ;;  %v3950_v53 = vadd.f32 1e-05, %v3694_v58  ;;  %v11166_v32 = vpop.xlane.xlu1 %3311  ;;  %v11168_v59 = vmul.f32 %v7258_v35, %v3818_v31  ;;  %v3689_v31 = vsub.f32 %v3433_v15, %v3561_v43  ;;  %v12792_v35 = vld [vmem:[#allocation204_spill] sm:$0xff]  ;;  %v12797_v15 = vld [vmem:[#allocation129_spill] sm:$0xff] }
 0xc34   : > { %5107 = vperm.xlu1 %7046, %v11140_v45   ;;  %v11172_v58 = vmul.f32 %v7260_v48, %v3811_v54  ;;  %v12791_v45 = vld [vmem:[#allocation116_spill] sm:$0xff]  ;;  %v11183_v48 = vmul.f32 0.020408163, %v12792_v35  ;;  %v4542_v54 = vsub.f32 %v4286_v55, %v4414_v28  ;;  %v3570_v35 = vmul.f32 %v11186_v5, %v11186_v5 }
 0xc35   : > { %12788 = vst [vmem:[#allocation51_spill] sm:$0xff] %v11168_v59  ;;  %7265 = vrsqrt.f32 %v3950_v53  ;;  %v11179_v17 = vpop.xlane.xlu0 %3308  ;;  %v12796_v43 = vld [vmem:[#allocation60_spill] sm:$0xff]  ;;  %v3945_v55 = vadd.f32 1e-05, %v3689_v31 }
 0xc36   : > { %12789 = vst [vmem:[#allocation125_spill] sm:$0xff] %v11172_v58  ;;  %7267 = vrsqrt.f32 %v3943_v51  ;;  %12793 = vst [vmem:[#allocation193_spill] sm:$0xff] %v11183_v48  ;;  %v3442_v51 = vmul.f32 0.020408163, %v10974_v37  ;;  %v4416_v28 = vmul.f32 %v12797_v15, %v12796_v43  ;;  %v3563_v9 = vmul.f32 %v11183_v48, %v11183_v48  ;;  %v4288_v37 = vld [vmem:[%s8300_s17 + $0x218] sm:$0xff]  ;;  %v4281_v43 = vld [vmem:[%s8300_s17 + $0x1e0] sm:$0xff] }
 0xc37   : > { %5690 = vperm.xlu0 %7045, %v4540_v61   ;;  %v3568_v61 = vmul.f32 %v11154_v38, %v11154_v38  ;;  %v7262_v38 = vpop.eup %7261  ;;  %v11189_v53 = vpop.permute.xlu1 %5027  ;;  %v12805_v48 = vld [vmem:[#allocation9_spill] sm:$0xff] }
 0xc38   : > { %5655 = vperm.xlu1 %7046, %v4533_v18   ;;  %v12790_v18 = vld [vmem:[#allocation111_spill] sm:$0xff]  ;;  %12795 = vst [vmem:[#allocation108_spill] sm:$0xff] %v11189_v53 }
 0xc39   : > { %v4407_v46 = vmul.f32 %v12791_v45, %v12790_v18  ;;  %v3696_v16 = vsub.f32 %v3440_v29, %v3568_v61  ;;  %v3820_v18 = vld [vmem:[%s8280_s15 + $0x378] sm:$0xff]  ;;  %v3813_v29 = vld [vmem:[%s8280_s15 + $0x340] sm:$0xff]  ;;  %v12802_v53 = vld [vmem:[#allocation47_spill] sm:$0xff] }
 0xc3b   : > { %5152 = vperm.xlu0 %7045, %v11168_v59   ;;  %v4535_v45 = vsub.f32 %v4279_v27, %v4407_v46  ;;  %v7264_v59 = vpop.eup %7263  ;;  %v3952_v61 = vadd.f32 1e-05, %v3696_v16  ;;  %v3435_v46 = vmul.f32 0.020408163, %v10828_v63  ;;  %v11198_v27 = vmul.f32 %v7262_v38, %v3820_v18 }
 0xc3c   : > { %5117 = vperm.xlu1 %7046, %v11172_v58   ;;  %v11204_v16 = vmul.f32 %v7264_v59, %v3813_v29  ;;  %v3698_v63 = vsub.f32 %v3442_v51, %v3570_v35  ;;  %v11215_v59 = vmul.f32 0.020408163, %v10849_v14  ;;  %v4544_v29 = vsub.f32 %v4288_v37, %v4416_v28  ;;  %v3815_v35 = vld [vmem:[%s8280_s15 + $0x350] sm:$0xff] }
 0xc3d   : > { %12798 = vst [vmem:[#allocation197_spill] sm:$0xff] %v11198_v27  ;;  %7269 = vrsqrt.f32 %v3952_v61  ;;  %v3691_v18 = vsub.f32 %v3435_v46, %v3563_v9  ;;  %v3822_v61 = vld [vmem:[%s8280_s15 + $0x388] sm:$0xff]  ;;  %v3444_v28 = vmul.f32 0.020408163, %v11038_v21 }
 0xc3e   : > { %12800 = vst [vmem:[#allocation127_spill] sm:$0xff] %v11204_v16  ;;  %7271 = vrsqrt.f32 %v3945_v55  ;;  %v12804_v55 = vld [vmem:[#allocation131_spill] sm:$0xff]  ;;  %v3954_v14 = vadd.f32 1e-05, %v3698_v63  ;;  %v4290_v21 = vld [vmem:[%s8300_s17 + $0x228] sm:$0xff] }
 0xc3f   : > { %5700 = vperm.xlu0 %7045, %v4542_v54   ;;  %v11202_v54 = vpop.permute.xlu0 %5022  ;;  %v7266_v15 = vpop.eup %7265  ;;  %v3947_v37 = vadd.f32 1e-05, %v3691_v18 }
 0xc40   : > { %5665 = vperm.xlu1 %7046, %v4535_v45   ;;  %12799 = vst [vmem:[#allocation55_spill] sm:$0xff] %v11202_v54  ;;  %v12801_v45 = vld [vmem:[#allocation121_spill] sm:$0xff]  ;;  %v7268_v5 = vpop.eup %7267  ;;  %7273 = vrsqrt.f32 %v3954_v14  ;;  %v3824_v14 = vld [vmem:[%s8280_s15 + $0x398] sm:$0xff] }
 0xc41   : > { %v4409_v58 = vmul.f32 %v12802_v53, %v12801_v45  ;;  %v11218_v53 = vmul.f32 0.020408163, %v11017_v1  ;;  %v11236_v63 = vmul.f32 %v7268_v5, %v3815_v35  ;;  %7275 = vrsqrt.f32 %v3947_v37 }
 0xc42   : > { %v11247_v5 = vmul.f32 0.020408163, %v10907_v20  ;;  %v3446_v37 = vmul.f32 0.020408163, %v11102_v19  ;;  %v12810_v20 = vld [vmem:[#allocation133_spill] sm:$0xff]  ;;  %v4292_v19 = vld [vmem:[%s8300_s17 + $0x238] sm:$0xff] }
 0xc43   : > { %v2678_v31 = vpop.xlane.xlu1 %2677  ;;  %5162 = vperm.xlu0 %7045, %v11198_v27   ;;  %v11220_v45 = vpop.xlane.xlu0 %2674  ;;  %v4537_v54 = vsub.f32 %v4281_v43, %v4409_v58  ;;  %v3565_v58 = vmul.f32 %v11215_v59, %v11215_v59  ;;  %v3437_v43 = vmul.f32 0.020408163, %v10869_v12  ;;  %v12806_v27 = vld [vmem:[#allocation53_spill] sm:$0xff] }
 0xc44   : > { %v11211_v38 = vmul.f32 0.020408163, %v2678_v31  ;;  %5127 = vperm.xlu1 %7046, %v11204_v16   ;;  %v12803_v31 = vld [vmem:[#allocation64_spill] sm:$0xff]  ;;  %v4411_v16 = vmul.f32 %v12806_v27, %v12805_v48  ;;  %12807 = vst [vmem:[#allocation200_spill] sm:$0xff] %v11247_v5  ;;  %v11250_v48 = vmul.f32 0.020408163, %v11081_v57  ;;  %v3567_v57 = vmul.f32 %v11247_v5, %v11247_v5 }
 0xc45   : > { %v4418_v9 = vmul.f32 %v12804_v55, %v12803_v31  ;;  %v3572_v31 = vmul.f32 %v11218_v53, %v11218_v53 }
 0xc46   : > { %v3578_v1 = vmul.f32 %v11211_v38, %v11211_v38  ;;  %12808 = vst [vmem:[#allocation111_spill] sm:$0xff] %v11250_v48 }
 0xc47   : > { %v3318_v51 = vpop.xlane.xlu1 %3317  ;;  %5710 = vperm.xlu0 %7045, %v4544_v29   ;;  %v11232_v29 = vmul.f32 %v7266_v15, %v3822_v61  ;;  %v3700_v18 = vsub.f32 %v3444_v28, %v3572_v31  ;;  %v11243_v12 = vpop.xlane.xlu0 %3314  ;;  %v3693_v61 = vsub.f32 %v3437_v43, %v3565_v58  ;;  %v12809_v58 = vld [vmem:[#allocation68_spill] sm:$0xff]  ;;  %v3439_v31 = vmul.f32 0.020408163, %v10924_v11 }
 0xc48   : > { %v3450_v46 = vmul.f32 0.020408163, %v3318_v51  ;;  %5675 = vperm.xlu1 %7046, %v4537_v54   ;;  %v4283_v54 = vld [vmem:[%s8300_s17 + $0x1f0] sm:$0xff]  ;;  %v4546_v51 = vsub.f32 %v4290_v21, %v4418_v9  ;;  %v7270_v35 = vpop.eup %7269  ;;  %v4420_v43 = vmul.f32 %v12810_v20, %v12809_v58  ;;  %v11274_v11 = vmul.f32 0.020408163, %v10964_v7 }
 0xc49   : > { %v4539_v27 = vsub.f32 %v4283_v54, %v4411_v16  ;;  %v7272_v28 = vpop.eup %7271  ;;  %v3949_v9 = vadd.f32 1e-05, %v3693_v61  ;;  %v11260_v16 = vmul.f32 %v7270_v35, %v3824_v14 }
 0xc4a   : > { %v3706_v55 = vsub.f32 %v3450_v46, %v3578_v1  ;;  %v3817_v1 = vld [vmem:[%s8280_s15 + $0x360] sm:$0xff]  ;;  %v3956_v46 = vadd.f32 1e-05, %v3700_v18  ;;  %v12812_v18 = vld [vmem:[#allocation11_spill] sm:$0xff]  ;;  %12814 = vst [vmem:[#allocation204_spill] sm:$0xff] %v11274_v11  ;;  %v4548_v14 = vsub.f32 %v4292_v19, %v4420_v43  ;;  %v3569_v43 = vmul.f32 %v11274_v11, %v11274_v11  ;;  %v4294_v11 = vld [vmem:[%s8300_s17 + $0x248] sm:$0xff] }
 0xc4b   : > { %5172 = vperm.xlu0 %7045, %v11232_v29   ;;  %v11264_v21 = vpop.permute.xlu0 %5032  ;;  %v11266_v54 = vmul.f32 %v7272_v28, %v3817_v1  ;;  %v7274_v28 = vpop.eup %7273  ;;  %v11278_v1 = vmul.f32 0.020408163, %v11145_v49  ;;  %v3441_v49 = vmul.f32 0.020408163, %v10987_v33  ;;  %v12818_v33 = vld [vmem:[#allocation13_spill] sm:$0xff] }
 0xc4c   : > { %v3962_v15 = vadd.f32 1e-05, %v3706_v55  ;;  %5137 = vperm.xlu1 %7046, %v11236_v63   ;;  %v3574_v55 = vmul.f32 %v11250_v48, %v11250_v48  ;;  %12811 = vst [vmem:[#allocation116_spill] sm:$0xff] %v11264_v21  ;;  %v7276_v21 = vpop.eup %7275 }
 0xc4d   : > { %12815 = vst [vmem:[#allocation60_spill] sm:$0xff] %v11278_v1 }
 0xc4e   : > { %7277 = vrsqrt.f32 %v3962_v15  ;;  %v12813_v15 = vld [vmem:[#allocation57_spill] sm:$0xff]  ;;  %v3702_v35 = vsub.f32 %v3446_v37, %v3574_v55  ;;  %v12816_v37 = vld [vmem:[#allocation71_spill] sm:$0xff]  ;;  %v12817_v55 = vld [vmem:[#allocation136_spill] sm:$0xff] }
 0xc4f   : > { %5720 = vperm.xlu0 %7045, %v4546_v51   ;;  %v4413_v61 = vmul.f32 %v12813_v15, %v12812_v18  ;;  %v4285_v51 = vld [vmem:[%s8300_s17 + $0x200] sm:$0xff]  ;;  %7279 = vrsqrt.f32 %v3956_v46  ;;  %v3826_v18 = vld [vmem:[%s8280_s15 + $0x3a8] sm:$0xff]  ;;  %v3819_v46 = vld [vmem:[%s8280_s15 + $0x370] sm:$0xff]  ;;  %v4422_v48 = vmul.f32 %v12817_v55, %v12816_v37 }
 0xc50   : > { %5685 = vperm.xlu1 %7046, %v4539_v27   ;;  %7281 = vrsqrt.f32 %v3949_v9  ;;  %v3695_v27 = vsub.f32 %v3439_v31, %v3567_v57  ;;  %v3834_v15 = vld [vmem:[%s8280_s15 + $0x3e8] sm:$0xff]  ;;  %v3958_v57 = vadd.f32 1e-05, %v3702_v35  ;;  %v3448_v31 = vmul.f32 0.020408163, %v11166_v32 }
 0xc51   : > { %v4541_v58 = vsub.f32 %v4285_v51, %v4413_v61  ;;  %v11293_v51 = vmul.f32 %v7274_v28, %v3826_v18  ;;  %v11299_v37 = vmul.f32 %v7276_v21, %v3819_v46  ;;  %v12819_v35 = vld [vmem:[#allocation62_spill] sm:$0xff]  ;;  %v3697_v18 = vsub.f32 %v3441_v49, %v3569_v43 }
 0xc52   : > { %v3951_v19 = vadd.f32 1e-05, %v3695_v27  ;;  %v4415_v32 = vmul.f32 %v12819_v35, %v12818_v33  ;;  %7283 = vrsqrt.f32 %v3958_v57  ;;  %v11312_v21 = vmul.f32 0.020408163, %v11028_v10  ;;  %v12821_v57 = vld [vmem:[#allocation75_spill] sm:$0xff] }
 0xc53   : > { %5182 = vperm.xlu0 %7045, %v11260_v16   ;;  %v3953_v43 = vadd.f32 1e-05, %v3697_v18 }
 0xc54   : > { %5147 = vperm.xlu1 %7046, %v11266_v54   ;;  %7285 = vrsqrt.f32 %v3951_v19  ;;  %v3571_v10 = vmul.f32 %v11312_v21, %v11312_v21 }
 0xc56   : > { %v2681_v20 = vpop.xlane.xlu0 %2680 }
 0xc57   : > { %5730 = vperm.xlu0 %7045, %v4548_v14   ;;  %v11282_v7 = vmul.f32 0.020408163, %v2681_v20  ;;  %v3576_v20 = vmul.f32 %v11278_v1, %v11278_v1 }
 0xc58   : > { %v7278_v9 = vpop.eup %7277  ;;  %5695 = vperm.xlu1 %7046, %v4541_v58   ;;  %v4287_v58 = vld [vmem:[%s8300_s17 + $0x210] sm:$0xff] }
 0xc59   : > { %v3579_v61 = vmul.f32 %v11282_v7, %v11282_v7  ;;  %v11295_v14 = vmul.f32 %v7278_v9, %v3834_v15  ;;  %v3704_v15 = vsub.f32 %v3448_v31, %v3576_v20  ;;  %v4550_v9 = vsub.f32 %v4294_v11, %v4422_v48  ;;  %v7280_v33 = vpop.eup %7279  ;;  %v12822_v31 = vld [vmem:[#allocation138_spill] sm:$0xff] }
 0xc5a   : > { %v3321_v55 = vpop.xlane.xlu0 %3320  ;;  %v4543_v35 = vsub.f32 %v4287_v58, %v4415_v32  ;;  %v7282_v1 = vpop.eup %7281  ;;  %v4424_v19 = vmul.f32 %v12822_v31, %v12821_v57  ;;  %v3443_v48 = vmul.f32 0.020408163, %v11051_v39  ;;  %v4296_v32 = vld [vmem:[%s8300_s17 + $0x258] sm:$0xff]  ;;  %v12825_v58 = vld [vmem:[#allocation66_spill] sm:$0xff] }
 0xc5b   : > { %5192 = vperm.xlu0 %7045, %v11293_v51   ;;  %v3451_v27 = vmul.f32 0.020408163, %v3321_v55  ;;  %v11308_v28 = vmul.f32 %v11295_v14, %v11211_v38  ;;  %v3828_v55 = vld [vmem:[%s8280_s15 + $0x3b8] sm:$0xff]  ;;  %v3821_v38 = vld [vmem:[%s8280_s15 + $0x380] sm:$0xff]  ;;  %v3960_v49 = vadd.f32 1e-05, %v3704_v15 }
 0xc5c   : > { %5157 = vperm.xlu1 %7046, %v11299_v37   ;;  %v11321_v11 = vmul.f32 %v7280_v33, %v3828_v55  ;;  %v11325_v20 = vmul.f32 %v7282_v1, %v3821_v38  ;;  %v4289_v15 = vld [vmem:[%s8300_s17 + $0x220] sm:$0xff]  ;;  %v12827_v39 = vld [vmem:[#allocation36_spill] sm:$0xff]  ;;  %v3699_v1 = vsub.f32 %v3443_v48, %v3571_v10  ;;  %v4552_v33 = vsub.f32 %v4296_v32, %v4424_v19  ;;  %v3830_v31 = vld [vmem:[%s8280_s15 + $0x3c8] sm:$0xff] }
 0xc5d   : > { %12820 = vst [vmem:[#allocation129_spill] sm:$0xff] %v11308_v28  ;;  %v3707_v46 = vsub.f32 %v3451_v27, %v3579_v61  ;;  %v12824_v27 = vld [vmem:[#allocation15_spill] sm:$0xff]  ;;  %v6184_v55 = vld [vmem:[%s8531_s25 + $0x158] sm:$0xff]  ;;  %v12829_v48 = vld [vmem:[#allocation141_spill] sm:$0xff] }
 0xc5e   : > { %v4417_v18 = vmul.f32 %v12825_v58, %v12824_v27  ;;  %v12830_v32 = vld [vmem:[#allocation145_spill] sm:$0xff] }
 0xc5f   : > { %v3963_v5 = vadd.f32 1e-05, %v3707_v46  ;;  %5740 = vperm.xlu0 %7045, %v4550_v9   ;;  %v11333_v46 = vmul.f32 0.020408163, %v11092_v56  ;;  %v3823_v56 = vld [vmem:[%s8280_s15 + $0x390] sm:$0xff] }
 0xc60   : > { %5705 = vperm.xlu1 %7046, %v4543_v35   ;;  %v7284_v35 = vpop.eup %7283  ;;  %v4545_v57 = vsub.f32 %v4289_v15, %v4417_v18  ;;  %v4426_v18 = vmul.f32 %v12830_v32, %v12829_v48  ;;  %v3835_v15 = vld [vmem:[%s8280_s15 + $0x3f0] sm:$0xff]  ;;  %v6186_v48 = vld [vmem:[%s8531_s25 + $0x168] sm:$0xff] }
 0xc61   : > { %7287 = vrsqrt.f32 %v3963_v5  ;;  %12826 = vst [vmem:[#allocation47_spill] sm:$0xff] %v11333_v46  ;;  %v12828_v5 = vld [vmem:[#allocation142_spill] sm:$0xff]  ;;  %v7286_v27 = vpop.eup %7285  ;;  %v11344_v10 = vmul.f32 %v7284_v35, %v3830_v31  ;;  %v4291_v35 = vld [vmem:[%s8300_s17 + $0x230] sm:$0xff] }
 0xc62   : > { %v11323_v61 = vpop.permute.xlu0 %5042  ;;  %7289 = vrsqrt.f32 %v3960_v49  ;;  %v5288_v9 = vmul.f32 %v12828_v5, %v12827_v39  ;;  %v3573_v49 = vmul.f32 %v11333_v46, %v11333_v46  ;;  %v3445_v39 = vmul.f32 0.020408163, %v11115_v52  ;;  %v12834_v31 = vld [vmem:[#allocation38_spill] sm:$0xff]  ;;  %v4304_v46 = vld [vmem:[%s8300_s17 + $0x298] sm:$0xff] }
 0xc63   : > { %12823 = vst [vmem:[#allocation121_spill] sm:$0xff] %v11323_v61  ;;  %5202 = vperm.xlu0 %7045, %v11321_v11   ;;  %7291 = vrsqrt.f32 %v3953_v43  ;;  %v3955_v43 = vadd.f32 1e-05, %v3699_v1  ;;  %v12833_v61 = vld [vmem:[#allocation70_spill] sm:$0xff] }
 0xc64   : > { %5167 = vperm.xlu1 %7046, %v11325_v20  }
 0xc65   : > { %7293 = vrsqrt.f32 %v3955_v43  ;;  %v3825_v43 = vld [vmem:[%s8280_s15 + $0x3a0] sm:$0xff] }
 0xc66   : > { %v5591_v38 = vpop.permute.xlu0 %5590 }
 0xc67   : > { %v6056_v58 = vadd.f32 %v5591_v38, %v5288_v9  ;;  %5750 = vperm.xlu0 %7045, %v4552_v33   ;;  %v11351_v9 = vmul.f32 %v7286_v27, %v3823_v56  ;;  %v4298_v33 = vld [vmem:[%s8300_s17 + $0x268] sm:$0xff]  ;;  %v12832_v38 = vld [vmem:[#allocation17_spill] sm:$0xff]  ;;  %v11364_v56 = vmul.f32 0.020408163, %v11156_v60 }
 0xc68   : > { %5715 = vperm.xlu1 %7046, %v4545_v57   ;;  %v4419_v28 = vmul.f32 %v12833_v61, %v12832_v38  ;;  %v12835_v27 = vld [vmem:[#allocation149_spill] sm:$0xff]  ;;  %v4554_v61 = vsub.f32 %v4298_v33, %v4426_v18 }
 0xc69   : > { %v6312_v19 = vadd.f32 %v6184_v55, %v6056_v58  ;;  %v3701_v55 = vsub.f32 %v3445_v39, %v3573_v49  ;;  %v5290_v58 = vmul.f32 %v12835_v27, %v12834_v31  ;;  %12836 = vst [vmem:[#allocation131_spill] sm:$0xff] %v11364_v56  ;;  %v3832_v39 = vld [vmem:[%s8280_s15 + $0x3d8] sm:$0xff]  ;;  %v3575_v33 = vmul.f32 %v11364_v56, %v11364_v56 }
 0xc6a   : > { %v11349_v5 = vpop.permute.xlu0 %5052  ;;  %v4547_v49 = vsub.f32 %v4291_v35, %v4419_v28  ;;  %v12838_v31 = vld [vmem:[#allocation148_spill] sm:$0xff]  ;;  %v3447_v28 = vmul.f32 0.020408163, %v11179_v17 }
 0xc6b   : > { %12831 = vst [vmem:[#allocation64_spill] sm:$0xff] %v11349_v5  ;;  %v7288_v52 = vpop.eup %7287  ;;  %v6440_v1 = vmax.f32 %v6312_v19, 0.0  ;;  %5212 = vperm.xlu0 %7045, %v11344_v10   ;;  %v3957_v60 = vadd.f32 1e-05, %v3701_v55  ;;  %v4300_v27 = vld [vmem:[%s8300_s17 + $0x278] sm:$0xff]  ;;  %v12841_v55 = vld [vmem:[#allocation134_spill] sm:$0xff] }
 0xc6c   : > { %5177 = vperm.xlu1 %7046, %v11351_v9   ;;  %v11359_v57 = vmul.f32 %v7288_v52, %v3835_v15  ;;  %v7290_v19 = vpop.eup %7289 }
 0xc6d   : > { %6568 = vst.msk [vmem:[%s8543_s30 + $0x158] sm:$0xff] %vm2300_vm0, %v6440_v1  ;;  %v7292_v38 = vpop.eup %7291  ;;  %v12839_v1 = vld [vmem:[#allocation152_spill] sm:$0xff]  ;;  %7295 = vrsqrt.f32 %v3957_v60 }
 0xc6e   : > { %v5601_v32 = vpop.permute.xlu0 %5600  ;;  %v11372_v15 = vmul.f32 %v11359_v57, %v11282_v7  ;;  %v4428_v18 = vmul.f32 %v12839_v1, %v12838_v31  ;;  %v11380_v7 = vmul.f32 %v7290_v19, %v3832_v39  ;;  %v4293_v31 = vld [vmem:[%s8300_s17 + $0x240] sm:$0xff]  ;;  %v3703_v39 = vsub.f32 %v3447_v28, %v3575_v33  ;;  %v12848_v60 = vld [vmem:[#allocation160_spill] sm:$0xff] }
 0xc6f   : > { %v6058_v52 = vadd.f32 %v5601_v32, %v5290_v58  ;;  %5760 = vperm.xlu0 %7045, %v4554_v61   ;;  %v11385_v61 = vmul.f32 %v7292_v38, %v3825_v43  ;;  %v12842_v32 = vld [vmem:[#allocation72_spill] sm:$0xff]  ;;  %v11395_v1 = vmul.f32 0.020408163, %v11220_v45 }
 0xc70   : > { %12837 = vst [vmem:[#allocation9_spill] sm:$0xff] %v11372_v15  ;;  %5725 = vperm.xlu1 %7046, %v4547_v49   ;;  %v4421_v49 = vmul.f32 %v12842_v32, %v12841_v55  ;;  %v4556_v17 = vsub.f32 %v4300_v27, %v4428_v18  ;;  %v6188_v38 = vld [vmem:[%s8531_s25 + $0x178] sm:$0xff]  ;;  %v7294_v55 = vpop.eup %7293  ;;  %v11401_v18 = vpop.permute.xlu1 %5037  ;;  %v12847_v27 = vld [vmem:[#allocation155_spill] sm:$0xff]  ;;  %v3959_v28 = vadd.f32 1e-05, %v3703_v39 }
 0xc71   : > { %v6314_v35 = vadd.f32 %v6186_v48, %v6058_v52  ;;  %v12843_v48 = vld [vmem:[#allocation48_spill] sm:$0xff]  ;;  %12845 = vst [vmem:[#allocation68_spill] sm:$0xff] %v11395_v1  ;;  %12846 = vst [vmem:[#allocation133_spill] sm:$0xff] %v11401_v18  ;;  %v4430_v33 = vmul.f32 %v12848_v60, %v12847_v27  ;;  %v3577_v45 = vmul.f32 %v11395_v1, %v11395_v1  ;;  %v4295_v39 = vld [vmem:[%s8300_s17 + $0x250] sm:$0xff] }
 0xc72   : > { %v11383_v58 = vpop.permute.xlu0 %5062  ;;  %v12844_v52 = vld [vmem:[#allocation156_spill] sm:$0xff]  ;;  %7297 = vrsqrt.f32 %v3959_v28 }
 0xc73   : > { %12840 = vst [vmem:[#allocation53_spill] sm:$0xff] %v11383_v58  ;;  %v6442_v5 = vmax.f32 %v6314_v35, 0.0  ;;  %5222 = vperm.xlu0 %7045, %v11380_v7   ;;  %v5292_v19 = vmul.f32 %v12844_v52, %v12843_v48  ;;  %v4549_v35 = vsub.f32 %v4293_v31, %v4421_v49  ;;  %v3827_v58 = vld [vmem:[%s8280_s15 + $0x3b0] sm:$0xff]  ;;  %v4302_v49 = vld [vmem:[%s8300_s17 + $0x288] sm:$0xff] }
 0xc74   : > { %5187 = vperm.xlu1 %7046, %v11385_v61   ;;  %v12850_v52 = vld [vmem:[#allocation74_spill] sm:$0xff]  ;;  %v4558_v60 = vsub.f32 %v4302_v49, %v4430_v33 }
 0xc75   : > { %6570 = vst.msk [vmem:[%s8543_s30 + $0x168] sm:$0xff] %vm2300_vm0, %v6442_v5  ;;  %v3449_v5 = vmul.f32 0.020408163, %v11243_v12  ;;  %v12852_v12 = vld [vmem:[#allocation78_spill] sm:$0xff] }
 0xc76   : > { %v5611_v43 = vpop.permute.xlu0 %5610 }
 0xc77   : > { %v6060_v32 = vadd.f32 %v5611_v43, %v5292_v19  ;;  %5770 = vperm.xlu0 %7045, %v4556_v17   ;;  %v11411_v17 = vmul.f32 %v7294_v55, %v3827_v58  ;;  %v12851_v19 = vld [vmem:[#allocation76_spill] sm:$0xff]  ;;  %v3705_v18 = vsub.f32 %v3449_v5, %v3577_v45  ;;  %v6190_v55 = vld [vmem:[%s8531_s25 + $0x188] sm:$0xff] }
 0xc78   : > { %5735 = vperm.xlu1 %7046, %v4549_v35   ;;  %v4423_v43 = vmul.f32 %v12851_v19, %v12850_v52 }
 0xc79   : > { %v6316_v48 = vadd.f32 %v6188_v38, %v6060_v32  ;;  %v12853_v38 = vld [vmem:[#allocation159_spill] sm:$0xff]  ;;  %v3961_v49 = vadd.f32 1e-05, %v3705_v18 }
 0xc7a   : > { %v11409_v31 = vpop.permute.xlu0 %5072  ;;  %v5294_v32 = vmul.f32 %v12853_v38, %v12852_v12 }
 0xc7b   : > { %12849 = vst [vmem:[#allocation11_spill] sm:$0xff] %v11409_v31  ;;  %v6444_v35 = vmax.f32 %v6316_v48, 0.0  ;;  %5232 = vperm.xlu0 %7045, %v11295_v14   ;;  %v4551_v48 = vsub.f32 %v4295_v39, %v4423_v43  ;;  %v7296_v14 = vpop.eup %7295  ;;  %v3829_v31 = vld [vmem:[%s8280_s15 + $0x3c0] sm:$0xff]  ;;  %v12856_v43 = vld [vmem:[#allocation139_spill] sm:$0xff]  ;;  %7299 = vrsqrt.f32 %v3961_v49 }
 0xc7c   : > { %5197 = vperm.xlu1 %7046, %v11411_v17   ;;  %v2684_v27 = vpop.xlane.xlu1 %2683  ;;  %v12857_v39 = vld [vmem:[#allocation143_spill] sm:$0xff] }
 0xc7d   : > { %6572 = vst.msk [vmem:[%s8543_s30 + $0x178] sm:$0xff] %vm2300_vm0, %v6444_v35  ;;  %v11422_v58 = vmul.f32 0.020408163, %v2684_v27  ;;  %v11430_v27 = vmul.f32 %v7296_v14, %v3829_v31  ;;  %v4425_v12 = vmul.f32 %v12857_v39, %v12856_v43  ;;  %v6192_v14 = vld [vmem:[%s8531_s25 + $0x198] sm:$0xff]  ;;  %v12861_v43 = vld [vmem:[#allocation37_spill] sm:$0xff] }
 0xc7e   : > { %v5621_v52 = vpop.permute.xlu0 %5620 }
 0xc7f   : > { %v6062_v19 = vadd.f32 %v5621_v52, %v5294_v32  ;;  %5780 = vperm.xlu0 %7045, %v4558_v60   ;;  %v3580_v28 = vmul.f32 %v11422_v58, %v11422_v58  ;;  %12855 = vst [vmem:[#allocation71_spill] sm:$0xff] %v11430_v27  ;;  %v4297_v32 = vld [vmem:[%s8300_s17 + $0x260] sm:$0xff]  ;;  %v12859_v52 = vld [vmem:[#allocation86_spill] sm:$0xff] }
 0xc80   : > { %5745 = vperm.xlu1 %7046, %v4551_v48   ;;  %v3324_v33 = vpop.xlane.xlu1 %3323  ;;  %v12860_v48 = vld [vmem:[#allocation162_spill] sm:$0xff] }
 0xc81   : > { %v6318_v45 = vadd.f32 %v6190_v55, %v6062_v19  ;;  %v3452_v5 = vmul.f32 0.020408163, %v3324_v33  ;;  %v5296_v55 = vmul.f32 %v12860_v48, %v12859_v52  ;;  %v4553_v33 = vsub.f32 %v4297_v32, %v4425_v12  ;;  %v12865_v12 = vld [vmem:[#allocation146_spill] sm:$0xff] }
 0xc82   : > { %v11428_v35 = vpop.permute.xlu0 %5082  ;;  %v12866_v32 = vld [vmem:[#allocation150_spill] sm:$0xff] }
 0xc83   : > { %12854 = vst [vmem:[#allocation57_spill] sm:$0xff] %v11428_v35  ;;  %v6446_v38 = vmax.f32 %v6318_v45, 0.0  ;;  %v3708_v60 = vsub.f32 %v3452_v5, %v3580_v28  ;;  %v7298_v45 = vpop.eup %7297  ;;  %v12862_v28 = vld [vmem:[#allocation107_spill] sm:$0xff]  ;;  %v4427_v15 = vmul.f32 %v12866_v32, %v12865_v12 }
 0xc84   : > { %5207 = vperm.xlu1 %7046, %v11430_v27   ;;  %v11436_v18 = vpop.permute.xlu1 %5047  ;;  %v5289_v5 = vmul.f32 %v12862_v28, %v12861_v43  ;;  %v3831_v35 = vld [vmem:[%s8280_s15 + $0x3d0] sm:$0xff]  ;;  %v4301_v27 = vld [vmem:[%s8300_s17 + $0x280] sm:$0xff] }
 0xc85   : > { %12858 = vst [vmem:[#allocation136_spill] sm:$0xff] %v11436_v18  ;;  %6574 = vst.msk [vmem:[%s8543_s30 + $0x188] sm:$0xff] %vm2300_vm0, %v6446_v38  ;;  %v3964_v31 = vadd.f32 1e-05, %v3708_v60  ;;  %v6185_v18 = vld [vmem:[%s8531_s25 + $0x160] sm:$0xff]  ;;  %v11449_v60 = vmul.f32 %v7298_v45, %v3831_v35  ;;  %v6194_v45 = vld [vmem:[%s8531_s25 + $0x1a8] sm:$0xff] }
 0xc86   : > { %v5631_v19 = vpop.permute.xlu0 %5630  ;;  %v12870_v12 = vld [vmem:[#allocation39_spill] sm:$0xff] }
 0xc87   : > { %7301 = vrsqrt.f32 %v3964_v31  ;;  %v6064_v39 = vadd.f32 %v5631_v19, %v5296_v55  ;;  %12864 = vst [vmem:[#allocation62_spill] sm:$0xff] %v11449_v60  ;;  %v4299_v31 = vld [vmem:[%s8300_s17 + $0x270] sm:$0xff] }
 0xc88   : > { %5755 = vperm.xlu1 %7046, %v4553_v33   ;;  %v5596_v52 = vpop.permute.xlu1 %5595  ;;  %v12869_v33 = vld [vmem:[#allocation165_spill] sm:$0xff] }
 0xc89   : > { %v6320_v49 = vadd.f32 %v6192_v14, %v6064_v39  ;;  %v6057_v48 = vadd.f32 %v5596_v52, %v5289_v5  ;;  %v12868_v14 = vld [vmem:[#allocation88_spill] sm:$0xff]  ;;  %v4555_v39 = vsub.f32 %v4299_v31, %v4427_v15  ;;  %v7300_v52 = vpop.eup %7299 }
 0xc8a   : > { %v11447_v38 = vpop.permute.xlu0 %5092  ;;  %v5298_v28 = vmul.f32 %v12869_v33, %v12868_v14 }
 0xc8b   : > { %12863 = vst [vmem:[#allocation13_spill] sm:$0xff] %v11447_v38  ;;  %v6448_v43 = vmax.f32 %v6320_v49, 0.0  ;;  %v6313_v55 = vadd.f32 %v6185_v18, %v6057_v48  ;;  %v12871_v49 = vld [vmem:[#allocation109_spill] sm:$0xff]  ;;  %v3836_v38 = vld [vmem:[%s8280_s15 + $0x3f8] sm:$0xff] }
 0xc8c   : > { %5217 = vperm.xlu1 %7046, %v11449_v60   ;;  %v11455_v19 = vpop.permute.xlu1 %5057  ;;  %v5291_v32 = vmul.f32 %v12871_v49, %v12870_v12  ;;  %v3833_v48 = vld [vmem:[%s8280_s15 + $0x3e0] sm:$0xff]  ;;  %v12876_v49 = vld [vmem:[#allocation172_spill] sm:$0xff] }
 0xc8d   : > { %12867 = vst [vmem:[#allocation75_spill] sm:$0xff] %v11455_v19  ;;  %6576 = vst.msk [vmem:[%s8543_s30 + $0x198] sm:$0xff] %vm2300_vm0, %v6448_v43  ;;  %v6441_v35 = vmax.f32 %v6313_v55, 0.0  ;;  %v6187_v19 = vld [vmem:[%s8531_s25 + $0x170] sm:$0xff]  ;;  %v11471_v15 = vmul.f32 %v7300_v52, %v3833_v48  ;;  %v12873_v12 = vld [vmem:[#allocation153_spill] sm:$0xff] }
 0xc8e   : > { %v5641_v5 = vpop.permute.xlu0 %5640  ;;  %v12877_v52 = vld [vmem:[#allocation90_spill] sm:$0xff] }
 0xc8f   : > { %6569 = vst.msk [vmem:[%s8543_s30 + $0x160] sm:$0xff] %vm2300_vm0, %v6441_v35  ;;  %v6066_v18 = vadd.f32 %v5641_v5, %v5298_v28  ;;  %v12874_v35 = vld [vmem:[#allocation157_spill] sm:$0xff]  ;;  %v12875_v5 = vld [vmem:[#allocation166_spill] sm:$0xff] }
 0xc90   : > { %5765 = vperm.xlu1 %7046, %v4555_v39   ;;  %v5606_v14 = vpop.permute.xlu1 %5605  ;;  %v4429_v28 = vmul.f32 %v12874_v35, %v12873_v12  ;;  %v4432_v60 = vmul.f32 %v12876_v49, %v12875_v5  ;;  %v12880_v12 = vld [vmem:[#allocation187_spill] sm:$0xff]  ;;  %v12882_v49 = vld [vmem:[#allocation112_spill] sm:$0xff] }
 0xc91   : > { %v7302_v33 = vpop.eup %7301  ;;  %v6322_v43 = vadd.f32 %v6194_v45, %v6066_v18  ;;  %v6059_v55 = vadd.f32 %v5606_v14, %v5291_v32  ;;  %v12878_v32 = vld [vmem:[#allocation169_spill] sm:$0xff]  ;;  %v12881_v5 = vld [vmem:[#allocation59_spill] sm:$0xff] }
 0xc92   : > { %v11469_v1 = vpop.permute.xlu0 %5102  ;;  %v4220_v31 = vmul.f32 %v7302_v33, %v3836_v38  ;;  %v5300_v18 = vmul.f32 %v12878_v32, %v12877_v52  ;;  %v4557_v33 = vsub.f32 %v4301_v27, %v4429_v28  ;;  %v12883_v28 = vld [vmem:[#allocation161_spill] sm:$0xff]  ;;  %v12884_v32 = vld [vmem:[#allocation167_spill] sm:$0xff] }
 0xc93   : > { %12872 = vst [vmem:[#allocation138_spill] sm:$0xff] %v11469_v1  ;;  %v6450_v56 = vmax.f32 %v6322_v43, 0.0  ;;  %v6315_v39 = vadd.f32 %v6187_v19, %v6059_v55  ;;  %v6196_v19 = vld [vmem:[%s8531_s25 + $0x1b8] sm:$0xff]  ;;  %v4560_v43 = vsub.f32 %v4304_v46, %v4432_v60  ;;  %v12879_v55 = vld [vmem:[#allocation178_spill] sm:$0xff]  ;;  %v5293_v1 = vmul.f32 %v12882_v49, %v12881_v5 }
 0xc94   : > { %5227 = vperm.xlu1 %7046, %v11471_v15   ;;  %5242 = vperm.xlu0 %7045, %v4220_v31   ;;  %v11480_v45 = vpop.permute.xlu1 %5067  ;;  %v11483_v38 = vmul.f32 %v4220_v31, %v11422_v58  ;;  %v4434_v35 = vmul.f32 %v12880_v12, %v12879_v55  ;;  %v4306_v31 = vld [vmem:[%s8300_s17 + $0x2a8] sm:$0xff]  ;;  %v4431_v55 = vmul.f32 %v12884_v32, %v12883_v28  ;;  %v12885_v12 = vld [vmem:[#allocation196_spill] sm:$0xff]  ;;  %v12890_v28 = vld [vmem:[#allocation201_spill] sm:$0xff] }
 0xc95   : > { %6578 = vst.msk [vmem:[%s8543_s30 + $0x1a8] sm:$0xff] %vm2300_vm0, %v6450_v56  ;;  %v6443_v48 = vmax.f32 %v6315_v39, 0.0  ;;  %v6189_v56 = vld [vmem:[%s8531_s25 + $0x180] sm:$0xff]  ;;  %v12892_v32 = vld [vmem:[#allocation114_spill] sm:$0xff] }
 0xc96   : > { %v5651_v14 = vpop.permute.xlu0 %5650  ;;  %v4562_v60 = vsub.f32 %v4306_v31, %v4434_v35 }
 0xc97   : > { %6571 = vst.msk [vmem:[%s8543_s30 + $0x170] sm:$0xff] %vm2300_vm0, %v6443_v48  ;;  %v6068_v58 = vadd.f32 %v5651_v14, %v5300_v18  ;;  %v4436_v48 = vmul.f32 %v10833_v26, %v12885_v12  ;;  %v4303_v14 = vld [vmem:[%s8300_s17 + $0x290] sm:$0xff]  ;;  %v6198_v26 = vld [vmem:[%s8531_s25 + $0x1c8] sm:$0xff] }
 0xc98   : > { %5775 = vperm.xlu1 %7046, %v4557_v33   ;;  %5790 = vperm.xlu0 %7045, %v4560_v43   ;;  %v5616_v39 = vpop.permute.xlu1 %5615  ;;  %v4308_v33 = vld [vmem:[%s8300_s17 + $0x2b8] sm:$0xff]  ;;  %v12887_v43 = vld [vmem:[#allocation173_spill] sm:$0xff]  ;;  %v4559_v31 = vsub.f32 %v4303_v14, %v4431_v55  ;;  %v6191_v55 = vld [vmem:[%s8531_s25 + $0x190] sm:$0xff] }
 0xc99   : > { %v6324_v52 = vadd.f32 %v6196_v19, %v6068_v58  ;;  %v6061_v46 = vadd.f32 %v5616_v39, %v5293_v1  ;;  %v12886_v19 = vld [vmem:[#allocation92_spill] sm:$0xff]  ;;  %v12888_v39 = vld [vmem:[#allocation174_spill] sm:$0xff] }
 0xc9a   : > { %v11498_v27 = vpop.permute.xlu0 %5112  ;;  %v5302_v35 = vmul.f32 %v12887_v43, %v12886_v19  ;;  %v4305_v43 = vld [vmem:[%s8300_s17 + $0x2a0] sm:$0xff] }
 0xc9b   : > { %v6452_v5 = vmax.f32 %v6324_v52, 0.0  ;;  %v6317_v18 = vadd.f32 %v6189_v56, %v6061_v46  ;;  %v4564_v56 = vsub.f32 %v4308_v33, %v4436_v48  ;;  %v12889_v52 = vld [vmem:[#allocation180_spill] sm:$0xff] }
 0xc9c   : > { %5237 = vperm.xlu1 %7046, %v11359_v57   ;;  %5800 = vperm.xlu0 %7045, %v4562_v60   ;;  %v11507_v1 = vpop.permute.xlu1 %5077  ;;  %v4433_v46 = vmul.f32 %v12889_v52, %v12888_v39  ;;  %v4438_v57 = vmul.f32 %v10861_v44, %v12890_v28  ;;  %v12891_v60 = vld [vmem:[#allocation85_spill] sm:$0xff]  ;;  %v12893_v52 = vld [vmem:[#allocation188_spill] sm:$0xff]  ;;  %v12894_v28 = vld [vmem:[#allocation199_spill] sm:$0xff] }
 0xc9d   : > { %6580 = vst.msk [vmem:[%s8543_s30 + $0x1b8] sm:$0xff] %vm2300_vm0, %v6452_v5  ;;  %v6445_v49 = vmax.f32 %v6317_v18, 0.0  ;;  %v5295_v12 = vmul.f32 %v12892_v32, %v12891_v60  ;;  %v4310_v5 = vld [vmem:[%s8300_s17 + $0x2c8] sm:$0xff] }
 0xc9e   : > { %v5661_v58 = vpop.permute.xlu0 %5660  ;;  %v4561_v44 = vsub.f32 %v4305_v43, %v4433_v46  ;;  %v4566_v39 = vsub.f32 %v4310_v5, %v4438_v57  ;;  %v12895_v32 = vld [vmem:[#allocation94_spill] sm:$0xff]  ;;  %v12896_v46 = vld [vmem:[#allocation176_spill] sm:$0xff]  ;;  %v4437_v5 = vmul.f32 %v10948_v4, %v10844_v30 }
 0xc9f   : > { %6573 = vst.msk [vmem:[%s8543_s30 + $0x180] sm:$0xff] %vm2300_vm0, %v6445_v49  ;;  %v6070_v19 = vadd.f32 %v5661_v58, %v5302_v35  ;;  %v4435_v49 = vmul.f32 %v12894_v28, %v12893_v52  ;;  %v4440_v35 = vmul.f32 %v10890_v23, %v10819_v25  ;;  %v5304_v57 = vmul.f32 %v12896_v46, %v12895_v32  ;;  %v4309_v52 = vld [vmem:[%s8300_s17 + $0x2c0] sm:$0xff]  ;;  %v4314_v28 = vld [vmem:[%s8300_s17 + $0x2e8] sm:$0xff] }
 0xca0   : > { %5785 = vperm.xlu1 %7046, %v4559_v31   ;;  %5810 = vperm.xlu0 %7045, %v4564_v56   ;;  %v5626_v48 = vpop.permute.xlu1 %5625  ;;  %v4307_v31 = vld [vmem:[%s8300_s17 + $0x2b0] sm:$0xff]  ;;  %v4312_v56 = vld [vmem:[%s8300_s17 + $0x2d8] sm:$0xff] }
 0xca1   : > { %v6326_v18 = vadd.f32 %v6198_v26, %v6070_v19  ;;  %v6063_v14 = vadd.f32 %v5626_v48, %v5295_v12  ;;  %v6200_v19 = vld [vmem:[%s8531_s25 + $0x1d8] sm:$0xff]  ;;  %v4563_v23 = vsub.f32 %v4307_v31, %v4435_v49  ;;  %v4568_v43 = vsub.f32 %v4312_v56, %v4440_v35  ;;  %v6193_v49 = vld [vmem:[%s8531_s25 + $0x1a0] sm:$0xff]  ;;  %v12900_v56 = vld [vmem:[#allocation206_spill] sm:$0xff] }
 0xca2   : > { %v11525_v33 = vpop.permute.xlu0 %5122  ;;  %v4439_v31 = vmul.f32 %v10980_v8, %v10874_v3  ;;  %v4444_v32 = vmul.f32 %v10942_v40, %v12900_v56  ;;  %v6202_v8 = vld [vmem:[%s8531_s25 + $0x1e8] sm:$0xff] }
 0xca3   : > { %v6454_v58 = vmax.f32 %v6326_v18, 0.0  ;;  %v6319_v60 = vadd.f32 %v6191_v55, %v6063_v14  ;;  %v12897_v55 = vld [vmem:[#allocation118_spill] sm:$0xff]  ;;  %v12898_v18 = vld [vmem:[#allocation87_spill] sm:$0xff]  ;;  %v12899_v14 = vld [vmem:[#allocation117_spill] sm:$0xff] }
 0xca4   : > { %5795 = vperm.xlu1 %7046, %v4561_v44   ;;  %5820 = vperm.xlu0 %7045, %v4566_v39   ;;  %v11533_v26 = vpop.permute.xlu1 %5087  ;;  %v4442_v48 = vmul.f32 %v10918_v24, %v12897_v55  ;;  %v5297_v44 = vmul.f32 %v12899_v14, %v12898_v18  ;;  %v4565_v24 = vsub.f32 %v4309_v52, %v4437_v5 }
 0xca5   : > { %6582 = vst.msk [vmem:[%s8543_s30 + $0x1c8] sm:$0xff] %vm2300_vm0, %v6454_v58  ;;  %v6447_v12 = vmax.f32 %v6319_v60, 0.0  ;;  %v4441_v18 = vmul.f32 %v11012_v42, %v10902_v2  ;;  %v4446_v14 = vmul.f32 %v10976_v62, %v10877_v13 }
 0xca6   : > { %v5671_v25 = vpop.permute.xlu0 %5670  ;;  %v4570_v60 = vsub.f32 %v4314_v28, %v4442_v48 }
 0xca7   : > { %6575 = vst.msk [vmem:[%s8543_s30 + $0x190] sm:$0xff] %vm2300_vm0, %v6447_v12  ;;  %v6072_v39 = vadd.f32 %v5671_v25, %v5304_v57  ;;  %v4311_v12 = vld [vmem:[%s8300_s17 + $0x2d0] sm:$0xff]  ;;  %v4316_v25 = vld [vmem:[%s8300_s17 + $0x2f8] sm:$0xff] }
 0xca8   : > { %5805 = vperm.xlu1 %7046, %v4563_v23   ;;  %5830 = vperm.xlu0 %7045, %v4568_v43   ;;  %v5636_v35 = vpop.permute.xlu1 %5635  ;;  %v12901_v23 = vld [vmem:[#allocation96_spill] sm:$0xff]  ;;  %v12902_v43 = vld [vmem:[#allocation181_spill] sm:$0xff]  ;;  %v4567_v55 = vsub.f32 %v4311_v12, %v4439_v31  ;;  %v4572_v48 = vsub.f32 %v4316_v25, %v4444_v32  ;;  %v4448_v31 = vmul.f32 %v11006_v47, %v10905_v6 }
 0xca9   : > { %v6328_v58 = vadd.f32 %v6200_v19, %v6072_v39  ;;  %v6065_v30 = vadd.f32 %v5636_v35, %v5297_v44  ;;  %v5306_v5 = vmul.f32 %v12902_v43, %v12901_v23  ;;  %v12903_v44 = vld [vmem:[#allocation89_spill] sm:$0xff]  ;;  %v12904_v39 = vld [vmem:[#allocation164_spill] sm:$0xff]  ;;  %v4318_v35 = vld [vmem:[%s8300_s17 + $0x308] sm:$0xff] }
 0xcaa   : > { %v11551_v4 = vpop.permute.xlu0 %5132  ;;  %v5299_v52 = vmul.f32 %v12904_v39, %v12903_v44  ;;  %v4574_v62 = vsub.f32 %v4318_v35, %v4446_v14  ;;  %v12905_v25 = vld [vmem:[#allocation41_spill] sm:$0xff]  ;;  %v4322_v39 = vld [vmem:[%s8300_s17 + $0x328] sm:$0xff] }
 0xcab   : > { %v6456_v46 = vmax.f32 %v6328_v58, 0.0  ;;  %v6321_v57 = vadd.f32 %v6193_v49, %v6065_v30  ;;  %v4313_v49 = vld [vmem:[%s8300_s17 + $0x2e0] sm:$0xff]  ;;  %v6195_v58 = vld [vmem:[%s8531_s25 + $0x1b0] sm:$0xff] }
 0xcac   : > { %5815 = vperm.xlu1 %7046, %v4565_v24   ;;  %5840 = vperm.xlu0 %7045, %v4570_v60   ;;  %v11559_v19 = vpop.permute.xlu1 %5097  ;;  %v4569_v13 = vsub.f32 %v4313_v49, %v4441_v18  ;;  %v4443_v60 = vmul.f32 %v11044_v50, %v10927_v36  ;;  %v12906_v23 = vld [vmem:[#allocation185_spill] sm:$0xff]  ;;  %v6204_v50 = vld [vmem:[%s8531_s25 + $0x1f8] sm:$0xff] }
 0xcad   : > { %6584 = vst.msk [vmem:[%s8543_s30 + $0x1d8] sm:$0xff] %vm2300_vm0, %v6456_v46  ;;  %v6449_v3 = vmax.f32 %v6321_v57, 0.0  ;;  %v4315_v46 = vld [vmem:[%s8300_s17 + $0x2f0] sm:$0xff]  ;;  %v4320_v57 = vld [vmem:[%s8300_s17 + $0x318] sm:$0xff]  ;;  %v5308_v43 = vmul.f32 %v12906_v23, %v12905_v25  ;;  %v4317_v44 = vld [vmem:[%s8300_s17 + $0x300] sm:$0xff] }
 0xcae   : > { %v5681_v40 = vpop.permute.xlu0 %5680  ;;  %v4571_v47 = vsub.f32 %v4315_v46, %v4443_v60  ;;  %v12913_v46 = vld [vmem:[#allocation44_spill] sm:$0xff]  ;;  %v6206_v23 = vld [vmem:[%s8531_s25 + $0x208] sm:$0xff] }
 0xcaf   : > { %6577 = vst.msk [vmem:[%s8543_s30 + $0x1a0] sm:$0xff] %vm2300_vm0, %v6449_v3  ;;  %v6074_v28 = vadd.f32 %v5681_v40, %v5306_v5  ;;  %v4576_v5 = vsub.f32 %v4320_v57, %v4448_v31  ;;  %v4445_v3 = vmul.f32 %v11076_v34, %v10959_v22  ;;  %v4319_v31 = vld [vmem:[%s8300_s17 + $0x310] sm:$0xff] }
 0xcb0   : > { %5825 = vperm.xlu1 %7046, %v4567_v55   ;;  %5850 = vperm.xlu0 %7045, %v4572_v48   ;;  %v5646_v30 = vpop.permute.xlu1 %5645  ;;  %v12908_v55 = vld [vmem:[#allocation91_spill] sm:$0xff]  ;;  %v12909_v48 = vld [vmem:[#allocation168_spill] sm:$0xff] }
 0xcb1   : > { %v6330_v24 = vadd.f32 %v6202_v8, %v6074_v28  ;;  %v6067_v2 = vadd.f32 %v5646_v30, %v5299_v52  ;;  %v12907_v8 = vld [vmem:[#allocation208_spill] sm:$0xff]  ;;  %v5301_v18 = vmul.f32 %v12909_v48, %v12908_v55  ;;  %v6197_v52 = vld [vmem:[%s8531_s25 + $0x1c0] sm:$0xff]  ;;  %v12914_v57 = vld [vmem:[#allocation191_spill] sm:$0xff] }
 0xcb2   : > { %v11577_v42 = vpop.permute.xlu0 %5142  ;;  %v4450_v40 = vmul.f32 %v11040_v41, %v12907_v8  ;;  %v4573_v41 = vsub.f32 %v4317_v44, %v4445_v3  ;;  %v5310_v25 = vmul.f32 %v12914_v57, %v12913_v46  ;;  %v12917_v3 = vld [vmem:[#allocation29_spill] sm:$0xff]  ;;  %v12920_v48 = vld [vmem:[#allocation171_spill] sm:$0xff]  ;;  %v4326_v44 = vld [vmem:[%s8300_s17 + $0x348] sm:$0xff] }
 0xcb3   : > { %v6458_v56 = vmax.f32 %v6330_v24, 0.0  ;;  %v6323_v32 = vadd.f32 %v6195_v58, %v6067_v2  ;;  %v12910_v58 = vld [vmem:[#allocation97_spill] sm:$0xff]  ;;  %v12911_v24 = vld [vmem:[#allocation80_spill] sm:$0xff]  ;;  %v12912_v2 = vld [vmem:[#allocation182_spill] sm:$0xff] }
 0xcb4   : > { %5835 = vperm.xlu1 %7046, %v4569_v13   ;;  %5860 = vperm.xlu0 %7045, %v4574_v62   ;;  %v11585_v12 = vpop.permute.xlu1 %5107  ;;  %v4578_v35 = vsub.f32 %v4322_v39, %v4450_v40  ;;  %v4447_v30 = vmul.f32 %v12910_v58, %v10991_v0  ;;  %v4452_v13 = vmul.f32 %v12912_v2, %v12911_v24  ;;  %v12918_v8 = vld [vmem:[#allocation101_spill] sm:$0xff]  ;;  %v12922_v24 = vld [vmem:[#allocation123_spill] sm:$0xff]  ;;  %v4328_v46 = vld [vmem:[%s8300_s17 + $0x358] sm:$0xff] }
 0xcb5   : > { %6586 = vst.msk [vmem:[%s8543_s30 + $0x1e8] sm:$0xff] %vm2300_vm0, %v6458_v56  ;;  %v6451_v36 = vmax.f32 %v6323_v32, 0.0  ;;  %v4324_v56 = vld [vmem:[%s8300_s17 + $0x338] sm:$0xff]  ;;  %v4449_v40 = vmul.f32 %v12918_v8, %v12917_v3  ;;  %v12919_v55 = vld [vmem:[#allocation93_spill] sm:$0xff]  ;;  %v4323_v57 = vld [vmem:[%s8300_s17 + $0x330] sm:$0xff] }
 0xcb6   : > { %v5691_v6 = vpop.permute.xlu0 %5690  ;;  %v4321_v39 = vld [vmem:[%s8300_s17 + $0x320] sm:$0xff]  ;;  %v12927_v3 = vld [vmem:[#allocation32_spill] sm:$0xff]  ;;  %v12928_v8 = vld [vmem:[#allocation51_spill] sm:$0xff] }
 0xcb7   : > { %6579 = vst.msk [vmem:[%s8543_s30 + $0x1b0] sm:$0xff] %vm2300_vm0, %v6451_v36  ;;  %v6076_v14 = vadd.f32 %v5691_v6, %v5308_v43  ;;  %v4575_v36 = vsub.f32 %v4319_v31, %v4447_v30  ;;  %v12915_v6 = vld [vmem:[#allocation26_spill] sm:$0xff]  ;;  %v4577_v58 = vsub.f32 %v4321_v39, %v4449_v40  ;;  %v12921_v30 = vld [vmem:[#allocation211_spill] sm:$0xff]  ;;  %v4458_v40 = vmul.f32 %v12928_v8, %v12927_v3 }
 0xcb8   : > { %5845 = vperm.xlu1 %7046, %v4571_v47   ;;  %5870 = vperm.xlu0 %7045, %v4576_v5   ;;  %v5656_v28 = vpop.permute.xlu1 %5655  ;;  %v12916_v47 = vld [vmem:[#allocation183_spill] sm:$0xff]  ;;  %v4456_v2 = vmul.f32 %v12922_v24, %v12921_v30  ;;  %v6210_v3 = vld [vmem:[%s8531_s25 + $0x228] sm:$0xff] }
 0xcb9   : > { %v6332_v49 = vadd.f32 %v6204_v50, %v6076_v14  ;;  %v6069_v22 = vadd.f32 %v5656_v28, %v5301_v18  ;;  %v4580_v50 = vsub.f32 %v4324_v56, %v4452_v13  ;;  %v4454_v5 = vmul.f32 %v12916_v47, %v12915_v6  ;;  %v12923_v13 = vld [vmem:[#allocation177_spill] sm:$0xff] }
 0xcba   : > { %v11603_v34 = vpop.permute.xlu0 %5152  ;;  %v5303_v18 = vmul.f32 %v12920_v48, %v12919_v55  ;;  %v4584_v47 = vsub.f32 %v4328_v46, %v4456_v2  ;;  %v12929_v55 = vld [vmem:[#allocation115_spill] sm:$0xff] }
 0xcbb   : > { %v6460_v62 = vmax.f32 %v6332_v49, 0.0  ;;  %v6325_v60 = vadd.f32 %v6197_v52, %v6069_v22  ;;  %v6199_v52 = vld [vmem:[%s8531_s25 + $0x1d0] sm:$0xff] }
 0xcbc   : > { %5855 = vperm.xlu1 %7046, %v4573_v41   ;;  %5880 = vperm.xlu0 %7045, %v4578_v35   ;;  %v11611_v32 = vpop.permute.xlu1 %5117  ;;  %v4582_v35 = vsub.f32 %v4326_v44, %v4454_v5  ;;  %v12930_v48 = vld [vmem:[#allocation127_spill] sm:$0xff] }
 0xcbd   : > { %6588 = vst.msk [vmem:[%s8543_s30 + $0x1f8] sm:$0xff] %vm2300_vm0, %v6460_v62  ;;  %v6453_v0 = vmax.f32 %v6325_v60, 0.0  ;;  %v12924_v62 = vld [vmem:[#allocation125_spill] sm:$0xff]  ;;  %v12932_v44 = vld [vmem:[#allocation175_spill] sm:$0xff] }
 0xcbe   : > { %v5701_v43 = vpop.permute.xlu0 %5700  ;;  %v4451_v60 = vmul.f32 %v12924_v62, %v12923_v13  ;;  %v12933_v62 = vld [vmem:[#allocation120_spill] sm:$0xff] }
 0xcbf   : > { %6581 = vst.msk [vmem:[%s8543_s30 + $0x1c0] sm:$0xff] %vm2300_vm0, %v6453_v0  ;;  %v6078_v14 = vadd.f32 %v5701_v43, %v5310_v25  ;;  %v12925_v0 = vld [vmem:[#allocation6_spill] sm:$0xff] }
 0xcc0   : > { %5865 = vperm.xlu1 %7046, %v4575_v36   ;;  %5890 = vperm.xlu0 %7045, %v4580_v50   ;;  %v5666_v28 = vpop.permute.xlu1 %5665  ;;  %v6208_v50 = vld [vmem:[%s8531_s25 + $0x218] sm:$0xff]  ;;  %v4579_v5 = vsub.f32 %v4323_v57, %v4451_v60  ;;  %v12934_v60 = vld [vmem:[#allocation197_spill] sm:$0xff] }
 0xcc1   : > { %v6334_v49 = vadd.f32 %v6206_v23, %v6078_v14  ;;  %v6071_v22 = vadd.f32 %v5666_v28, %v5303_v18  ;;  %v12926_v23 = vld [vmem:[#allocation195_spill] sm:$0xff]  ;;  %v4453_v18 = vmul.f32 %v12930_v48, %v12929_v55  ;;  %v4330_v28 = vld [vmem:[%s8300_s17 + $0x368] sm:$0xff] }
 0xcc2   : > { %v11629_v41 = vpop.permute.xlu0 %5162  ;;  %v5312_v43 = vmul.f32 %v12926_v23, %v12925_v0  ;;  %v12931_v14 = vld [vmem:[#allocation95_spill] sm:$0xff]  ;;  %v4586_v2 = vsub.f32 %v4330_v28, %v4458_v40  ;;  %v4332_v23 = vld [vmem:[%s8300_s17 + $0x378] sm:$0xff]  ;;  %v12938_v55 = vld [vmem:[#allocation186_spill] sm:$0xff] }
 0xcc3   : > { %v6462_v31 = vmax.f32 %v6334_v49, 0.0  ;;  %v6327_v56 = vadd.f32 %v6199_v52, %v6071_v22  ;;  %v5305_v39 = vmul.f32 %v12932_v44, %v12931_v14  ;;  %v4325_v49 = vld [vmem:[%s8300_s17 + $0x340] sm:$0xff]  ;;  %v4462_v48 = vmul.f32 %v11232_v29, %v12938_v55  ;;  %v12940_v44 = vld [vmem:[#allocation40_spill] sm:$0xff] }
 0xcc4   : > { %5900 = vperm.xlu0 %7045, %v4582_v35   ;;  %5875 = vperm.xlu1 %7046, %v4577_v58   ;;  %v11637_v25 = vpop.permute.xlu1 %5127  ;;  %v6201_v22 = vld [vmem:[%s8531_s25 + $0x1e0] sm:$0xff]  ;;  %v4581_v13 = vsub.f32 %v4325_v49, %v4453_v18  ;;  %v12939_v18 = vld [vmem:[#allocation103_spill] sm:$0xff]  ;;  %v4334_v49 = vld [vmem:[%s8300_s17 + $0x388] sm:$0xff]  ;;  %v4461_v55 = vmul.f32 %v11325_v20, %v11215_v59 }
 0xcc5   : > { %6590 = vst.msk [vmem:[%s8543_s30 + $0x208] sm:$0xff] %vm2300_vm0, %v6462_v31  ;;  %v6455_v36 = vmax.f32 %v6327_v56, 0.0  ;;  %v4460_v31 = vmul.f32 %v12934_v60, %v12933_v62  ;;  %v12935_v56 = vld [vmem:[#allocation99_spill] sm:$0xff]  ;;  %v4457_v14 = vmul.f32 %v11266_v54, %v12939_v18  ;;  %v4590_v54 = vsub.f32 %v4334_v49, %v4462_v48  ;;  %v12942_v62 = vld [vmem:[#allocation192_spill] sm:$0xff]  ;;  %v12947_v48 = vld [vmem:[#allocation42_spill] sm:$0xff] }
 0xcc6   : > { %v5711_v6 = vpop.permute.xlu0 %5710  ;;  %v4455_v46 = vmul.f32 %v11236_v63, %v12935_v56  ;;  %v4464_v60 = vmul.f32 %v11260_v16, %v12942_v62  ;;  %v12948_v18 = vld [vmem:[#allocation184_spill] sm:$0xff] }
 0xcc7   : > { %6583 = vst.msk [vmem:[%s8543_s30 + $0x1d0] sm:$0xff] %vm2300_vm0, %v6455_v36  ;;  %v6080_v52 = vadd.f32 %v5711_v6, %v5312_v43  ;;  %v4327_v43 = vld [vmem:[%s8300_s17 + $0x350] sm:$0xff]  ;;  %v4588_v8 = vsub.f32 %v4332_v23, %v4460_v31  ;;  %v12943_v31 = vld [vmem:[#allocation193_spill] sm:$0xff]  ;;  %v4340_v62 = vld [vmem:[%s8300_s17 + $0x3b8] sm:$0xff] }
 0xcc8   : > { %5910 = vperm.xlu0 %7045, %v4584_v47   ;;  %5885 = vperm.xlu1 %7046, %v4579_v5   ;;  %v5676_v35 = vpop.permute.xlu1 %5675  ;;  %v12937_v6 = vld [vmem:[#allocation203_spill] sm:$0xff]  ;;  %v4583_v40 = vsub.f32 %v4327_v43, %v4455_v46  ;;  %v4459_v56 = vmul.f32 %v11299_v37, %v12943_v31 }
 0xcc9   : > { %v6336_v58 = vadd.f32 %v6208_v50, %v6080_v52  ;;  %v6073_v30 = vadd.f32 %v5676_v35, %v5305_v39  ;;  %v12936_v50 = vld [vmem:[#allocation46_spill] sm:$0xff]  ;;  %v12941_v39 = vld [vmem:[#allocation179_spill] sm:$0xff] }
 0xcca   : > { %v11655_v24 = vpop.permute.xlu0 %5172  ;;  %v5314_v47 = vmul.f32 %v12937_v6, %v12936_v50  ;;  %v5307_v52 = vmul.f32 %v12941_v39, %v12940_v44  ;;  %v6203_v35 = vld [vmem:[%s8531_s25 + $0x1f0] sm:$0xff]  ;;  %v12944_v50 = vld [vmem:[#allocation49_spill] sm:$0xff]  ;;  %v4338_v39 = vld [vmem:[%s8300_s17 + $0x3a8] sm:$0xff] }
 0xccb   : > { %v6464_v57 = vmax.f32 %v6336_v58, 0.0  ;;  %v6329_v0 = vadd.f32 %v6201_v22, %v6073_v30  ;;  %v4329_v22 = vld [vmem:[%s8300_s17 + $0x360] sm:$0xff]  ;;  %v4331_v23 = vld [vmem:[%s8300_s17 + $0x370] sm:$0xff] }
 0xccc   : > { %5920 = vperm.xlu0 %7045, %v4586_v2   ;;  %5895 = vperm.xlu1 %7046, %v4581_v13   ;;  %v11663_v36 = vpop.permute.xlu1 %5137  ;;  %v4585_v13 = vsub.f32 %v4329_v22, %v4457_v14  ;;  %v12945_v6 = vld [vmem:[#allocation77_spill] sm:$0xff]  ;;  %v5309_v14 = vmul.f32 %v12948_v18, %v12947_v48 }
 0xccd   : > { %6592 = vst.msk [vmem:[%s8543_s30 + $0x218] sm:$0xff] %vm2300_vm0, %v6464_v57  ;;  %v6457_v5 = vmax.f32 %v6329_v0, 0.0  ;;  %v4336_v0 = vld [vmem:[%s8300_s17 + $0x398] sm:$0xff] }
 0xcce   : > { %v5721_v63 = vpop.permute.xlu0 %5720 }
 0xccf   : > { %6585 = vst.msk [vmem:[%s8543_s30 + $0x1e0] sm:$0xff] %vm2300_vm0, %v6457_v5  ;;  %v6082_v28 = vadd.f32 %v5721_v63, %v5314_v47  ;;  %v5316_v47 = vmul.f32 %v12945_v6, %v12944_v50  ;;  %v6212_v5 = vld [vmem:[%s8531_s25 + $0x238] sm:$0xff]  ;;  %v4587_v63 = vsub.f32 %v4331_v23, %v4459_v56  ;;  %v12952_v50 = vld [vmem:[#allocation111_spill] sm:$0xff] }
 0xcd0   : > { %5930 = vperm.xlu0 %7045, %v4588_v8   ;;  %5905 = vperm.xlu1 %7046, %v4583_v40   ;;  %v5686_v58 = vpop.permute.xlu1 %5685  ;;  %v12946_v8 = vld [vmem:[#allocation105_spill] sm:$0xff]  ;;  %v12950_v56 = vld [vmem:[#allocation52_spill] sm:$0xff]  ;;  %v4470_v6 = vmul.f32 %v11344_v10, %v12952_v50 }
 0xcd1   : > { %v6338_v30 = vadd.f32 %v6210_v3, %v6082_v28  ;;  %v6075_v29 = vadd.f32 %v5686_v58, %v5307_v52  ;;  %v4592_v3 = vsub.f32 %v4336_v0, %v4464_v60  ;;  %v4466_v40 = vmul.f32 %v11293_v51, %v12946_v8  ;;  %v4333_v52 = vld [vmem:[%s8300_s17 + $0x380] sm:$0xff]  ;;  %v4335_v60 = vld [vmem:[%s8300_s17 + $0x390] sm:$0xff]  ;;  %v4342_v8 = vld [vmem:[%s8300_s17 + $0x3c8] sm:$0xff] }
 0xcd2   : > { %v11681_v2 = vpop.permute.xlu0 %5182  ;;  %v6205_v28 = vld [vmem:[%s8531_s25 + $0x200] sm:$0xff]  ;;  %v4589_v20 = vsub.f32 %v4333_v52, %v4461_v55  ;;  %v4468_v58 = vmul.f32 %v11321_v11, %v11218_v53  ;;  %v6214_v11 = vld [vmem:[%s8531_s25 + $0x248] sm:$0xff]  ;;  %v6207_v55 = vld [vmem:[%s8531_s25 + $0x210] sm:$0xff] }
 0xcd3   : > { %v6466_v46 = vmax.f32 %v6338_v30, 0.0  ;;  %v6331_v57 = vadd.f32 %v6203_v35, %v6075_v29  ;;  %v4594_v59 = vsub.f32 %v4338_v39, %v4466_v40  ;;  %v12949_v30 = vld [vmem:[#allocation200_spill] sm:$0xff]  ;;  %v4337_v40 = vld [vmem:[%s8300_s17 + $0x3a0] sm:$0xff] }
 0xcd4   : > { %5940 = vperm.xlu0 %7045, %v4590_v54   ;;  %5915 = vperm.xlu1 %7046, %v4585_v13   ;;  %v11689_v43 = vpop.permute.xlu1 %5147  ;;  %v4463_v29 = vmul.f32 %v11351_v9, %v12949_v30  ;;  %v4596_v0 = vsub.f32 %v4340_v62, %v4468_v58  ;;  %v12956_v39 = vld [vmem:[#allocation60_spill] sm:$0xff]  ;;  %v12958_v30 = vld [vmem:[#allocation210_spill] sm:$0xff]  ;;  %v12959_v62 = vld [vmem:[#allocation47_spill] sm:$0xff] }
 0xcd5   : > { %6594 = vst.msk [vmem:[%s8543_s30 + $0x228] sm:$0xff] %vm2300_vm0, %v6466_v46  ;;  %v6459_v16 = vmax.f32 %v6331_v57, 0.0  ;;  %v12951_v46 = vld [vmem:[#allocation28_spill] sm:$0xff]  ;;  %v4472_v52 = vmul.f32 %v11380_v7, %v12956_v39 }
 0xcd6   : > { %v5731_v37 = vpop.permute.xlu0 %5730  ;;  %v5318_v57 = vmul.f32 %v12951_v46, %v12950_v56  ;;  %v4591_v23 = vsub.f32 %v4335_v60, %v4463_v29  ;;  %v12957_v58 = vld [vmem:[#allocation56_spill] sm:$0xff]  ;;  %v12960_v60 = vld [vmem:[#allocation71_spill] sm:$0xff] }
 0xcd7   : > { %6587 = vst.msk [vmem:[%s8543_s30 + $0x1f0] sm:$0xff] %vm2300_vm0, %v6459_v16  ;;  %v6084_v44 = vadd.f32 %v5731_v37, %v5316_v47  ;;  %v12953_v47 = vld [vmem:[#allocation204_spill] sm:$0xff]  ;;  %v12955_v37 = vld [vmem:[#allocation190_spill] sm:$0xff]  ;;  %v5320_v29 = vmul.f32 %v12958_v30, %v12957_v58  ;;  %v4469_v56 = vmul.f32 %v12960_v60, %v12959_v62  ;;  %v12961_v46 = vld [vmem:[#allocation43_spill] sm:$0xff] }
 0xcd8   : > { %5950 = vperm.xlu0 %7045, %v4592_v3   ;;  %5925 = vperm.xlu1 %7046, %v4587_v63   ;;  %v5696_v49 = vpop.permute.xlu1 %5695  ;;  %v4465_v16 = vmul.f32 %v11385_v61, %v12953_v47  ;;  %v4598_v61 = vsub.f32 %v4342_v8, %v4470_v6  ;;  %v12965_v8 = vld [vmem:[#allocation62_spill] sm:$0xff]  ;;  %v12967_v39 = vld [vmem:[#allocation84_spill] sm:$0xff] }
 0xcd9   : > { %v6340_v22 = vadd.f32 %v6212_v5, %v6084_v44  ;;  %v6077_v51 = vadd.f32 %v5696_v49, %v5309_v14  ;;  %v12954_v5 = vld [vmem:[#allocation5_spill] sm:$0xff]  ;;  %v12968_v58 = vld [vmem:[#allocation68_spill] sm:$0xff] }
 0xcda   : > { %v11707_v35 = vpop.permute.xlu0 %5192  ;;  %v5311_v3 = vmul.f32 %v12955_v37, %v12954_v5  ;;  %v4593_v44 = vsub.f32 %v4337_v40, %v4465_v16  ;;  %v12963_v5 = vld [vmem:[#allocation129_spill] sm:$0xff]  ;;  %v4473_v30 = vmul.f32 %v11471_v15, %v12968_v58  ;;  %v6222_v58 = vld [vmem:[%s8531_s25 + $0x288] sm:$0xff] }
 0xcdb   : > { %v6468_v54 = vmax.f32 %v6340_v22, 0.0  ;;  %v6333_v13 = vadd.f32 %v6205_v28, %v6077_v51  ;;  %v4467_v28 = vmul.f32 %v11411_v17, %v11312_v21  ;;  %v4344_v51 = vld [vmem:[%s8300_s17 + $0x3d8] sm:$0xff] }
 0xcdc   : > { %5960 = vperm.xlu0 %7045, %v4594_v59   ;;  %5935 = vperm.xlu1 %7046, %v4589_v20   ;;  %v11715_v31 = vpop.permute.xlu1 %5157  ;;  %v4339_v59 = vld [vmem:[%s8300_s17 + $0x3b0] sm:$0xff]  ;;  %v4600_v17 = vsub.f32 %v4344_v51, %v4472_v52 }
 0xcdd   : > { %6596 = vst.msk [vmem:[%s8543_s30 + $0x238] sm:$0xff] %vm2300_vm0, %v6468_v54  ;;  %v6461_v53 = vmax.f32 %v6333_v13, 0.0  ;;  %v6216_v54 = vld [vmem:[%s8531_s25 + $0x258] sm:$0xff]  ;;  %v4595_v13 = vsub.f32 %v4339_v59, %v4467_v28 }
 0xcde   : > { %v5741_v9 = vpop.permute.xlu0 %5740 }
 0xcdf   : > { %6589 = vst.msk [vmem:[%s8543_s30 + $0x200] sm:$0xff] %vm2300_vm0, %v6461_v53  ;;  %v6086_v63 = vadd.f32 %v5741_v9, %v5318_v57  ;;  %v12962_v57 = vld [vmem:[#allocation194_spill] sm:$0xff] }
 0xce0   : > { %5970 = vperm.xlu0 %7045, %v4596_v0   ;;  %5945 = vperm.xlu1 %7046, %v4591_v23   ;;  %v5706_v48 = vpop.permute.xlu1 %5705  ;;  %v5313_v53 = vmul.f32 %v12962_v57, %v12961_v46  ;;  %v4346_v9 = vld [vmem:[%s8300_s17 + $0x3e8] sm:$0xff]  ;;  %v4341_v0 = vld [vmem:[%s8300_s17 + $0x3c0] sm:$0xff] }
 0xce1   : > { %v6342_v18 = vadd.f32 %v6214_v11, %v6086_v63  ;;  %v6079_v10 = vadd.f32 %v5706_v48, %v5311_v3  ;;  %v6209_v23 = vld [vmem:[%s8531_s25 + $0x220] sm:$0xff]  ;;  %v4602_v37 = vsub.f32 %v4346_v9, %v12963_v5  ;;  %v4597_v3 = vsub.f32 %v4341_v0, %v4469_v56  ;;  %v12964_v63 = vld [vmem:[#allocation131_spill] sm:$0xff]  ;;  %v12972_v0 = vld [vmem:[#allocation198_spill] sm:$0xff] }
 0xce2   : > { %v11733_v14 = vpop.permute.xlu0 %5202  ;;  %v4471_v40 = vmul.f32 %v12965_v8, %v12964_v63  ;;  %v12971_v9 = vld [vmem:[#allocation65_spill] sm:$0xff] }
 0xce3   : > { %v6470_v49 = vmax.f32 %v6342_v18, 0.0  ;;  %v6335_v22 = vadd.f32 %v6207_v55, %v6079_v10  ;;  %v4348_v18 = vld [vmem:[%s8300_s17 + $0x3f8] sm:$0xff]  ;;  %v4343_v10 = vld [vmem:[%s8300_s17 + $0x3d0] sm:$0xff]  ;;  %v12973_v5 = vld [vmem:[#allocation9_spill] sm:$0xff] }
 0xce4   : > { %5980 = vperm.xlu0 %7045, %v4598_v61   ;;  %5955 = vperm.xlu1 %7046, %v4593_v44   ;;  %v11741_v20 = vpop.permute.xlu1 %5167  ;;  %v12966_v44 = vld [vmem:[#allocation61_spill] sm:$0xff]  ;;  %v4604_v51 = vsub.f32 %v4348_v18, %v11483_v38  ;;  %v4599_v59 = vsub.f32 %v4343_v10, %v4471_v40 }
 0xce5   : > { %6598 = vst.msk [vmem:[%s8543_s30 + $0x248] sm:$0xff] %vm2300_vm0, %v6470_v49  ;;  %v6463_v7 = vmax.f32 %v6335_v22, 0.0  ;;  %v5322_v52 = vmul.f32 %v12967_v39, %v12966_v44  ;;  %v6218_v49 = vld [vmem:[%s8531_s25 + $0x268] sm:$0xff]  ;;  %v12975_v63 = vld [vmem:[#allocation205_spill] sm:$0xff] }
 0xce6   : > { %v5751_v21 = vpop.permute.xlu0 %5750 }
 0xce7   : > { %6591 = vst.msk [vmem:[%s8543_s30 + $0x210] sm:$0xff] %vm2300_vm0, %v6463_v7  ;;  %v6088_v11 = vadd.f32 %v5751_v21, %v5320_v29  ;;  %v12969_v29 = vld [vmem:[#allocation7_spill] sm:$0xff]  ;;  %v12970_v7 = vld [vmem:[#allocation202_spill] sm:$0xff] }
 0xce8   : > { %5990 = vperm.xlu0 %7045, %v4600_v17   ;;  %5965 = vperm.xlu1 %7046, %v4595_v13   ;;  %v5716_v50 = vpop.permute.xlu1 %5715  ;;  %v4345_v17 = vld [vmem:[%s8300_s17 + $0x3e0] sm:$0xff]  ;;  %v6211_v13 = vld [vmem:[%s8531_s25 + $0x230] sm:$0xff] }
 0xce9   : > { %v6344_v6 = vadd.f32 %v6216_v54, %v6088_v11  ;;  %v6081_v47 = vadd.f32 %v5716_v50, %v5313_v53  ;;  %v5315_v54 = vmul.f32 %v12970_v7, %v12969_v29  ;;  %v4601_v46 = vsub.f32 %v4345_v17, %v4473_v30  ;;  %v4347_v53 = vld [vmem:[%s8300_s17 + $0x3f0] sm:$0xff]  ;;  %v12978_v29 = vld [vmem:[#allocation54_spill] sm:$0xff] }
 0xcea   : > { %v11757_v16 = vpop.permute.xlu0 %5212  ;;  %v12979_v7 = vld [vmem:[#allocation207_spill] sm:$0xff] }
 0xceb   : > { %v6472_v55 = vmax.f32 %v6344_v6, 0.0  ;;  %v6337_v48 = vadd.f32 %v6209_v23, %v6081_v47  ;;  %v5324_v23 = vmul.f32 %v12972_v0, %v12971_v9  ;;  %v6220_v6 = vld [vmem:[%s8531_s25 + $0x278] sm:$0xff]  ;;  %v6215_v17 = vld [vmem:[%s8531_s25 + $0x250] sm:$0xff]  ;;  %v12981_v9 = vld [vmem:[#allocation209_spill] sm:$0xff] }
 0xcec   : > { %6000 = vperm.xlu0 %7045, %v4602_v37   ;;  %5975 = vperm.xlu1 %7046, %v4597_v3   ;;  %v11764_v61 = vpop.permute.xlu1 %5177  ;;  %v4603_v37 = vsub.f32 %v4347_v53, %v12973_v5  ;;  %v12974_v3 = vld [vmem:[#allocation50_spill] sm:$0xff] }
 0xced   : > { %6600 = vst.msk [vmem:[%s8543_s30 + $0x258] sm:$0xff] %vm2300_vm0, %v6472_v55  ;;  %v6465_v28 = vmax.f32 %v6337_v48, 0.0  ;;  %v5317_v8 = vmul.f32 %v12975_v63, %v12974_v3  ;;  %v6213_v55 = vld [vmem:[%s8531_s25 + $0x240] sm:$0xff]  ;;  %v12980_v53 = vld [vmem:[#allocation58_spill] sm:$0xff]  ;;  %v12982_v3 = vld [vmem:[#allocation63_spill] sm:$0xff] }
 0xcee   : > { %v5761_v22 = vpop.permute.xlu0 %5760  ;;  %v5321_v0 = vmul.f32 %v12981_v9, %v12980_v53  ;;  %v12983_v63 = vld [vmem:[#allocation83_spill] sm:$0xff]  ;;  %v6226_v53 = vld [vmem:[%s8531_s25 + $0x2a8] sm:$0xff] }
 0xcef   : > { %6593 = vst.msk [vmem:[%s8543_s30 + $0x220] sm:$0xff] %vm2300_vm0, %v6465_v28  ;;  %v6090_v21 = vadd.f32 %v5761_v22, %v5322_v52  ;;  %v12977_v22 = vld [vmem:[#allocation189_spill] sm:$0xff] }
 0xcf0   : > { %6010 = vperm.xlu0 %7045, %v4604_v51   ;;  %5985 = vperm.xlu1 %7046, %v4599_v59   ;;  %v5726_v62 = vpop.permute.xlu1 %5725 }
 0xcf1   : > { %v6346_v60 = vadd.f32 %v6218_v49, %v6090_v21  ;;  %v6083_v38 = vadd.f32 %v5726_v62, %v5315_v54  ;;  %v12976_v49 = vld [vmem:[#allocation20_spill] sm:$0xff]  ;;  %v5319_v54 = vmul.f32 %v12979_v7, %v12978_v29 }
 0xcf2   : > { %v11780_v56 = vpop.permute.xlu0 %5222  ;;  %v5326_v51 = vmul.f32 %v12977_v22, %v12976_v49  ;;  %v12984_v49 = vld [vmem:[#allocation22_spill] sm:$0xff]  ;;  %v12985_v22 = vld [vmem:[#allocation55_spill] sm:$0xff]  ;;  %v6224_v29 = vld [vmem:[%s8531_s25 + $0x298] sm:$0xff] }
 0xcf3   : > { %v6474_v15 = vmax.f32 %v6346_v60, 0.0  ;;  %v6339_v57 = vadd.f32 %v6211_v13, %v6083_v38 }
 0xcf4   : > { %5995 = vperm.xlu1 %7046, %v4601_v46   ;;  %v11783_v11 = vpop.permute.xlu1 %5187 }
 0xcf5   : > { %6602 = vst.msk [vmem:[%s8543_s30 + $0x268] sm:$0xff] %vm2300_vm0, %v6474_v15  ;;  %v6467_v50 = vmax.f32 %v6339_v57, 0.0 }
 0xcf6   : > { %v5771_v47 = vpop.permute.xlu0 %5770 }
 0xcf7   : > { %6595 = vst.msk [vmem:[%s8543_s30 + $0x230] sm:$0xff] %vm2300_vm0, %v6467_v50  ;;  %v6092_v40 = vadd.f32 %v5771_v47, %v5324_v23  ;;  %v6217_v23 = vld [vmem:[%s8531_s25 + $0x260] sm:$0xff] }
 0xcf8   : > { %6005 = vperm.xlu1 %7046, %v4603_v37   ;;  %v5736_v48 = vpop.permute.xlu1 %5735 }
 0xcf9   : > { %v6348_v18 = vadd.f32 %v6220_v6, %v6092_v40  ;;  %v6085_v10 = vadd.f32 %v5736_v48, %v5317_v8  ;;  %v5323_v8 = vmul.f32 %v12983_v63, %v12982_v3  ;;  %v6219_v40 = vld [vmem:[%s8531_s25 + $0x270] sm:$0xff] }
 0xcfa   : > { %v11796_v44 = vpop.permute.xlu0 %5232 }
 0xcfb   : > { %v6476_v39 = vmax.f32 %v6348_v18, 0.0  ;;  %v6341_v52 = vadd.f32 %v6213_v55, %v6085_v10 }
 0xcfc   : > { %v11798_v28 = vpop.permute.xlu1 %5197 }
 0xcfd   : > { %6604 = vst.msk [vmem:[%s8543_s30 + $0x278] sm:$0xff] %vm2300_vm0, %v6476_v39  ;;  %v6469_v59 = vmax.f32 %v6341_v52, 0.0 }
 0xcfe   : > { %v5781_v30 = vpop.permute.xlu0 %5780 }
 0xcff   : > { %6597 = vst.msk [vmem:[%s8543_s30 + $0x240] sm:$0xff] %vm2300_vm0, %v6469_v59  ;;  %v6094_v21 = vadd.f32 %v5781_v30, %v5326_v51  ;;  %v5328_v51 = vmul.f32 %v12985_v22, %v12984_v49  ;;  %v12986_v59 = vld [vmem:[#allocation67_spill] sm:$0xff] }
 0xd00   : > { %v5746_v13 = vpop.permute.xlu1 %5745  ;;  %v6223_v22 = vld [vmem:[%s8531_s25 + $0x290] sm:$0xff] }
 0xd01   : > { %v6350_v62 = vadd.f32 %v6222_v58, %v6094_v21  ;;  %v6087_v60 = vadd.f32 %v5746_v13, %v5319_v54  ;;  %v12987_v58 = vld [vmem:[#allocation34_spill] sm:$0xff]  ;;  %v6221_v21 = vld [vmem:[%s8531_s25 + $0x280] sm:$0xff] }
 0xd02   : > { %v5325_v30 = vmul.f32 %v12987_v58, %v12986_v59  ;;  %v12994_v58 = vld [vmem:[#allocation81_spill] sm:$0xff] }
 0xd03   : > { %v6478_v38 = vmax.f32 %v6350_v62, 0.0  ;;  %v6343_v46 = vadd.f32 %v6215_v17, %v6087_v60  ;;  %v12988_v62 = vld [vmem:[#allocation23_spill] sm:$0xff]  ;;  %v12989_v60 = vld [vmem:[#allocation116_spill] sm:$0xff] }
 0xd04   : > { %v11810_v15 = vpop.permute.xlu1 %5207 }
 0xd05   : > { %6606 = vst.msk [vmem:[%s8543_s30 + $0x288] sm:$0xff] %vm2300_vm0, %v6478_v38  ;;  %v6471_v57 = vmax.f32 %v6343_v46, 0.0  ;;  %v5330_v38 = vmul.f32 %v12989_v60, %v12988_v62  ;;  %v6230_v62 = vld [vmem:[%s8531_s25 + $0x2c8] sm:$0xff] }
 0xd07   : > { %6599 = vst.msk [vmem:[%s8543_s30 + $0x250] sm:$0xff] %vm2300_vm0, %v6471_v57 }
 0xd08   : > { %v5756_v50 = vpop.permute.xlu1 %5755 }
 0xd09   : > { %v6089_v6 = vadd.f32 %v5756_v50, %v5321_v0 }
 0xd0b   : > { %v6345_v47 = vadd.f32 %v6217_v23, %v6089_v6 }
 0xd0c   : > { %v11819_v5 = vpop.permute.xlu1 %5217 }
 0xd0d   : > { %v6473_v37 = vmax.f32 %v6345_v47, 0.0  ;;  %v12990_v47 = vld [vmem:[#allocation79_spill] sm:$0xff] }
 0xd0f   : > { %6601 = vst.msk [vmem:[%s8543_s30 + $0x260] sm:$0xff] %vm2300_vm0, %v6473_v37  ;;  %v12991_v37 = vld [vmem:[#allocation121_spill] sm:$0xff] }
 0xd10   : > { %v5766_v55 = vpop.permute.xlu1 %5765  ;;  %v5332_v3 = vmul.f32 %v12991_v37, %v12990_v47 }
 0xd11   : > { %v6091_v48 = vadd.f32 %v5766_v55, %v5323_v8  ;;  %v12992_v8 = vld [vmem:[#allocation69_spill] sm:$0xff] }
 0xd13   : > { %v6347_v18 = vadd.f32 %v6219_v40, %v6091_v48  ;;  %v11826_v10 = vpop.permute.xlu0 %5242  ;;  %v12993_v40 = vld [vmem:[#allocation8_spill] sm:$0xff] }
 0xd14   : > { %v11828_v39 = vpop.permute.xlu1 %5227  ;;  %v5327_v55 = vmul.f32 %v12993_v40, %v12992_v8  ;;  %v6228_v48 = vld [vmem:[%s8531_s25 + $0x2b8] sm:$0xff] }
 0xd15   : > { %v6475_v52 = vmax.f32 %v6347_v18, 0.0 }
 0xd17   : > { %6603 = vst.msk [vmem:[%s8543_s30 + $0x270] sm:$0xff] %vm2300_vm0, %v6475_v52  ;;  %v5791_v7 = vpop.permute.xlu0 %5790 }
 0xd18   : > { %v6096_v54 = vadd.f32 %v5791_v7, %v5328_v51  ;;  %v5776_v17 = vpop.permute.xlu1 %5775 }
 0xd19   : > { %v6093_v13 = vadd.f32 %v5776_v17, %v5325_v30  ;;  %v12995_v30 = vld [vmem:[#allocation64_spill] sm:$0xff] }
 0xd1a   : > { %v6352_v46 = vadd.f32 %v6224_v29, %v6096_v54  ;;  %v5334_v29 = vmul.f32 %v12995_v30, %v12994_v58  ;;  %v12996_v54 = vld [vmem:[#allocation73_spill] sm:$0xff]  ;;  %v13002_v58 = vld [vmem:[#allocation31_spill] sm:$0xff] }
 0xd1b   : > { %v6349_v57 = vadd.f32 %v6221_v21, %v6093_v13  ;;  %v5801_v9 = vpop.permute.xlu0 %5800  ;;  %v12997_v21 = vld [vmem:[#allocation108_spill] sm:$0xff]  ;;  %v13003_v30 = vld [vmem:[#allocation11_spill] sm:$0xff] }
 0xd1c   : > { %v6480_v0 = vmax.f32 %v6352_v46, 0.0  ;;  %v6098_v23 = vadd.f32 %v5801_v9, %v5330_v38  ;;  %v11841_v50 = vpop.permute.xlu1 %5237  ;;  %v5329_v17 = vmul.f32 %v12997_v21, %v12996_v54  ;;  %v13004_v54 = vld [vmem:[#allocation25_spill] sm:$0xff]  ;;  %v13005_v21 = vld [vmem:[#allocation136_spill] sm:$0xff] }
 0xd1d   : > { %v6477_v6 = vmax.f32 %v6349_v57, 0.0  ;;  %v6225_v57 = vld [vmem:[%s8531_s25 + $0x2a0] sm:$0xff] }
 0xd1e   : > { %6608 = vst.msk [vmem:[%s8543_s30 + $0x298] sm:$0xff] %vm2300_vm0, %v6480_v0  ;;  %v6354_v63 = vadd.f32 %v6226_v53, %v6098_v23  ;;  %v12998_v23 = vld [vmem:[#allocation27_spill] sm:$0xff] }
 0xd1f   : > { %6605 = vst.msk [vmem:[%s8543_s30 + $0x280] sm:$0xff] %vm2300_vm0, %v6477_v6  ;;  %v5811_v18 = vpop.permute.xlu0 %5810  ;;  %v12999_v6 = vld [vmem:[#allocation53_spill] sm:$0xff] }
 0xd20   : > { %v6482_v52 = vmax.f32 %v6354_v63, 0.0  ;;  %v6100_v49 = vadd.f32 %v5811_v18, %v5332_v3  ;;  %v5786_v51 = vpop.permute.xlu1 %5785  ;;  %v5336_v47 = vmul.f32 %v12999_v6, %v12998_v23  ;;  %v13000_v3 = vld [vmem:[#allocation24_spill] sm:$0xff]  ;;  %v13001_v63 = vld [vmem:[#allocation133_spill] sm:$0xff]  ;;  %v13006_v23 = vld [vmem:[#allocation35_spill] sm:$0xff] }
 0xd21   : > { %v6095_v59 = vadd.f32 %v5786_v51, %v5327_v55  ;;  %v5331_v8 = vmul.f32 %v13001_v63, %v13000_v3  ;;  %v6232_v55 = vld [vmem:[%s8531_s25 + $0x2d8] sm:$0xff]  ;;  %v13007_v6 = vld [vmem:[#allocation57_spill] sm:$0xff]  ;;  %v13008_v3 = vld [vmem:[#allocation82_spill] sm:$0xff] }
 0xd22   : > { %6610 = vst.msk [vmem:[%s8543_s30 + $0x2a8] sm:$0xff] %vm2300_vm0, %v6482_v52  ;;  %v6356_v7 = vadd.f32 %v6228_v48, %v6100_v49  ;;  %v6227_v49 = vld [vmem:[%s8531_s25 + $0x2b0] sm:$0xff] }
 0xd23   : > { %v6351_v13 = vadd.f32 %v6223_v22, %v6095_v59  ;;  %v5821_v60 = vpop.permute.xlu0 %5820  ;;  %v13009_v63 = vld [vmem:[#allocation75_spill] sm:$0xff] }
 0xd24   : > { %v6484_v38 = vmax.f32 %v6356_v7, 0.0  ;;  %v6102_v46 = vadd.f32 %v5821_v60, %v5334_v29  ;;  %v5796_v53 = vpop.permute.xlu1 %5795  ;;  %v5338_v29 = vmul.f32 %v13003_v30, %v13002_v58  ;;  %v13010_v58 = vld [vmem:[#allocation100_spill] sm:$0xff]  ;;  %v13011_v30 = vld [vmem:[#allocation13_spill] sm:$0xff] }
 0xd25   : > { %v6479_v9 = vmax.f32 %v6351_v13, 0.0  ;;  %v6097_v0 = vadd.f32 %v5796_v53, %v5329_v17  ;;  %v5333_v17 = vmul.f32 %v13005_v21, %v13004_v54  ;;  %v13012_v54 = vld [vmem:[#allocation30_spill] sm:$0xff] }
 0xd26   : > { %6612 = vst.msk [vmem:[%s8543_s30 + $0x2b8] sm:$0xff] %vm2300_vm0, %v6484_v38  ;;  %v6358_v37 = vadd.f32 %v6230_v62, %v6102_v46  ;;  %v6234_v62 = vld [vmem:[%s8531_s25 + $0x2e8] sm:$0xff]  ;;  %v5337_v21 = vmul.f32 %v11480_v45, %v13012_v54 }
 0xd27   : > { %6607 = vst.msk [vmem:[%s8543_s30 + $0x290] sm:$0xff] %vm2300_vm0, %v6479_v9  ;;  %v6353_v40 = vadd.f32 %v6225_v57, %v6097_v0  ;;  %v5831_v48 = vpop.permute.xlu0 %5830  ;;  %v6229_v57 = vld [vmem:[%s8531_s25 + $0x2c0] sm:$0xff] }
 0xd28   : > { %v6486_v18 = vmax.f32 %v6358_v37, 0.0  ;;  %v6104_v52 = vadd.f32 %v5831_v48, %v5336_v47  ;;  %v5806_v22 = vpop.permute.xlu1 %5805  ;;  %v5340_v47 = vmul.f32 %v13007_v6, %v13006_v23  ;;  %v13014_v23 = vld [vmem:[#allocation138_spill] sm:$0xff] }
 0xd29   : > { %v6481_v51 = vmax.f32 %v6353_v40, 0.0  ;;  %v6099_v59 = vadd.f32 %v5806_v22, %v5331_v8  ;;  %v5335_v8 = vmul.f32 %v13009_v63, %v13008_v3  ;;  %v6240_v63 = vld [vmem:[%s8531_s25 + $0x318] sm:$0xff] }
 0xd2a   : > { %6614 = vst.msk [vmem:[%s8543_s30 + $0x2c8] sm:$0xff] %vm2300_vm0, %v6486_v18  ;;  %v6360_v7 = vadd.f32 %v6232_v55, %v6104_v52  ;;  %v6236_v55 = vld [vmem:[%s8531_s25 + $0x2f8] sm:$0xff] }
 0xd2b   : > { %6609 = vst.msk [vmem:[%s8543_s30 + $0x2a0] sm:$0xff] %vm2300_vm0, %v6481_v51  ;;  %v6355_v13 = vadd.f32 %v6227_v49, %v6099_v59  ;;  %v5841_v60 = vpop.permute.xlu0 %5840  ;;  %v6231_v49 = vld [vmem:[%s8531_s25 + $0x2d0] sm:$0xff] }
 0xd2c   : > { %v6488_v38 = vmax.f32 %v6360_v7, 0.0  ;;  %v6106_v46 = vadd.f32 %v5841_v60, %v5338_v29  ;;  %v5816_v53 = vpop.permute.xlu1 %5815  ;;  %v5342_v29 = vmul.f32 %v13011_v30, %v13010_v58 }
 0xd2d   : > { %v6483_v9 = vmax.f32 %v6355_v13, 0.0  ;;  %v6101_v0 = vadd.f32 %v5816_v53, %v5333_v17  ;;  %v6238_v13 = vld [vmem:[%s8531_s25 + $0x308] sm:$0xff] }
 0xd2e   : > { %6616 = vst.msk [vmem:[%s8543_s30 + $0x2d8] sm:$0xff] %vm2300_vm0, %v6488_v38  ;;  %v6362_v37 = vadd.f32 %v6234_v62, %v6106_v46  ;;  %v6233_v46 = vld [vmem:[%s8531_s25 + $0x2e0] sm:$0xff] }
 0xd2f   : > { %6611 = vst.msk [vmem:[%s8543_s30 + $0x2b0] sm:$0xff] %vm2300_vm0, %v6483_v9  ;;  %v6357_v40 = vadd.f32 %v6229_v57, %v6101_v0  ;;  %v5851_v48 = vpop.permute.xlu0 %5850  ;;  %v13013_v0 = vld [vmem:[#allocation104_spill] sm:$0xff] }
 0xd30   : > { %v6490_v18 = vmax.f32 %v6362_v37, 0.0  ;;  %v6108_v52 = vadd.f32 %v5851_v48, %v5340_v47  ;;  %v5826_v22 = vpop.permute.xlu1 %5825  ;;  %v5344_v6 = vmul.f32 %v13014_v23, %v13013_v0  ;;  %v13015_v47 = vld [vmem:[#allocation33_spill] sm:$0xff]  ;;  %v6235_v48 = vld [vmem:[%s8531_s25 + $0x2f0] sm:$0xff] }
 0xd31   : > { %v6485_v51 = vmax.f32 %v6357_v40, 0.0  ;;  %v6103_v59 = vadd.f32 %v5826_v22, %v5335_v8  ;;  %v5339_v37 = vmul.f32 %v11507_v1, %v13015_v47  ;;  %v13016_v22 = vld [vmem:[#allocation110_spill] sm:$0xff] }
 0xd32   : > { %6618 = vst.msk [vmem:[%s8543_s30 + $0x2e8] sm:$0xff] %vm2300_vm0, %v6490_v18  ;;  %v6364_v7 = vadd.f32 %v6236_v55, %v6108_v52 }
 0xd33   : > { %6613 = vst.msk [vmem:[%s8543_s30 + $0x2c0] sm:$0xff] %vm2300_vm0, %v6485_v51  ;;  %v6359_v17 = vadd.f32 %v6231_v49, %v6103_v59  ;;  %v5861_v62 = vpop.permute.xlu0 %5860  ;;  %v5346_v51 = vmul.f32 %v11498_v27, %v13016_v22  ;;  %v13017_v59 = vld [vmem:[#allocation98_spill] sm:$0xff]  ;;  %v6241_v22 = vld [vmem:[%s8531_s25 + $0x320] sm:$0xff] }
 0xd34   : > { %v6492_v60 = vmax.f32 %v6364_v7, 0.0  ;;  %v6110_v38 = vadd.f32 %v5861_v62, %v5342_v29  ;;  %v5836_v57 = vpop.permute.xlu1 %5835  ;;  %v5341_v58 = vmul.f32 %v11533_v26, %v13017_v59  ;;  %v6242_v29 = vld [vmem:[%s8531_s25 + $0x328] sm:$0xff]  ;;  %v13022_v59 = vld [vmem:[#allocation124_spill] sm:$0xff] }
 0xd35   : > { %v6487_v53 = vmax.f32 %v6359_v17, 0.0  ;;  %v6105_v9 = vadd.f32 %v5836_v57, %v5337_v21  ;;  %v6237_v17 = vld [vmem:[%s8531_s25 + $0x300] sm:$0xff] }
 0xd36   : > { %6620 = vst.msk [vmem:[%s8543_s30 + $0x2f8] sm:$0xff] %vm2300_vm0, %v6492_v60  ;;  %v6366_v45 = vadd.f32 %v6238_v13, %v6110_v38  ;;  %v13018_v60 = vld [vmem:[#allocation119_spill] sm:$0xff] }
 0xd37   : > { %6615 = vst.msk [vmem:[%s8543_s30 + $0x2d0] sm:$0xff] %vm2300_vm0, %v6487_v53  ;;  %v6361_v3 = vadd.f32 %v6233_v46, %v6105_v9  ;;  %v5871_v8 = vpop.permute.xlu0 %5870  ;;  %v5348_v38 = vmul.f32 %v11525_v33, %v13018_v60  ;;  %v13019_v46 = vld [vmem:[#allocation102_spill] sm:$0xff]  ;;  %v6244_v9 = vld [vmem:[%s8531_s25 + $0x338] sm:$0xff] }
 0xd38   : > { %v6494_v40 = vmax.f32 %v6366_v45, 0.0  ;;  %v6112_v55 = vadd.f32 %v5871_v8, %v5344_v6  ;;  %v5846_v18 = vpop.permute.xlu1 %5845  ;;  %v5343_v57 = vmul.f32 %v11559_v19, %v13019_v46  ;;  %v6239_v45 = vld [vmem:[%s8531_s25 + $0x310] sm:$0xff]  ;;  %v13021_v8 = vld [vmem:[#allocation106_spill] sm:$0xff]  ;;  %v13025_v46 = vld [vmem:[#allocation45_spill] sm:$0xff] }
 0xd39   : > { %v6489_v52 = vmax.f32 %v6361_v3, 0.0  ;;  %v6107_v49 = vadd.f32 %v5846_v18, %v5339_v37  ;;  %v13020_v3 = vld [vmem:[#allocation122_spill] sm:$0xff] }
 0xd3a   : > { %6622 = vst.msk [vmem:[%s8543_s30 + $0x308] sm:$0xff] %vm2300_vm0, %v6494_v40  ;;  %v6368_v1 = vadd.f32 %v6240_v63, %v6112_v55  ;;  %v5350_v63 = vmul.f32 %v11551_v4, %v13020_v3  ;;  %v5345_v40 = vmul.f32 %v11585_v12, %v13021_v8 }
 0xd3b   : > { %6617 = vst.msk [vmem:[%s8543_s30 + $0x2e0] sm:$0xff] %vm2300_vm0, %v6489_v52  ;;  %v6363_v30 = vadd.f32 %v6235_v48, %v6107_v49  ;;  %v5881_v7 = vpop.permute.xlu0 %5880  ;;  %v6246_v48 = vld [vmem:[%s8531_s25 + $0x348] sm:$0xff] }
 0xd3c   : > { %v6496_v54 = vmax.f32 %v6368_v1, 0.0  ;;  %v6114_v21 = vadd.f32 %v5881_v7, %v5346_v51  ;;  %v5856_v13 = vpop.permute.xlu1 %5855 }
 0xd3d   : > { %v6491_v62 = vmax.f32 %v6363_v30, 0.0  ;;  %v6109_v27 = vadd.f32 %v5856_v13, %v5341_v58  ;;  %v5352_v58 = vmul.f32 %v11577_v42, %v13022_v59  ;;  %v13023_v30 = vld [vmem:[#allocation113_spill] sm:$0xff] }
 0xd3e   : > { %6624 = vst.msk [vmem:[%s8543_s30 + $0x318] sm:$0xff] %vm2300_vm0, %v6496_v54  ;;  %v6370_v26 = vadd.f32 %v6242_v29, %v6114_v21  ;;  %v5347_v29 = vmul.f32 %v11611_v32, %v13023_v30  ;;  %v6248_v54 = vld [vmem:[%s8531_s25 + $0x358] sm:$0xff] }
 0xd3f   : > { %6619 = vst.msk [vmem:[%s8543_s30 + $0x2f0] sm:$0xff] %vm2300_vm0, %v6491_v62  ;;  %v6365_v53 = vadd.f32 %v6237_v17, %v6109_v27  ;;  %v5891_v0 = vpop.permute.xlu0 %5890  ;;  %v6243_v62 = vld [vmem:[%s8531_s25 + $0x330] sm:$0xff] }
 0xd40   : > { %v6498_v23 = vmax.f32 %v6370_v26, 0.0  ;;  %v6116_v6 = vadd.f32 %v5891_v0, %v5348_v38  ;;  %v5866_v47 = vpop.permute.xlu1 %5865  ;;  %v13024_v38 = vld [vmem:[#allocation126_spill] sm:$0xff] }
 0xd41   : > { %v6493_v37 = vmax.f32 %v6365_v53, 0.0  ;;  %v6111_v33 = vadd.f32 %v5866_v47, %v5343_v57  ;;  %v5354_v26 = vmul.f32 %v11603_v34, %v13024_v38  ;;  %v5349_v57 = vmul.f32 %v11637_v25, %v13025_v46  ;;  %v6256_v38 = vld [vmem:[%s8531_s25 + $0x398] sm:$0xff] }
 0xd42   : > { %6626 = vst.msk [vmem:[%s8543_s30 + $0x328] sm:$0xff] %vm2300_vm0, %v6498_v23  ;;  %v6372_v19 = vadd.f32 %v6244_v9, %v6116_v6  ;;  %v6250_v9 = vld [vmem:[%s8531_s25 + $0x368] sm:$0xff] }
 0xd43   : > { %6621 = vst.msk [vmem:[%s8543_s30 + $0x300] sm:$0xff] %vm2300_vm0, %v6493_v37  ;;  %v6367_v55 = vadd.f32 %v6239_v45, %v6111_v33  ;;  %v5901_v18 = vpop.permute.xlu0 %5900  ;;  %v6245_v45 = vld [vmem:[%s8531_s25 + $0x340] sm:$0xff]  ;;  %v13026_v33 = vld [vmem:[#allocation128_spill] sm:$0xff] }
 0xd44   : > { %v6500_v52 = vmax.f32 %v6372_v19, 0.0  ;;  %v6118_v49 = vadd.f32 %v5901_v18, %v5350_v63  ;;  %v5876_v51 = vpop.permute.xlu1 %5875  ;;  %v5356_v3 = vmul.f32 %v11629_v41, %v13026_v33  ;;  %v13027_v63 = vld [vmem:[#allocation10_spill] sm:$0xff] }
 0xd45   : > { %v6495_v1 = vmax.f32 %v6367_v55, 0.0  ;;  %v6113_v4 = vadd.f32 %v5876_v51, %v5345_v40  ;;  %v5351_v19 = vmul.f32 %v11663_v36, %v13027_v63  ;;  %v6252_v40 = vld [vmem:[%s8531_s25 + $0x378] sm:$0xff]  ;;  %v13028_v51 = vld [vmem:[#allocation130_spill] sm:$0xff] }
 0xd46   : > { %6628 = vst.msk [vmem:[%s8543_s30 + $0x338] sm:$0xff] %vm2300_vm0, %v6500_v52  ;;  %v6374_v12 = vadd.f32 %v6246_v48, %v6118_v49  ;;  %v6247_v52 = vld [vmem:[%s8531_s25 + $0x350] sm:$0xff] }
 0xd47   : > { %6623 = vst.msk [vmem:[%s8543_s30 + $0x310] sm:$0xff] %vm2300_vm0, %v6495_v1  ;;  %v6369_v7 = vadd.f32 %v6241_v22, %v6113_v4  ;;  %v5911_v21 = vpop.permute.xlu0 %5910  ;;  %v5358_v1 = vmul.f32 %v11655_v24, %v13028_v51  ;;  %v13029_v4 = vld [vmem:[#allocation12_spill] sm:$0xff]  ;;  %v6255_v51 = vld [vmem:[%s8531_s25 + $0x390] sm:$0xff] }
 0xd48   : > { %v6502_v17 = vmax.f32 %v6374_v12, 0.0  ;;  %v6120_v13 = vadd.f32 %v5911_v21, %v5352_v58  ;;  %v5886_v27 = vpop.permute.xlu1 %5885  ;;  %v5353_v59 = vmul.f32 %v11689_v43, %v13029_v4  ;;  %v6254_v12 = vld [vmem:[%s8531_s25 + $0x388] sm:$0xff]  ;;  %v13036_v4 = vld [vmem:[#allocation144_spill] sm:$0xff] }
 0xd49   : > { %v6497_v60 = vmax.f32 %v6369_v7, 0.0  ;;  %v6115_v42 = vadd.f32 %v5886_v27, %v5347_v29  ;;  %v13031_v27 = vld [vmem:[#allocation14_spill] sm:$0xff] }
 0xd4a   : > { %6630 = vst.msk [vmem:[%s8543_s30 + $0x348] sm:$0xff] %vm2300_vm0, %v6502_v17  ;;  %v6376_v32 = vadd.f32 %v6248_v54, %v6120_v13  ;;  %v6249_v54 = vld [vmem:[%s8531_s25 + $0x360] sm:$0xff]  ;;  %v13030_v13 = vld [vmem:[#allocation132_spill] sm:$0xff] }
 0xd4b   : > { %6625 = vst.msk [vmem:[%s8543_s30 + $0x320] sm:$0xff] %vm2300_vm0, %v6497_v60  ;;  %v6371_v53 = vadd.f32 %v6243_v62, %v6115_v42  ;;  %v5921_v0 = vpop.permute.xlu0 %5920  ;;  %v5360_v62 = vmul.f32 %v11681_v2, %v13030_v13  ;;  %v5355_v60 = vmul.f32 %v11715_v31, %v13031_v27  ;;  %v13039_v27 = vld [vmem:[#allocation21_spill] sm:$0xff] }
 0xd4c   : > { %v6504_v23 = vmax.f32 %v6376_v32, 0.0  ;;  %v6122_v6 = vadd.f32 %v5921_v0, %v5354_v26  ;;  %v5896_v47 = vpop.permute.xlu1 %5895  ;;  %v13032_v0 = vld [vmem:[#allocation135_spill] sm:$0xff] }
 0xd4d   : > { %v6499_v37 = vmax.f32 %v6371_v53, 0.0  ;;  %v6117_v34 = vadd.f32 %v5896_v47, %v5349_v57  ;;  %v6251_v57 = vld [vmem:[%s8531_s25 + $0x370] sm:$0xff] }
 0xd4e   : > { %6632 = vst.msk [vmem:[%s8543_s30 + $0x358] sm:$0xff] %vm2300_vm0, %v6504_v23  ;;  %v6378_v25 = vadd.f32 %v6250_v9, %v6122_v6  ;;  %v5362_v23 = vmul.f32 %v11707_v35, %v13032_v0  ;;  %v13033_v6 = vld [vmem:[#allocation16_spill] sm:$0xff] }
 0xd4f   : > { %6627 = vst.msk [vmem:[%s8543_s30 + $0x330] sm:$0xff] %vm2300_vm0, %v6499_v37  ;;  %v6373_v8 = vadd.f32 %v6245_v45, %v6117_v34  ;;  %v5931_v55 = vpop.permute.xlu0 %5930  ;;  %v5357_v45 = vmul.f32 %v11741_v20, %v13033_v6  ;;  %v6258_v37 = vld [vmem:[%s8531_s25 + $0x3a8] sm:$0xff] }
 0xd50   : > { %v6506_v48 = vmax.f32 %v6378_v25, 0.0  ;;  %v6124_v18 = vadd.f32 %v5931_v55, %v5356_v3  ;;  %v5906_v49 = vpop.permute.xlu1 %5905  ;;  %v6253_v25 = vld [vmem:[%s8531_s25 + $0x380] sm:$0xff]  ;;  %v13035_v55 = vld [vmem:[#allocation18_spill] sm:$0xff] }
 0xd51   : > { %v6501_v22 = vmax.f32 %v6373_v8, 0.0  ;;  %v6119_v41 = vadd.f32 %v5906_v49, %v5351_v19  ;;  %v13034_v8 = vld [vmem:[#allocation137_spill] sm:$0xff] }
 0xd52   : > { %6634 = vst.msk [vmem:[%s8543_s30 + $0x368] sm:$0xff] %vm2300_vm0, %v6506_v48  ;;  %v6380_v36 = vadd.f32 %v6252_v40, %v6124_v18  ;;  %v5364_v40 = vmul.f32 %v11733_v14, %v13034_v8  ;;  %v5359_v48 = vmul.f32 %v11764_v61, %v13035_v55 }
 0xd53   : > { %6629 = vst.msk [vmem:[%s8543_s30 + $0x340] sm:$0xff] %vm2300_vm0, %v6501_v22  ;;  %v6375_v58 = vadd.f32 %v6247_v52, %v6119_v41  ;;  %v5941_v30 = vpop.permute.xlu0 %5940  ;;  %v6260_v52 = vld [vmem:[%s8531_s25 + $0x3b8] sm:$0xff] }
 0xd54   : > { %v6508_v29 = vmax.f32 %v6380_v36, 0.0  ;;  %v6126_v7 = vadd.f32 %v5941_v30, %v5358_v1  ;;  %v5916_v21 = vpop.permute.xlu1 %5915 }
 0xd55   : > { %v6503_v17 = vmax.f32 %v6375_v58, 0.0  ;;  %v6121_v24 = vadd.f32 %v5916_v21, %v5353_v59  ;;  %v5366_v59 = vmul.f32 %v11757_v16, %v13036_v4  ;;  %v13037_v58 = vld [vmem:[#allocation19_spill] sm:$0xff] }
 0xd56   : > { %6636 = vst.msk [vmem:[%s8543_s30 + $0x378] sm:$0xff] %vm2300_vm0, %v6508_v29  ;;  %v6382_v43 = vadd.f32 %v6254_v12, %v6126_v7  ;;  %v5361_v12 = vmul.f32 %v11783_v11, %v13037_v58  ;;  %v6262_v29 = vld [vmem:[%s8531_s25 + $0x3c8] sm:$0xff]  ;;  %v13045_v58 = vld [vmem:[#allocation163_spill] sm:$0xff] }
 0xd57   : > { %6631 = vst.msk [vmem:[%s8543_s30 + $0x350] sm:$0xff] %vm2300_vm0, %v6503_v17  ;;  %v6377_v42 = vadd.f32 %v6249_v54, %v6121_v24  ;;  %v5951_v26 = vpop.permute.xlu0 %5950  ;;  %v6257_v17 = vld [vmem:[%s8531_s25 + $0x3a0] sm:$0xff] }
 0xd58   : > { %v6510_v32 = vmax.f32 %v6382_v43, 0.0  ;;  %v6128_v46 = vadd.f32 %v5951_v26, %v5360_v62  ;;  %v5926_v53 = vpop.permute.xlu1 %5925  ;;  %v13038_v62 = vld [vmem:[#allocation151_spill] sm:$0xff] }
 0xd59   : > { %v6505_v9 = vmax.f32 %v6377_v42, 0.0  ;;  %v6123_v2 = vadd.f32 %v5926_v53, %v5355_v60  ;;  %v5368_v43 = vmul.f32 %v11780_v56, %v13038_v62  ;;  %v5363_v60 = vmul.f32 %v11798_v28, %v13039_v27 }
 0xd5a   : > { %6638 = vst.msk [vmem:[%s8543_s30 + $0x388] sm:$0xff] %vm2300_vm0, %v6510_v32  ;;  %v6384_v31 = vadd.f32 %v6256_v38, %v6128_v46  ;;  %v6264_v38 = vld [vmem:[%s8531_s25 + $0x3d8] sm:$0xff] }
 0xd5b   : > { %6633 = vst.msk [vmem:[%s8543_s30 + $0x360] sm:$0xff] %vm2300_vm0, %v6505_v9  ;;  %v6379_v47 = vadd.f32 %v6251_v57, %v6123_v2  ;;  %v5961_v34 = vpop.permute.xlu0 %5960  ;;  %v6259_v57 = vld [vmem:[%s8531_s25 + $0x3b0] sm:$0xff]  ;;  %v13040_v2 = vld [vmem:[#allocation158_spill] sm:$0xff] }
 0xd5c   : > { %v6512_v33 = vmax.f32 %v6384_v31, 0.0  ;;  %v6130_v3 = vadd.f32 %v5961_v34, %v5362_v23  ;;  %v5936_v63 = vpop.permute.xlu1 %5935  ;;  %v5370_v0 = vmul.f32 %v11796_v44, %v13040_v2  ;;  %v13041_v23 = vld [vmem:[#allocation140_spill] sm:$0xff] }
 0xd5d   : > { %v6507_v19 = vmax.f32 %v6379_v47, 0.0  ;;  %v6125_v35 = vadd.f32 %v5936_v63, %v5357_v45  ;;  %v5365_v31 = vmul.f32 %v11810_v15, %v13041_v23  ;;  %v6266_v45 = vld [vmem:[%s8531_s25 + $0x3e8] sm:$0xff] }
 0xd5e   : > { %6640 = vst.msk [vmem:[%s8543_s30 + $0x398] sm:$0xff] %vm2300_vm0, %v6512_v33  ;;  %v6386_v20 = vadd.f32 %v6258_v37, %v6130_v3  ;;  %v6261_v33 = vld [vmem:[%s8531_s25 + $0x3c0] sm:$0xff]  ;;  %v13042_v63 = vld [vmem:[#allocation170_spill] sm:$0xff] }
 0xd5f   : > { %6635 = vst.msk [vmem:[%s8543_s30 + $0x370] sm:$0xff] %vm2300_vm0, %v6507_v19  ;;  %v6381_v18 = vadd.f32 %v6253_v25, %v6125_v35  ;;  %v5971_v49 = vpop.permute.xlu0 %5970  ;;  %v5372_v19 = vmul.f32 %v11826_v10, %v13042_v63  ;;  %v13043_v35 = vld [vmem:[#allocation147_spill] sm:$0xff] }
 0xd60   : > { %v6514_v22 = vmax.f32 %v6386_v20, 0.0  ;;  %v6132_v41 = vadd.f32 %v5971_v49, %v5364_v40  ;;  %v5946_v1 = vpop.permute.xlu1 %5945  ;;  %v5367_v8 = vmul.f32 %v11819_v5, %v13043_v35  ;;  %v6268_v20 = vld [vmem:[%s8531_s25 + $0x3f8] sm:$0xff] }
 0xd61   : > { %v6509_v36 = vmax.f32 %v6381_v18, 0.0  ;;  %v6127_v14 = vadd.f32 %v5946_v1, %v5359_v48 }
 0xd62   : > { %6642 = vst.msk [vmem:[%s8543_s30 + $0x3a8] sm:$0xff] %vm2300_vm0, %v6514_v22  ;;  %v6388_v61 = vadd.f32 %v6260_v52, %v6132_v41  ;;  %v6263_v52 = vld [vmem:[%s8531_s25 + $0x3d0] sm:$0xff] }
 0xd63   : > { %6637 = vst.msk [vmem:[%s8543_s30 + $0x380] sm:$0xff] %vm2300_vm0, %v6509_v36  ;;  %v6383_v30 = vadd.f32 %v6255_v51, %v6127_v14  ;;  %v5981_v7 = vpop.permute.xlu0 %5980  ;;  %v13044_v51 = vld [vmem:[#allocation154_spill] sm:$0xff]  ;;  %v6265_v14 = vld [vmem:[%s8531_s25 + $0x3e0] sm:$0xff] }
 0xd64   : > { %v6516_v54 = vmax.f32 %v6388_v61, 0.0  ;;  %v6134_v21 = vadd.f32 %v5981_v7, %v5366_v59  ;;  %v5956_v24 = vpop.permute.xlu1 %5955  ;;  %v5369_v5 = vmul.f32 %v11828_v39, %v13044_v51 }
 0xd65   : > { %v6511_v13 = vmax.f32 %v6383_v30, 0.0  ;;  %v6129_v16 = vadd.f32 %v5956_v24, %v5361_v12  ;;  %v5371_v12 = vmul.f32 %v11841_v50, %v13045_v58 }
 0xd66   : > { %6644 = vst.msk [vmem:[%s8543_s30 + $0x3b8] sm:$0xff] %vm2300_vm0, %v6516_v54  ;;  %v6390_v11 = vadd.f32 %v6262_v29, %v6134_v21  ;;  %v6267_v29 = vld [vmem:[%s8531_s25 + $0x3f0] sm:$0xff] }
 0xd67   : > { %6639 = vst.msk [vmem:[%s8543_s30 + $0x390] sm:$0xff] %vm2300_vm0, %v6511_v13  ;;  %v6385_v42 = vadd.f32 %v6257_v17, %v6129_v16  ;;  %v5991_v26 = vpop.permute.xlu0 %5990 }
 0xd68   : > { %v6518_v32 = vmax.f32 %v6390_v11, 0.0  ;;  %v6136_v46 = vadd.f32 %v5991_v26, %v5368_v43  ;;  %v5966_v53 = vpop.permute.xlu1 %5965 }
 0xd69   : > { %v6513_v9 = vmax.f32 %v6385_v42, 0.0  ;;  %v6131_v56 = vadd.f32 %v5966_v53, %v5363_v60 }
 0xd6a   : > { %6646 = vst.msk [vmem:[%s8543_s30 + $0x3c8] sm:$0xff] %vm2300_vm0, %v6518_v32  ;;  %v6392_v28 = vadd.f32 %v6264_v38, %v6136_v46 }
 0xd6b   : > { %6641 = vst.msk [vmem:[%s8543_s30 + $0x3a0] sm:$0xff] %vm2300_vm0, %v6513_v9  ;;  %v6387_v6 = vadd.f32 %v6259_v57, %v6131_v56  ;;  %v6001_v47 = vpop.permute.xlu0 %6000 }
 0xd6c   : > { %v6520_v37 = vmax.f32 %v6392_v28, 0.0  ;;  %v6138_v34 = vadd.f32 %v6001_v47, %v5370_v0  ;;  %v5976_v3 = vpop.permute.xlu1 %5975 }
 0xd6d   : > { %v6515_v25 = vmax.f32 %v6387_v6, 0.0  ;;  %v6133_v44 = vadd.f32 %v5976_v3, %v5365_v31 }
 0xd6e   : > { %6648 = vst.msk [vmem:[%s8543_s30 + $0x3d8] sm:$0xff] %vm2300_vm0, %v6520_v37  ;;  %v6394_v15 = vadd.f32 %v6266_v45, %v6138_v34 }
 0xd6f   : > { %6643 = vst.msk [vmem:[%s8543_s30 + $0x3b0] sm:$0xff] %vm2300_vm0, %v6515_v25  ;;  %v6389_v40 = vadd.f32 %v6261_v33, %v6133_v44  ;;  %v6011_v55 = vpop.permute.xlu0 %6010 }
 0xd70   : > { %v6522_v48 = vmax.f32 %v6394_v15, 0.0  ;;  %v6140_v18 = vadd.f32 %v6011_v55, %v5372_v19  ;;  %v5986_v49 = vpop.permute.xlu1 %5985 }
 0xd71   : > { %v6517_v10 = vmax.f32 %v6389_v40, 0.0  ;;  %v6135_v22 = vadd.f32 %v5986_v49, %v5367_v8 }
 0xd72   : > { %6650 = vst.msk [vmem:[%s8543_s30 + $0x3e8] sm:$0xff] %vm2300_vm0, %v6522_v48  ;;  %v6396_v41 = vadd.f32 %v6268_v20, %v6140_v18 }
 0xd73   : > { %6645 = vst.msk [vmem:[%s8543_s30 + $0x3c0] sm:$0xff] %vm2300_vm0, %v6517_v10  ;;  %v6391_v1 = vadd.f32 %v6263_v52, %v6135_v22 }
 0xd74   : > { %v6524_v36 = vmax.f32 %v6396_v41, 0.0  ;;  %v5996_v4 = vpop.permute.xlu1 %5995 }
 0xd75   : > { %v6519_v59 = vmax.f32 %v6391_v1, 0.0  ;;  %v6137_v61 = vadd.f32 %v5996_v4, %v5369_v5 }
 0xd76   : > { %6652 = vst.msk [vmem:[%s8543_s30 + $0x3f8] sm:$0xff] %vm2300_vm0, %v6524_v36 }
 0xd77   : > { %6647 = vst.msk [vmem:[%s8543_s30 + $0x3d0] sm:$0xff] %vm2300_vm0, %v6519_v59  ;;  %v6393_v30 = vadd.f32 %v6265_v14, %v6137_v61 }
 0xd78   : > { %v6006_v39 = vpop.permute.xlu1 %6005 }
 0xd79   : > { %v6521_v7 = vmax.f32 %v6393_v30, 0.0  ;;  %v6139_v54 = vadd.f32 %v6006_v39, %v5371_v12 }
 0xd7b   : > { %6649 = vst.msk [vmem:[%s8543_s30 + $0x3e0] sm:$0xff] %vm2300_vm0, %v6521_v7  ;;  %v6395_v21 = vadd.f32 %v6267_v29, %v6139_v54 }
 0xd7d   : > { %v6523_v17 = vmax.f32 %v6395_v21, 0.0 }
 0xd7f   : > { %6651 = vst.msk [vmem:[%s8543_s30 + $0x3f0] sm:$0xff] %vm2300_vm0, %v6523_v17 }
 0xd80 PF: > { %p15_p8 = scmp.ge.s32.totalorder %s7424_s23, 4   ;;  %s13046_s18 = smov %s7359_s19 }
 0xd81   : > { %s13047_s19 = smov %s7363_s20  ;;  %s13048_s20 = smov %s7434_s26 }
 0xd82   : > { %s13049_s21 = smov %s7424_s23  ;;  %17 = sbr.rel (!%p15_p8) target bundleno = 3 (0x3), region = 89 }
 0xd89   :  { %6675 = vsyncpa [#allocation3], 1 }
 0xd8a   :  { %6677 = vsyncpa [#allocation3 + $0x1], 1 }

</bundles_post_ra>
